<compile_context>
chip_gen: v7x
topology: tpu7x:2x2x1
jax: 0.10.0
libtpu: 0.0.40
codegen_flags: <defaults>
</compile_context>

<pallas_src>
import functools
from collections import namedtuple

import numpy as np
import jax
import jax.numpy as jnp
from jax.experimental import pallas as pl
from jax.experimental.pallas import tpu as pltpu

Genotype = namedtuple("Genotype", "normal normal_concat reduce reduce_concat")

# Standard DARTS_V2 genotype (arch == 'DARTS' path of the reference module).
DARTS_V2 = Genotype(
    normal=[("sep_conv_3x3", 0), ("sep_conv_3x3", 1), ("sep_conv_3x3", 0), ("sep_conv_3x3", 1),
            ("sep_conv_3x3", 1), ("skip_connect", 0), ("skip_connect", 0), ("dil_conv_3x3", 2)],
    normal_concat=[2, 3, 4, 5],
    reduce=[("max_pool_3x3", 0), ("max_pool_3x3", 1), ("skip_connect", 2), ("max_pool_3x3", 1),
            ("max_pool_3x3", 0), ("skip_connect", 2), ("skip_connect", 2), ("max_pool_3x3", 1)],
    reduce_concat=[2, 3, 4, 5])

BN_EPS = 1e-5
MXU_DTYPE = jnp.bfloat16      # MXU operand dtype (accumulation stays f32)


def _pick_tile(m, cap=1024):
    """Largest power-of-two tile <= cap dividing m that still yields grid >= 2
    (keeps both v7x TensorCores busy); falls back to the whole extent."""
    t = cap
    while t >= 8:
        if 2 * t <= m and m % t == 0:
            return t
        t //= 2
    return m


def _cparams():
    return pltpu.CompilerParams(dimension_semantics=("parallel",))


# ----------------------------- Pallas kernels -----------------------------

def _matmul_bn_kernel(a_ref, b_ref, s_ref, t_ref, o_ref, *, relu_input):
    a = a_ref[...]
    if relu_input:
        a = jnp.maximum(a, 0.0)                              # f32 VPU
    acc = jnp.dot(a.astype(MXU_DTYPE), b_ref[...],
                  preferred_element_type=jnp.float32)        # bf16 MXU, f32 acc
    o_ref[...] = acc * s_ref[...] + t_ref[...]               # folded BN / bias


def matmul_bn(a, b, scale, shift, *, relu_input=False):
    """out = (relu?(a) @ b) * scale + shift ; scale/shift broadcast over rows."""
    m, k = a.shape
    n = b.shape[1]
    tm = _pick_tile(m)
    return pl.pallas_call(
        functools.partial(_matmul_bn_kernel, relu_input=relu_input),
        out_shape=jax.ShapeDtypeStruct((m, n), jnp.float32),
        grid=(m // tm,),
        in_specs=[pl.BlockSpec((tm, k), lambda i: (i, 0)),
                  pl.BlockSpec((k, n), lambda i: (0, 0)),
                  pl.BlockSpec((1, n), lambda i: (0, 0)),
                  pl.BlockSpec((1, n), lambda i: (0, 0))],
        out_specs=pl.BlockSpec((tm, n), lambda i: (i, 0)),
        compiler_params=_cparams(),
    )(a.astype(jnp.float32), b.astype(MXU_DTYPE),
      scale.reshape(1, n).astype(jnp.float32),
      shift.reshape(1, n).astype(jnp.float32))


def _dw_pw_bn_kernel(x_ref, dw_ref, pw_ref, s_ref, t_ref, o_ref,
                     *, k, dil, h, w, relu_input):
    """ReLU? -> depthwise kxk (dilation dil, stride 1) -> 1x1 conv -> folded BN.

    x_ref:  (1, h + 2p, w + 2p, cin) padded input block (one batch item)
    dw_ref: (k*k, cin) depthwise weights, pw_ref: (cin, cout) bf16 pointwise
    o_ref:  (h*w, cout)
    """
    cin = x_ref.shape[-1]
    dw = dw_ref[...]                                         # (k*k, cin) f32
    acc = None
    for i in range(k):
        for j in range(k):
            tap = x_ref[:, i * dil:i * dil + h, j * dil:j * dil + w, :]
            if relu_input:
                tap = jnp.maximum(tap, 0.0)
            term = tap * dw[i * k + j:i * k + j + 1, :]      # f32 VPU
            acc = term if acc is None else acc + term
    a = acc.reshape(h * w, cin)                              # collapse (1,h,w) -> rows
    y = jnp.dot(a.astype(MXU_DTYPE), pw_ref[...],
                preferred_element_type=jnp.float32)
    o_ref[...] = y * s_ref[...] + t_ref[...]


def dw_pw_bn(x, dw2d, pw, scale, shift, *, k, dilation=1, relu_input=True):
    n, h, w, cin = x.shape
    cout = pw.shape[1]
    pad = dilation * (k // 2)
    xp = jnp.pad(x, ((0, 0), (pad, pad), (pad, pad), (0, 0)))
    hp, wp = h + 2 * pad, w + 2 * pad
    out = pl.pallas_call(
        functools.partial(_dw_pw_bn_kernel, k=k, dil=dilation, h=h, w=w,
                          relu_input=relu_input),
        out_shape=jax.ShapeDtypeStruct((n * h * w, cout), jnp.float32),
        grid=(n,),
        in_specs=[pl.BlockSpec((1, hp, wp, cin), lambda b: (b, 0, 0, 0)),
                  pl.BlockSpec((k * k, cin), lambda b: (0, 0)),
                  pl.BlockSpec((cin, cout), lambda b: (0, 0)),
                  pl.BlockSpec((1, cout), lambda b: (0, 0)),
                  pl.BlockSpec((1, cout), lambda b: (0, 0))],
        out_specs=pl.BlockSpec((h * w, cout), lambda b: (b, 0)),
        compiler_params=_cparams(),
    )(xp.astype(jnp.float32), dw2d.astype(jnp.float32), pw.astype(MXU_DTYPE),
      scale.reshape(1, cout).astype(jnp.float32),
      shift.reshape(1, cout).astype(jnp.float32))
    return out.reshape(n, h, w, cout)


def _maxpool_kernel(x_ref, o_ref, *, h, w):
    r = x_ref[:, 0:h, 0:w, :]
    for i in range(3):
        for j in range(3):
            if i == 0 and j == 0:
                continue
            r = jnp.maximum(r, x_ref[:, i:i + h, j:j + w, :])
    o_ref[...] = r


def max_pool_3x3(x, stride):
    n, h, w, c = x.shape
    xp = jnp.pad(x, ((0, 0), (1, 1), (1, 1), (0, 0)), constant_values=-jnp.inf)
    out = pl.pallas_call(
        functools.partial(_maxpool_kernel, h=h, w=w),
        out_shape=jax.ShapeDtypeStruct((n, h, w, c), jnp.float32),
        grid=(n,),
        in_specs=[pl.BlockSpec((1, h + 2, w + 2, c), lambda b: (b, 0, 0, 0))],
        out_specs=pl.BlockSpec((1, h, w, c), lambda b: (b, 0, 0, 0)),
        compiler_params=_cparams(),
    )(xp.astype(jnp.float32))
    if stride > 1:
        out = out[:, ::stride, ::stride, :]
    return out


def _avgpool_kernel(x_ref, inv_ref, o_ref, *, h, w):
    acc = None
    for i in range(3):
        for j in range(3):
            tap = x_ref[:, i:i + h, j:j + w, :]
            acc = tap if acc is None else acc + tap
    o_ref[...] = acc * inv_ref[...]


def avg_pool_3x3(x, stride):
    # count_include_pad=False: divisor map is a static trace-time constant.
    n, h, w, c = x.shape
    xp = jnp.pad(x, ((0, 0), (1, 1), (1, 1), (0, 0)))
    ones = np.zeros((h + 2, w + 2), np.float32)
    ones[1:h + 1, 1:w + 1] = 1.0
    cnt = sum(ones[i:i + h, j:j + w] for i in range(3) for j in range(3))
    inv = jnp.asarray(1.0 / cnt, jnp.float32).reshape(1, h, w, 1)
    out = pl.pallas_call(
        functools.partial(_avgpool_kernel, h=h, w=w),
        out_shape=jax.ShapeDtypeStruct((n, h, w, c), jnp.float32),
        grid=(n,),
        in_specs=[pl.BlockSpec((1, h + 2, w + 2, c), lambda b: (b, 0, 0, 0)),
                  pl.BlockSpec((1, h, w, 1), lambda b: (0, 0, 0, 0))],
        out_specs=pl.BlockSpec((1, h, w, c), lambda b: (b, 0, 0, 0)),
        compiler_params=_cparams(),
    )(xp.astype(jnp.float32), inv)
    if stride > 1:
        out = out[:, ::stride, ::stride, :]
    return out


def _gap_linear_kernel(x_ref, w_ref, b_ref, o_ref, *, inv_hw):
    g = jnp.sum(x_ref[...], axis=1) * inv_hw                 # (N, C) global avg
    o_ref[...] = jnp.dot(g, w_ref[...],
                         preferred_element_type=jnp.float32) + b_ref[...]


def gap_linear(x, w, b):
    """AdaptiveAvgPool2d(1) + Linear, fused into one kernel."""
    n, h, ww, c = x.shape
    nc = w.shape[1]
    xr = x.reshape(n, h * ww, c).astype(jnp.float32)
    return pl.pallas_call(
        functools.partial(_gap_linear_kernel, inv_hw=1.0 / (h * ww)),
        out_shape=jax.ShapeDtypeStruct((n, nc), jnp.float32),
        grid=(1,),
        in_specs=[pl.BlockSpec((n, h * ww, c), lambda i: (0, 0, 0)),
                  pl.BlockSpec((c, nc), lambda i: (0, 0)),
                  pl.BlockSpec((1, nc), lambda i: (0, 0))],
        out_specs=pl.BlockSpec((n, nc), lambda i: (0, 0)),
    )(xr, w.astype(jnp.float32), b.reshape(1, nc).astype(jnp.float32))


# ----------------------------- parameters -----------------------------

class ParamGen:
    """Deterministic synthetic parameter generator."""

    def __init__(self, seed):
        self.key = jax.random.PRNGKey(seed)

    def _next(self):
        self.key, k = jax.random.split(self.key)
        return k

    def conv(self, kh, kw, cin, cout):        # HWIO
        fan = kh * kw * cin
        return jax.random.normal(self._next(), (kh, kw, cin, cout), jnp.float32) / jnp.sqrt(fan)

    def dw(self, kh, kw, c):                  # depthwise [kh,kw,C]
        return jax.random.normal(self._next(), (kh, kw, c), jnp.float32) / (kh * kw)

    def bn(self, c):                          # eval-mode BN (running stats folded later)
        return dict(
            gamma=jax.random.uniform(self._next(), (c,), jnp.float32, 0.5, 1.5),
            beta=jax.random.normal(self._next(), (c,), jnp.float32) * 0.1,
            mean=jax.random.normal(self._next(), (c,), jnp.float32) * 0.1,
            var=jax.random.uniform(self._next(), (c,), jnp.float32, 0.5, 1.5))

    def linear(self, cin, cout):
        w = jax.random.normal(self._next(), (cin, cout), jnp.float32) / jnp.sqrt(cin)
        b = jax.random.normal(self._next(), (cout,), jnp.float32) * 0.1
        return w, b


def bn_fold(p):
    scale = p["gamma"] / jnp.sqrt(p["var"] + BN_EPS)
    shift = p["beta"] - p["mean"] * scale
    return scale, shift


# ----------------------------- DARTS ops -----------------------------

def make_relu_conv_bn(pg, cin, cout, k, stride, pad):
    assert k == 1 and stride == 1 and pad == 0    # only 1x1 preprocess is used
    w = pg.conv(1, 1, cin, cout).reshape(cin, cout)
    s, t = bn_fold(pg.bn(cout))

    def apply(x):
        n, h, ww, _ = x.shape
        out = matmul_bn(x.reshape(n * h * ww, cin), w, s, t, relu_input=True)
        return out.reshape(n, h, ww, cout)
    return apply


def make_factorized_reduce(pg, cin, cout):
    half = cout // 2
    w1 = pg.conv(1, 1, cin, half).reshape(cin, half)
    w2 = pg.conv(1, 1, cin, half).reshape(cin, half)
    # block-diagonal weight: both strided branches become ONE matmul
    w_blk = jnp.zeros((2 * cin, cout), jnp.float32)
    w_blk = w_blk.at[:cin, :half].set(w1).at[cin:, half:].set(w2)
    s, t = bn_fold(pg.bn(cout))

    def apply(x):
        x1 = x[:, ::2, ::2, :]
        x2 = x[:, 1::2, 1::2, :]       # == relu(x)[:, :, 1:, 1:] then stride-2 1x1 conv
        n, ho, wo, _ = x1.shape
        a = jnp.concatenate([x1, x2], axis=-1).reshape(n * ho * wo, 2 * cin)
        out = matmul_bn(a, w_blk, s, t, relu_input=True)
        return out.reshape(n, ho, wo, cout)
    return apply


def make_sep_conv(pg, cin, cmid, cout, k, stride, pad):
    if stride != 1:
        raise NotImplementedError("fused SepConv kernel supports stride=1 "
                                  "(all DARTS_V2 sep_convs are stride-1)")
    dw1 = pg.dw(k, k, cin).reshape(k * k, cin)
    pw1 = pg.conv(1, 1, cin, cmid).reshape(cin, cmid)
    s1, t1 = bn_fold(pg.bn(cmid))
    dw2 = pg.dw(k, k, cmid).reshape(k * k, cmid)
    pw2 = pg.conv(1, 1, cmid, cout).reshape(cmid, cout)
    s2, t2 = bn_fold(pg.bn(cout))

    def apply(x):
        y = dw_pw_bn(x, dw1, pw1, s1, t1, k=k, dilation=1, relu_input=True)
        return dw_pw_bn(y, dw2, pw2, s2, t2, k=k, dilation=1, relu_input=True)
    return apply


def make_dil_conv(pg, cin, cout, k, stride, pad, dilation):
    if stride != 1:
        raise NotImplementedError("fused DilConv kernel supports stride=1 "
                                  "(the DARTS_V2 dil_conv is stride-1)")
    dw = pg.dw(k, k, cin).reshape(k * k, cin)
    pw = pg.conv(1, 1, cin, cout).reshape(cin, cout)
    s, t = bn_fold(pg.bn(cout))

    def apply(x):
        return dw_pw_bn(x, dw, pw, s, t, k=k, dilation=dilation, relu_input=True)
    return apply


def make_op(pg, name, *args):
    """Mirrors OPS[name](...) call conventions of the reference Cell."""
    if "sep_conv" in name:
        cin, cmid, cout, stride, _affine = args
        k = 3 if "3x3" in name else 5
        return make_sep_conv(pg, cin, cmid, cout, k, stride, k // 2)
    cin, cout, stride, _affine = args
    if name == "skip_connect":
        if stride == 1:
            return lambda x: x
        return make_factorized_reduce(pg, cin, cout)
    if name == "max_pool_3x3":
        return lambda x: max_pool_3x3(x, stride)
    if name == "avg_pool_3x3":
        return lambda x: avg_pool_3x3(x, stride)
    if "dil_conv" in name:
        k = 3 if "3x3" in name else 5
        d = 2
        return make_dil_conv(pg, cin, cout, k, stride, d * (k // 2), d)
    if name == "none":
        return lambda x: jnp.zeros(x[:, ::stride, ::stride, :].shape[:3] + (cout,), x.dtype)
    raise ValueError(f"unknown op {name}")


# ----------------------------- Cell / Network -----------------------------

def build_cell(pg, genotype, c_pp, c_p, c_set, sep_set, reduction, reduction_prev):
    """arch == 'DARTS' compile path."""
    if reduction_prev:
        pre0 = make_factorized_reduce(pg, c_pp, c_set[0])
    else:
        pre0 = make_relu_conv_bn(pg, c_pp, c_set[0], 1, 1, 0)
    if reduction:
        pre1 = make_relu_conv_bn(pg, c_p, c_set[0], 1, 1, 0)
    else:
        pre1 = make_relu_conv_bn(pg, c_p, c_set[1], 1, 1, 0)

    if reduction:
        op_names, indices = zip(*genotype.reduce)
        concat = genotype.reduce_concat
    else:
        op_names, indices = zip(*genotype.normal)
        concat = genotype.normal_concat

    ops = []
    if reduction:
        for name, index in zip(op_names, indices):
            stride = 2 if index < 2 else 1
            ops.append(make_op(pg, name, c_set[0], c_set[0], stride, True))
        concat_size = 4 * c_set[0]
    else:
        node_to_input = [c_set[2], c_set[3], c_set[0], c_set[0]]
        node_idx, sep_i, edge = 0, 0, 0
        for name, index in zip(op_names, indices):
            if "sep_conv" in name:
                ops.append(make_op(pg, name, c_set[index], sep_set[sep_i],
                                   node_to_input[node_idx], 1, True))
                sep_i += 1
            else:
                ops.append(make_op(pg, name, c_set[index], node_to_input[node_idx], 1, True))
            edge += 1
            if edge == 2:
                node_idx += 1
                edge = 0
        concat_size = c_set[0] + c_set[0] + c_set[2] + c_set[3]

    steps = len(op_names) // 2

    def apply(s0, s1):
        # TODO(synk): drop_path is training-only (drop_prob contributes nothing in eval); omitted.
        s0 = pre0(s0)
        s1 = pre1(s1)
        states = [s0, s1]
        for i in range(steps):
            h1 = ops[2 * i](states[indices[2 * i]])
            h2 = ops[2 * i + 1](states[indices[2 * i + 1]])
            states.append(h1 + h2)
        return jnp.concatenate([states[i] for i in concat], axis=-1)

    return apply, concat_size


def build_network(pg, c_list, sep_conv_list, num_classes, layers, genotype):
    c_curr = c_list[0][0]
    stem_w = pg.conv(3, 3, 3, c_curr).reshape(9 * 3, c_curr)   # Conv2d(3, C, 3, pad=1, bias=False)
    stem_s, stem_t = bn_fold(pg.bn(c_curr))

    cells = []
    c_pp, c_p = c_curr, c_curr
    reduction_prev = False
    sep_i = 0
    for i in range(layers):
        reduction = i in [layers // 3, 2 * layers // 3]
        cell, csize = build_cell(pg, genotype, c_pp, c_p, c_list[i + 1],
                                 sep_conv_list[sep_i], reduction, reduction_prev)
        if not reduction:
            sep_i += 1
        reduction_prev = reduction
        cells.append(cell)
        c_pp, c_p = c_p, csize

    lin_w, lin_b = pg.linear(c_p, num_classes)

    def stem(x):
        # 3x3 / pad 1 conv via a single padded-K (K=27) fused matmul+BN kernel.
        n, h, w, c = x.shape
        xp = jnp.pad(x, ((0, 0), (1, 1), (1, 1), (0, 0)))
        cols = [xp[:, i:i + h, j:j + w, :] for i in range(3) for j in range(3)]
        a = jnp.concatenate(cols, axis=-1).reshape(n * h * w, 9 * c)
        out = matmul_bn(a, stem_w, stem_s, stem_t, relu_input=False)
        return out.reshape(n, h, w, c_curr)

    # TODO(synk): AuxiliaryHeadCIFAR only executes when module.training=True; eval returns None.
    def forward(x_nhwc):
        s0 = s1 = stem(x_nhwc)
        for cell in cells:
            s0, s1 = s1, cell(s0, s1)
        logits = gap_linear(s1, lin_w, lin_b)                  # fused GAP + Linear
        return logits, None

    return forward


# ----------------------------- main -----------------------------

if __name__ == "__main__":
    # Small config: 3 layers -> cell0 normal, cell1/cell2 reduction. Spatial 16 -> 16 -> 8 -> 4.
    layers = 3
    num_classes = 10
    C_list = [[16]] + [[16, 16, 16, 16] for _ in range(layers)]
    sep_conv_list = [[16, 16, 16, 16, 16], []]   # 5 sep_convs in the (single) normal cell

    x_nchw = jax.random.normal(jax.random.PRNGKey(0), (2, 3, 16, 16), jnp.float32)
    x = jnp.transpose(x_nchw, (0, 2, 3, 1))      # NCHW -> NHWC

    pg = ParamGen(1)
    forward = jax.jit(build_network(pg, C_list, sep_conv_list, num_classes, layers, DARTS_V2))

    logits, logits_aux = forward(x)
    jax.block_until_ready(logits)
    assert logits.shape == (2, num_classes)
    assert logits_aux is None
    assert bool(jnp.all(jnp.isfinite(logits)))
    print("KERNEL_OK")
</pallas_src>

<mosaic_0001>
module attributes {stable_mosaic.version = 11 : i64} {
  func.func @_matmul_bn_kernel(%arg0: i32, %arg1: memref<256x27xf32, #tpu.memory_space<vmem>>, %arg2: memref<27x16xbf16, #tpu.memory_space<vmem>>, %arg3: memref<1x16xf32, #tpu.memory_space<vmem>>, %arg4: memref<1x16xf32, #tpu.memory_space<vmem>>, %arg5: memref<256x16xf32, #tpu.memory_space<vmem>>) attributes {dimension_semantics = [#tpu.dimension_semantics<parallel>], iteration_bounds = array<i64: 2>, scalar_prefetch = 0 : i64, scratch_operands = 0 : i64, tpu.core_type = #tpu.core_type<tc>, window_params = [{transform_indices = @transform_0, window_bounds = array<i64: 256, 27>}, {pipeline_mode = #tpu.pipeline_mode<synchronous>, transform_indices = @transform_1, window_bounds = array<i64: 27, 16>}, {pipeline_mode = #tpu.pipeline_mode<synchronous>, transform_indices = @transform_2, window_bounds = array<i64: 1, 16>}, {pipeline_mode = #tpu.pipeline_mode<synchronous>, transform_indices = @transform_3, window_bounds = array<i64: 1, 16>}, {transform_indices = @transform_4, window_bounds = array<i64: 256, 16>}]} {
    %c0 = arith.constant 0 : index
    %c0_0 = arith.constant 0 : index
    %0 = vector.load %arg1[%c0, %c0_0] : memref<256x27xf32, #tpu.memory_space<vmem>>, vector<256x27xf32>
    %1 = arith.truncf %0 : vector<256x27xf32> to vector<256x27xbf16>
    %c0_1 = arith.constant 0 : index
    %c0_2 = arith.constant 0 : index
    %2 = vector.load %arg2[%c0_1, %c0_2] : memref<27x16xbf16, #tpu.memory_space<vmem>>, vector<27x16xbf16>
    %cst = arith.constant dense<0.000000e+00> : vector<256x16xf32>
    %3 = tpu.matmul %1, %2, %cst {dimension_numbers = #tpu.dot_dimension_numbers<[1], [0], [0], [1], [0, 0, 1, 1], [], []>} : vector<256x27xbf16>, vector<27x16xbf16>, vector<256x16xf32> -> vector<256x16xf32>
    %c0_3 = arith.constant 0 : index
    %c0_4 = arith.constant 0 : index
    %4 = vector.load %arg3[%c0_3, %c0_4] : memref<1x16xf32, #tpu.memory_space<vmem>>, vector<1x16xf32>
    %5 = vector.broadcast %4 : vector<1x16xf32> to vector<256x16xf32>
    %6 = arith.mulf %3, %5 : vector<256x16xf32>
    %c0_5 = arith.constant 0 : index
    %c0_6 = arith.constant 0 : index
    %7 = vector.load %arg4[%c0_5, %c0_6] : memref<1x16xf32, #tpu.memory_space<vmem>>, vector<1x16xf32>
    %8 = vector.broadcast %7 : vector<1x16xf32> to vector<256x16xf32>
    %9 = arith.addf %6, %8 : vector<256x16xf32>
    %c0_7 = arith.constant 0 : index
    %c0_8 = arith.constant 0 : index
    %10 = vector.load %arg5[%c0_7, %c0_8] : memref<256x16xf32, #tpu.memory_space<vmem>>, vector<256x16xf32>
    tpu.vector_store %arg5[%c0_7, %c0_8], %9 {strides = array<i32>} : memref<256x16xf32, #tpu.memory_space<vmem>>, vector<256x16xf32>,
    return
  }
  func.func @transform_0(%arg0: i32) -> (i32, i32) {
    %c0_i32 = arith.constant 0 : i32
    %c0_i32_0 = arith.constant 0 : i32
    return %arg0, %c0_i32 : i32, i32
  }
  func.func @transform_1(%arg0: i32) -> (i32, i32) {
    %c0_i32 = arith.constant 0 : i32
    %c0_i32_0 = arith.constant 0 : i32
    %c0_i32_1 = arith.constant 0 : i32
    return %c0_i32, %c0_i32_0 : i32, i32
  }
  func.func @transform_2(%arg0: i32) -> (i32, i32) {
    %c0_i32 = arith.constant 0 : i32
    %c0_i32_0 = arith.constant 0 : i32
    %c0_i32_1 = arith.constant 0 : i32
    return %c0_i32, %c0_i32_0 : i32, i32
  }
  func.func @transform_3(%arg0: i32) -> (i32, i32) {
    %c0_i32 = arith.constant 0 : i32
    %c0_i32_0 = arith.constant 0 : i32
    %c0_i32_1 = arith.constant 0 : i32
    return %c0_i32, %c0_i32_0 : i32, i32
  }
  func.func @transform_4(%arg0: i32) -> (i32, i32) {
    %c0_i32 = arith.constant 0 : i32
    %c0_i32_0 = arith.constant 0 : i32
    return %arg0, %c0_i32 : i32, i32
  }
}

module attributes {stable_mosaic.version = 11 : i64} {
  func.func @_matmul_bn_kernel(%arg0: i32, %arg1: memref<256x16xf32, #tpu.memory_space<vmem>>, %arg2: memref<16x16xbf16, #tpu.memory_space<vmem>>, %arg3: memref<1x16xf32, #tpu.memory_space<vmem>>, %arg4: memref<1x16xf32, #tpu.memory_space<vmem>>, %arg5: memref<256x16xf32, #tpu.memory_space<vmem>>) attributes {dimension_semantics = [#tpu.dimension_semantics<parallel>], iteration_bounds = array<i64: 2>, scalar_prefetch = 0 : i64, scratch_operands = 0 : i64, tpu.core_type = #tpu.core_type<tc>, window_params = [{transform_indices = @transform_0, window_bounds = array<i64: 256, 16>}, {pipeline_mode = #tpu.pipeline_mode<synchronous>, transform_indices = @transform_1, window_bounds = array<i64: 16, 16>}, {pipeline_mode = #tpu.pipeline_mode<synchronous>, transform_indices = @transform_2, window_bounds = array<i64: 1, 16>}, {pipeline_mode = #tpu.pipeline_mode<synchronous>, transform_indices = @transform_3, window_bounds = array<i64: 1, 16>}, {transform_indices = @transform_4, window_bounds = array<i64: 256, 16>}]} {
    %c0 = arith.constant 0 : index
    %c0_0 = arith.constant 0 : index
    %0 = vector.load %arg1[%c0, %c0_0] : memref<256x16xf32, #tpu.memory_space<vmem>>, vector<256x16xf32>
    %cst = arith.constant 0.000000e+00 : f32
    %1 = vector.broadcast %cst : f32 to vector<256x16xf32>
    %2 = arith.maximumf %0, %1 : vector<256x16xf32>
    %3 = arith.truncf %2 : vector<256x16xf32> to vector<256x16xbf16>
    %c0_1 = arith.constant 0 : index
    %c0_2 = arith.constant 0 : index
    %4 = vector.load %arg2[%c0_1, %c0_2] : memref<16x16xbf16, #tpu.memory_space<vmem>>, vector<16x16xbf16>
    %cst_3 = arith.constant dense<0.000000e+00> : vector<256x16xf32>
    %5 = tpu.matmul %3, %4, %cst_3 {dimension_numbers = #tpu.dot_dimension_numbers<[1], [0], [0], [1], [0, 0, 1, 1], [], []>} : vector<256x16xbf16>, vector<16x16xbf16>, vector<256x16xf32> -> vector<256x16xf32>
    %c0_4 = arith.constant 0 : index
    %c0_5 = arith.constant 0 : index
    %6 = vector.load %arg3[%c0_4, %c0_5] : memref<1x16xf32, #tpu.memory_space<vmem>>, vector<1x16xf32>
    %7 = vector.broadcast %6 : vector<1x16xf32> to vector<256x16xf32>
    %8 = arith.mulf %5, %7 : vector<256x16xf32>
    %c0_6 = arith.constant 0 : index
    %c0_7 = arith.constant 0 : index
    %9 = vector.load %arg4[%c0_6, %c0_7] : memref<1x16xf32, #tpu.memory_space<vmem>>, vector<1x16xf32>
    %10 = vector.broadcast %9 : vector<1x16xf32> to vector<256x16xf32>
    %11 = arith.addf %8, %10 : vector<256x16xf32>
    %c0_8 = arith.constant 0 : index
    %c0_9 = arith.constant 0 : index
    %12 = vector.load %arg5[%c0_8, %c0_9] : memref<256x16xf32, #tpu.memory_space<vmem>>, vector<256x16xf32>
    tpu.vector_store %arg5[%c0_8, %c0_9], %11 {strides = array<i32>} : memref<256x16xf32, #tpu.memory_space<vmem>>, vector<256x16xf32>,
    return
  }
  func.func @transform_0(%arg0: i32) -> (i32, i32) {
    %c0_i32 = arith.constant 0 : i32
    %c0_i32_0 = arith.constant 0 : i32
    return %arg0, %c0_i32 : i32, i32
  }
  func.func @transform_1(%arg0: i32) -> (i32, i32) {
    %c0_i32 = arith.constant 0 : i32
    %c0_i32_0 = arith.constant 0 : i32
    %c0_i32_1 = arith.constant 0 : i32
    return %c0_i32, %c0_i32_0 : i32, i32
  }
  func.func @transform_2(%arg0: i32) -> (i32, i32) {
    %c0_i32 = arith.constant 0 : i32
    %c0_i32_0 = arith.constant 0 : i32
    %c0_i32_1 = arith.constant 0 : i32
    return %c0_i32, %c0_i32_0 : i32, i32
  }
  func.func @transform_3(%arg0: i32) -> (i32, i32) {
    %c0_i32 = arith.constant 0 : i32
    %c0_i32_0 = arith.constant 0 : i32
    %c0_i32_1 = arith.constant 0 : i32
    return %c0_i32, %c0_i32_0 : i32, i32
  }
  func.func @transform_4(%arg0: i32) -> (i32, i32) {
    %c0_i32 = arith.constant 0 : i32
    %c0_i32_0 = arith.constant 0 : i32
    return %arg0, %c0_i32 : i32, i32
  }
}

module attributes {stable_mosaic.version = 11 : i64} {
  func.func @_maxpool_kernel(%arg0: i32, %arg1: memref<1x18x18x16xf32, #tpu.memory_space<vmem>>, %arg2: memref<1x16x16x16xf32, #tpu.memory_space<vmem>>) attributes {dimension_semantics = [#tpu.dimension_semantics<parallel>], iteration_bounds = array<i64: 2>, scalar_prefetch = 0 : i64, scratch_operands = 0 : i64, tpu.core_type = #tpu.core_type<tc>, window_params = [{transform_indices = @transform_0, window_bounds = array<i64: 1, 18, 18, 16>}, {transform_indices = @transform_1, window_bounds = array<i64: 1, 16, 16, 16>}]} {
    %c0 = arith.constant 0 : index
    %c0_0 = arith.constant 0 : index
    %c0_1 = arith.constant 0 : index
    %c0_2 = arith.constant 0 : index
    %0 = vector.load %arg1[%c0, %c0_0, %c0_1, %c0_2] : memref<1x18x18x16xf32, #tpu.memory_space<vmem>>, vector<1x16x16x16xf32>
    %c0_3 = arith.constant 0 : index
    %c0_4 = arith.constant 0 : index
    %c1 = arith.constant 1 : index
    %c0_5 = arith.constant 0 : index
    %1 = vector.load %arg1[%c0_3, %c0_4, %c1, %c0_5] : memref<1x18x18x16xf32, #tpu.memory_space<vmem>>, vector<1x16x16x16xf32>
    %2 = arith.maximumf %0, %1 : vector<1x16x16x16xf32>
    %c0_6 = arith.constant 0 : index
    %c0_7 = arith.constant 0 : index
    %c2 = arith.constant 2 : index
    %c0_8 = arith.constant 0 : index
    %3 = vector.load %arg1[%c0_6, %c0_7, %c2, %c0_8] : memref<1x18x18x16xf32, #tpu.memory_space<vmem>>, vector<1x16x16x16xf32>
    %4 = arith.maximumf %2, %3 : vector<1x16x16x16xf32>
    %c0_9 = arith.constant 0 : index
    %c1_10 = arith.constant 1 : index
    %c0_11 = arith.constant 0 : index
    %c0_12 = arith.constant 0 : index
    %5 = vector.load %arg1[%c0_9, %c1_10, %c0_11, %c0_12] : memref<1x18x18x16xf32, #tpu.memory_space<vmem>>, vector<1x16x16x16xf32>
    %6 = arith.maximumf %4, %5 : vector<1x16x16x16xf32>
    %c0_13 = arith.constant 0 : index
    %c1_14 = arith.constant 1 : index
    %c1_15 = arith.constant 1 : index
    %c0_16 = arith.constant 0 : index
    %7 = vector.load %arg1[%c0_13, %c1_14, %c1_15, %c0_16] : memref<1x18x18x16xf32, #tpu.memory_space<vmem>>, vector<1x16x16x16xf32>
    %8 = arith.maximumf %6, %7 : vector<1x16x16x16xf32>
    %c0_17 = arith.constant 0 : index
    %c1_18 = arith.constant 1 : index
    %c2_19 = arith.constant 2 : index
    %c0_20 = arith.constant 0 : index
    %9 = vector.load %arg1[%c0_17, %c1_18, %c2_19, %c0_20] : memref<1x18x18x16xf32, #tpu.memory_space<vmem>>, vector<1x16x16x16xf32>
    %10 = arith.maximumf %8, %9 : vector<1x16x16x16xf32>
    %c0_21 = arith.constant 0 : index
    %c2_22 = arith.constant 2 : index
    %c0_23 = arith.constant 0 : index
    %c0_24 = arith.constant 0 : index
    %11 = vector.load %arg1[%c0_21, %c2_22, %c0_23, %c0_24] : memref<1x18x18x16xf32, #tpu.memory_space<vmem>>, vector<1x16x16x16xf32>
    %12 = arith.maximumf %10, %11 : vector<1x16x16x16xf32>
    %c0_25 = arith.constant 0 : index
    %c2_26 = arith.constant 2 : index
    %c1_27 = arith.constant 1 : index
    %c0_28 = arith.constant 0 : index
    %13 = vector.load %arg1[%c0_25, %c2_26, %c1_27, %c0_28] : memref<1x18x18x16xf32, #tpu.memory_space<vmem>>, vector<1x16x16x16xf32>
    %14 = arith.maximumf %12, %13 : vector<1x16x16x16xf32>
    %c0_29 = arith.constant 0 : index
    %c2_30 = arith.constant 2 : index
    %c2_31 = arith.constant 2 : index
    %c0_32 = arith.constant 0 : index
    %15 = vector.load %arg1[%c0_29, %c2_30, %c2_31, %c0_32] : memref<1x18x18x16xf32, #tpu.memory_space<vmem>>, vector<1x16x16x16xf32>
    %16 = arith.maximumf %14, %15 : vector<1x16x16x16xf32>
    %c0_33 = arith.constant 0 : index
    %c0_34 = arith.constant 0 : index
    %c0_35 = arith.constant 0 : index
    %c0_36 = arith.constant 0 : index
    %17 = vector.load %arg2[%c0_33, %c0_34, %c0_35, %c0_36] : memref<1x16x16x16xf32, #tpu.memory_space<vmem>>, vector<1x16x16x16xf32>
    tpu.vector_store %arg2[%c0_33, %c0_34, %c0_35, %c0_36], %16 {strides = array<i32>} : memref<1x16x16x16xf32, #tpu.memory_space<vmem>>, vector<1x16x16x16xf32>,
    return
  }
  func.func @transform_0(%arg0: i32) -> (i32, i32, i32, i32) {
    %c0_i32 = arith.constant 0 : i32
    %c0_i32_0 = arith.constant 0 : i32
    %c0_i32_1 = arith.constant 0 : i32
    %c0_i32_2 = arith.constant 0 : i32
    return %arg0, %c0_i32, %c0_i32_0, %c0_i32_1 : i32, i32, i32, i32
  }
  func.func @transform_1(%arg0: i32) -> (i32, i32, i32, i32) {
    %c0_i32 = arith.constant 0 : i32
    %c0_i32_0 = arith.constant 0 : i32
    %c0_i32_1 = arith.constant 0 : i32
    %c0_i32_2 = arith.constant 0 : i32
    return %arg0, %c0_i32, %c0_i32_0, %c0_i32_1 : i32, i32, i32, i32
  }
}

module attributes {stable_mosaic.version = 11 : i64} {
  func.func @_dw_pw_bn_kernel(%arg0: i32, %arg1: memref<1x18x18x16xf32, #tpu.memory_space<vmem>>, %arg2: memref<9x16xf32, #tpu.memory_space<vmem>>, %arg3: memref<16x16xbf16, #tpu.memory_space<vmem>>, %arg4: memref<1x16xf32, #tpu.memory_space<vmem>>, %arg5: memref<1x16xf32, #tpu.memory_space<vmem>>, %arg6: memref<256x16xf32, #tpu.memory_space<vmem>>) attributes {dimension_semantics = [#tpu.dimension_semantics<parallel>], iteration_bounds = array<i64: 2>, scalar_prefetch = 0 : i64, scratch_operands = 0 : i64, tpu.core_type = #tpu.core_type<tc>, window_params = [{transform_indices = @transform_0, window_bounds = array<i64: 1, 18, 18, 16>}, {pipeline_mode = #tpu.pipeline_mode<synchronous>, transform_indices = @transform_1, window_bounds = array<i64: 9, 16>}, {pipeline_mode = #tpu.pipeline_mode<synchronous>, transform_indices = @transform_2, window_bounds = array<i64: 16, 16>}, {pipeline_mode = #tpu.pipeline_mode<synchronous>, transform_indices = @transform_3, window_bounds = array<i64: 1, 16>}, {pipeline_mode = #tpu.pipeline_mode<synchronous>, transform_indices = @transform_4, window_bounds = array<i64: 1, 16>}, {transform_indices = @transform_5, window_bounds = array<i64: 256, 16>}]} {
    %c0 = arith.constant 0 : index
    %c0_0 = arith.constant 0 : index
    %0 = vector.load %arg2[%c0, %c0_0] : memref<9x16xf32, #tpu.memory_space<vmem>>, vector<9x16xf32>
    %c0_1 = arith.constant 0 : index
    %c0_2 = arith.constant 0 : index
    %c0_3 = arith.constant 0 : index
    %c0_4 = arith.constant 0 : index
    %1 = vector.load %arg1[%c0_1, %c0_2, %c0_3, %c0_4] : memref<1x18x18x16xf32, #tpu.memory_space<vmem>>, vector<1x16x16x16xf32>
    %cst = arith.constant 0.000000e+00 : f32
    %2 = vector.broadcast %cst : f32 to vector<1x16x16x16xf32>
    %3 = arith.maximumf %1, %2 : vector<1x16x16x16xf32>
    %4 = vector.extract_strided_slice %0 {offsets = [0, 0], sizes = [1, 16], strides = [1, 1]} : vector<9x16xf32> to vector<1x16xf32>
    %5 = vector.shape_cast %4 : vector<1x16xf32> to vector<1x1x1x16xf32>
    %6 = vector.broadcast %5 : vector<1x1x1x16xf32> to vector<1x16x16x16xf32>
    %7 = arith.mulf %3, %6 : vector<1x16x16x16xf32>
    %c0_5 = arith.constant 0 : index
    %c0_6 = arith.constant 0 : index
    %c1 = arith.constant 1 : index
    %c0_7 = arith.constant 0 : index
    %8 = vector.load %arg1[%c0_5, %c0_6, %c1, %c0_7] : memref<1x18x18x16xf32, #tpu.memory_space<vmem>>, vector<1x16x16x16xf32>
    %cst_8 = arith.constant 0.000000e+00 : f32
    %9 = vector.broadcast %cst_8 : f32 to vector<1x16x16x16xf32>
    %10 = arith.maximumf %8, %9 : vector<1x16x16x16xf32>
    %11 = vector.extract_strided_slice %0 {offsets = [1, 0], sizes = [1, 16], strides = [1, 1]} : vector<9x16xf32> to vector<1x16xf32>
    %12 = vector.shape_cast %11 : vector<1x16xf32> to vector<1x1x1x16xf32>
    %13 = vector.broadcast %12 : vector<1x1x1x16xf32> to vector<1x16x16x16xf32>
    %14 = arith.mulf %10, %13 : vector<1x16x16x16xf32>
    %15 = arith.addf %7, %14 : vector<1x16x16x16xf32>
    %c0_9 = arith.constant 0 : index
    %c0_10 = arith.constant 0 : index
    %c2 = arith.constant 2 : index
    %c0_11 = arith.constant 0 : index
    %16 = vector.load %arg1[%c0_9, %c0_10, %c2, %c0_11] : memref<1x18x18x16xf32, #tpu.memory_space<vmem>>, vector<1x16x16x16xf32>
    %cst_12 = arith.constant 0.000000e+00 : f32
    %17 = vector.broadcast %cst_12 : f32 to vector<1x16x16x16xf32>
    %18 = arith.maximumf %16, %17 : vector<1x16x16x16xf32>
    %19 = vector.extract_strided_slice %0 {offsets = [2, 0], sizes = [1, 16], strides = [1, 1]} : vector<9x16xf32> to vector<1x16xf32>
    %20 = vector.shape_cast %19 : vector<1x16xf32> to vector<1x1x1x16xf32>
    %21 = vector.broadcast %20 : vector<1x1x1x16xf32> to vector<1x16x16x16xf32>
    %22 = arith.mulf %18, %21 : vector<1x16x16x16xf32>
    %23 = arith.addf %15, %22 : vector<1x16x16x16xf32>
    %c0_13 = arith.constant 0 : index
    %c1_14 = arith.constant 1 : index
    %c0_15 = arith.constant 0 : index
    %c0_16 = arith.constant 0 : index
    %24 = vector.load %arg1[%c0_13, %c1_14, %c0_15, %c0_16] : memref<1x18x18x16xf32, #tpu.memory_space<vmem>>, vector<1x16x16x16xf32>
    %cst_17 = arith.constant 0.000000e+00 : f32
    %25 = vector.broadcast %cst_17 : f32 to vector<1x16x16x16xf32>
    %26 = arith.maximumf %24, %25 : vector<1x16x16x16xf32>
    %27 = vector.extract_strided_slice %0 {offsets = [3, 0], sizes = [1, 16], strides = [1, 1]} : vector<9x16xf32> to vector<1x16xf32>
    %28 = vector.shape_cast %27 : vector<1x16xf32> to vector<1x1x1x16xf32>
    %29 = vector.broadcast %28 : vector<1x1x1x16xf32> to vector<1x16x16x16xf32>
    %30 = arith.mulf %26, %29 : vector<1x16x16x16xf32>
    %31 = arith.addf %23, %30 : vector<1x16x16x16xf32>
    %c0_18 = arith.constant 0 : index
    %c1_19 = arith.constant 1 : index
    %c1_20 = arith.constant 1 : index
    %c0_21 = arith.constant 0 : index
    %32 = vector.load %arg1[%c0_18, %c1_19, %c1_20, %c0_21] : memref<1x18x18x16xf32, #tpu.memory_space<vmem>>, vector<1x16x16x16xf32>
    %cst_22 = arith.constant 0.000000e+00 : f32
    %33 = vector.broadcast %cst_22 : f32 to vector<1x16x16x16xf32>
    %34 = arith.maximumf %32, %33 : vector<1x16x16x16xf32>
    %35 = vector.extract_strided_slice %0 {offsets = [4, 0], sizes = [1, 16], strides = [1, 1]} : vector<9x16xf32> to vector<1x16xf32>
    %36 = vector.shape_cast %35 : vector<1x16xf32> to vector<1x1x1x16xf32>
    %37 = vector.broadcast %36 : vector<1x1x1x16xf32> to vector<1x16x16x16xf32>
    %38 = arith.mulf %34, %37 : vector<1x16x16x16xf32>
    %39 = arith.addf %31, %38 : vector<1x16x16x16xf32>
    %c0_23 = arith.constant 0 : index
    %c1_24 = arith.constant 1 : index
    %c2_25 = arith.constant 2 : index
    %c0_26 = arith.constant 0 : index
    %40 = vector.load %arg1[%c0_23, %c1_24, %c2_25, %c0_26] : memref<1x18x18x16xf32, #tpu.memory_space<vmem>>, vector<1x16x16x16xf32>
    %cst_27 = arith.constant 0.000000e+00 : f32
    %41 = vector.broadcast %cst_27 : f32 to vector<1x16x16x16xf32>
    %42 = arith.maximumf %40, %41 : vector<1x16x16x16xf32>
    %43 = vector.extract_strided_slice %0 {offsets = [5, 0], sizes = [1, 16], strides = [1, 1]} : vector<9x16xf32> to vector<1x16xf32>
    %44 = vector.shape_cast %43 : vector<1x16xf32> to vector<1x1x1x16xf32>
    %45 = vector.broadcast %44 : vector<1x1x1x16xf32> to vector<1x16x16x16xf32>
    %46 = arith.mulf %42, %45 : vector<1x16x16x16xf32>
    %47 = arith.addf %39, %46 : vector<1x16x16x16xf32>
    %c0_28 = arith.constant 0 : index
    %c2_29 = arith.constant 2 : index
    %c0_30 = arith.constant 0 : index
    %c0_31 = arith.constant 0 : index
    %48 = vector.load %arg1[%c0_28, %c2_29, %c0_30, %c0_31] : memref<1x18x18x16xf32, #tpu.memory_space<vmem>>, vector<1x16x16x16xf32>
    %cst_32 = arith.constant 0.000000e+00 : f32
    %49 = vector.broadcast %cst_32 : f32 to vector<1x16x16x16xf32>
    %50 = arith.maximumf %48, %49 : vector<1x16x16x16xf32>
    %51 = vector.extract_strided_slice %0 {offsets = [6, 0], sizes = [1, 16], strides = [1, 1]} : vector<9x16xf32> to vector<1x16xf32>
    %52 = vector.shape_cast %51 : vector<1x16xf32> to vector<1x1x1x16xf32>
    %53 = vector.broadcast %52 : vector<1x1x1x16xf32> to vector<1x16x16x16xf32>
    %54 = arith.mulf %50, %53 : vector<1x16x16x16xf32>
    %55 = arith.addf %47, %54 : vector<1x16x16x16xf32>
    %c0_33 = arith.constant 0 : index
    %c2_34 = arith.constant 2 : index
    %c1_35 = arith.constant 1 : index
    %c0_36 = arith.constant 0 : index
    %56 = vector.load %arg1[%c0_33, %c2_34, %c1_35, %c0_36] : memref<1x18x18x16xf32, #tpu.memory_space<vmem>>, vector<1x16x16x16xf32>
    %cst_37 = arith.constant 0.000000e+00 : f32
    %57 = vector.broadcast %cst_37 : f32 to vector<1x16x16x16xf32>
    %58 = arith.maximumf %56, %57 : vector<1x16x16x16xf32>
    %59 = vector.extract_strided_slice %0 {offsets = [7, 0], sizes = [1, 16], strides = [1, 1]} : vector<9x16xf32> to vector<1x16xf32>
    %60 = vector.shape_cast %59 : vector<1x16xf32> to vector<1x1x1x16xf32>
    %61 = vector.broadcast %60 : vector<1x1x1x16xf32> to vector<1x16x16x16xf32>
    %62 = arith.mulf %58, %61 : vector<1x16x16x16xf32>
    %63 = arith.addf %55, %62 : vector<1x16x16x16xf32>
    %c0_38 = arith.constant 0 : index
    %c2_39 = arith.constant 2 : index
    %c2_40 = arith.constant 2 : index
    %c0_41 = arith.constant 0 : index
    %64 = vector.load %arg1[%c0_38, %c2_39, %c2_40, %c0_41] : memref<1x18x18x16xf32, #tpu.memory_space<vmem>>, vector<1x16x16x16xf32>
    %cst_42 = arith.constant 0.000000e+00 : f32
    %65 = vector.broadcast %cst_42 : f32 to vector<1x16x16x16xf32>
    %66 = arith.maximumf %64, %65 : vector<1x16x16x16xf32>
    %67 = vector.extract_strided_slice %0 {offsets = [8, 0], sizes = [1, 16], strides = [1, 1]} : vector<9x16xf32> to vector<1x16xf32>
    %68 = vector.shape_cast %67 : vector<1x16xf32> to vector<1x1x1x16xf32>
    %69 = vector.broadcast %68 : vector<1x1x1x16xf32> to vector<1x16x16x16xf32>
    %70 = arith.mulf %66, %69 : vector<1x16x16x16xf32>
    %71 = arith.addf %63, %70 : vector<1x16x16x16xf32>
    %72 = vector.shape_cast %71 : vector<1x16x16x16xf32> to vector<256x16xf32>
    %73 = arith.truncf %72 : vector<256x16xf32> to vector<256x16xbf16>
    %c0_43 = arith.constant 0 : index
    %c0_44 = arith.constant 0 : index
    %74 = vector.load %arg3[%c0_43, %c0_44] : memref<16x16xbf16, #tpu.memory_space<vmem>>, vector<16x16xbf16>
    %cst_45 = arith.constant dense<0.000000e+00> : vector<256x16xf32>
    %75 = tpu.matmul %73, %74, %cst_45 {dimension_numbers = #tpu.dot_dimension_numbers<[1], [0], [0], [1], [0, 0, 1, 1], [], []>} : vector<256x16xbf16>, vector<16x16xbf16>, vector<256x16xf32> -> vector<256x16xf32>
    %c0_46 = arith.constant 0 : index
    %c0_47 = arith.constant 0 : index
    %76 = vector.load %arg4[%c0_46, %c0_47] : memref<1x16xf32, #tpu.memory_space<vmem>>, vector<1x16xf32>
    %77 = vector.broadcast %76 : vector<1x16xf32> to vector<256x16xf32>
    %78 = arith.mulf %75, %77 : vector<256x16xf32>
    %c0_48 = arith.constant 0 : index
    %c0_49 = arith.constant 0 : index
    %79 = vector.load %arg5[%c0_48, %c0_49] : memref<1x16xf32, #tpu.memory_space<vmem>>, vector<1x16xf32>
    %80 = vector.broadcast %79 : vector<1x16xf32> to vector<256x16xf32>
    %81 = arith.addf %78, %80 : vector<256x16xf32>
    %c0_50 = arith.constant 0 : index
    %c0_51 = arith.constant 0 : index
    %82 = vector.load %arg6[%c0_50, %c0_51] : memref<256x16xf32, #tpu.memory_space<vmem>>, vector<256x16xf32>
    tpu.vector_store %arg6[%c0_50, %c0_51], %81 {strides = array<i32>} : memref<256x16xf32, #tpu.memory_space<vmem>>, vector<256x16xf32>,
    return
  }
  func.func @transform_0(%arg0: i32) -> (i32, i32, i32, i32) {
    %c0_i32 = arith.constant 0 : i32
    %c0_i32_0 = arith.constant 0 : i32
    %c0_i32_1 = arith.constant 0 : i32
    %c0_i32_2 = arith.constant 0 : i32
    return %arg0, %c0_i32, %c0_i32_0, %c0_i32_1 : i32, i32, i32, i32
  }
  func.func @transform_1(%arg0: i32) -> (i32, i32) {
    %c0_i32 = arith.constant 0 : i32
    %c0_i32_0 = arith.constant 0 : i32
    %c0_i32_1 = arith.constant 0 : i32
    return %c0_i32, %c0_i32_0 : i32, i32
  }
  func.func @transform_2(%arg0: i32) -> (i32, i32) {
    %c0_i32 = arith.constant 0 : i32
    %c0_i32_0 = arith.constant 0 : i32
    %c0_i32_1 = arith.constant 0 : i32
    return %c0_i32, %c0_i32_0 : i32, i32
  }
  func.func @transform_3(%arg0: i32) -> (i32, i32) {
    %c0_i32 = arith.constant 0 : i32
    %c0_i32_0 = arith.constant 0 : i32
    %c0_i32_1 = arith.constant 0 : i32
    return %c0_i32, %c0_i32_0 : i32, i32
  }
  func.func @transform_4(%arg0: i32) -> (i32, i32) {
    %c0_i32 = arith.constant 0 : i32
    %c0_i32_0 = arith.constant 0 : i32
    %c0_i32_1 = arith.constant 0 : i32
    return %c0_i32, %c0_i32_0 : i32, i32
  }
  func.func @transform_5(%arg0: i32) -> (i32, i32) {
    %c0_i32 = arith.constant 0 : i32
    %c0_i32_0 = arith.constant 0 : i32
    return %arg0, %c0_i32 : i32, i32
  }
}

module attributes {stable_mosaic.version = 11 : i64} {
  func.func @_dw_pw_bn_kernel(%arg0: i32, %arg1: memref<1x20x20x16xf32, #tpu.memory_space<vmem>>, %arg2: memref<9x16xf32, #tpu.memory_space<vmem>>, %arg3: memref<16x16xbf16, #tpu.memory_space<vmem>>, %arg4: memref<1x16xf32, #tpu.memory_space<vmem>>, %arg5: memref<1x16xf32, #tpu.memory_space<vmem>>, %arg6: memref<256x16xf32, #tpu.memory_space<vmem>>) attributes {dimension_semantics = [#tpu.dimension_semantics<parallel>], iteration_bounds = array<i64: 2>, scalar_prefetch = 0 : i64, scratch_operands = 0 : i64, tpu.core_type = #tpu.core_type<tc>, window_params = [{transform_indices = @transform_0, window_bounds = array<i64: 1, 20, 20, 16>}, {pipeline_mode = #tpu.pipeline_mode<synchronous>, transform_indices = @transform_1, window_bounds = array<i64: 9, 16>}, {pipeline_mode = #tpu.pipeline_mode<synchronous>, transform_indices = @transform_2, window_bounds = array<i64: 16, 16>}, {pipeline_mode = #tpu.pipeline_mode<synchronous>, transform_indices = @transform_3, window_bounds = array<i64: 1, 16>}, {pipeline_mode = #tpu.pipeline_mode<synchronous>, transform_indices = @transform_4, window_bounds = array<i64: 1, 16>}, {transform_indices = @transform_5, window_bounds = array<i64: 256, 16>}]} {
    %c0 = arith.constant 0 : index
    %c0_0 = arith.constant 0 : index
    %0 = vector.load %arg2[%c0, %c0_0] : memref<9x16xf32, #tpu.memory_space<vmem>>, vector<9x16xf32>
    %c0_1 = arith.constant 0 : index
    %c0_2 = arith.constant 0 : index
    %c0_3 = arith.constant 0 : index
    %c0_4 = arith.constant 0 : index
    %1 = vector.load %arg1[%c0_1, %c0_2, %c0_3, %c0_4] : memref<1x20x20x16xf32, #tpu.memory_space<vmem>>, vector<1x16x16x16xf32>
    %cst = arith.constant 0.000000e+00 : f32
    %2 = vector.broadcast %cst : f32 to vector<1x16x16x16xf32>
    %3 = arith.maximumf %1, %2 : vector<1x16x16x16xf32>
    %4 = vector.extract_strided_slice %0 {offsets = [0, 0], sizes = [1, 16], strides = [1, 1]} : vector<9x16xf32> to vector<1x16xf32>
    %5 = vector.shape_cast %4 : vector<1x16xf32> to vector<1x1x1x16xf32>
    %6 = vector.broadcast %5 : vector<1x1x1x16xf32> to vector<1x16x16x16xf32>
    %7 = arith.mulf %3, %6 : vector<1x16x16x16xf32>
    %c0_5 = arith.constant 0 : index
    %c0_6 = arith.constant 0 : index
    %c2 = arith.constant 2 : index
    %c0_7 = arith.constant 0 : index
    %8 = vector.load %arg1[%c0_5, %c0_6, %c2, %c0_7] : memref<1x20x20x16xf32, #tpu.memory_space<vmem>>, vector<1x16x16x16xf32>
    %cst_8 = arith.constant 0.000000e+00 : f32
    %9 = vector.broadcast %cst_8 : f32 to vector<1x16x16x16xf32>
    %10 = arith.maximumf %8, %9 : vector<1x16x16x16xf32>
    %11 = vector.extract_strided_slice %0 {offsets = [1, 0], sizes = [1, 16], strides = [1, 1]} : vector<9x16xf32> to vector<1x16xf32>
    %12 = vector.shape_cast %11 : vector<1x16xf32> to vector<1x1x1x16xf32>
    %13 = vector.broadcast %12 : vector<1x1x1x16xf32> to vector<1x16x16x16xf32>
    %14 = arith.mulf %10, %13 : vector<1x16x16x16xf32>
    %15 = arith.addf %7, %14 : vector<1x16x16x16xf32>
    %c0_9 = arith.constant 0 : index
    %c0_10 = arith.constant 0 : index
    %c4 = arith.constant 4 : index
    %c0_11 = arith.constant 0 : index
    %16 = vector.load %arg1[%c0_9, %c0_10, %c4, %c0_11] : memref<1x20x20x16xf32, #tpu.memory_space<vmem>>, vector<1x16x16x16xf32>
    %cst_12 = arith.constant 0.000000e+00 : f32
    %17 = vector.broadcast %cst_12 : f32 to vector<1x16x16x16xf32>
    %18 = arith.maximumf %16, %17 : vector<1x16x16x16xf32>
    %19 = vector.extract_strided_slice %0 {offsets = [2, 0], sizes = [1, 16], strides = [1, 1]} : vector<9x16xf32> to vector<1x16xf32>
    %20 = vector.shape_cast %19 : vector<1x16xf32> to vector<1x1x1x16xf32>
    %21 = vector.broadcast %20 : vector<1x1x1x16xf32> to vector<1x16x16x16xf32>
    %22 = arith.mulf %18, %21 : vector<1x16x16x16xf32>
    %23 = arith.addf %15, %22 : vector<1x16x16x16xf32>
    %c0_13 = arith.constant 0 : index
    %c2_14 = arith.constant 2 : index
    %c0_15 = arith.constant 0 : index
    %c0_16 = arith.constant 0 : index
    %24 = vector.load %arg1[%c0_13, %c2_14, %c0_15, %c0_16] : memref<1x20x20x16xf32, #tpu.memory_space<vmem>>, vector<1x16x16x16xf32>
    %cst_17 = arith.constant 0.000000e+00 : f32
    %25 = vector.broadcast %cst_17 : f32 to vector<1x16x16x16xf32>
    %26 = arith.maximumf %24, %25 : vector<1x16x16x16xf32>
    %27 = vector.extract_strided_slice %0 {offsets = [3, 0], sizes = [1, 16], strides = [1, 1]} : vector<9x16xf32> to vector<1x16xf32>
    %28 = vector.shape_cast %27 : vector<1x16xf32> to vector<1x1x1x16xf32>
    %29 = vector.broadcast %28 : vector<1x1x1x16xf32> to vector<1x16x16x16xf32>
    %30 = arith.mulf %26, %29 : vector<1x16x16x16xf32>
    %31 = arith.addf %23, %30 : vector<1x16x16x16xf32>
    %c0_18 = arith.constant 0 : index
    %c2_19 = arith.constant 2 : index
    %c2_20 = arith.constant 2 : index
    %c0_21 = arith.constant 0 : index
    %32 = vector.load %arg1[%c0_18, %c2_19, %c2_20, %c0_21] : memref<1x20x20x16xf32, #tpu.memory_space<vmem>>, vector<1x16x16x16xf32>
    %cst_22 = arith.constant 0.000000e+00 : f32
    %33 = vector.broadcast %cst_22 : f32 to vector<1x16x16x16xf32>
    %34 = arith.maximumf %32, %33 : vector<1x16x16x16xf32>
    %35 = vector.extract_strided_slice %0 {offsets = [4, 0], sizes = [1, 16], strides = [1, 1]} : vector<9x16xf32> to vector<1x16xf32>
    %36 = vector.shape_cast %35 : vector<1x16xf32> to vector<1x1x1x16xf32>
    %37 = vector.broadcast %36 : vector<1x1x1x16xf32> to vector<1x16x16x16xf32>
    %38 = arith.mulf %34, %37 : vector<1x16x16x16xf32>
    %39 = arith.addf %31, %38 : vector<1x16x16x16xf32>
    %c0_23 = arith.constant 0 : index
    %c2_24 = arith.constant 2 : index
    %c4_25 = arith.constant 4 : index
    %c0_26 = arith.constant 0 : index
    %40 = vector.load %arg1[%c0_23, %c2_24, %c4_25, %c0_26] : memref<1x20x20x16xf32, #tpu.memory_space<vmem>>, vector<1x16x16x16xf32>
    %cst_27 = arith.constant 0.000000e+00 : f32
    %41 = vector.broadcast %cst_27 : f32 to vector<1x16x16x16xf32>
    %42 = arith.maximumf %40, %41 : vector<1x16x16x16xf32>
    %43 = vector.extract_strided_slice %0 {offsets = [5, 0], sizes = [1, 16], strides = [1, 1]} : vector<9x16xf32> to vector<1x16xf32>
    %44 = vector.shape_cast %43 : vector<1x16xf32> to vector<1x1x1x16xf32>
    %45 = vector.broadcast %44 : vector<1x1x1x16xf32> to vector<1x16x16x16xf32>
    %46 = arith.mulf %42, %45 : vector<1x16x16x16xf32>
    %47 = arith.addf %39, %46 : vector<1x16x16x16xf32>
    %c0_28 = arith.constant 0 : index
    %c4_29 = arith.constant 4 : index
    %c0_30 = arith.constant 0 : index
    %c0_31 = arith.constant 0 : index
    %48 = vector.load %arg1[%c0_28, %c4_29, %c0_30, %c0_31] : memref<1x20x20x16xf32, #tpu.memory_space<vmem>>, vector<1x16x16x16xf32>
    %cst_32 = arith.constant 0.000000e+00 : f32
    %49 = vector.broadcast %cst_32 : f32 to vector<1x16x16x16xf32>
    %50 = arith.maximumf %48, %49 : vector<1x16x16x16xf32>
    %51 = vector.extract_strided_slice %0 {offsets = [6, 0], sizes = [1, 16], strides = [1, 1]} : vector<9x16xf32> to vector<1x16xf32>
    %52 = vector.shape_cast %51 : vector<1x16xf32> to vector<1x1x1x16xf32>
    %53 = vector.broadcast %52 : vector<1x1x1x16xf32> to vector<1x16x16x16xf32>
    %54 = arith.mulf %50, %53 : vector<1x16x16x16xf32>
    %55 = arith.addf %47, %54 : vector<1x16x16x16xf32>
    %c0_33 = arith.constant 0 : index
    %c4_34 = arith.constant 4 : index
    %c2_35 = arith.constant 2 : index
    %c0_36 = arith.constant 0 : index
    %56 = vector.load %arg1[%c0_33, %c4_34, %c2_35, %c0_36] : memref<1x20x20x16xf32, #tpu.memory_space<vmem>>, vector<1x16x16x16xf32>
    %cst_37 = arith.constant 0.000000e+00 : f32
    %57 = vector.broadcast %cst_37 : f32 to vector<1x16x16x16xf32>
    %58 = arith.maximumf %56, %57 : vector<1x16x16x16xf32>
    %59 = vector.extract_strided_slice %0 {offsets = [7, 0], sizes = [1, 16], strides = [1, 1]} : vector<9x16xf32> to vector<1x16xf32>
    %60 = vector.shape_cast %59 : vector<1x16xf32> to vector<1x1x1x16xf32>
    %61 = vector.broadcast %60 : vector<1x1x1x16xf32> to vector<1x16x16x16xf32>
    %62 = arith.mulf %58, %61 : vector<1x16x16x16xf32>
    %63 = arith.addf %55, %62 : vector<1x16x16x16xf32>
    %c0_38 = arith.constant 0 : index
    %c4_39 = arith.constant 4 : index
    %c4_40 = arith.constant 4 : index
    %c0_41 = arith.constant 0 : index
    %64 = vector.load %arg1[%c0_38, %c4_39, %c4_40, %c0_41] : memref<1x20x20x16xf32, #tpu.memory_space<vmem>>, vector<1x16x16x16xf32>
    %cst_42 = arith.constant 0.000000e+00 : f32
    %65 = vector.broadcast %cst_42 : f32 to vector<1x16x16x16xf32>
    %66 = arith.maximumf %64, %65 : vector<1x16x16x16xf32>
    %67 = vector.extract_strided_slice %0 {offsets = [8, 0], sizes = [1, 16], strides = [1, 1]} : vector<9x16xf32> to vector<1x16xf32>
    %68 = vector.shape_cast %67 : vector<1x16xf32> to vector<1x1x1x16xf32>
    %69 = vector.broadcast %68 : vector<1x1x1x16xf32> to vector<1x16x16x16xf32>
    %70 = arith.mulf %66, %69 : vector<1x16x16x16xf32>
    %71 = arith.addf %63, %70 : vector<1x16x16x16xf32>
    %72 = vector.shape_cast %71 : vector<1x16x16x16xf32> to vector<256x16xf32>
    %73 = arith.truncf %72 : vector<256x16xf32> to vector<256x16xbf16>
    %c0_43 = arith.constant 0 : index
    %c0_44 = arith.constant 0 : index
    %74 = vector.load %arg3[%c0_43, %c0_44] : memref<16x16xbf16, #tpu.memory_space<vmem>>, vector<16x16xbf16>
    %cst_45 = arith.constant dense<0.000000e+00> : vector<256x16xf32>
    %75 = tpu.matmul %73, %74, %cst_45 {dimension_numbers = #tpu.dot_dimension_numbers<[1], [0], [0], [1], [0, 0, 1, 1], [], []>} : vector<256x16xbf16>, vector<16x16xbf16>, vector<256x16xf32> -> vector<256x16xf32>
    %c0_46 = arith.constant 0 : index
    %c0_47 = arith.constant 0 : index
    %76 = vector.load %arg4[%c0_46, %c0_47] : memref<1x16xf32, #tpu.memory_space<vmem>>, vector<1x16xf32>
    %77 = vector.broadcast %76 : vector<1x16xf32> to vector<256x16xf32>
    %78 = arith.mulf %75, %77 : vector<256x16xf32>
    %c0_48 = arith.constant 0 : index
    %c0_49 = arith.constant 0 : index
    %79 = vector.load %arg5[%c0_48, %c0_49] : memref<1x16xf32, #tpu.memory_space<vmem>>, vector<1x16xf32>
    %80 = vector.broadcast %79 : vector<1x16xf32> to vector<256x16xf32>
    %81 = arith.addf %78, %80 : vector<256x16xf32>
    %c0_50 = arith.constant 0 : index
    %c0_51 = arith.constant 0 : index
    %82 = vector.load %arg6[%c0_50, %c0_51] : memref<256x16xf32, #tpu.memory_space<vmem>>, vector<256x16xf32>
    tpu.vector_store %arg6[%c0_50, %c0_51], %81 {strides = array<i32>} : memref<256x16xf32, #tpu.memory_space<vmem>>, vector<256x16xf32>,
    return
  }
  func.func @transform_0(%arg0: i32) -> (i32, i32, i32, i32) {
    %c0_i32 = arith.constant 0 : i32
    %c0_i32_0 = arith.constant 0 : i32
    %c0_i32_1 = arith.constant 0 : i32
    %c0_i32_2 = arith.constant 0 : i32
    return %arg0, %c0_i32, %c0_i32_0, %c0_i32_1 : i32, i32, i32, i32
  }
  func.func @transform_1(%arg0: i32) -> (i32, i32) {
    %c0_i32 = arith.constant 0 : i32
    %c0_i32_0 = arith.constant 0 : i32
    %c0_i32_1 = arith.constant 0 : i32
    return %c0_i32, %c0_i32_0 : i32, i32
  }
  func.func @transform_2(%arg0: i32) -> (i32, i32) {
    %c0_i32 = arith.constant 0 : i32
    %c0_i32_0 = arith.constant 0 : i32
    %c0_i32_1 = arith.constant 0 : i32
    return %c0_i32, %c0_i32_0 : i32, i32
  }
  func.func @transform_3(%arg0: i32) -> (i32, i32) {
    %c0_i32 = arith.constant 0 : i32
    %c0_i32_0 = arith.constant 0 : i32
    %c0_i32_1 = arith.constant 0 : i32
    return %c0_i32, %c0_i32_0 : i32, i32
  }
  func.func @transform_4(%arg0: i32) -> (i32, i32) {
    %c0_i32 = arith.constant 0 : i32
    %c0_i32_0 = arith.constant 0 : i32
    %c0_i32_1 = arith.constant 0 : i32
    return %c0_i32, %c0_i32_0 : i32, i32
  }
  func.func @transform_5(%arg0: i32) -> (i32, i32) {
    %c0_i32 = arith.constant 0 : i32
    %c0_i32_0 = arith.constant 0 : i32
    return %arg0, %c0_i32 : i32, i32
  }
}

module attributes {stable_mosaic.version = 11 : i64} {
  func.func @_matmul_bn_kernel(%arg0: i32, %arg1: memref<64x128xf32, #tpu.memory_space<vmem>>, %arg2: memref<128x16xbf16, #tpu.memory_space<vmem>>, %arg3: memref<1x16xf32, #tpu.memory_space<vmem>>, %arg4: memref<1x16xf32, #tpu.memory_space<vmem>>, %arg5: memref<64x16xf32, #tpu.memory_space<vmem>>) attributes {dimension_semantics = [#tpu.dimension_semantics<parallel>], iteration_bounds = array<i64: 2>, scalar_prefetch = 0 : i64, scratch_operands = 0 : i64, tpu.core_type = #tpu.core_type<tc>, window_params = [{transform_indices = @transform_0, window_bounds = array<i64: 64, 128>}, {pipeline_mode = #tpu.pipeline_mode<synchronous>, transform_indices = @transform_1, window_bounds = array<i64: 128, 16>}, {pipeline_mode = #tpu.pipeline_mode<synchronous>, transform_indices = @transform_2, window_bounds = array<i64: 1, 16>}, {pipeline_mode = #tpu.pipeline_mode<synchronous>, transform_indices = @transform_3, window_bounds = array<i64: 1, 16>}, {transform_indices = @transform_4, window_bounds = array<i64: 64, 16>}]} {
    %c0 = arith.constant 0 : index
    %c0_0 = arith.constant 0 : index
    %0 = vector.load %arg1[%c0, %c0_0] : memref<64x128xf32, #tpu.memory_space<vmem>>, vector<64x128xf32>
    %cst = arith.constant 0.000000e+00 : f32
    %1 = vector.broadcast %cst : f32 to vector<64x128xf32>
    %2 = arith.maximumf %0, %1 : vector<64x128xf32>
    %3 = arith.truncf %2 : vector<64x128xf32> to vector<64x128xbf16>
    %c0_1 = arith.constant 0 : index
    %c0_2 = arith.constant 0 : index
    %4 = vector.load %arg2[%c0_1, %c0_2] : memref<128x16xbf16, #tpu.memory_space<vmem>>, vector<128x16xbf16>
    %cst_3 = arith.constant dense<0.000000e+00> : vector<64x16xf32>
    %5 = tpu.matmul %3, %4, %cst_3 {dimension_numbers = #tpu.dot_dimension_numbers<[1], [0], [0], [1], [0, 0, 1, 1], [], []>} : vector<64x128xbf16>, vector<128x16xbf16>, vector<64x16xf32> -> vector<64x16xf32>
    %c0_4 = arith.constant 0 : index
    %c0_5 = arith.constant 0 : index
    %6 = vector.load %arg3[%c0_4, %c0_5] : memref<1x16xf32, #tpu.memory_space<vmem>>, vector<1x16xf32>
    %7 = vector.broadcast %6 : vector<1x16xf32> to vector<64x16xf32>
    %8 = arith.mulf %5, %7 : vector<64x16xf32>
    %c0_6 = arith.constant 0 : index
    %c0_7 = arith.constant 0 : index
    %9 = vector.load %arg4[%c0_6, %c0_7] : memref<1x16xf32, #tpu.memory_space<vmem>>, vector<1x16xf32>
    %10 = vector.broadcast %9 : vector<1x16xf32> to vector<64x16xf32>
    %11 = arith.addf %8, %10 : vector<64x16xf32>
    %c0_8 = arith.constant 0 : index
    %c0_9 = arith.constant 0 : index
    %12 = vector.load %arg5[%c0_8, %c0_9] : memref<64x16xf32, #tpu.memory_space<vmem>>, vector<64x16xf32>
    tpu.vector_store %arg5[%c0_8, %c0_9], %11 {strides = array<i32>} : memref<64x16xf32, #tpu.memory_space<vmem>>, vector<64x16xf32>,
    return
  }
  func.func @transform_0(%arg0: i32) -> (i32, i32) {
    %c0_i32 = arith.constant 0 : i32
    %c0_i32_0 = arith.constant 0 : i32
    return %arg0, %c0_i32 : i32, i32
  }
  func.func @transform_1(%arg0: i32) -> (i32, i32) {
    %c0_i32 = arith.constant 0 : i32
    %c0_i32_0 = arith.constant 0 : i32
    %c0_i32_1 = arith.constant 0 : i32
    return %c0_i32, %c0_i32_0 : i32, i32
  }
  func.func @transform_2(%arg0: i32) -> (i32, i32) {
    %c0_i32 = arith.constant 0 : i32
    %c0_i32_0 = arith.constant 0 : i32
    %c0_i32_1 = arith.constant 0 : i32
    return %c0_i32, %c0_i32_0 : i32, i32
  }
  func.func @transform_3(%arg0: i32) -> (i32, i32) {
    %c0_i32 = arith.constant 0 : i32
    %c0_i32_0 = arith.constant 0 : i32
    %c0_i32_1 = arith.constant 0 : i32
    return %c0_i32, %c0_i32_0 : i32, i32
  }
  func.func @transform_4(%arg0: i32) -> (i32, i32) {
    %c0_i32 = arith.constant 0 : i32
    %c0_i32_0 = arith.constant 0 : i32
    return %arg0, %c0_i32 : i32, i32
  }
}

module attributes {stable_mosaic.version = 11 : i64} {
  func.func @_maxpool_kernel(%arg0: i32, %arg1: memref<1x10x10x16xf32, #tpu.memory_space<vmem>>, %arg2: memref<1x8x8x16xf32, #tpu.memory_space<vmem>>) attributes {dimension_semantics = [#tpu.dimension_semantics<parallel>], iteration_bounds = array<i64: 2>, scalar_prefetch = 0 : i64, scratch_operands = 0 : i64, tpu.core_type = #tpu.core_type<tc>, window_params = [{transform_indices = @transform_0, window_bounds = array<i64: 1, 10, 10, 16>}, {transform_indices = @transform_1, window_bounds = array<i64: 1, 8, 8, 16>}]} {
    %c0 = arith.constant 0 : index
    %c0_0 = arith.constant 0 : index
    %c0_1 = arith.constant 0 : index
    %c0_2 = arith.constant 0 : index
    %0 = vector.load %arg1[%c0, %c0_0, %c0_1, %c0_2] : memref<1x10x10x16xf32, #tpu.memory_space<vmem>>, vector<1x8x8x16xf32>
    %c0_3 = arith.constant 0 : index
    %c0_4 = arith.constant 0 : index
    %c1 = arith.constant 1 : index
    %c0_5 = arith.constant 0 : index
    %1 = vector.load %arg1[%c0_3, %c0_4, %c1, %c0_5] : memref<1x10x10x16xf32, #tpu.memory_space<vmem>>, vector<1x8x8x16xf32>
    %2 = arith.maximumf %0, %1 : vector<1x8x8x16xf32>
    %c0_6 = arith.constant 0 : index
    %c0_7 = arith.constant 0 : index
    %c2 = arith.constant 2 : index
    %c0_8 = arith.constant 0 : index
    %3 = vector.load %arg1[%c0_6, %c0_7, %c2, %c0_8] : memref<1x10x10x16xf32, #tpu.memory_space<vmem>>, vector<1x8x8x16xf32>
    %4 = arith.maximumf %2, %3 : vector<1x8x8x16xf32>
    %c0_9 = arith.constant 0 : index
    %c1_10 = arith.constant 1 : index
    %c0_11 = arith.constant 0 : index
    %c0_12 = arith.constant 0 : index
    %5 = vector.load %arg1[%c0_9, %c1_10, %c0_11, %c0_12] : memref<1x10x10x16xf32, #tpu.memory_space<vmem>>, vector<1x8x8x16xf32>
    %6 = arith.maximumf %4, %5 : vector<1x8x8x16xf32>
    %c0_13 = arith.constant 0 : index
    %c1_14 = arith.constant 1 : index
    %c1_15 = arith.constant 1 : index
    %c0_16 = arith.constant 0 : index
    %7 = vector.load %arg1[%c0_13, %c1_14, %c1_15, %c0_16] : memref<1x10x10x16xf32, #tpu.memory_space<vmem>>, vector<1x8x8x16xf32>
    %8 = arith.maximumf %6, %7 : vector<1x8x8x16xf32>
    %c0_17 = arith.constant 0 : index
    %c1_18 = arith.constant 1 : index
    %c2_19 = arith.constant 2 : index
    %c0_20 = arith.constant 0 : index
    %9 = vector.load %arg1[%c0_17, %c1_18, %c2_19, %c0_20] : memref<1x10x10x16xf32, #tpu.memory_space<vmem>>, vector<1x8x8x16xf32>
    %10 = arith.maximumf %8, %9 : vector<1x8x8x16xf32>
    %c0_21 = arith.constant 0 : index
    %c2_22 = arith.constant 2 : index
    %c0_23 = arith.constant 0 : index
    %c0_24 = arith.constant 0 : index
    %11 = vector.load %arg1[%c0_21, %c2_22, %c0_23, %c0_24] : memref<1x10x10x16xf32, #tpu.memory_space<vmem>>, vector<1x8x8x16xf32>
    %12 = arith.maximumf %10, %11 : vector<1x8x8x16xf32>
    %c0_25 = arith.constant 0 : index
    %c2_26 = arith.constant 2 : index
    %c1_27 = arith.constant 1 : index
    %c0_28 = arith.constant 0 : index
    %13 = vector.load %arg1[%c0_25, %c2_26, %c1_27, %c0_28] : memref<1x10x10x16xf32, #tpu.memory_space<vmem>>, vector<1x8x8x16xf32>
    %14 = arith.maximumf %12, %13 : vector<1x8x8x16xf32>
    %c0_29 = arith.constant 0 : index
    %c2_30 = arith.constant 2 : index
    %c2_31 = arith.constant 2 : index
    %c0_32 = arith.constant 0 : index
    %15 = vector.load %arg1[%c0_29, %c2_30, %c2_31, %c0_32] : memref<1x10x10x16xf32, #tpu.memory_space<vmem>>, vector<1x8x8x16xf32>
    %16 = arith.maximumf %14, %15 : vector<1x8x8x16xf32>
    %c0_33 = arith.constant 0 : index
    %c0_34 = arith.constant 0 : index
    %c0_35 = arith.constant 0 : index
    %c0_36 = arith.constant 0 : index
    %17 = vector.load %arg2[%c0_33, %c0_34, %c0_35, %c0_36] : memref<1x8x8x16xf32, #tpu.memory_space<vmem>>, vector<1x8x8x16xf32>
    tpu.vector_store %arg2[%c0_33, %c0_34, %c0_35, %c0_36], %16 {strides = array<i32>} : memref<1x8x8x16xf32, #tpu.memory_space<vmem>>, vector<1x8x8x16xf32>,
    return
  }
  func.func @transform_0(%arg0: i32) -> (i32, i32, i32, i32) {
    %c0_i32 = arith.constant 0 : i32
    %c0_i32_0 = arith.constant 0 : i32
    %c0_i32_1 = arith.constant 0 : i32
    %c0_i32_2 = arith.constant 0 : i32
    return %arg0, %c0_i32, %c0_i32_0, %c0_i32_1 : i32, i32, i32, i32
  }
  func.func @transform_1(%arg0: i32) -> (i32, i32, i32, i32) {
    %c0_i32 = arith.constant 0 : i32
    %c0_i32_0 = arith.constant 0 : i32
    %c0_i32_1 = arith.constant 0 : i32
    %c0_i32_2 = arith.constant 0 : i32
    return %arg0, %c0_i32, %c0_i32_0, %c0_i32_1 : i32, i32, i32, i32
  }
}

module attributes {stable_mosaic.version = 11 : i64} {
  func.func @_matmul_bn_kernel(%arg0: i32, %arg1: memref<256x64xf32, #tpu.memory_space<vmem>>, %arg2: memref<64x16xbf16, #tpu.memory_space<vmem>>, %arg3: memref<1x16xf32, #tpu.memory_space<vmem>>, %arg4: memref<1x16xf32, #tpu.memory_space<vmem>>, %arg5: memref<256x16xf32, #tpu.memory_space<vmem>>) attributes {dimension_semantics = [#tpu.dimension_semantics<parallel>], iteration_bounds = array<i64: 2>, scalar_prefetch = 0 : i64, scratch_operands = 0 : i64, tpu.core_type = #tpu.core_type<tc>, window_params = [{transform_indices = @transform_0, window_bounds = array<i64: 256, 64>}, {pipeline_mode = #tpu.pipeline_mode<synchronous>, transform_indices = @transform_1, window_bounds = array<i64: 64, 16>}, {pipeline_mode = #tpu.pipeline_mode<synchronous>, transform_indices = @transform_2, window_bounds = array<i64: 1, 16>}, {pipeline_mode = #tpu.pipeline_mode<synchronous>, transform_indices = @transform_3, window_bounds = array<i64: 1, 16>}, {transform_indices = @transform_4, window_bounds = array<i64: 256, 16>}]} {
    %c0 = arith.constant 0 : index
    %c0_0 = arith.constant 0 : index
    %0 = vector.load %arg1[%c0, %c0_0] : memref<256x64xf32, #tpu.memory_space<vmem>>, vector<256x64xf32>
    %cst = arith.constant 0.000000e+00 : f32
    %1 = vector.broadcast %cst : f32 to vector<256x64xf32>
    %2 = arith.maximumf %0, %1 : vector<256x64xf32>
    %3 = arith.truncf %2 : vector<256x64xf32> to vector<256x64xbf16>
    %c0_1 = arith.constant 0 : index
    %c0_2 = arith.constant 0 : index
    %4 = vector.load %arg2[%c0_1, %c0_2] : memref<64x16xbf16, #tpu.memory_space<vmem>>, vector<64x16xbf16>
    %cst_3 = arith.constant dense<0.000000e+00> : vector<256x16xf32>
    %5 = tpu.matmul %3, %4, %cst_3 {dimension_numbers = #tpu.dot_dimension_numbers<[1], [0], [0], [1], [0, 0, 1, 1], [], []>} : vector<256x64xbf16>, vector<64x16xbf16>, vector<256x16xf32> -> vector<256x16xf32>
    %c0_4 = arith.constant 0 : index
    %c0_5 = arith.constant 0 : index
    %6 = vector.load %arg3[%c0_4, %c0_5] : memref<1x16xf32, #tpu.memory_space<vmem>>, vector<1x16xf32>
    %7 = vector.broadcast %6 : vector<1x16xf32> to vector<256x16xf32>
    %8 = arith.mulf %5, %7 : vector<256x16xf32>
    %c0_6 = arith.constant 0 : index
    %c0_7 = arith.constant 0 : index
    %9 = vector.load %arg4[%c0_6, %c0_7] : memref<1x16xf32, #tpu.memory_space<vmem>>, vector<1x16xf32>
    %10 = vector.broadcast %9 : vector<1x16xf32> to vector<256x16xf32>
    %11 = arith.addf %8, %10 : vector<256x16xf32>
    %c0_8 = arith.constant 0 : index
    %c0_9 = arith.constant 0 : index
    %12 = vector.load %arg5[%c0_8, %c0_9] : memref<256x16xf32, #tpu.memory_space<vmem>>, vector<256x16xf32>
    tpu.vector_store %arg5[%c0_8, %c0_9], %11 {strides = array<i32>} : memref<256x16xf32, #tpu.memory_space<vmem>>, vector<256x16xf32>,
    return
  }
  func.func @transform_0(%arg0: i32) -> (i32, i32) {
    %c0_i32 = arith.constant 0 : i32
    %c0_i32_0 = arith.constant 0 : i32
    return %arg0, %c0_i32 : i32, i32
  }
  func.func @transform_1(%arg0: i32) -> (i32, i32) {
    %c0_i32 = arith.constant 0 : i32
    %c0_i32_0 = arith.constant 0 : i32
    %c0_i32_1 = arith.constant 0 : i32
    return %c0_i32, %c0_i32_0 : i32, i32
  }
  func.func @transform_2(%arg0: i32) -> (i32, i32) {
    %c0_i32 = arith.constant 0 : i32
    %c0_i32_0 = arith.constant 0 : i32
    %c0_i32_1 = arith.constant 0 : i32
    return %c0_i32, %c0_i32_0 : i32, i32
  }
  func.func @transform_3(%arg0: i32) -> (i32, i32) {
    %c0_i32 = arith.constant 0 : i32
    %c0_i32_0 = arith.constant 0 : i32
    %c0_i32_1 = arith.constant 0 : i32
    return %c0_i32, %c0_i32_0 : i32, i32
  }
  func.func @transform_4(%arg0: i32) -> (i32, i32) {
    %c0_i32 = arith.constant 0 : i32
    %c0_i32_0 = arith.constant 0 : i32
    return %arg0, %c0_i32 : i32, i32
  }
}

module attributes {stable_mosaic.version = 11 : i64} {
  func.func @_matmul_bn_kernel(%arg0: i32, %arg1: memref<64x64xf32, #tpu.memory_space<vmem>>, %arg2: memref<64x16xbf16, #tpu.memory_space<vmem>>, %arg3: memref<1x16xf32, #tpu.memory_space<vmem>>, %arg4: memref<1x16xf32, #tpu.memory_space<vmem>>, %arg5: memref<64x16xf32, #tpu.memory_space<vmem>>) attributes {dimension_semantics = [#tpu.dimension_semantics<parallel>], iteration_bounds = array<i64: 2>, scalar_prefetch = 0 : i64, scratch_operands = 0 : i64, tpu.core_type = #tpu.core_type<tc>, window_params = [{transform_indices = @transform_0, window_bounds = array<i64: 64, 64>}, {pipeline_mode = #tpu.pipeline_mode<synchronous>, transform_indices = @transform_1, window_bounds = array<i64: 64, 16>}, {pipeline_mode = #tpu.pipeline_mode<synchronous>, transform_indices = @transform_2, window_bounds = array<i64: 1, 16>}, {pipeline_mode = #tpu.pipeline_mode<synchronous>, transform_indices = @transform_3, window_bounds = array<i64: 1, 16>}, {transform_indices = @transform_4, window_bounds = array<i64: 64, 16>}]} {
    %c0 = arith.constant 0 : index
    %c0_0 = arith.constant 0 : index
    %0 = vector.load %arg1[%c0, %c0_0] : memref<64x64xf32, #tpu.memory_space<vmem>>, vector<64x64xf32>
    %cst = arith.constant 0.000000e+00 : f32
    %1 = vector.broadcast %cst : f32 to vector<64x64xf32>
    %2 = arith.maximumf %0, %1 : vector<64x64xf32>
    %3 = arith.truncf %2 : vector<64x64xf32> to vector<64x64xbf16>
    %c0_1 = arith.constant 0 : index
    %c0_2 = arith.constant 0 : index
    %4 = vector.load %arg2[%c0_1, %c0_2] : memref<64x16xbf16, #tpu.memory_space<vmem>>, vector<64x16xbf16>
    %cst_3 = arith.constant dense<0.000000e+00> : vector<64x16xf32>
    %5 = tpu.matmul %3, %4, %cst_3 {dimension_numbers = #tpu.dot_dimension_numbers<[1], [0], [0], [1], [0, 0, 1, 1], [], []>} : vector<64x64xbf16>, vector<64x16xbf16>, vector<64x16xf32> -> vector<64x16xf32>
    %c0_4 = arith.constant 0 : index
    %c0_5 = arith.constant 0 : index
    %6 = vector.load %arg3[%c0_4, %c0_5] : memref<1x16xf32, #tpu.memory_space<vmem>>, vector<1x16xf32>
    %7 = vector.broadcast %6 : vector<1x16xf32> to vector<64x16xf32>
    %8 = arith.mulf %5, %7 : vector<64x16xf32>
    %c0_6 = arith.constant 0 : index
    %c0_7 = arith.constant 0 : index
    %9 = vector.load %arg4[%c0_6, %c0_7] : memref<1x16xf32, #tpu.memory_space<vmem>>, vector<1x16xf32>
    %10 = vector.broadcast %9 : vector<1x16xf32> to vector<64x16xf32>
    %11 = arith.addf %8, %10 : vector<64x16xf32>
    %c0_8 = arith.constant 0 : index
    %c0_9 = arith.constant 0 : index
    %12 = vector.load %arg5[%c0_8, %c0_9] : memref<64x16xf32, #tpu.memory_space<vmem>>, vector<64x16xf32>
    tpu.vector_store %arg5[%c0_8, %c0_9], %11 {strides = array<i32>} : memref<64x16xf32, #tpu.memory_space<vmem>>, vector<64x16xf32>,
    return
  }
  func.func @transform_0(%arg0: i32) -> (i32, i32) {
    %c0_i32 = arith.constant 0 : i32
    %c0_i32_0 = arith.constant 0 : i32
    return %arg0, %c0_i32 : i32, i32
  }
  func.func @transform_1(%arg0: i32) -> (i32, i32) {
    %c0_i32 = arith.constant 0 : i32
    %c0_i32_0 = arith.constant 0 : i32
    %c0_i32_1 = arith.constant 0 : i32
    return %c0_i32, %c0_i32_0 : i32, i32
  }
  func.func @transform_2(%arg0: i32) -> (i32, i32) {
    %c0_i32 = arith.constant 0 : i32
    %c0_i32_0 = arith.constant 0 : i32
    %c0_i32_1 = arith.constant 0 : i32
    return %c0_i32, %c0_i32_0 : i32, i32
  }
  func.func @transform_3(%arg0: i32) -> (i32, i32) {
    %c0_i32 = arith.constant 0 : i32
    %c0_i32_0 = arith.constant 0 : i32
    %c0_i32_1 = arith.constant 0 : i32
    return %c0_i32, %c0_i32_0 : i32, i32
  }
  func.func @transform_4(%arg0: i32) -> (i32, i32) {
    %c0_i32 = arith.constant 0 : i32
    %c0_i32_0 = arith.constant 0 : i32
    return %arg0, %c0_i32 : i32, i32
  }
}

module attributes {stable_mosaic.version = 11 : i64} {
  func.func @_gap_linear_kernel(%arg0: i32, %arg1: memref<2x16x64xf32, #tpu.memory_space<vmem>>, %arg2: memref<64x10xf32, #tpu.memory_space<vmem>>, %arg3: memref<1x10xf32, #tpu.memory_space<vmem>>, %arg4: memref<2x10xf32, #tpu.memory_space<vmem>>) attributes {dimension_semantics = [#tpu.dimension_semantics<arbitrary>], iteration_bounds = array<i64: 1>, scalar_prefetch = 0 : i64, scratch_operands = 0 : i64, tpu.core_type = #tpu.core_type<tc>, window_params = [{pipeline_mode = #tpu.pipeline_mode<synchronous>, transform_indices = @transform_0, window_bounds = array<i64: 2, 16, 64>}, {pipeline_mode = #tpu.pipeline_mode<synchronous>, transform_indices = @transform_1, window_bounds = array<i64: 64, 10>}, {pipeline_mode = #tpu.pipeline_mode<synchronous>, transform_indices = @transform_2, window_bounds = array<i64: 1, 10>}, {pipeline_mode = #tpu.pipeline_mode<synchronous>, transform_indices = @transform_3, window_bounds = array<i64: 2, 10>}]} {
    %c0 = arith.constant 0 : index
    %c0_0 = arith.constant 0 : index
    %c0_1 = arith.constant 0 : index
    %0 = vector.load %arg1[%c0, %c0_0, %c0_1] : memref<2x16x64xf32, #tpu.memory_space<vmem>>, vector<2x16x64xf32>
    %cst = arith.constant dense<0.000000e+00> : vector<2x64xf32>
    %1 = vector.multi_reduction <add>, %0, %cst [1] : vector<2x16x64xf32> to vector<2x64xf32>
    %cst_2 = arith.constant 6.250000e-02 : f32
    %2 = vector.broadcast %cst_2 : f32 to vector<2x64xf32>
    %3 = arith.mulf %1, %2 : vector<2x64xf32>
    %c0_3 = arith.constant 0 : index
    %c0_4 = arith.constant 0 : index
    %4 = vector.load %arg2[%c0_3, %c0_4] : memref<64x10xf32, #tpu.memory_space<vmem>>, vector<64x10xf32>
    %cst_5 = arith.constant dense<0.000000e+00> : vector<2x10xf32>
    %5 = tpu.matmul %3, %4, %cst_5 {dimension_numbers = #tpu.dot_dimension_numbers<[1], [0], [0], [1], [0, 0, 1, 1], [], []>} : vector<2x64xf32>, vector<64x10xf32>, vector<2x10xf32> -> vector<2x10xf32>
    %c0_6 = arith.constant 0 : index
    %c0_7 = arith.constant 0 : index
    %6 = vector.load %arg3[%c0_6, %c0_7] : memref<1x10xf32, #tpu.memory_space<vmem>>, vector<1x10xf32>
    %7 = vector.broadcast %6 : vector<1x10xf32> to vector<2x10xf32>
    %8 = arith.addf %5, %7 : vector<2x10xf32>
    %c0_8 = arith.constant 0 : index
    %c0_9 = arith.constant 0 : index
    %9 = vector.load %arg4[%c0_8, %c0_9] : memref<2x10xf32, #tpu.memory_space<vmem>>, vector<2x10xf32>
    tpu.vector_store %arg4[%c0_8, %c0_9], %8 {strides = array<i32>} : memref<2x10xf32, #tpu.memory_space<vmem>>, vector<2x10xf32>,
    return
  }
  func.func @transform_0(%arg0: i32) -> (i32, i32, i32) {
    %c0_i32 = arith.constant 0 : i32
    %c0_i32_0 = arith.constant 0 : i32
    %c0_i32_1 = arith.constant 0 : i32
    %c0_i32_2 = arith.constant 0 : i32
    return %c0_i32, %c0_i32_0, %c0_i32_1 : i32, i32, i32
  }
  func.func @transform_1(%arg0: i32) -> (i32, i32) {
    %c0_i32 = arith.constant 0 : i32
    %c0_i32_0 = arith.constant 0 : i32
    %c0_i32_1 = arith.constant 0 : i32
    return %c0_i32, %c0_i32_0 : i32, i32
  }
  func.func @transform_2(%arg0: i32) -> (i32, i32) {
    %c0_i32 = arith.constant 0 : i32
    %c0_i32_0 = arith.constant 0 : i32
    %c0_i32_1 = arith.constant 0 : i32
    return %c0_i32, %c0_i32_0 : i32, i32
  }
  func.func @transform_3(%arg0: i32) -> (i32, i32) {
    %c0_i32 = arith.constant 0 : i32
    %c0_i32_0 = arith.constant 0 : i32
    %c0_i32_1 = arith.constant 0 : i32
    return %c0_i32, %c0_i32_0 : i32, i32
  }
}

</mosaic_0001>

<bundles_post_ra>
// kernel: forward.29
= control target key start
LH: loop header
LB: loop body
LE: loop exit
PB: predicated region body
PF: predicated region fallthrough
CT: control target
= control target key end

     0   :  { %s783_s15 = smov 0   ;;  %s1003_s0 = inlined_call_operand.vmem [shape: f32[512,27], index: 0, kind: input, shape index: {}]   ;;  %s1004_s1 = inlined_call_operand.vmem [shape: bf16[27,16], index: 1, kind: input, shape index: {}]   ;;  %s1005_s2 = inlined_call_operand.vmem [shape: f32[1,16], index: 2, kind: input, shape index: {}]   ;;  %s1006_s3 = inlined_call_operand.vmem [shape: f32[1,16], index: 3, kind: input, shape index: {}]   ;;  %s1007_s4 = inlined_call_operand.vmem [shape: f32[512,16], index: 4, kind: output, shape index: {}]  }
   0x1 LB: > { %s649_s16 = sadd.s32 4294967295, %s755_s15   ;;  %p653_p0 = scmp.ge.s32.totalorder %s755_s15, 1  ;;  %s755_s15 = sphi %s783_s15, %s14_s15  }
   0x2   : > { %p163_p1 = scmp.lt.s32.totalorder %s755_s15, 3 }
   0x4   : > { %p164_p2 = pnand %p653_p0, %p163_p1 }
   0x5   : > { %v747_v0 = vld [vmem:[%s1004_s1] sm:$0xff] (!%p164_p2)   ;;  %vm314_vm0 = vcmask (!%p164_p2), 1044480   ;;  %v748_v1 = vld [vmem:[%s1004_s1 + $0x8] sm:$0x3f] (!%p164_p2)   ;;  %vm315_vm1 = vcmask (!%p164_p2), 1045504   ;;  %s654_s21 = sshll.u32 (!%p164_p2), %s649_s16, 5 }
   0x6   : > { %167 = sbr.rel (%p164_p2) target bundleno = 265 (0x109), region = 36  ;;  %698 = vmatprep.subr.bf16.mxu0 (!%p164_p2), %v747_v0  ;;  %734 = vmatprep.subr.bf16.mxu1 (!%p164_p2), %v747_v0  ;;  %v757_v2 = vmov (!%p164_p2), 65535   ;;  %p190_p3 = scmp.lt.s32.totalorder (!%p164_p2), %s654_s21, 63  ;;  %vm265_vm2 = vcmask (!%p164_p2), 220160   ;;  %v858_v54 = vld [vmem:[%s1005_s2] ss:$0 sm:$0xff] (!%p164_p2) }
   0x7   : > { %699 = vmatpush3.bf16.msra.mxu0 (!%p164_p2), %v747_v0  ;;  %736 = vmatpush3.bf16.msra.mxu1 (!%p164_p2), %v747_v0  ;;  %v316_v3 = vsel (!%p164_p2), %vm314_vm0, 4294967295, %v757_v2  ;;  %v863_v56 = vld [vmem:[%s1006_s3] ss:$0 sm:$0xff] (!%p164_p2)  ;;  %vm560_vm3 = vcmask (!%p164_p2), 130048  }
   0x8   : > { %v317_v4 = vsel (!%p164_p2), %vm315_vm1, %v316_v3, 0 }
   0x9   : > { %v319_v5 = vand.u32 (!%p164_p2), %v748_v1, %v317_v4 }
   0xb   : > { %700 = vmatprep.subr.bf16.mxu0 (!%p164_p2), %v319_v5  ;;  %735 = vmatprep.subr.bf16.mxu1 (!%p164_p2), %v319_v5 }
   0xc   : > { %701 = vmatpush3.bf16.msra.mxu0 (!%p164_p2), %v319_v5  ;;  %737 = vmatpush3.bf16.msra.mxu1 (!%p164_p2), %v319_v5 }
   0xd   : > { %s1009_s21 = smov (!%p190_p3, %s654_s21), 63 }
   0xe   : > { %s655_s22 = sshll.u32 %s1009_s21, 3 }
   0xf   : > { %s805_s25 = scalar_lea.vmem %s1003_s0, %s655_s22  ;;  %s871_s6 = scalar_lea.vmem %s1007_s4, %s655_s22 }
  0x10   : > { %v202_v6 = vld [vmem:[%s805_s25] sm:$0xff]  ;;  %v203_v7 = vld [vmem:[%s805_s25 + $0x8] sm:$0xff]  ;;  %v204_v11 = vld [vmem:[%s805_s25 + $0x10] sm:$0xff] }
  0x11   : > { %v218_v8 = vld [vmem:[%s805_s25 + $0x80] sm:$0xff]  ;;  %v234_v9 = vpack.c.bf16 %v203_v7, %v202_v6  ;;  %v219_v10 = vld [vmem:[%s805_s25 + $0x88] sm:$0xff]  ;;  %v205_v12 = vld [vmem:[%s805_s25 + $0x18] sm:$0xff] }
  0x12   : > { %v242_v13 = vpack.c.bf16 %v219_v10, %v218_v8  ;;  %v235_v14 = vpack.c.bf16 %v205_v12, %v204_v11  ;;  %v220_v15 = vld [vmem:[%s805_s25 + $0x90] sm:$0xff]  ;;  %v221_v16 = vld [vmem:[%s805_s25 + $0x98] sm:$0xff]  ;;  %v206_v17 = vld [vmem:[%s805_s25 + $0x20] sm:$0xff] }
  0x13   : > { %702 = vmatprep.mubr.msk.bf16.mxu0 %vm265_vm2, %v234_v9  ;;  %v243_v18 = vpack.c.bf16 %v221_v16, %v220_v15  ;;  %v207_v19 = vld [vmem:[%s805_s25 + $0x28] sm:$0xff]  ;;  %v222_v20 = vld [vmem:[%s805_s25 + $0xa0] sm:$0xff]  ;;  %v208_v24 = vld [vmem:[%s805_s25 + $0x30] sm:$0xff] }
  0x14   : > { %v223_v21 = vld [vmem:[%s805_s25 + $0xa8] sm:$0xff]  ;;  %718 = vmatprep.mubr.msk.bf16.mxu1 %vm265_vm2, %v242_v13  ;;  %703 = vmatmul.mubr.msk.bf16.vlgmr.msra.gmra.mrb[0].mxu0 %vm265_vm2, %v235_v14  ;;  %v236_v22 = vpack.c.bf16 %v207_v19, %v206_v17  ;;  %v209_v25 = vld [vmem:[%s805_s25 + $0x38] sm:$0xff]  ;;  %v224_v26 = vld [vmem:[%s805_s25 + $0xb0] sm:$0xff] }
  0x15   : > { %v244_v23 = vpack.c.bf16 %v223_v21, %v222_v20  ;;  %719 = vmatmul.mubr.msk.bf16.vlgmr.msra.gmra.mrb[0].mxu1 %vm265_vm2, %v243_v18  ;;  %v225_v27 = vld [vmem:[%s805_s25 + $0xb8] sm:$0xff]  ;;  %v210_v28 = vld [vmem:[%s805_s25 + $0x40] sm:$0xff]  ;;  %v211_v29 = vld [vmem:[%s805_s25 + $0x48] sm:$0xff]  ;;  %v237_v32 = vpack.c.bf16 %v209_v25, %v208_v24 }
  0x16   : > { %706 = vmatprep.mubr.msk.bf16.mxu0 %vm265_vm2, %v236_v22  ;;  %v226_v30 = vld [vmem:[%s805_s25 + $0xc0] sm:$0xff]  ;;  %v227_v31 = vld [vmem:[%s805_s25 + $0xc8] sm:$0xff]  ;;  %v245_v33 = vpack.c.bf16 %v225_v27, %v224_v26  ;;  %v238_v34 = vpack.c.bf16 %v211_v29, %v210_v28  ;;  %v212_v36 = vld [vmem:[%s805_s25 + $0x50] sm:$0xff] }
  0x17   : > { %722 = vmatprep.mubr.msk.bf16.mxu1 %vm265_vm2, %v244_v23  ;;  %v246_v35 = vpack.c.bf16 %v227_v31, %v226_v30  ;;  %v213_v37 = vld [vmem:[%s805_s25 + $0x58] sm:$0xff]  ;;  %v228_v38 = vld [vmem:[%s805_s25 + $0xd0] sm:$0xff]  ;;  %v214_v40 = vld [vmem:[%s805_s25 + $0x60] sm:$0xff] }
  0x18   : > { %v229_v39 = vld [vmem:[%s805_s25 + $0xd8] sm:$0xff]  ;;  %v215_v41 = vld [vmem:[%s805_s25 + $0x68] sm:$0xff]  ;;  %v230_v42 = vld [vmem:[%s805_s25 + $0xe0] sm:$0xff]  ;;  %v239_v44 = vpack.c.bf16 %v213_v37, %v212_v36 }
  0x19   : > { %v231_v43 = vld [vmem:[%s805_s25 + $0xe8] sm:$0xff]  ;;  %v247_v45 = vpack.c.bf16 %v229_v39, %v228_v38  ;;  %v240_v46 = vpack.c.bf16 %v215_v41, %v214_v40  ;;  %v216_v48 = vld [vmem:[%s805_s25 + $0x70] sm:$0xff]  ;;  %v217_v49 = vld [vmem:[%s805_s25 + $0x78] sm:$0xff] }
  0x1a   : > { %v248_v47 = vpack.c.bf16 %v231_v43, %v230_v42  ;;  %v232_v50 = vld [vmem:[%s805_s25 + $0xf0] sm:$0xff]  ;;  %v233_v51 = vld [vmem:[%s805_s25 + $0xf8] sm:$0xff]  ;;  %v241_v52 = vpack.c.bf16 %v217_v49, %v216_v48 }
  0x1b   : > { %v249_v53 = vpack.c.bf16 %v233_v51, %v232_v50 }
  0x1c   : > { %707 = vmatmul.mubr.msk.bf16.gmra.mrb[4].mxu0 %vm265_vm2, %v237_v32 }
  0x1d   : > { %723 = vmatmul.mubr.msk.bf16.gmra.mrb[4].mxu1 %vm265_vm2, %v245_v33  ;;  %710 = vmatprep.mubr.msk.bf16.mxu0 %vm265_vm2, %v238_v34 }
  0x1e   : > { %726 = vmatprep.mubr.msk.bf16.mxu1 %vm265_vm2, %v246_v35 }
  0x24   : > { %711 = vmatmul.mubr.msk.bf16.gmra.mrb[8].mxu0 %vm265_vm2, %v239_v44 }
  0x25   : > { %727 = vmatmul.mubr.msk.bf16.gmra.mrb[8].mxu1 %vm265_vm2, %v247_v45  ;;  %714 = vmatprep.mubr.msk.bf16.mxu0 %vm265_vm2, %v240_v46 }
  0x26   : > { %730 = vmatprep.mubr.msk.bf16.mxu1 %vm265_vm2, %v248_v47 }
  0x2c   : > { %715 = vmatmul.mubr.msk.bf16.gmra.mrb[12].mxu0 %vm265_vm2, %v241_v52 }
  0x2d   : > { %731 = vmatmul.mubr.msk.bf16.gmra.mrb[12].mxu1 %vm265_vm2, %v249_v53 }
  0xe7   : > { %v704_v55 = vpop.f32.mrb[0].mxu0 }
  0xe8   : > { %v491_v57 = vmul.f32 %v704_v55, %v858_v54  ;;  %v720_v58 = vpop.f32.mrb[0].mxu1  ;;  %v355_v59 = vpop.f32.mrb[1].mxu0 }
  0xe9   : > { %v507_v60 = vmul.f32 %v720_v58, %v858_v54  ;;  %v489_v61 = vmul.f32 %v858_v54, %v355_v59  ;;  %v419_v62 = vpop.f32.mrb[1].mxu1  ;;  %v705_v63 = vpop.f32.mrb[2].mxu0 }
  0xea   : > { %v530_v0 = vadd.f32 %v863_v56, %v491_v57  ;;  %v505_v1 = vmul.f32 %v858_v54, %v419_v62  ;;  %v492_v2 = vmul.f32 %v705_v63, %v858_v54  ;;  %v721_v3 = vpop.f32.mrb[2].mxu1  ;;  %v358_v4 = vpop.f32.mrb[3].mxu0 }
  0xeb   : > { %v546_v5 = vadd.f32 %v863_v56, %v507_v60  ;;  %v528_v6 = vadd.f32 %v863_v56, %v489_v61  ;;  %v508_v7 = vmul.f32 %v721_v3, %v858_v54  ;;  %v490_v8 = vmul.f32 %v858_v54, %v358_v4  ;;  %v422_v9 = vpop.f32.mrb[3].mxu1 }
  0xec   : > { %563 = vst.msk [vmem:[%s871_s6 + $0x10] sm:$0xff] %vm560_vm3, %v530_v0  ;;  %v544_v10 = vadd.f32 %v863_v56, %v505_v1  ;;  %v531_v11 = vadd.f32 %v863_v56, %v492_v2  ;;  %v506_v12 = vmul.f32 %v858_v54, %v422_v9 }
  0xed   : > { %579 = vst.msk [vmem:[%s871_s6 + $0x90] sm:$0xff] %vm560_vm3, %v546_v5  ;;  %561 = vst.msk [vmem:[%s871_s6] sm:$0xff] %vm560_vm3, %v528_v6  ;;  %v547_v13 = vadd.f32 %v863_v56, %v508_v7  ;;  %v529_v14 = vadd.f32 %v863_v56, %v490_v8 }
  0xee   : > { %577 = vst.msk [vmem:[%s871_s6 + $0x80] sm:$0xff] %vm560_vm3, %v544_v10  ;;  %564 = vst.msk [vmem:[%s871_s6 + $0x18] sm:$0xff] %vm560_vm3, %v531_v11  ;;  %v545_v15 = vadd.f32 %v863_v56, %v506_v12 }
  0xef   : > { %580 = vst.msk [vmem:[%s871_s6 + $0x98] sm:$0xff] %vm560_vm3, %v547_v13  ;;  %562 = vst.msk [vmem:[%s871_s6 + $0x8] sm:$0xff] %vm560_vm3, %v529_v14  ;;  %v708_v16 = vpop.f32.mrb[4].mxu0 }
  0xf0   : > { %578 = vst.msk [vmem:[%s871_s6 + $0x88] sm:$0xff] %vm560_vm3, %v545_v15  ;;  %v495_v17 = vmul.f32 %v708_v16, %v858_v54  ;;  %v724_v18 = vpop.f32.mrb[4].mxu1  ;;  %v371_v19 = vpop.f32.mrb[5].mxu0 }
  0xf1   : > { %v511_v20 = vmul.f32 %v724_v18, %v858_v54  ;;  %v493_v21 = vmul.f32 %v858_v54, %v371_v19  ;;  %v435_v22 = vpop.f32.mrb[5].mxu1  ;;  %v709_v23 = vpop.f32.mrb[6].mxu0 }
  0xf2   : > { %v534_v24 = vadd.f32 %v863_v56, %v495_v17  ;;  %v509_v25 = vmul.f32 %v858_v54, %v435_v22  ;;  %v496_v26 = vmul.f32 %v709_v23, %v858_v54  ;;  %v725_v27 = vpop.f32.mrb[6].mxu1  ;;  %v374_v28 = vpop.f32.mrb[7].mxu0 }
  0xf3   : > { %v550_v29 = vadd.f32 %v863_v56, %v511_v20  ;;  %v532_v30 = vadd.f32 %v863_v56, %v493_v21  ;;  %v512_v31 = vmul.f32 %v725_v27, %v858_v54  ;;  %v494_v32 = vmul.f32 %v858_v54, %v374_v28  ;;  %v438_v33 = vpop.f32.mrb[7].mxu1 }
  0xf4   : > { %567 = vst.msk [vmem:[%s871_s6 + $0x30] sm:$0xff] %vm560_vm3, %v534_v24  ;;  %v548_v34 = vadd.f32 %v863_v56, %v509_v25  ;;  %v535_v35 = vadd.f32 %v863_v56, %v496_v26  ;;  %v510_v36 = vmul.f32 %v858_v54, %v438_v33 }
  0xf5   : > { %583 = vst.msk [vmem:[%s871_s6 + $0xb0] sm:$0xff] %vm560_vm3, %v550_v29  ;;  %565 = vst.msk [vmem:[%s871_s6 + $0x20] sm:$0xff] %vm560_vm3, %v532_v30  ;;  %v551_v37 = vadd.f32 %v863_v56, %v512_v31  ;;  %v533_v38 = vadd.f32 %v863_v56, %v494_v32 }
  0xf6   : > { %581 = vst.msk [vmem:[%s871_s6 + $0xa0] sm:$0xff] %vm560_vm3, %v548_v34  ;;  %568 = vst.msk [vmem:[%s871_s6 + $0x38] sm:$0xff] %vm560_vm3, %v535_v35  ;;  %v549_v39 = vadd.f32 %v863_v56, %v510_v36 }
  0xf7   : > { %584 = vst.msk [vmem:[%s871_s6 + $0xb8] sm:$0xff] %vm560_vm3, %v551_v37  ;;  %566 = vst.msk [vmem:[%s871_s6 + $0x28] sm:$0xff] %vm560_vm3, %v533_v38  ;;  %v712_v40 = vpop.f32.mrb[8].mxu0 }
  0xf8   : > { %582 = vst.msk [vmem:[%s871_s6 + $0xa8] sm:$0xff] %vm560_vm3, %v549_v39  ;;  %v499_v41 = vmul.f32 %v712_v40, %v858_v54  ;;  %v728_v42 = vpop.f32.mrb[8].mxu1  ;;  %v387_v43 = vpop.f32.mrb[9].mxu0 }
  0xf9   : > { %v515_v44 = vmul.f32 %v728_v42, %v858_v54  ;;  %v497_v45 = vmul.f32 %v858_v54, %v387_v43  ;;  %v451_v46 = vpop.f32.mrb[9].mxu1  ;;  %v713_v47 = vpop.f32.mrb[10].mxu0 }
  0xfa   : > { %v538_v48 = vadd.f32 %v863_v56, %v499_v41  ;;  %v513_v49 = vmul.f32 %v858_v54, %v451_v46  ;;  %v500_v50 = vmul.f32 %v713_v47, %v858_v54  ;;  %v729_v51 = vpop.f32.mrb[10].mxu1  ;;  %v390_v52 = vpop.f32.mrb[11].mxu0 }
  0xfb   : > { %v554_v53 = vadd.f32 %v863_v56, %v515_v44  ;;  %v536_v55 = vadd.f32 %v863_v56, %v497_v45  ;;  %v516_v57 = vmul.f32 %v729_v51, %v858_v54  ;;  %v498_v58 = vmul.f32 %v858_v54, %v390_v52  ;;  %v454_v59 = vpop.f32.mrb[11].mxu1 }
  0xfc   : > { %571 = vst.msk [vmem:[%s871_s6 + $0x50] sm:$0xff] %vm560_vm3, %v538_v48  ;;  %v552_v60 = vadd.f32 %v863_v56, %v513_v49  ;;  %v539_v61 = vadd.f32 %v863_v56, %v500_v50  ;;  %v514_v62 = vmul.f32 %v858_v54, %v454_v59 }
  0xfd   : > { %587 = vst.msk [vmem:[%s871_s6 + $0xd0] sm:$0xff] %vm560_vm3, %v554_v53  ;;  %569 = vst.msk [vmem:[%s871_s6 + $0x40] sm:$0xff] %vm560_vm3, %v536_v55  ;;  %v555_v63 = vadd.f32 %v863_v56, %v516_v57  ;;  %v537_v0 = vadd.f32 %v863_v56, %v498_v58 }
  0xfe   : > { %585 = vst.msk [vmem:[%s871_s6 + $0xc0] sm:$0xff] %vm560_vm3, %v552_v60  ;;  %572 = vst.msk [vmem:[%s871_s6 + $0x58] sm:$0xff] %vm560_vm3, %v539_v61  ;;  %v553_v1 = vadd.f32 %v863_v56, %v514_v62 }
  0xff   : > { %588 = vst.msk [vmem:[%s871_s6 + $0xd8] sm:$0xff] %vm560_vm3, %v555_v63  ;;  %570 = vst.msk [vmem:[%s871_s6 + $0x48] sm:$0xff] %vm560_vm3, %v537_v0  ;;  %v716_v2 = vpop.f32.mrb[12].mxu0 }
 0x100   : > { %586 = vst.msk [vmem:[%s871_s6 + $0xc8] sm:$0xff] %vm560_vm3, %v553_v1  ;;  %v503_v3 = vmul.f32 %v716_v2, %v858_v54  ;;  %v732_v4 = vpop.f32.mrb[12].mxu1  ;;  %v403_v5 = vpop.f32.mrb[13].mxu0 }
 0x101   : > { %v519_v6 = vmul.f32 %v732_v4, %v858_v54  ;;  %v501_v7 = vmul.f32 %v858_v54, %v403_v5  ;;  %v467_v8 = vpop.f32.mrb[13].mxu1  ;;  %v717_v9 = vpop.f32.mrb[14].mxu0 }
 0x102   : > { %v542_v10 = vadd.f32 %v863_v56, %v503_v3  ;;  %v517_v11 = vmul.f32 %v858_v54, %v467_v8  ;;  %v504_v12 = vmul.f32 %v717_v9, %v858_v54  ;;  %v733_v13 = vpop.f32.mrb[14].mxu1  ;;  %v406_v14 = vpop.f32.mrb[15].mxu0 }
 0x103   : > { %v558_v15 = vadd.f32 %v863_v56, %v519_v6  ;;  %v540_v16 = vadd.f32 %v863_v56, %v501_v7  ;;  %v520_v17 = vmul.f32 %v733_v13, %v858_v54  ;;  %v502_v18 = vmul.f32 %v858_v54, %v406_v14  ;;  %v470_v19 = vpop.f32.mrb[15].mxu1 }
 0x104   : > { %575 = vst.msk [vmem:[%s871_s6 + $0x70] sm:$0xff] %vm560_vm3, %v542_v10  ;;  %v556_v20 = vadd.f32 %v863_v56, %v517_v11  ;;  %v543_v21 = vadd.f32 %v863_v56, %v504_v12  ;;  %v518_v22 = vmul.f32 %v858_v54, %v470_v19 }
 0x105   : > { %591 = vst.msk [vmem:[%s871_s6 + $0xf0] sm:$0xff] %vm560_vm3, %v558_v15  ;;  %573 = vst.msk [vmem:[%s871_s6 + $0x60] sm:$0xff] %vm560_vm3, %v540_v16  ;;  %v559_v23 = vadd.f32 %v863_v56, %v520_v17  ;;  %v541_v24 = vadd.f32 %v863_v56, %v502_v18 }
 0x106   : > { %589 = vst.msk [vmem:[%s871_s6 + $0xe0] sm:$0xff] %vm560_vm3, %v556_v20  ;;  %576 = vst.msk [vmem:[%s871_s6 + $0x78] sm:$0xff] %vm560_vm3, %v543_v21  ;;  %v557_v25 = vadd.f32 %v863_v56, %v518_v22 }
 0x107   : > { %592 = vst.msk [vmem:[%s871_s6 + $0xf8] sm:$0xff] %vm560_vm3, %v559_v23  ;;  %574 = vst.msk [vmem:[%s871_s6 + $0x68] sm:$0xff] %vm560_vm3, %v541_v24 }
 0x108   : > { %590 = vst.msk [vmem:[%s871_s6 + $0xe8] sm:$0xff] %vm560_vm3, %v557_v25 }
 0x109 PF: > { %s14_s15 = sadd.s32 1, %s755_s15  }
 0x10a   : > { %p11_p4 = scmp.ge.s32.totalorder %s14_s15, 4  }
 0x10c   :  { %13 = sbr.rel (!%p11_p4) target bundleno = 1 (0x1), region = 66 }

// kernel: forward.30
= control target key start
LH: loop header
LB: loop body
LE: loop exit
PB: predicated region body
PF: predicated region fallthrough
CT: control target
= control target key end

     0   :  { %s791_s15 = smov 0   ;;  %s1008_s0 = inlined_call_operand.vmem [shape: f32[512,16], index: 0, kind: input, shape index: {}]   ;;  %s1009_s1 = inlined_call_operand.vmem [shape: bf16[16,16], index: 1, kind: input, shape index: {}]   ;;  %s1010_s2 = inlined_call_operand.vmem [shape: f32[1,16], index: 2, kind: input, shape index: {}]   ;;  %s1011_s3 = inlined_call_operand.vmem [shape: f32[1,16], index: 3, kind: input, shape index: {}]   ;;  %s1012_s4 = inlined_call_operand.vmem [shape: f32[512,16], index: 4, kind: output, shape index: {}]  }
   0x1 LB: > { %s666_s16 = sadd.s32 4294967295, %s764_s15   ;;  %p670_p0 = scmp.ge.s32.totalorder %s764_s15, 1  ;;  %s764_s15 = sphi %s791_s15, %s14_s15  }
   0x2   : > { %p163_p1 = scmp.lt.s32.totalorder %s764_s15, 3 }
   0x4   : > { %p164_p2 = pnand %p670_p0, %p163_p1 }
   0x5   : > { %v757_v0 = vld [vmem:[%s1009_s1] sm:$0xff] (!%p164_p2)   ;;  %s671_s19 = sshll.u32 (!%p164_p2), %s666_s16, 5  ;;  %vm290_vm0 = vcmask (!%p164_p2), 130048  }
   0x6   : > { %167 = sbr.rel (%p164_p2) target bundleno = 267 (0x10b), region = 36  ;;  %p190_p3 = scmp.lt.s32.totalorder (!%p164_p2), %s671_s19, 63  ;;  %713 = vmatprep.subr.bf16.mxu0 (!%p164_p2), %v757_v0  ;;  %747 = vmatprep.subr.bf16.mxu1 (!%p164_p2), %v757_v0 }
   0x7   : > { %714 = vmatpush3.bf16.msra.mxu0 (!%p164_p2), %v757_v0  ;;  %748 = vmatpush3.bf16.msra.mxu1 (!%p164_p2), %v757_v0 }
   0xd   : > { %s1014_s19 = smov (!%p190_p3, %s671_s19), 63 }
   0xe   : > { %s672_s20 = sshll.u32 %s1014_s19, 3 }
   0xf   : > { %s810_s23 = scalar_lea.vmem %s1008_s0, %s672_s20  ;;  %s876_s30 = scalar_lea.vmem %s1012_s4, %s672_s20 }
  0x10   : > { %v202_v1 = vld [vmem:[%s810_s23] sm:$0xff]  ;;  %v203_v2 = vld [vmem:[%s810_s23 + $0x8] sm:$0xff]  ;;  %v204_v8 = vld [vmem:[%s810_s23 + $0x10] sm:$0xff] }
  0x11   : > { %v218_v3 = vld [vmem:[%s810_s23 + $0x80] sm:$0xff]  ;;  %v234_v4 = vmax.f32 %v202_v1, 0.0  ;;  %v235_v5 = vmax.f32 %v203_v2, 0.0  ;;  %v219_v6 = vld [vmem:[%s810_s23 + $0x88] sm:$0xff]  ;;  %v205_v9 = vld [vmem:[%s810_s23 + $0x18] sm:$0xff]  ;;  %v236_v11 = vmax.f32 %v204_v8, 0.0 }
  0x12   : > { %v250_v7 = vmax.f32 %v218_v3, 0.0  ;;  %v251_v10 = vmax.f32 %v219_v6, 0.0  ;;  %v237_v12 = vmax.f32 %v205_v9, 0.0  ;;  %v220_v13 = vld [vmem:[%s810_s23 + $0x90] sm:$0xff]  ;;  %v221_v14 = vld [vmem:[%s810_s23 + $0x98] sm:$0xff]  ;;  %v206_v15 = vld [vmem:[%s810_s23 + $0x20] sm:$0xff] }
  0x13   : > { %v266_v16 = vpack.c.bf16 %v235_v5, %v234_v4  ;;  %v252_v17 = vmax.f32 %v220_v13, 0.0  ;;  %v253_v18 = vmax.f32 %v221_v14, 0.0  ;;  %v207_v19 = vld [vmem:[%s810_s23 + $0x28] sm:$0xff]  ;;  %v238_v20 = vmax.f32 %v206_v15, 0.0  ;;  %v222_v21 = vld [vmem:[%s810_s23 + $0xa0] sm:$0xff]  ;;  %v208_v27 = vld [vmem:[%s810_s23 + $0x30] sm:$0xff] }
  0x14   : > { %v223_v22 = vld [vmem:[%s810_s23 + $0xa8] sm:$0xff]  ;;  %v274_v23 = vpack.c.bf16 %v251_v10, %v250_v7  ;;  %v267_v24 = vpack.c.bf16 %v237_v12, %v236_v11  ;;  %v239_v25 = vmax.f32 %v207_v19, 0.0  ;;  %v254_v26 = vmax.f32 %v222_v21, 0.0  ;;  %v209_v28 = vld [vmem:[%s810_s23 + $0x38] sm:$0xff]  ;;  %v224_v29 = vld [vmem:[%s810_s23 + $0xb0] sm:$0xff] }
  0x15   : > { %715 = vmatprep.mubr.msk.bf16.mxu0 %vm290_vm0, %v266_v16  ;;  %v275_v30 = vpack.c.bf16 %v253_v18, %v252_v17  ;;  %v255_v31 = vmax.f32 %v223_v22, 0.0  ;;  %v225_v32 = vld [vmem:[%s810_s23 + $0xb8] sm:$0xff]  ;;  %v210_v33 = vld [vmem:[%s810_s23 + $0x40] sm:$0xff]  ;;  %v211_v34 = vld [vmem:[%s810_s23 + $0x48] sm:$0xff]  ;;  %v240_v36 = vmax.f32 %v208_v27, 0.0  ;;  %v241_v37 = vmax.f32 %v209_v28, 0.0 }
  0x16   : > { %731 = vmatprep.mubr.msk.bf16.mxu1 %vm290_vm0, %v274_v23  ;;  %716 = vmatmul.mubr.msk.bf16.vlgmr.msra.gmra.mrb[0].mxu0 %vm290_vm0, %v267_v24  ;;  %v268_v35 = vpack.c.bf16 %v239_v25, %v238_v20  ;;  %v256_v38 = vmax.f32 %v224_v29, 0.0  ;;  %v226_v39 = vld [vmem:[%s810_s23 + $0xc0] sm:$0xff]  ;;  %v227_v40 = vld [vmem:[%s810_s23 + $0xc8] sm:$0xff]  ;;  %v257_v42 = vmax.f32 %v225_v32, 0.0  ;;  %v242_v43 = vmax.f32 %v210_v33, 0.0  ;;  %v212_v50 = vld [vmem:[%s810_s23 + $0x50] sm:$0xff] }
  0x17   : > { %732 = vmatmul.mubr.msk.bf16.vlgmr.msra.gmra.mrb[0].mxu1 %vm290_vm0, %v275_v30  ;;  %v276_v41 = vpack.c.bf16 %v255_v31, %v254_v26  ;;  %v243_v44 = vmax.f32 %v211_v34, 0.0  ;;  %v258_v45 = vmax.f32 %v226_v39, 0.0  ;;  %v259_v46 = vmax.f32 %v227_v40, 0.0  ;;  %v213_v51 = vld [vmem:[%s810_s23 + $0x58] sm:$0xff]  ;;  %v228_v52 = vld [vmem:[%s810_s23 + $0xd0] sm:$0xff]  ;;  %v214_v55 = vld [vmem:[%s810_s23 + $0x60] sm:$0xff] }
  0x18   : > { %719 = vmatprep.mubr.msk.bf16.mxu0 %vm290_vm0, %v268_v35  ;;  %v269_v47 = vpack.c.bf16 %v241_v37, %v240_v36  ;;  %v277_v48 = vpack.c.bf16 %v257_v42, %v256_v38  ;;  %v229_v54 = vld [vmem:[%s810_s23 + $0xd8] sm:$0xff]  ;;  %v215_v56 = vld [vmem:[%s810_s23 + $0x68] sm:$0xff]  ;;  %v230_v57 = vld [vmem:[%s810_s23 + $0xe0] sm:$0xff]  ;;  %v244_v59 = vmax.f32 %v212_v50, 0.0  ;;  %v245_v60 = vmax.f32 %v213_v51, 0.0 }
  0x19   : > { %735 = vmatprep.mubr.msk.bf16.mxu1 %vm290_vm0, %v276_v41  ;;  %v270_v49 = vpack.c.bf16 %v243_v44, %v242_v43  ;;  %v278_v53 = vpack.c.bf16 %v259_v46, %v258_v45  ;;  %v231_v58 = vld [vmem:[%s810_s23 + $0xe8] sm:$0xff]  ;;  %v260_v61 = vmax.f32 %v228_v52, 0.0  ;;  %v261_v62 = vmax.f32 %v229_v54, 0.0  ;;  %v216_v6 = vld [vmem:[%s810_s23 + $0x70] sm:$0xff]  ;;  %v217_v7 = vld [vmem:[%s810_s23 + $0x78] sm:$0xff] }
  0x1a   : > { %v246_v63 = vmax.f32 %v214_v55, 0.0  ;;  %v247_v0 = vmax.f32 %v215_v56, 0.0  ;;  %v262_v1 = vmax.f32 %v230_v57, 0.0  ;;  %v263_v2 = vmax.f32 %v231_v58, 0.0  ;;  %v232_v9 = vld [vmem:[%s810_s23 + $0xf0] sm:$0xff]  ;;  %v233_v10 = vld [vmem:[%s810_s23 + $0xf8] sm:$0xff] }
  0x1b   : > { %v271_v3 = vpack.c.bf16 %v245_v60, %v244_v59  ;;  %v279_v4 = vpack.c.bf16 %v261_v62, %v260_v61  ;;  %v248_v11 = vmax.f32 %v216_v6, 0.0  ;;  %v249_v12 = vmax.f32 %v217_v7, 0.0  ;;  %v863_v17 = vld [vmem:[%s1010_s2] ss:$0 sm:$0xff] }
  0x1c   : > { %v272_v5 = vpack.c.bf16 %v247_v0, %v246_v63  ;;  %v280_v8 = vpack.c.bf16 %v263_v2, %v262_v1  ;;  %v264_v13 = vmax.f32 %v232_v9, 0.0  ;;  %v265_v14 = vmax.f32 %v233_v10, 0.0  ;;  %v868_v19 = vld [vmem:[%s1011_s3] ss:$0 sm:$0xff] }
  0x1d   : > { %v273_v15 = vpack.c.bf16 %v249_v12, %v248_v11 }
  0x1e   : > { %720 = vmatmul.mubr.msk.bf16.gmra.mrb[4].mxu0 %vm290_vm0, %v269_v47  ;;  %v281_v16 = vpack.c.bf16 %v265_v14, %v264_v13 }
  0x1f   : > { %736 = vmatmul.mubr.msk.bf16.gmra.mrb[4].mxu1 %vm290_vm0, %v277_v48  ;;  %723 = vmatprep.mubr.msk.bf16.mxu0 %vm290_vm0, %v270_v49 }
  0x20   : > { %739 = vmatprep.mubr.msk.bf16.mxu1 %vm290_vm0, %v278_v53 }
  0x26   : > { %724 = vmatmul.mubr.msk.bf16.gmra.mrb[8].mxu0 %vm290_vm0, %v271_v3 }
  0x27   : > { %740 = vmatmul.mubr.msk.bf16.gmra.mrb[8].mxu1 %vm290_vm0, %v279_v4  ;;  %727 = vmatprep.mubr.msk.bf16.mxu0 %vm290_vm0, %v272_v5 }
  0x28   : > { %743 = vmatprep.mubr.msk.bf16.mxu1 %vm290_vm0, %v280_v8 }
  0x2e   : > { %728 = vmatmul.mubr.msk.bf16.gmra.mrb[12].mxu0 %vm290_vm0, %v273_v15 }
  0x2f   : > { %744 = vmatmul.mubr.msk.bf16.gmra.mrb[12].mxu1 %vm290_vm0, %v281_v16 }
  0xe9   : > { %v717_v18 = vpop.f32.mrb[0].mxu0 }
  0xea   : > { %v509_v20 = vmul.f32 %v717_v18, %v863_v17  ;;  %v733_v21 = vpop.f32.mrb[0].mxu1  ;;  %v373_v22 = vpop.f32.mrb[1].mxu0 }
  0xeb   : > { %v525_v23 = vmul.f32 %v733_v21, %v863_v17  ;;  %v507_v24 = vmul.f32 %v863_v17, %v373_v22  ;;  %v437_v25 = vpop.f32.mrb[1].mxu1  ;;  %v718_v26 = vpop.f32.mrb[2].mxu0 }
  0xec   : > { %v548_v27 = vadd.f32 %v868_v19, %v509_v20  ;;  %v523_v28 = vmul.f32 %v863_v17, %v437_v25  ;;  %v510_v29 = vmul.f32 %v718_v26, %v863_v17  ;;  %v734_v30 = vpop.f32.mrb[2].mxu1  ;;  %v376_v31 = vpop.f32.mrb[3].mxu0 }
  0xed   : > { %v564_v32 = vadd.f32 %v868_v19, %v525_v23  ;;  %v546_v33 = vadd.f32 %v868_v19, %v507_v24  ;;  %v526_v34 = vmul.f32 %v734_v30, %v863_v17  ;;  %v508_v35 = vmul.f32 %v863_v17, %v376_v31  ;;  %v440_v36 = vpop.f32.mrb[3].mxu1 }
  0xee   : > { %580 = vst.msk [vmem:[%s876_s30 + $0x10] sm:$0xff] %vm290_vm0, %v548_v27  ;;  %v562_v37 = vadd.f32 %v868_v19, %v523_v28  ;;  %v549_v38 = vadd.f32 %v868_v19, %v510_v29  ;;  %v524_v39 = vmul.f32 %v863_v17, %v440_v36 }
  0xef   : > { %596 = vst.msk [vmem:[%s876_s30 + $0x90] sm:$0xff] %vm290_vm0, %v564_v32  ;;  %578 = vst.msk [vmem:[%s876_s30] sm:$0xff] %vm290_vm0, %v546_v33  ;;  %v565_v40 = vadd.f32 %v868_v19, %v526_v34  ;;  %v547_v41 = vadd.f32 %v868_v19, %v508_v35 }
  0xf0   : > { %594 = vst.msk [vmem:[%s876_s30 + $0x80] sm:$0xff] %vm290_vm0, %v562_v37  ;;  %581 = vst.msk [vmem:[%s876_s30 + $0x18] sm:$0xff] %vm290_vm0, %v549_v38  ;;  %v563_v42 = vadd.f32 %v868_v19, %v524_v39 }
  0xf1   : > { %597 = vst.msk [vmem:[%s876_s30 + $0x98] sm:$0xff] %vm290_vm0, %v565_v40  ;;  %579 = vst.msk [vmem:[%s876_s30 + $0x8] sm:$0xff] %vm290_vm0, %v547_v41  ;;  %v721_v43 = vpop.f32.mrb[4].mxu0 }
  0xf2   : > { %595 = vst.msk [vmem:[%s876_s30 + $0x88] sm:$0xff] %vm290_vm0, %v563_v42  ;;  %v513_v44 = vmul.f32 %v721_v43, %v863_v17  ;;  %v737_v45 = vpop.f32.mrb[4].mxu1  ;;  %v389_v46 = vpop.f32.mrb[5].mxu0 }
  0xf3   : > { %v529_v47 = vmul.f32 %v737_v45, %v863_v17  ;;  %v511_v48 = vmul.f32 %v863_v17, %v389_v46  ;;  %v453_v49 = vpop.f32.mrb[5].mxu1  ;;  %v722_v50 = vpop.f32.mrb[6].mxu0 }
  0xf4   : > { %v552_v51 = vadd.f32 %v868_v19, %v513_v44  ;;  %v527_v52 = vmul.f32 %v863_v17, %v453_v49  ;;  %v514_v53 = vmul.f32 %v722_v50, %v863_v17  ;;  %v738_v54 = vpop.f32.mrb[6].mxu1  ;;  %v392_v55 = vpop.f32.mrb[7].mxu0 }
  0xf5   : > { %v568_v56 = vadd.f32 %v868_v19, %v529_v47  ;;  %v550_v57 = vadd.f32 %v868_v19, %v511_v48  ;;  %v530_v58 = vmul.f32 %v738_v54, %v863_v17  ;;  %v512_v59 = vmul.f32 %v863_v17, %v392_v55  ;;  %v456_v60 = vpop.f32.mrb[7].mxu1 }
  0xf6   : > { %584 = vst.msk [vmem:[%s876_s30 + $0x30] sm:$0xff] %vm290_vm0, %v552_v51  ;;  %v566_v61 = vadd.f32 %v868_v19, %v527_v52  ;;  %v553_v62 = vadd.f32 %v868_v19, %v514_v53  ;;  %v528_v63 = vmul.f32 %v863_v17, %v456_v60 }
  0xf7   : > { %600 = vst.msk [vmem:[%s876_s30 + $0xb0] sm:$0xff] %vm290_vm0, %v568_v56  ;;  %582 = vst.msk [vmem:[%s876_s30 + $0x20] sm:$0xff] %vm290_vm0, %v550_v57  ;;  %v569_v0 = vadd.f32 %v868_v19, %v530_v58  ;;  %v551_v1 = vadd.f32 %v868_v19, %v512_v59 }
  0xf8   : > { %598 = vst.msk [vmem:[%s876_s30 + $0xa0] sm:$0xff] %vm290_vm0, %v566_v61  ;;  %585 = vst.msk [vmem:[%s876_s30 + $0x38] sm:$0xff] %vm290_vm0, %v553_v62  ;;  %v567_v2 = vadd.f32 %v868_v19, %v528_v63 }
  0xf9   : > { %601 = vst.msk [vmem:[%s876_s30 + $0xb8] sm:$0xff] %vm290_vm0, %v569_v0  ;;  %583 = vst.msk [vmem:[%s876_s30 + $0x28] sm:$0xff] %vm290_vm0, %v551_v1  ;;  %v725_v3 = vpop.f32.mrb[8].mxu0 }
  0xfa   : > { %599 = vst.msk [vmem:[%s876_s30 + $0xa8] sm:$0xff] %vm290_vm0, %v567_v2  ;;  %v517_v4 = vmul.f32 %v725_v3, %v863_v17  ;;  %v741_v5 = vpop.f32.mrb[8].mxu1  ;;  %v405_v6 = vpop.f32.mrb[9].mxu0 }
  0xfb   : > { %v533_v7 = vmul.f32 %v741_v5, %v863_v17  ;;  %v515_v8 = vmul.f32 %v863_v17, %v405_v6  ;;  %v469_v9 = vpop.f32.mrb[9].mxu1  ;;  %v726_v10 = vpop.f32.mrb[10].mxu0 }
  0xfc   : > { %v556_v11 = vadd.f32 %v868_v19, %v517_v4  ;;  %v531_v12 = vmul.f32 %v863_v17, %v469_v9  ;;  %v518_v13 = vmul.f32 %v726_v10, %v863_v17  ;;  %v742_v14 = vpop.f32.mrb[10].mxu1  ;;  %v408_v15 = vpop.f32.mrb[11].mxu0 }
  0xfd   : > { %v572_v16 = vadd.f32 %v868_v19, %v533_v7  ;;  %v554_v18 = vadd.f32 %v868_v19, %v515_v8  ;;  %v534_v20 = vmul.f32 %v742_v14, %v863_v17  ;;  %v516_v21 = vmul.f32 %v863_v17, %v408_v15  ;;  %v472_v22 = vpop.f32.mrb[11].mxu1 }
  0xfe   : > { %588 = vst.msk [vmem:[%s876_s30 + $0x50] sm:$0xff] %vm290_vm0, %v556_v11  ;;  %v570_v23 = vadd.f32 %v868_v19, %v531_v12  ;;  %v557_v24 = vadd.f32 %v868_v19, %v518_v13  ;;  %v532_v25 = vmul.f32 %v863_v17, %v472_v22 }
  0xff   : > { %604 = vst.msk [vmem:[%s876_s30 + $0xd0] sm:$0xff] %vm290_vm0, %v572_v16  ;;  %586 = vst.msk [vmem:[%s876_s30 + $0x40] sm:$0xff] %vm290_vm0, %v554_v18  ;;  %v573_v26 = vadd.f32 %v868_v19, %v534_v20  ;;  %v555_v27 = vadd.f32 %v868_v19, %v516_v21 }
 0x100   : > { %602 = vst.msk [vmem:[%s876_s30 + $0xc0] sm:$0xff] %vm290_vm0, %v570_v23  ;;  %589 = vst.msk [vmem:[%s876_s30 + $0x58] sm:$0xff] %vm290_vm0, %v557_v24  ;;  %v571_v28 = vadd.f32 %v868_v19, %v532_v25 }
 0x101   : > { %605 = vst.msk [vmem:[%s876_s30 + $0xd8] sm:$0xff] %vm290_vm0, %v573_v26  ;;  %587 = vst.msk [vmem:[%s876_s30 + $0x48] sm:$0xff] %vm290_vm0, %v555_v27  ;;  %v729_v29 = vpop.f32.mrb[12].mxu0 }
 0x102   : > { %603 = vst.msk [vmem:[%s876_s30 + $0xc8] sm:$0xff] %vm290_vm0, %v571_v28  ;;  %v521_v30 = vmul.f32 %v729_v29, %v863_v17  ;;  %v745_v31 = vpop.f32.mrb[12].mxu1  ;;  %v421_v32 = vpop.f32.mrb[13].mxu0 }
 0x103   : > { %v537_v33 = vmul.f32 %v745_v31, %v863_v17  ;;  %v519_v34 = vmul.f32 %v863_v17, %v421_v32  ;;  %v485_v35 = vpop.f32.mrb[13].mxu1  ;;  %v730_v36 = vpop.f32.mrb[14].mxu0 }
 0x104   : > { %v560_v37 = vadd.f32 %v868_v19, %v521_v30  ;;  %v535_v38 = vmul.f32 %v863_v17, %v485_v35  ;;  %v522_v39 = vmul.f32 %v730_v36, %v863_v17  ;;  %v746_v40 = vpop.f32.mrb[14].mxu1  ;;  %v424_v41 = vpop.f32.mrb[15].mxu0 }
 0x105   : > { %v576_v42 = vadd.f32 %v868_v19, %v537_v33  ;;  %v558_v43 = vadd.f32 %v868_v19, %v519_v34  ;;  %v538_v44 = vmul.f32 %v746_v40, %v863_v17  ;;  %v520_v45 = vmul.f32 %v863_v17, %v424_v41  ;;  %v488_v46 = vpop.f32.mrb[15].mxu1 }
 0x106   : > { %592 = vst.msk [vmem:[%s876_s30 + $0x70] sm:$0xff] %vm290_vm0, %v560_v37  ;;  %v574_v47 = vadd.f32 %v868_v19, %v535_v38  ;;  %v561_v48 = vadd.f32 %v868_v19, %v522_v39  ;;  %v536_v49 = vmul.f32 %v863_v17, %v488_v46 }
 0x107   : > { %608 = vst.msk [vmem:[%s876_s30 + $0xf0] sm:$0xff] %vm290_vm0, %v576_v42  ;;  %590 = vst.msk [vmem:[%s876_s30 + $0x60] sm:$0xff] %vm290_vm0, %v558_v43  ;;  %v577_v50 = vadd.f32 %v868_v19, %v538_v44  ;;  %v559_v51 = vadd.f32 %v868_v19, %v520_v45 }
 0x108   : > { %606 = vst.msk [vmem:[%s876_s30 + $0xe0] sm:$0xff] %vm290_vm0, %v574_v47  ;;  %593 = vst.msk [vmem:[%s876_s30 + $0x78] sm:$0xff] %vm290_vm0, %v561_v48  ;;  %v575_v52 = vadd.f32 %v868_v19, %v536_v49 }
 0x109   : > { %609 = vst.msk [vmem:[%s876_s30 + $0xf8] sm:$0xff] %vm290_vm0, %v577_v50  ;;  %591 = vst.msk [vmem:[%s876_s30 + $0x68] sm:$0xff] %vm290_vm0, %v559_v51 }
 0x10a   : > { %607 = vst.msk [vmem:[%s876_s30 + $0xe8] sm:$0xff] %vm290_vm0, %v575_v52 }
 0x10b PF: > { %s14_s15 = sadd.s32 1, %s764_s15  }
 0x10c   : > { %p11_p4 = scmp.ge.s32.totalorder %s14_s15, 4  }
 0x10e   :  { %13 = sbr.rel (!%p11_p4) target bundleno = 1 (0x1), region = 66 }

// kernel: forward.45
= control target key start
LH: loop header
LB: loop body
LE: loop exit
PB: predicated region body
PF: predicated region fallthrough
CT: control target
= control target key end

     0   :  { %s981_s6 = smov 0   ;;  %s1268_s0 = inlined_call_operand.vmem [shape: f32[2,18,18,16], index: 0, kind: input, shape index: {}]   ;;  %s1269_s1 = inlined_call_operand.vmem [shape: f32[2,16,16,16], index: 1, kind: output, shape index: {}]  }
   0x1 LB: > { %s751_s7 = sadd.s32 4294967295, %s969_s6   ;;  %p755_p0 = scmp.ge.s32.totalorder %s969_s6, 1  ;;  %s969_s6 = sphi %s981_s6, %s11_s6  }
   0x2   : > { %p87_p1 = scmp.lt.s32.totalorder %s969_s6, 3 }
   0x4   : > { %p88_p2 = pnand %p755_p0, %p87_p1 }
   0x5   : > { %p107_p3 = scmp.lt.s32.totalorder (!%p88_p2), %s751_s7, 1  ;;  %vm663_vm0 = vcmask (!%p88_p2), 130048  }
   0x6   : > { %91 = sbr.rel (%p88_p2) target bundleno = 91 (0x5b), region = 24 }
   0xd   : > { %s1271_s7 = smov (!%p107_p3, %s751_s7), 1 }
   0xe   : > { %s954_s8 = smul.u32 432, %s1271_s7  ;;  %s953_s12 = sshll.u32 %s1271_s7, 8 }
   0xf   : > { %s1053_s15 = scalar_lea.vmem %s1269_s1, %s953_s12 }
  0x10   : > { %s995_s11 = scalar_lea.vmem %s1268_s0, %s954_s8 }
  0x11   : > { %v117_v0 = vld [vmem:[%s995_s11] sm:$0xff]  ;;  %v759_v4 = vld [vmem:[%s995_s11 + $0x18] sm:$0xff]  ;;  %v855_v7 = vld [vmem:[%s995_s11 + $0x30] sm:$0xff] }
  0x12   : > { %v149_v1 = vld [vmem:[%s995_s11 + $0x1] sm:$0xff]  ;;  %v791_v5 = vld [vmem:[%s995_s11 + $0x19] sm:$0xff]  ;;  %v1005_v8 = vld [vmem:[%s995_s11 + $0x31] sm:$0xff] }
  0x13   : > { %v213_v2 = vld [vmem:[%s995_s11 + $0x2] sm:$0xff]  ;;  %v181_v3 = vmax.f32 %v117_v0, %v149_v1  ;;  %v823_v6 = vld [vmem:[%s995_s11 + $0x1a] sm:$0xff]  ;;  %v1008_v9 = vld [vmem:[%s995_s11 + $0x32] sm:$0xff]  ;;  %v183_v10 = vmax.f32 %v759_v4, %v791_v5  ;;  %v185_v15 = vmax.f32 %v855_v7, %v1005_v8 }
  0x14   : > { %v118_v12 = vld [vmem:[%s995_s11 + $0x8] sm:$0xff]  ;;  %v760_v17 = vld [vmem:[%s995_s11 + $0x20] sm:$0xff]  ;;  %v856_v22 = vld [vmem:[%s995_s11 + $0x38] sm:$0xff] }
  0x15   : > { %v245_v11 = vmax.f32 %v181_v3, %v213_v2  ;;  %v150_v13 = vld [vmem:[%s995_s11 + $0x9] sm:$0xff]  ;;  %v792_v18 = vld [vmem:[%s995_s11 + $0x21] sm:$0xff]  ;;  %v247_v20 = vmax.f32 %v183_v10, %v823_v6  ;;  %v1019_v23 = vld [vmem:[%s995_s11 + $0x39] sm:$0xff]  ;;  %v249_v26 = vmax.f32 %v185_v15, %v1008_v9 }
  0x16   : > { %v214_v14 = vld [vmem:[%s995_s11 + $0xa] sm:$0xff]  ;;  %v182_v16 = vmax.f32 %v118_v12, %v150_v13  ;;  %v824_v19 = vld [vmem:[%s995_s11 + $0x22] sm:$0xff]  ;;  %v1022_v24 = vld [vmem:[%s995_s11 + $0x3a] sm:$0xff]  ;;  %v184_v25 = vmax.f32 %v760_v17, %v792_v18  ;;  %v186_v32 = vmax.f32 %v856_v22, %v1019_v23 }
  0x17   : > { %v310_v21 = vmax.f32 %v245_v11, %v759_v4  ;;  %v312_v28 = vmax.f32 %v247_v20, %v855_v7  ;;  %v857_v29 = vld [vmem:[%s995_s11 + $0x48] sm:$0xff]  ;;  %v858_v35 = vld [vmem:[%s995_s11 + $0x50] sm:$0xff]  ;;  %v859_v50 = vld [vmem:[%s995_s11 + $0x60] sm:$0xff] }
  0x18   : > { %v246_v27 = vmax.f32 %v182_v16, %v214_v14  ;;  %v889_v30 = vld [vmem:[%s995_s11 + $0x49] sm:$0xff]  ;;  %v248_v34 = vmax.f32 %v184_v25, %v824_v19  ;;  %v1031_v36 = vld [vmem:[%s995_s11 + $0x51] sm:$0xff]  ;;  %v314_v38 = vmax.f32 %v249_v26, %v857_v29  ;;  %v250_v42 = vmax.f32 %v186_v32, %v1022_v24  ;;  %v891_v60 = vld [vmem:[%s995_s11 + $0x61] sm:$0xff] }
  0x19   : > { %v921_v31 = vld [vmem:[%s995_s11 + $0x4a] sm:$0xff]  ;;  %v374_v33 = vmax.f32 %v310_v21, %v791_v5  ;;  %v1034_v37 = vld [vmem:[%s995_s11 + $0x52] sm:$0xff]  ;;  %v187_v39 = vmax.f32 %v857_v29, %v889_v30  ;;  %v376_v41 = vmax.f32 %v312_v28, %v1005_v8  ;;  %v188_v43 = vmax.f32 %v858_v35, %v1031_v36  ;;  %v862_v25 = vld [vmem:[%s995_s11 + $0x80] sm:$0xff] }
  0x1a   : > { %v311_v40 = vmax.f32 %v246_v27, %v760_v17  ;;  %v313_v45 = vmax.f32 %v248_v34, %v856_v22  ;;  %v378_v46 = vmax.f32 %v314_v38, %v889_v30  ;;  %v315_v51 = vmax.f32 %v250_v42, %v858_v35  ;;  %v860_v56 = vld [vmem:[%s995_s11 + $0x68] sm:$0xff]  ;;  %v1073_v32 = vld [vmem:[%s995_s11 + $0x91] sm:$0xff] }
  0x1b   : > { %v438_v44 = vmax.f32 %v374_v33, %v823_v6  ;;  %v251_v47 = vmax.f32 %v187_v39, %v921_v31  ;;  %v440_v49 = vmax.f32 %v376_v41, %v1008_v9  ;;  %v252_v52 = vmax.f32 %v188_v43, %v1034_v37  ;;  %v892_v2 = vld [vmem:[%s995_s11 + $0x69] sm:$0xff]  ;;  %v894_v26 = vld [vmem:[%s995_s11 + $0x81] sm:$0xff]  ;;  %v864_v38 = vld [vmem:[%s995_s11 + $0x98] sm:$0xff] }
  0x1c   : > { %v375_v48 = vmax.f32 %v311_v40, %v792_v18  ;;  %v377_v54 = vmax.f32 %v313_v45, %v1019_v23  ;;  %v442_v55 = vmax.f32 %v378_v46, %v921_v31  ;;  %v379_v61 = vmax.f32 %v315_v51, %v1031_v36  ;;  %v923_v6 = vld [vmem:[%s995_s11 + $0x62] sm:$0xff]  ;;  %v924_v13 = vld [vmem:[%s995_s11 + $0x6a] sm:$0xff]  ;;  %v861_v18 = vld [vmem:[%s995_s11 + $0x78] sm:$0xff] }
  0x1d   : > { %v503_v53 = vmax.f32 %v438_v44, %v855_v7  ;;  %v316_v57 = vmax.f32 %v251_v47, %v859_v50  ;;  %v505_v59 = vmax.f32 %v440_v49, %v857_v29  ;;  %v317_v62 = vmax.f32 %v252_v52, %v860_v56  ;;  %v925_v29 = vld [vmem:[%s995_s11 + $0x7a] sm:$0xff]  ;;  %v927_v43 = vld [vmem:[%s995_s11 + $0x92] sm:$0xff]  ;;  %v865_v44 = vld [vmem:[%s995_s11 + $0xa8] sm:$0xff] }
  0x1e   : > { %v439_v58 = vmax.f32 %v375_v48, %v824_v19  ;;  %v441_v0 = vmax.f32 %v377_v54, %v1022_v24  ;;  %v507_v1 = vmax.f32 %v442_v55, %v859_v50  ;;  %v443_v7 = vmax.f32 %v379_v61, %v1034_v37  ;;  %v893_v19 = vld [vmem:[%s995_s11 + $0x79] sm:$0xff]  ;;  %v1088_v45 = vld [vmem:[%s995_s11 + $0xa9] sm:$0xff]  ;;  %v1095_v52 = vld [vmem:[%s995_s11 + $0xb1] sm:$0xff] }
  0x1f   : > { %v567_v63 = vmax.f32 %v503_v53, %v1005_v8  ;;  %v380_v3 = vmax.f32 %v316_v57, %v891_v60  ;;  %v569_v5 = vmax.f32 %v505_v59, %v889_v30  ;;  %v381_v10 = vmax.f32 %v317_v62, %v892_v2  ;;  %v1081_v39 = vld [vmem:[%s995_s11 + $0x99] sm:$0xff]  ;;  %v866_v51 = vld [vmem:[%s995_s11 + $0xb0] sm:$0xff] }
  0x20   : > { %v504_v4 = vmax.f32 %v439_v58, %v856_v22  ;;  %v506_v11 = vmax.f32 %v441_v0, %v858_v35  ;;  %v571_v12 = vmax.f32 %v507_v1, %v891_v60  ;;  %v508_v17 = vmax.f32 %v443_v7, %v860_v56  ;;  %v928_v49 = vld [vmem:[%s995_s11 + $0x9a] sm:$0xff]  ;;  %v930_v61 = vld [vmem:[%s995_s11 + $0xb2] sm:$0xff] }
  0x21   : > { %v631_v8 = vmax.f32 %v567_v63, %v1008_v9  ;;  %v444_v14 = vmax.f32 %v380_v3, %v923_v6  ;;  %v633_v16 = vmax.f32 %v569_v5, %v921_v31  ;;  %v445_v20 = vmax.f32 %v381_v10, %v924_v13  ;;  %v863_v31 = vld [vmem:[%s995_s11 + $0x90] sm:$0xff] }
  0x22   : > { %v568_v15 = vmax.f32 %v504_v4, %v1019_v23  ;;  %v570_v9 = vmax.f32 %v506_v11, %v1031_v36  ;;  %v635_v21 = vmax.f32 %v571_v12, %v923_v6  ;;  %v189_v23 = vmax.f32 %v859_v50, %v891_v60  ;;  %v867_v11 = vld [vmem:[%s995_s11 + $0xc0] sm:$0xff] }
  0x23   : > { %664 = vst.msk [vmem:[%s1053_s15] sm:$0xff] %vm663_vm0, %v631_v8  ;;  %v509_v22 = vmax.f32 %v444_v14, %v861_v18  ;;  %666 = vst.msk [vmem:[%s1053_s15 + $0x10] sm:$0xff] %vm663_vm0, %v633_v16  ;;  %v572_v28 = vmax.f32 %v508_v17, %v892_v2  ;;  %v510_v30 = vmax.f32 %v445_v20, %v862_v25  ;;  %v868_v17 = vld [vmem:[%s995_s11 + $0xc8] sm:$0xff] }
  0x24   : > { %v632_v27 = vmax.f32 %v568_v15, %v1022_v24  ;;  %v190_v33 = vmax.f32 %v860_v56, %v892_v2  ;;  %v634_v34 = vmax.f32 %v570_v9, %v1034_v37  ;;  %668 = vst.msk [vmem:[%s1053_s15 + $0x20] sm:$0xff] %vm663_vm0, %v635_v21  ;;  %v926_v24 = vld [vmem:[%s995_s11 + $0x82] sm:$0xff]  ;;  %v253_v36 = vmax.f32 %v189_v23, %v923_v6  ;;  %v929_v56 = vld [vmem:[%s995_s11 + $0xaa] sm:$0xff] }
  0x25   : > { %v573_v35 = vmax.f32 %v509_v22, %v893_v19  ;;  %v191_v40 = vmax.f32 %v861_v18, %v893_v19  ;;  %v636_v41 = vmax.f32 %v572_v28, %v924_v13  ;;  %v574_v42 = vmax.f32 %v510_v30, %v894_v26  ;;  %v899_v9 = vld [vmem:[%s995_s11 + $0xc1] sm:$0xff] }
  0x26   : > { %665 = vst.msk [vmem:[%s1053_s15 + $0x8] sm:$0xff] %vm663_vm0, %v632_v27  ;;  %v254_v37 = vmax.f32 %v190_v33, %v924_v13  ;;  %v192_v46 = vmax.f32 %v862_v25, %v894_v26  ;;  %667 = vst.msk [vmem:[%s1053_s15 + $0x18] sm:$0xff] %vm663_vm0, %v634_v34  ;;  %v318_v48 = vmax.f32 %v253_v36, %v861_v18  ;;  %v900_v27 = vld [vmem:[%s995_s11 + $0xc9] sm:$0xff] }
  0x27   : > { %v637_v47 = vmax.f32 %v573_v35, %v925_v29  ;;  %v255_v50 = vmax.f32 %v191_v40, %v925_v29  ;;  %v193_v53 = vmax.f32 %v863_v31, %v1073_v32  ;;  %669 = vst.msk [vmem:[%s1053_s15 + $0x28] sm:$0xff] %vm663_vm0, %v636_v41  ;;  %v638_v54 = vmax.f32 %v574_v42, %v926_v24 }
  0x28   : > { %v319_v55 = vmax.f32 %v254_v37, %v862_v25  ;;  %v256_v57 = vmax.f32 %v192_v46, %v926_v24  ;;  %v194_v58 = vmax.f32 %v864_v38, %v1081_v39  ;;  %v382_v59 = vmax.f32 %v318_v48, %v893_v19  ;;  %v901_v37 = vld [vmem:[%s995_s11 + $0xd9] sm:$0xff]  ;;  %v902_v48 = vld [vmem:[%s995_s11 + $0xe1] sm:$0xff] }
  0x29   : > { %670 = vst.msk [vmem:[%s1053_s15 + $0x30] sm:$0xff] %vm663_vm0, %v637_v47  ;;  %v320_v60 = vmax.f32 %v255_v50, %v863_v31  ;;  %v257_v62 = vmax.f32 %v193_v53, %v927_v43  ;;  %v195_v63 = vmax.f32 %v865_v44, %v1088_v45  ;;  %671 = vst.msk [vmem:[%s1053_s15 + $0x38] sm:$0xff] %vm663_vm0, %v638_v54  ;;  %v870_v47 = vld [vmem:[%s995_s11 + $0xe0] sm:$0xff]  ;;  %v871_v54 = vld [vmem:[%s995_s11 + $0xf0] sm:$0xff] }
  0x2a   : > { %v383_v0 = vmax.f32 %v319_v55, %v894_v26  ;;  %v321_v1 = vmax.f32 %v256_v57, %v864_v38  ;;  %v258_v2 = vmax.f32 %v194_v58, %v928_v49  ;;  %v196_v3 = vmax.f32 %v866_v51, %v1095_v52  ;;  %v1134_v55 = vld [vmem:[%s995_s11 + $0xf1] sm:$0xff] }
  0x2b   : > { %v446_v4 = vmax.f32 %v382_v59, %v925_v29  ;;  %v384_v5 = vmax.f32 %v320_v60, %v1073_v32  ;;  %v322_v6 = vmax.f32 %v257_v62, %v865_v44  ;;  %v259_v7 = vmax.f32 %v195_v63, %v929_v56  ;;  %v934_v59 = vld [vmem:[%s995_s11 + $0xe2] sm:$0xff]  ;;  %v872_v62 = vld [vmem:[%s995_s11 + $0xf8] sm:$0xff] }
  0x2c   : > { %v447_v10 = vmax.f32 %v383_v0, %v926_v24  ;;  %v385_v8 = vmax.f32 %v321_v1, %v1081_v39  ;;  %v323_v12 = vmax.f32 %v258_v2, %v866_v51  ;;  %v260_v13 = vmax.f32 %v196_v3, %v930_v61  ;;  %v935_v2 = vld [vmem:[%s995_s11 + $0xf2] sm:$0xff] }
  0x2d   : > { %v511_v14 = vmax.f32 %v446_v4, %v863_v31  ;;  %v448_v15 = vmax.f32 %v384_v5, %v927_v43  ;;  %v386_v16 = vmax.f32 %v322_v6, %v1088_v45  ;;  %v324_v18 = vmax.f32 %v259_v7, %v867_v11  ;;  %v931_v31 = vld [vmem:[%s995_s11 + $0xc2] sm:$0xff] }
  0x2e   : > { %v512_v19 = vmax.f32 %v447_v10, %v864_v38  ;;  %v449_v20 = vmax.f32 %v385_v8, %v928_v49  ;;  %v387_v21 = vmax.f32 %v323_v12, %v1095_v52  ;;  %v325_v22 = vmax.f32 %v260_v13, %v868_v17  ;;  %v873_v4 = vld [vmem:[%s995_s11 + $0x108] sm:$0xff]  ;;  %v936_v8 = vld [vmem:[%s995_s11 + $0xfa] sm:$0xff]  ;;  %v874_v12 = vld [vmem:[%s995_s11 + $0x110] sm:$0xff] }
  0x2f   : > { %v575_v25 = vmax.f32 %v511_v14, %v1073_v32  ;;  %v513_v26 = vmax.f32 %v448_v15, %v865_v44  ;;  %v450_v23 = vmax.f32 %v386_v16, %v929_v56  ;;  %v388_v28 = vmax.f32 %v324_v18, %v899_v9  ;;  %v932_v32 = vld [vmem:[%s995_s11 + $0xca] sm:$0xff] }
  0x30   : > { %v576_v29 = vmax.f32 %v512_v19, %v1081_v39  ;;  %v514_v30 = vmax.f32 %v449_v20, %v866_v51  ;;  %v451_v33 = vmax.f32 %v387_v21, %v930_v61  ;;  %v389_v34 = vmax.f32 %v325_v22, %v900_v27  ;;  %v869_v39 = vld [vmem:[%s995_s11 + $0xd8] sm:$0xff]  ;;  %v1148_v5 = vld [vmem:[%s995_s11 + $0x109] sm:$0xff] }
  0x31   : > { %v639_v35 = vmax.f32 %v575_v25, %v927_v43  ;;  %v577_v24 = vmax.f32 %v513_v26, %v1088_v45  ;;  %v515_v36 = vmax.f32 %v450_v23, %v867_v11  ;;  %v452_v38 = vmax.f32 %v388_v28, %v931_v31  ;;  %v1155_v13 = vld [vmem:[%s995_s11 + $0x111] sm:$0xff] }
  0x32   : > { %v640_v40 = vmax.f32 %v576_v29, %v928_v49  ;;  %v578_v41 = vmax.f32 %v514_v30, %v1095_v52  ;;  %v516_v42 = vmax.f32 %v451_v33, %v868_v17  ;;  %v453_v44 = vmax.f32 %v389_v34, %v932_v32  ;;  %v933_v52 = vld [vmem:[%s995_s11 + $0xda] sm:$0xff]  ;;  %v938_v21 = vld [vmem:[%s995_s11 + $0x112] sm:$0xff] }
  0x33   : > { %672 = vst.msk [vmem:[%s1053_s15 + $0x40] sm:$0xff] %vm663_vm0, %v639_v35  ;;  %v641_v43 = vmax.f32 %v577_v24, %v929_v56  ;;  %v579_v46 = vmax.f32 %v515_v36, %v899_v9  ;;  %v517_v45 = vmax.f32 %v452_v38, %v869_v39  ;;  %v197_v49 = vmax.f32 %v867_v11, %v899_v9  ;;  %v875_v24 = vld [vmem:[%s995_s11 + $0x120] sm:$0xff] }
  0x34   : > { %673 = vst.msk [vmem:[%s1053_s15 + $0x48] sm:$0xff] %vm663_vm0, %v640_v40  ;;  %v642_v50 = vmax.f32 %v578_v41, %v930_v61  ;;  %v580_v51 = vmax.f32 %v516_v42, %v900_v27  ;;  %v518_v53 = vmax.f32 %v453_v44, %v870_v47  ;;  %v198_v56 = vmax.f32 %v868_v17, %v900_v27  ;;  %v1141_v61 = vld [vmem:[%s995_s11 + $0xf9] sm:$0xff]  ;;  %v937_v17 = vld [vmem:[%s995_s11 + $0x10a] sm:$0xff] }
  0x35   : > { %674 = vst.msk [vmem:[%s1053_s15 + $0x50] sm:$0xff] %vm663_vm0, %v641_v43  ;;  %v643_v57 = vmax.f32 %v579_v46, %v931_v31  ;;  %v581_v58 = vmax.f32 %v517_v45, %v901_v37  ;;  %v261_v60 = vmax.f32 %v197_v49, %v931_v31  ;;  %v199_v63 = vmax.f32 %v869_v39, %v901_v37  ;;  %v876_v42 = vld [vmem:[%s995_s11 + $0x128] sm:$0xff] }
  0x36   : > { %675 = vst.msk [vmem:[%s1053_s15 + $0x58] sm:$0xff] %vm663_vm0, %v642_v50  ;;  %v644_v0 = vmax.f32 %v580_v51, %v932_v32  ;;  %v582_v1 = vmax.f32 %v518_v53, %v902_v48  ;;  %v262_v3 = vmax.f32 %v198_v56, %v932_v32  ;;  %v200_v6 = vmax.f32 %v870_v47, %v902_v48  ;;  %v907_v43 = vld [vmem:[%s995_s11 + $0x121] sm:$0xff]  ;;  %v908_v50 = vld [vmem:[%s995_s11 + $0x129] sm:$0xff] }
  0x37   : > { %676 = vst.msk [vmem:[%s1053_s15 + $0x60] sm:$0xff] %vm663_vm0, %v643_v57  ;;  %v645_v7 = vmax.f32 %v581_v58, %v933_v52  ;;  %v326_v10 = vmax.f32 %v261_v60, %v869_v39  ;;  %v263_v11 = vmax.f32 %v199_v63, %v933_v52  ;;  %v201_v14 = vmax.f32 %v871_v54, %v1134_v55 }
  0x38   : > { %677 = vst.msk [vmem:[%s1053_s15 + $0x68] sm:$0xff] %vm663_vm0, %v644_v0  ;;  %v646_v15 = vmax.f32 %v582_v1, %v934_v59  ;;  %v327_v16 = vmax.f32 %v262_v3, %v870_v47  ;;  %v264_v18 = vmax.f32 %v200_v6, %v934_v59  ;;  %v202_v19 = vmax.f32 %v872_v62, %v1141_v61  ;;  %v909_v3 = vld [vmem:[%s995_s11 + $0x139] sm:$0xff] }
  0x39   : > { %678 = vst.msk [vmem:[%s1053_s15 + $0x70] sm:$0xff] %vm663_vm0, %v645_v7  ;;  %v390_v20 = vmax.f32 %v326_v10, %v901_v37  ;;  %v328_v9 = vmax.f32 %v263_v11, %v871_v54  ;;  %v265_v22 = vmax.f32 %v201_v14, %v935_v2  ;;  %v203_v25 = vmax.f32 %v873_v4, %v1148_v5  ;;  %v878_v7 = vld [vmem:[%s995_s11 + $0x140] sm:$0xff] }
  0x3a   : > { %679 = vst.msk [vmem:[%s1053_s15 + $0x78] sm:$0xff] %vm663_vm0, %v646_v15  ;;  %v391_v26 = vmax.f32 %v327_v16, %v902_v48  ;;  %v329_v23 = vmax.f32 %v264_v18, %v872_v62  ;;  %v266_v27 = vmax.f32 %v202_v19, %v936_v8  ;;  %v204_v28 = vmax.f32 %v874_v12, %v1155_v13  ;;  %v910_v10 = vld [vmem:[%s995_s11 + $0x141] sm:$0xff]  ;;  %v879_v15 = vld [vmem:[%s995_s11 + $0x150] sm:$0xff] }
  0x3b   : > { %v454_v29 = vmax.f32 %v390_v20, %v933_v52  ;;  %v392_v30 = vmax.f32 %v328_v9, %v1134_v55  ;;  %v330_v31 = vmax.f32 %v265_v22, %v873_v4  ;;  %v267_v33 = vmax.f32 %v203_v25, %v937_v17  ;;  %v1194_v16 = vld [vmem:[%s995_s11 + $0x151] sm:$0xff]  ;;  %v942_v20 = vld [vmem:[%s995_s11 + $0x142] sm:$0xff] }
  0x3c   : > { %v455_v34 = vmax.f32 %v391_v26, %v934_v59  ;;  %v393_v35 = vmax.f32 %v329_v23, %v1141_v61  ;;  %v331_v36 = vmax.f32 %v266_v27, %v874_v12  ;;  %v268_v32 = vmax.f32 %v204_v28, %v938_v21  ;;  %v880_v22 = vld [vmem:[%s995_s11 + $0x158] sm:$0xff] }
  0x3d   : > { %v519_v38 = vmax.f32 %v454_v29, %v871_v54  ;;  %v456_v40 = vmax.f32 %v392_v30, %v935_v2  ;;  %v394_v41 = vmax.f32 %v330_v31, %v1148_v5  ;;  %v332_v39 = vmax.f32 %v267_v33, %v875_v24  ;;  %v939_v54 = vld [vmem:[%s995_s11 + $0x122] sm:$0xff]  ;;  %v943_v27 = vld [vmem:[%s995_s11 + $0x152] sm:$0xff] }
  0x3e   : > { %v520_v37 = vmax.f32 %v455_v34, %v872_v62  ;;  %v457_v44 = vmax.f32 %v393_v35, %v936_v8  ;;  %v395_v46 = vmax.f32 %v331_v36, %v1155_v13  ;;  %v333_v45 = vmax.f32 %v268_v32, %v876_v42  ;;  %v881_v29 = vld [vmem:[%s995_s11 + $0x168] sm:$0xff]  ;;  %v944_v35 = vld [vmem:[%s995_s11 + $0x15a] sm:$0xff]  ;;  %v882_v36 = vld [vmem:[%s995_s11 + $0x170] sm:$0xff] }
  0x3f   : > { %v583_v47 = vmax.f32 %v519_v38, %v1134_v55  ;;  %v521_v48 = vmax.f32 %v456_v40, %v873_v4  ;;  %v458_v49 = vmax.f32 %v394_v41, %v937_v17  ;;  %v396_v51 = vmax.f32 %v332_v39, %v907_v43  ;;  %v940_v55 = vld [vmem:[%s995_s11 + $0x12a] sm:$0xff] }
  0x40   : > { %v584_v52 = vmax.f32 %v520_v37, %v1141_v61  ;;  %v522_v53 = vmax.f32 %v457_v44, %v874_v12  ;;  %v459_v56 = vmax.f32 %v395_v46, %v938_v21  ;;  %v397_v57 = vmax.f32 %v333_v45, %v908_v50  ;;  %v877_v61 = vld [vmem:[%s995_s11 + $0x138] sm:$0xff]  ;;  %v1208_v30 = vld [vmem:[%s995_s11 + $0x169] sm:$0xff] }
  0x41   : > { %v647_v58 = vmax.f32 %v583_v47, %v935_v2  ;;  %v585_v59 = vmax.f32 %v521_v48, %v1148_v5  ;;  %v523_v60 = vmax.f32 %v458_v49, %v875_v24  ;;  %v460_v62 = vmax.f32 %v396_v51, %v939_v54  ;;  %v1215_v32 = vld [vmem:[%s995_s11 + $0x171] sm:$0xff] }
  0x42   : > { %v648_v63 = vmax.f32 %v584_v52, %v936_v8  ;;  %v586_v0 = vmax.f32 %v522_v53, %v1155_v13  ;;  %v524_v1 = vmax.f32 %v459_v56, %v876_v42  ;;  %v461_v4 = vmax.f32 %v397_v57, %v940_v55  ;;  %v941_v13 = vld [vmem:[%s995_s11 + $0x13a] sm:$0xff]  ;;  %v946_v46 = vld [vmem:[%s995_s11 + $0x172] sm:$0xff]  ;;  %v884_v57 = vld [vmem:[%s995_s11 + $0x188] sm:$0xff] }
  0x43   : > { %680 = vst.msk [vmem:[%s1053_s15 + $0x80] sm:$0xff] %vm663_vm0, %v647_v58  ;;  %v649_v2 = vmax.f32 %v585_v59, %v937_v17  ;;  %v587_v6 = vmax.f32 %v523_v60, %v907_v43  ;;  %v525_v5 = vmax.f32 %v460_v62, %v877_v61  ;;  %v205_v8 = vmax.f32 %v875_v24, %v907_v43 }
  0x44   : > { %681 = vst.msk [vmem:[%s1053_s15 + $0x88] sm:$0xff] %vm663_vm0, %v648_v63  ;;  %v650_v11 = vmax.f32 %v586_v0, %v938_v21  ;;  %v588_v12 = vmax.f32 %v524_v1, %v908_v50  ;;  %v526_v14 = vmax.f32 %v461_v4, %v878_v7  ;;  %v206_v17 = vmax.f32 %v876_v42, %v908_v50  ;;  %v1201_v21 = vld [vmem:[%s995_s11 + $0x159] sm:$0xff]  ;;  %v945_v42 = vld [vmem:[%s995_s11 + $0x16a] sm:$0xff] }
  0x45   : > { %682 = vst.msk [vmem:[%s1053_s15 + $0x90] sm:$0xff] %vm663_vm0, %v649_v2  ;;  %v651_v18 = vmax.f32 %v587_v6, %v939_v54  ;;  %v589_v19 = vmax.f32 %v525_v5, %v909_v3  ;;  %v269_v9 = vmax.f32 %v205_v8, %v939_v54  ;;  %v207_v25 = vmax.f32 %v877_v61, %v909_v3  ;;  %v883_v50 = vld [vmem:[%s995_s11 + $0x180] sm:$0xff] }
  0x46   : > { %683 = vst.msk [vmem:[%s1053_s15 + $0x98] sm:$0xff] %vm663_vm0, %v650_v11  ;;  %v652_v26 = vmax.f32 %v588_v12, %v940_v55  ;;  %v590_v23 = vmax.f32 %v526_v14, %v910_v10  ;;  %v270_v28 = vmax.f32 %v206_v17, %v940_v55  ;;  %v208_v31 = vmax.f32 %v878_v7, %v910_v10  ;;  %v915_v55 = vld [vmem:[%s995_s11 + $0x181] sm:$0xff] }
  0x47   : > { %684 = vst.msk [vmem:[%s1053_s15 + $0xa0] sm:$0xff] %vm663_vm0, %v651_v18  ;;  %v653_v33 = vmax.f32 %v589_v19, %v941_v13  ;;  %v334_v34 = vmax.f32 %v269_v9, %v877_v61  ;;  %v271_v24 = vmax.f32 %v207_v25, %v941_v13  ;;  %v209_v38 = vmax.f32 %v879_v15, %v1194_v16  ;;  %v947_v5 = vld [vmem:[%s995_s11 + $0x182] sm:$0xff]  ;;  %v885_v19 = vld [vmem:[%s995_s11 + $0x198] sm:$0xff] }
  0x48   : > { %685 = vst.msk [vmem:[%s1053_s15 + $0xa8] sm:$0xff] %vm663_vm0, %v652_v26  ;;  %v654_v40 = vmax.f32 %v590_v23, %v942_v20  ;;  %v335_v41 = vmax.f32 %v270_v28, %v878_v7  ;;  %v272_v39 = vmax.f32 %v208_v31, %v942_v20  ;;  %v210_v37 = vmax.f32 %v880_v22, %v1201_v21  ;;  %v886_v26 = vld [vmem:[%s995_s11 + $0x1a0] sm:$0xff] }
  0x49   : > { %686 = vst.msk [vmem:[%s1053_s15 + $0xb0] sm:$0xff] %vm663_vm0, %v653_v33  ;;  %v398_v44 = vmax.f32 %v334_v34, %v909_v3  ;;  %v336_v43 = vmax.f32 %v271_v24, %v879_v15  ;;  %v273_v45 = vmax.f32 %v209_v38, %v943_v27  ;;  %v211_v47 = vmax.f32 %v881_v29, %v1208_v30  ;;  %v916_v3 = vld [vmem:[%s995_s11 + $0x189] sm:$0xff] }
  0x4a   : > { %687 = vst.msk [vmem:[%s1053_s15 + $0xb8] sm:$0xff] %vm663_vm0, %v654_v40  ;;  %v399_v48 = vmax.f32 %v335_v41, %v910_v10  ;;  %v337_v49 = vmax.f32 %v272_v39, %v880_v22  ;;  %v274_v51 = vmax.f32 %v210_v37, %v944_v35  ;;  %v212_v52 = vmax.f32 %v882_v36, %v1215_v32  ;;  %v950_v41 = vld [vmem:[%s995_s11 + $0x1a2] sm:$0xff] }
  0x4b   : > { %v462_v53 = vmax.f32 %v398_v44, %v941_v13  ;;  %v400_v54 = vmax.f32 %v336_v43, %v1194_v16  ;;  %v338_v56 = vmax.f32 %v273_v45, %v881_v29  ;;  %v275_v58 = vmax.f32 %v211_v47, %v945_v42  ;;  %v948_v13 = vld [vmem:[%s995_s11 + $0x18a] sm:$0xff] }
  0x4c   : > { %v463_v59 = vmax.f32 %v399_v48, %v942_v20  ;;  %v401_v60 = vmax.f32 %v337_v49, %v1201_v21  ;;  %v339_v62 = vmax.f32 %v274_v51, %v882_v36  ;;  %v276_v63 = vmax.f32 %v212_v52, %v946_v46 }
  0x4d   : > { %v527_v0 = vmax.f32 %v462_v53, %v879_v15  ;;  %v464_v1 = vmax.f32 %v400_v54, %v943_v27  ;;  %v402_v61 = vmax.f32 %v338_v56, %v1208_v30  ;;  %v340_v4 = vmax.f32 %v275_v58, %v883_v50 }
  0x4e   : > { %v528_v2 = vmax.f32 %v463_v59, %v880_v22  ;;  %v465_v6 = vmax.f32 %v401_v60, %v944_v35  ;;  %v403_v7 = vmax.f32 %v339_v62, %v1215_v32  ;;  %v341_v10 = vmax.f32 %v276_v63, %v884_v57 }
  0x4f   : > { %v591_v8 = vmax.f32 %v527_v0, %v1194_v16  ;;  %v529_v11 = vmax.f32 %v464_v1, %v881_v29  ;;  %v466_v12 = vmax.f32 %v402_v61, %v945_v42  ;;  %v404_v14 = vmax.f32 %v340_v4, %v915_v55 }
  0x50   : > { %v592_v15 = vmax.f32 %v528_v2, %v1201_v21  ;;  %v530_v17 = vmax.f32 %v465_v6, %v882_v36  ;;  %v467_v18 = vmax.f32 %v403_v7, %v946_v46  ;;  %v405_v20 = vmax.f32 %v341_v10, %v916_v3  ;;  %v917_v21 = vld [vmem:[%s995_s11 + $0x199] sm:$0xff] }
  0x51   : > { %v655_v9 = vmax.f32 %v591_v8, %v943_v27  ;;  %v593_v22 = vmax.f32 %v529_v11, %v1208_v30  ;;  %v531_v25 = vmax.f32 %v466_v12, %v883_v50  ;;  %v468_v16 = vmax.f32 %v404_v14, %v947_v5  ;;  %v918_v30 = vld [vmem:[%s995_s11 + $0x1a1] sm:$0xff] }
  0x52   : > { %v656_v23 = vmax.f32 %v592_v15, %v944_v35  ;;  %v594_v28 = vmax.f32 %v530_v17, %v1215_v32  ;;  %v532_v29 = vmax.f32 %v467_v18, %v884_v57  ;;  %v469_v31 = vmax.f32 %v405_v20, %v948_v13  ;;  %v949_v36 = vld [vmem:[%s995_s11 + $0x19a] sm:$0xff] }
  0x53   : > { %688 = vst.msk [vmem:[%s1053_s15 + $0xc0] sm:$0xff] %vm663_vm0, %v655_v9  ;;  %v657_v33 = vmax.f32 %v593_v22, %v945_v42  ;;  %v595_v27 = vmax.f32 %v531_v25, %v915_v55  ;;  %v533_v34 = vmax.f32 %v468_v16, %v885_v19 }
  0x54   : > { %689 = vst.msk [vmem:[%s1053_s15 + $0xc8] sm:$0xff] %vm663_vm0, %v656_v23  ;;  %v658_v24 = vmax.f32 %v594_v28, %v946_v46  ;;  %v596_v35 = vmax.f32 %v532_v29, %v916_v3  ;;  %v534_v32 = vmax.f32 %v469_v31, %v886_v26 }
  0x55   : > { %690 = vst.msk [vmem:[%s1053_s15 + $0xd0] sm:$0xff] %vm663_vm0, %v657_v33  ;;  %v659_v38 = vmax.f32 %v595_v27, %v947_v5  ;;  %v597_v40 = vmax.f32 %v533_v34, %v917_v21 }
  0x56   : > { %691 = vst.msk [vmem:[%s1053_s15 + $0xd8] sm:$0xff] %vm663_vm0, %v658_v24  ;;  %v660_v42 = vmax.f32 %v596_v35, %v948_v13  ;;  %v598_v39 = vmax.f32 %v534_v32, %v918_v30 }
  0x57   : > { %692 = vst.msk [vmem:[%s1053_s15 + $0xe0] sm:$0xff] %vm663_vm0, %v659_v38  ;;  %v661_v37 = vmax.f32 %v597_v40, %v949_v36 }
  0x58   : > { %693 = vst.msk [vmem:[%s1053_s15 + $0xe8] sm:$0xff] %vm663_vm0, %v660_v42  ;;  %v662_v44 = vmax.f32 %v598_v39, %v950_v41 }
  0x59   : > { %694 = vst.msk [vmem:[%s1053_s15 + $0xf0] sm:$0xff] %vm663_vm0, %v661_v37 }
  0x5a   : > { %695 = vst.msk [vmem:[%s1053_s15 + $0xf8] sm:$0xff] %vm663_vm0, %v662_v44 }
  0x5b PF: > { %s11_s6 = sadd.s32 1, %s969_s6  }
  0x5c   : > { %p8_p4 = scmp.ge.s32.totalorder %s11_s6, 4  }
  0x5e   :  { %10 = sbr.rel (!%p8_p4) target bundleno = 1 (0x1), region = 56 }

// kernel: forward.40
= control target key start
LH: loop header
LB: loop body
LE: loop exit
PB: predicated region body
PF: predicated region fallthrough
CT: control target
= control target key end

     0   :  { %s2111_s18 = smov 0   ;;  %s3259_s0 = inlined_call_operand.vmem [shape: f32[2,18,18,16], index: 0, kind: input, shape index: {}]   ;;  %s3260_s1 = inlined_call_operand.vmem [shape: f32[9,16], index: 1, kind: input, shape index: {}]   ;;  %s3261_s2 = inlined_call_operand.vmem [shape: bf16[16,16], index: 2, kind: input, shape index: {}]   ;;  %s3262_s3 = inlined_call_operand.vmem [shape: f32[1,16], index: 3, kind: input, shape index: {}]   ;;  %s3263_s4 = inlined_call_operand.vmem [shape: f32[1,16], index: 4, kind: input, shape index: {}]   ;;  %s3264_s5 = inlined_call_operand.vmem [shape: f32[512,16], index: 5, kind: output, shape index: {}]  }
   0x1 LB: > { %s2117_s19 = sadd.s32 4294967295, %s2079_s18   ;;  %p1791_p0 = scmp.ge.s32.totalorder %s2079_s18, 1  ;;  %s2079_s18 = sphi %s2111_s18, %s15_s18  }
   0x2   : > { %p187_p1 = scmp.lt.s32.totalorder %s2079_s18, 3 }
   0x4   : > { %p188_p2 = pnand %p1791_p0, %p187_p1 }
   0x5   : > { %v2071_v0 = vld [vmem:[%s3261_s2] sm:$0xff] (!%p188_p2)   ;;  %p215_p3 = scmp.lt.s32.totalorder (!%p188_p2), %s2117_s19, 1  ;;  %v293_v1 = vlaneseq (!%p188_p2)  ;;  %vm1411_vm0 = vcmask (!%p188_p2), 130048   ;;  %s1793_s8 = sshll.u32 (!%p188_p2), %s2117_s19, 5 }
   0x6   : > { %191 = sbr.rel (%p188_p2) target bundleno = 418 (0x1a2), region = 40  ;;  %2026 = vmatprep.subr.bf16.mxu0 (!%p188_p2), %v2071_v0  ;;  %2060 = vmatprep.subr.bf16.mxu1 (!%p188_p2), %v2071_v0  ;;  %v227_v3 = vld [vmem:[%s3260_s1] sm:$0xff] (!%p188_p2)  ;;  %p221_p4 = scmp.lt.s32.totalorder (!%p188_p2), %s1793_s8, 63 }
   0x7   : > { %v294_v2 = vshrl.u32 (!%p188_p2), %v293_v1, 7  ;;  %2027 = vmatpush3.bf16.msra.mxu0 (!%p188_p2), %v2071_v0  ;;  %2061 = vmatpush3.bf16.msra.mxu1 (!%p188_p2), %v2071_v0 }
   0x9   : > { %v295_v4 = vsub.s32 (!%p188_p2), 0, %v294_v2  ;;  %v395_v5 = vsub.s32 (!%p188_p2), 1, %v294_v2  ;;  %v527_v6 = vsub.s32 (!%p188_p2), 2, %v294_v2  ;;  %v660_v7 = vsub.s32 (!%p188_p2), 3, %v294_v2 }
   0xa   : > { %v792_v8 = vsub.s32 (!%p188_p2), 4, %v294_v2  ;;  %v924_v9 = vsub.s32 (!%p188_p2), 5, %v294_v2  ;;  %v1057_v10 = vsub.s32 (!%p188_p2), 6, %v294_v2  ;;  %v1189_v11 = vsub.s32 (!%p188_p2), 7, %v294_v2 }
   0xb   : > { %v2134_v12 = vrot.slane (!%p188_p2), %v227_v3, %v295_v4  ;;  %v2136_v13 = vrot.slane (!%p188_p2), %v227_v3, %v395_v5  ;;  %v2141_v17 = vrot.slane (!%p188_p2), %v227_v3, %v527_v6  ;;  %v2143_v18 = vrot.slane (!%p188_p2), %v227_v3, %v660_v7  ;;  %v2218_v5 = vld [vmem:[%s3260_s1 + $0x8] ss:$0 sm:$0xff] (!%p188_p2) }
   0xc   : > { %v2145_v19 = vrot.slane (!%p188_p2), %v227_v3, %v792_v8  ;;  %v2147_v20 = vrot.slane (!%p188_p2), %v227_v3, %v924_v9  ;;  %v2152_v27 = vrot.slane (!%p188_p2), %v227_v3, %v1057_v10  ;;  %v2163_v34 = vrot.slane (!%p188_p2), %v227_v3, %v1189_v11 }
   0xd   : > { %s216_s22 = scalar_select %p215_p3, %s2117_s19, 1 }
   0xe   : > { %s3266_s8 = smov (!%p221_p4, %s1793_s8), 63 }
   0xf   : > { %s2062_s25 = smul.u32 432, %s216_s22  ;;  %s1794_s11 = sshll.u32 %s3266_s8, 3 }
  0x10   : > { %s3127_s16 = scalar_lea.vmem %s3264_s5, %s1794_s11 }
  0x11   : > { %s2132_s28 = scalar_lea.vmem %s3259_s0, %s2062_s25 }
  0x12   : > { %v229_v14 = vld [vmem:[%s2132_s28] sm:$0xff]  ;;  %v230_v15 = vld [vmem:[%s2132_s28 + $0x8] sm:$0xff]  ;;  %v2155_v31 = vld [vmem:[%s2132_s28 + $0x18] sm:$0xff] }
  0x13   : > { %v329_v16 = vld [vmem:[%s2132_s28 + $0x1] sm:$0xff]  ;;  %v261_v21 = vmax.f32 %v229_v14, 0.0  ;;  %v262_v22 = vmax.f32 %v230_v15, 0.0  ;;  %v330_v23 = vld [vmem:[%s2132_s28 + $0x9] sm:$0xff]  ;;  %v2161_v33 = vld [vmem:[%s2132_s28 + $0x19] sm:$0xff]  ;;  %v626_v38 = vmax.f32 %v2155_v31, 0.0 }
  0x14   : > { %v361_v24 = vmax.f32 %v329_v16, 0.0  ;;  %v461_v25 = vld [vmem:[%s2132_s28 + $0x2] sm:$0xff]  ;;  %v462_v26 = vld [vmem:[%s2132_s28 + $0xa] sm:$0xff]  ;;  %v362_v28 = vmax.f32 %v330_v23, 0.0  ;;  %v2173_v40 = vld [vmem:[%s2132_s28 + $0x1a] sm:$0xff]  ;;  %v758_v49 = vmax.f32 %v2161_v33, 0.0 }
  0x15   : > { %v493_v29 = vmax.f32 %v461_v25, 0.0  ;;  %v494_v30 = vmax.f32 %v462_v26, 0.0  ;;  %v2158_v32 = vld [vmem:[%s2132_s28 + $0x20] sm:$0xff]  ;;  %v297_v35 = vmul.f32 %v2134_v12, %v261_v21  ;;  %v298_v36 = vmul.f32 %v2134_v12, %v262_v22  ;;  %v1891_v46 = vld [vmem:[%s2132_s28 + $0x30] sm:$0xff]  ;;  %v1892_v51 = vld [vmem:[%s2132_s28 + $0x38] sm:$0xff] }
  0x16   : > { %v397_v37 = vmul.f32 %v2136_v13, %v361_v24  ;;  %v2170_v39 = vld [vmem:[%s2132_s28 + $0x21] sm:$0xff]  ;;  %v398_v42 = vmul.f32 %v2136_v13, %v362_v28  ;;  %v627_v45 = vmax.f32 %v2158_v32, 0.0  ;;  %v662_v48 = vmul.f32 %v2143_v18, %v626_v38  ;;  %v1923_v56 = vld [vmem:[%s2132_s28 + $0x31] sm:$0xff]  ;;  %v1924_v57 = vld [vmem:[%s2132_s28 + $0x39] sm:$0xff] }
  0x17   : > { %v2176_v41 = vld [vmem:[%s2132_s28 + $0x22] sm:$0xff]  ;;  %v529_v43 = vmul.f32 %v2141_v17, %v493_v29  ;;  %v530_v44 = vmul.f32 %v2141_v17, %v494_v30  ;;  %v759_v50 = vmax.f32 %v2170_v39, 0.0  ;;  %v890_v54 = vmax.f32 %v2173_v40, 0.0  ;;  %v1955_v62 = vld [vmem:[%s2132_s28 + $0x32] sm:$0xff]  ;;  %v1956_v63 = vld [vmem:[%s2132_s28 + $0x3a] sm:$0xff] }
  0x18   : > { %v429_v47 = vadd.f32 %v397_v37, %v297_v35  ;;  %v430_v52 = vadd.f32 %v398_v42, %v298_v36  ;;  %v663_v53 = vmul.f32 %v2143_v18, %v627_v45  ;;  %v891_v55 = vmax.f32 %v2176_v41, 0.0  ;;  %v245_v4 = vld [vmem:[%s2132_s28 + $0xc0] sm:$0xff]  ;;  %v246_v10 = vld [vmem:[%s2132_s28 + $0xc8] sm:$0xff]  ;;  %v2246_v42 = vld [vmem:[%s2132_s28 + $0xd8] sm:$0xff] }
  0x19   : > { %v794_v59 = vmul.f32 %v2145_v19, %v758_v49  ;;  %v795_v60 = vmul.f32 %v2145_v19, %v759_v50  ;;  %v2202_v61 = vmax.f32 %v1891_v46, 0.0  ;;  %v926_v1 = vmul.f32 %v2147_v20, %v890_v54  ;;  %v345_v21 = vld [vmem:[%s2132_s28 + $0xc1] sm:$0xff]  ;;  %v346_v22 = vld [vmem:[%s2132_s28 + $0xc9] sm:$0xff] }
  0x1a   : > { %v561_v58 = vadd.f32 %v529_v43, %v429_v47  ;;  %v562_v0 = vadd.f32 %v530_v44, %v430_v52  ;;  %v927_v2 = vmul.f32 %v2147_v20, %v891_v55  ;;  %v2212_v3 = vmax.f32 %v1892_v51, 0.0  ;;  %v477_v28 = vld [vmem:[%s2132_s28 + $0xc2] sm:$0xff]  ;;  %v478_v29 = vld [vmem:[%s2132_s28 + $0xca] sm:$0xff] }
  0x1b   : > { %v1059_v7 = vmul.f32 %v2152_v27, %v2202_v61  ;;  %v2222_v8 = vmax.f32 %v1923_v56, 0.0  ;;  %v2224_v9 = vmax.f32 %v1924_v57, 0.0  ;;  %v2229_v15 = vmax.f32 %v1955_v62, 0.0  ;;  %v2257_v62 = vld [vmem:[%s2132_s28 + $0xd9] sm:$0xff] }
  0x1c   : > { %v694_v6 = vadd.f32 %v662_v48, %v561_v58  ;;  %v695_v11 = vadd.f32 %v663_v53, %v562_v0  ;;  %v1060_v14 = vmul.f32 %v2152_v27, %v2212_v3  ;;  %v2231_v16 = vmax.f32 %v1956_v63, 0.0  ;;  %v2250_v48 = vld [vmem:[%s2132_s28 + $0xe0] sm:$0xff] }
  0x1d   : > { %v1191_v24 = vmul.f32 %v2163_v34, %v2222_v8  ;;  %v1192_v25 = vmul.f32 %v2163_v34, %v2224_v9  ;;  %v277_v26 = vmax.f32 %v245_v4, 0.0  ;;  %v1323_v35 = vmul.f32 %v2218_v5, %v2229_v15  ;;  %v2260_v63 = vld [vmem:[%s2132_s28 + $0xe1] sm:$0xff] }
  0x1e   : > { %v826_v23 = vadd.f32 %v794_v59, %v694_v6  ;;  %v827_v30 = vadd.f32 %v795_v60, %v695_v11  ;;  %v1324_v36 = vmul.f32 %v2218_v5, %v2231_v16  ;;  %v278_v37 = vmax.f32 %v246_v10, 0.0  ;;  %v2266_v6 = vld [vmem:[%s2132_s28 + $0xda] sm:$0xff] }
  0x1f   : > { %v313_v44 = vmul.f32 %v2134_v12, %v277_v26  ;;  %v377_v46 = vmax.f32 %v345_v21, 0.0  ;;  %v378_v47 = vmax.f32 %v346_v22, 0.0  ;;  %v509_v53 = vmax.f32 %v477_v28, 0.0  ;;  %v2272_v22 = vld [vmem:[%s2132_s28 + $0xe2] sm:$0xff] }
  0x20   : > { %v958_v43 = vadd.f32 %v926_v1, %v826_v23  ;;  %v959_v51 = vadd.f32 %v927_v2, %v827_v30  ;;  %v314_v52 = vmul.f32 %v2134_v12, %v278_v37  ;;  %v510_v56 = vmax.f32 %v478_v29, 0.0  ;;  %v1907_v29 = vld [vmem:[%s2132_s28 + $0xf0] sm:$0xff] }
  0x21   : > { %v413_v58 = vmul.f32 %v2136_v13, %v377_v46  ;;  %v414_v59 = vmul.f32 %v2136_v13, %v378_v47  ;;  %v642_v60 = vmax.f32 %v2246_v42, 0.0  ;;  %v545_v1 = vmul.f32 %v2141_v17, %v509_v53  ;;  %v1939_v46 = vld [vmem:[%s2132_s28 + $0xf1] sm:$0xff]  ;;  %v1940_v53 = vld [vmem:[%s2132_s28 + $0xf9] sm:$0xff] }
  0x22   : > { %v1091_v57 = vadd.f32 %v1059_v7, %v958_v43  ;;  %v1092_v0 = vadd.f32 %v1060_v14, %v959_v51  ;;  %v546_v2 = vmul.f32 %v2141_v17, %v510_v56  ;;  %v643_v4 = vmax.f32 %v2250_v48, 0.0 }
  0x23   : > { %v445_v10 = vadd.f32 %v413_v58, %v313_v44  ;;  %v446_v11 = vadd.f32 %v414_v59, %v314_v52  ;;  %v678_v21 = vmul.f32 %v2143_v18, %v642_v60  ;;  %v774_v26 = vmax.f32 %v2257_v62, 0.0  ;;  %v1908_v44 = vld [vmem:[%s2132_s28 + $0xf8] sm:$0xff] }
  0x24   : > { %v1223_v7 = vadd.f32 %v1191_v24, %v1091_v57  ;;  %v1224_v14 = vadd.f32 %v1192_v25, %v1092_v0  ;;  %v679_v23 = vmul.f32 %v2143_v18, %v643_v4  ;;  %v775_v28 = vmax.f32 %v2260_v63, 0.0  ;;  %v1972_v59 = vld [vmem:[%s2132_s28 + $0xfa] sm:$0xff] }
  0x25   : > { %v577_v30 = vadd.f32 %v545_v1, %v445_v10  ;;  %v578_v37 = vadd.f32 %v546_v2, %v446_v11  ;;  %v906_v43 = vmax.f32 %v2266_v6, 0.0  ;;  %v810_v25 = vmul.f32 %v2145_v19, %v774_v26 }
  0x26   : > { %v1355_v24 = vadd.f32 %v1323_v35, %v1223_v7  ;;  %v1356_v47 = vadd.f32 %v1324_v36, %v1224_v14  ;;  %v811_v51 = vmul.f32 %v2145_v19, %v775_v28  ;;  %v907_v52 = vmax.f32 %v2272_v22, 0.0  ;;  %v1971_v36 = vld [vmem:[%s2132_s28 + $0xf2] sm:$0xff] }
  0x27   : > { %v710_v35 = vadd.f32 %v678_v21, %v577_v30  ;;  %v711_v56 = vadd.f32 %v679_v23, %v578_v37  ;;  %v942_v57 = vmul.f32 %v2147_v20, %v906_v43  ;;  %v2294_v58 = vmax.f32 %v1907_v29, 0.0 }
  0x28   : > { %v1387_v0 = vpack.c.bf16 %v1356_v47, %v1355_v24  ;;  %v943_v1 = vmul.f32 %v2147_v20, %v907_v52  ;;  %v2301_v2 = vmax.f32 %v1908_v44, 0.0  ;;  %v2303_v7 = vmax.f32 %v1939_v46, 0.0 }
  0x29   : > { %v842_v10 = vadd.f32 %v810_v25, %v710_v35  ;;  %v843_v11 = vadd.f32 %v811_v51, %v711_v56  ;;  %v1075_v21 = vmul.f32 %v2152_v27, %v2294_v58  ;;  %v2307_v14 = vmax.f32 %v1940_v53, 0.0 }
  0x2a   : > { %2028 = vmatprep.mubr.msk.bf16.mxu0 %vm1411_vm0, %v1387_v0  ;;  %v1076_v23 = vmul.f32 %v2152_v27, %v2301_v2  ;;  %v1207_v29 = vmul.f32 %v2163_v34, %v2303_v7  ;;  %v2314_v24 = vmax.f32 %v1971_v36, 0.0  ;;  %v2316_v30 = vmax.f32 %v1972_v59, 0.0  ;;  %v1925_v0 = vld [vmem:[%s2132_s28 + $0x49] sm:$0xff] }
  0x2b   : > { %v974_v37 = vadd.f32 %v942_v57, %v842_v10  ;;  %v975_v44 = vadd.f32 %v943_v1, %v843_v11  ;;  %v1208_v46 = vmul.f32 %v2163_v34, %v2307_v14  ;;  %v299_v47 = vmul.f32 %v626_v38, %v2134_v12  ;;  %v1926_v1 = vld [vmem:[%s2132_s28 + $0x51] sm:$0xff] }
  0x2c   : > { %v1339_v25 = vmul.f32 %v2218_v5, %v2314_v24  ;;  %v1340_v51 = vmul.f32 %v2218_v5, %v2316_v30  ;;  %v300_v53 = vmul.f32 %v627_v45, %v2134_v12  ;;  %v399_v35 = vmul.f32 %v758_v49, %v2136_v13  ;;  %v1893_v49 = vld [vmem:[%s2132_s28 + $0x48] sm:$0xff] }
  0x2d   : > { %v1107_v56 = vadd.f32 %v1075_v21, %v974_v37  ;;  %v1108_v31 = vadd.f32 %v1076_v23, %v975_v44  ;;  %v400_v38 = vmul.f32 %v759_v50, %v2136_v13  ;;  %v531_v57 = vmul.f32 %v890_v54, %v2141_v17  ;;  %v1894_v54 = vld [vmem:[%s2132_s28 + $0x50] sm:$0xff] }
  0x2e   : > { %v431_v36 = vadd.f32 %v399_v35, %v299_v47  ;;  %v532_v32 = vmul.f32 %v891_v55, %v2141_v17  ;;  %v664_v33 = vmul.f32 %v2202_v61, %v2143_v18  ;;  %v665_v45 = vmul.f32 %v2212_v3, %v2143_v18  ;;  %v1957_v21 = vld [vmem:[%s2132_s28 + $0x4a] sm:$0xff] }
  0x2f   : > { %v1239_v59 = vadd.f32 %v1207_v29, %v1107_v56  ;;  %v1240_v39 = vadd.f32 %v1208_v46, %v1108_v31  ;;  %v432_v50 = vadd.f32 %v400_v38, %v300_v53  ;;  %v796_v40 = vmul.f32 %v2222_v8, %v2145_v19  ;;  %v1958_v56 = vld [vmem:[%s2132_s28 + $0x52] sm:$0xff] }
  0x30   : > { %v563_v41 = vadd.f32 %v531_v57, %v431_v36  ;;  %v797_v55 = vmul.f32 %v2224_v9, %v2145_v19  ;;  %v928_v10 = vmul.f32 %v2229_v15, %v2147_v20  ;;  %v929_v11 = vmul.f32 %v2231_v16, %v2147_v20 }
  0x31   : > { %v1371_v23 = vadd.f32 %v1339_v25, %v1239_v59  ;;  %v1372_v29 = vadd.f32 %v1340_v51, %v1240_v39  ;;  %v564_v37 = vadd.f32 %v532_v32, %v432_v50  ;;  %v2359_v44 = vmax.f32 %v1893_v49, 0.0 }
  0x32   : > { %v696_v46 = vadd.f32 %v664_v33, %v563_v41  ;;  %v2361_v47 = vmax.f32 %v1894_v54, 0.0  ;;  %v2363_v53 = vmax.f32 %v1925_v0, 0.0  ;;  %v2365_v35 = vmax.f32 %v1926_v1, 0.0 }
  0x33   : > { %v1395_v31 = vpack.c.bf16 %v1372_v29, %v1371_v23  ;;  %v697_v38 = vadd.f32 %v665_v45, %v564_v37  ;;  %v1061_v57 = vmul.f32 %v2152_v27, %v2359_v44  ;;  %v2370_v36 = vmax.f32 %v1957_v21, 0.0  ;;  %v1942_v29 = vld [vmem:[%s2132_s28 + $0x111] sm:$0xff] }
  0x34   : > { %v828_v25 = vadd.f32 %v796_v40, %v696_v46  ;;  %v1062_v51 = vmul.f32 %v2152_v27, %v2361_v47  ;;  %v1193_v32 = vmul.f32 %v2163_v34, %v2363_v53  ;;  %v1194_v33 = vmul.f32 %v2163_v34, %v2365_v35 }
  0x35   : > { %2044 = vmatprep.mubr.msk.bf16.mxu1 %vm1411_vm0, %v1395_v31  ;;  %v829_v49 = vadd.f32 %v797_v55, %v697_v38  ;;  %v2379_v45 = vmax.f32 %v1958_v56, 0.0  ;;  %v1325_v59 = vmul.f32 %v2218_v5, %v2370_v36  ;;  %v315_v39 = vmul.f32 %v642_v60, %v2134_v12  ;;  %v1973_v38 = vld [vmem:[%s2132_s28 + $0x10a] sm:$0xff] }
  0x36   : > { %v960_v50 = vadd.f32 %v928_v10, %v828_v25  ;;  %v316_v40 = vmul.f32 %v643_v4, %v2134_v12  ;;  %v415_v54 = vmul.f32 %v774_v26, %v2136_v13  ;;  %v416_v0 = vmul.f32 %v775_v28, %v2136_v13  ;;  %v1909_v26 = vld [vmem:[%s2132_s28 + $0x108] sm:$0xff]  ;;  %v1910_v28 = vld [vmem:[%s2132_s28 + $0x110] sm:$0xff] }
  0x37   : > { %v961_v1 = vadd.f32 %v929_v11, %v829_v49  ;;  %v1326_v41 = vmul.f32 %v2218_v5, %v2379_v45  ;;  %v547_v42 = vmul.f32 %v906_v43, %v2141_v17  ;;  %v548_v48 = vmul.f32 %v907_v52, %v2141_v17  ;;  %v1941_v43 = vld [vmem:[%s2132_s28 + $0x109] sm:$0xff] }
  0x38   : > { %v1093_v60 = vadd.f32 %v1061_v57, %v960_v50  ;;  %v447_v62 = vadd.f32 %v415_v54, %v315_v39  ;;  %v448_v4 = vadd.f32 %v416_v0, %v316_v40  ;;  %v680_v63 = vmul.f32 %v2294_v58, %v2143_v18 }
  0x39   : > { %v1094_v55 = vadd.f32 %v1062_v51, %v961_v1  ;;  %v681_v10 = vmul.f32 %v2301_v2, %v2143_v18  ;;  %v812_v6 = vmul.f32 %v2303_v7, %v2145_v19  ;;  %v813_v22 = vmul.f32 %v2307_v14, %v2145_v19 }
  0x3a   : > { %v1225_v52 = vadd.f32 %v1193_v32, %v1093_v60  ;;  %v579_v11 = vadd.f32 %v547_v42, %v447_v62  ;;  %v580_v21 = vadd.f32 %v548_v48, %v448_v4  ;;  %v944_v23 = vmul.f32 %v2314_v24, %v2147_v20  ;;  %v1974_v32 = vld [vmem:[%s2132_s28 + $0x112] sm:$0xff] }
  0x3b   : > { %v1226_v37 = vadd.f32 %v1194_v33, %v1094_v55  ;;  %v945_v46 = vmul.f32 %v2316_v30, %v2147_v20  ;;  %v2419_v56 = vmax.f32 %v1909_v26, 0.0  ;;  %v2421_v31 = vmax.f32 %v1910_v28, 0.0 }
  0x3c   : > { %v1357_v57 = vadd.f32 %v1325_v59, %v1225_v52  ;;  %v712_v25 = vadd.f32 %v680_v63, %v579_v11  ;;  %v713_v51 = vadd.f32 %v681_v10, %v580_v21  ;;  %v2424_v49 = vmax.f32 %v1941_v43, 0.0  ;;  %v1895_v52 = vld [vmem:[%s2132_s28 + $0x60] sm:$0xff] }
  0x3d   : > { %v1358_v39 = vadd.f32 %v1326_v41, %v1226_v37  ;;  %v1077_v50 = vmul.f32 %v2152_v27, %v2419_v56  ;;  %v1078_v33 = vmul.f32 %v2152_v27, %v2421_v31  ;;  %v2431_v40 = vmax.f32 %v1942_v29, 0.0 }
  0x3e   : > { %v844_v54 = vadd.f32 %v812_v6, %v712_v25  ;;  %v845_v0 = vadd.f32 %v813_v22, %v713_v51  ;;  %v1209_v1 = vmul.f32 %v2163_v34, %v2424_v49  ;;  %v2435_v59 = vmax.f32 %v1973_v38, 0.0  ;;  %v1928_v38 = vld [vmem:[%s2132_s28 + $0x69] sm:$0xff] }
  0x3f   : > { %v1388_v42 = vpack.c.bf16 %v1358_v39, %v1357_v57  ;;  %v1210_v48 = vmul.f32 %v2163_v34, %v2431_v40  ;;  %v2439_v41 = vmax.f32 %v1974_v32, 0.0  ;;  %v301_v60 = vmul.f32 %v2202_v61, %v2134_v12  ;;  %v1959_v39 = vld [vmem:[%s2132_s28 + $0x62] sm:$0xff] }
  0x40   : > { %v976_v62 = vadd.f32 %v944_v23, %v844_v54  ;;  %v977_v4 = vadd.f32 %v945_v46, %v845_v0  ;;  %v1341_v63 = vmul.f32 %v2218_v5, %v2435_v59  ;;  %v302_v26 = vmul.f32 %v2212_v3, %v2134_v12  ;;  %v1927_v23 = vld [vmem:[%s2132_s28 + $0x61] sm:$0xff] }
  0x41   : > { %2029 = vmatmul.mubr.msk.bf16.vlgmr.msra.gmra.mrb[0].mxu0 %vm1411_vm0, %v1388_v42  ;;  %v1342_v28 = vmul.f32 %v2218_v5, %v2439_v41  ;;  %v401_v55 = vmul.f32 %v2222_v8, %v2136_v13  ;;  %v402_v61 = vmul.f32 %v2224_v9, %v2136_v13  ;;  %v533_v10 = vmul.f32 %v2229_v15, %v2141_v17  ;;  %v1896_v15 = vld [vmem:[%s2132_s28 + $0x68] sm:$0xff] }
  0x42   : > { %v1109_v6 = vadd.f32 %v1077_v50, %v976_v62  ;;  %v1110_v22 = vadd.f32 %v1078_v33, %v977_v4  ;;  %v534_v3 = vmul.f32 %v2231_v16, %v2141_v17  ;;  %v666_v43 = vmul.f32 %v2359_v44, %v2143_v18 }
  0x43   : > { %v433_v11 = vadd.f32 %v401_v55, %v301_v60  ;;  %v434_v21 = vadd.f32 %v402_v61, %v302_v26  ;;  %v667_v8 = vmul.f32 %v2361_v47, %v2143_v18  ;;  %v798_v9 = vmul.f32 %v2363_v53, %v2145_v19 }
  0x44   : > { %v1241_v29 = vadd.f32 %v1209_v1, %v1109_v6  ;;  %v1242_v37 = vadd.f32 %v1210_v48, %v1110_v22  ;;  %v799_v16 = vmul.f32 %v2365_v35, %v2145_v19  ;;  %v930_v46 = vmul.f32 %v2370_v36, %v2147_v20  ;;  %v1960_v1 = vld [vmem:[%s2132_s28 + $0x6a] sm:$0xff] }
  0x45   : > { %v565_v57 = vadd.f32 %v533_v10, %v433_v11  ;;  %v566_v25 = vadd.f32 %v534_v3, %v434_v21  ;;  %v931_v51 = vmul.f32 %v2379_v45, %v2147_v20  ;;  %v2474_v32 = vmax.f32 %v1895_v52, 0.0 }
  0x46   : > { %v1373_v50 = vadd.f32 %v1341_v63, %v1241_v29  ;;  %v1374_v33 = vadd.f32 %v1342_v28, %v1242_v37  ;;  %v2477_v54 = vmax.f32 %v1896_v15, 0.0  ;;  %v2479_v0 = vmax.f32 %v1927_v23, 0.0 }
  0x47   : > { %v698_v42 = vadd.f32 %v666_v43, %v565_v57  ;;  %v699_v48 = vadd.f32 %v667_v8, %v566_v25  ;;  %v1063_v60 = vmul.f32 %v2152_v27, %v2474_v32  ;;  %v2484_v62 = vmax.f32 %v1928_v38, 0.0  ;;  %v1943_v38 = vld [vmem:[%s2132_s28 + $0x121] sm:$0xff] }
  0x48   : > { %v1396_v4 = vpack.c.bf16 %v1374_v33, %v1373_v50  ;;  %v1064_v26 = vmul.f32 %v2152_v27, %v2477_v54  ;;  %v1195_v63 = vmul.f32 %v2163_v34, %v2479_v0  ;;  %v2490_v28 = vmax.f32 %v1959_v39, 0.0 }
  0x49   : > { %v830_v55 = vadd.f32 %v798_v9, %v698_v42  ;;  %v831_v61 = vadd.f32 %v799_v16, %v699_v48  ;;  %v1196_v10 = vmul.f32 %v2163_v34, %v2484_v62  ;;  %v2494_v6 = vmax.f32 %v1960_v1, 0.0 }
  0x4a   : > { %2045 = vmatmul.mubr.msk.bf16.vlgmr.msra.gmra.mrb[0].mxu1 %vm1411_vm0, %v1396_v4  ;;  %v1327_v22 = vmul.f32 %v2218_v5, %v2490_v28  ;;  %v317_v3 = vmul.f32 %v2294_v58, %v2134_v12  ;;  %v318_v43 = vmul.f32 %v2301_v2, %v2134_v12  ;;  %v417_v52 = vmul.f32 %v2303_v7, %v2136_v13 }
  0x4b   : > { %v962_v11 = vadd.f32 %v930_v46, %v830_v55  ;;  %v963_v21 = vadd.f32 %v931_v51, %v831_v61  ;;  %v1328_v8 = vmul.f32 %v2218_v5, %v2494_v6  ;;  %v418_v9 = vmul.f32 %v2307_v14, %v2136_v13  ;;  %v1911_v46 = vld [vmem:[%s2132_s28 + $0x120] sm:$0xff]  ;;  %v1912_v14 = vld [vmem:[%s2132_s28 + $0x128] sm:$0xff] }
  0x4c   : > { %v449_v15 = vadd.f32 %v417_v52, %v317_v3  ;;  %v549_v58 = vmul.f32 %v2314_v24, %v2141_v17  ;;  %v550_v2 = vmul.f32 %v2316_v30, %v2141_v17  ;;  %v682_v23 = vmul.f32 %v2419_v56, %v2143_v18  ;;  %v1944_v51 = vld [vmem:[%s2132_s28 + $0x129] sm:$0xff] }
  0x4d   : > { %v1095_v7 = vadd.f32 %v1063_v60, %v962_v11  ;;  %v1096_v29 = vadd.f32 %v1064_v26, %v963_v21  ;;  %v450_v37 = vadd.f32 %v418_v9, %v318_v43  ;;  %v683_v16 = vmul.f32 %v2421_v31, %v2143_v18  ;;  %v1975_v26 = vld [vmem:[%s2132_s28 + $0x122] sm:$0xff]  ;;  %v1976_v52 = vld [vmem:[%s2132_s28 + $0x12a] sm:$0xff] }
  0x4e   : > { %v581_v57 = vadd.f32 %v549_v58, %v449_v15  ;;  %v814_v24 = vmul.f32 %v2424_v49, %v2145_v19  ;;  %v815_v30 = vmul.f32 %v2431_v40, %v2145_v19  ;;  %v946_v25 = vmul.f32 %v2435_v59, %v2147_v20 }
  0x4f   : > { %v1227_v39 = vadd.f32 %v1195_v63, %v1095_v7  ;;  %v1228_v50 = vadd.f32 %v1196_v10, %v1096_v29  ;;  %v582_v33 = vadd.f32 %v550_v2, %v450_v37  ;;  %v947_v1 = vmul.f32 %v2439_v41, %v2147_v20 }
  0x50   : > { %v714_v42 = vadd.f32 %v682_v23, %v581_v57  ;;  %v2529_v48 = vmax.f32 %v1911_v46, 0.0  ;;  %v2531_v60 = vmax.f32 %v1912_v14, 0.0  ;;  %v2533_v4 = vmax.f32 %v1943_v38, 0.0 }
  0x51   : > { %v1359_v55 = vadd.f32 %v1327_v22, %v1227_v39  ;;  %v1360_v61 = vadd.f32 %v1328_v8, %v1228_v50  ;;  %v715_v3 = vadd.f32 %v683_v16, %v582_v33  ;;  %v2536_v43 = vmax.f32 %v1944_v51, 0.0  ;;  %v1929_v50 = vld [vmem:[%s2132_s28 + $0x79] sm:$0xff] }
  0x52   : > { %v846_v63 = vadd.f32 %v814_v24, %v714_v42  ;;  %v1079_v10 = vmul.f32 %v2152_v27, %v2529_v48  ;;  %v1080_v11 = vmul.f32 %v2152_v27, %v2531_v60  ;;  %v1211_v21 = vmul.f32 %v2163_v34, %v2533_v4 }
  0x53   : > { %v1389_v9 = vpack.c.bf16 %v1360_v61, %v1359_v55  ;;  %v847_v15 = vadd.f32 %v815_v30, %v715_v3  ;;  %v1212_v22 = vmul.f32 %v2163_v34, %v2536_v43  ;;  %v2547_v8 = vmax.f32 %v1975_v26, 0.0  ;;  %v1930_v55 = vld [vmem:[%s2132_s28 + $0x81] sm:$0xff] }
  0x54   : > { %v978_v58 = vadd.f32 %v946_v25, %v846_v63  ;;  %v2549_v2 = vmax.f32 %v1976_v52, 0.0  ;;  %v303_v23 = vmul.f32 %v2359_v44, %v2134_v12  ;;  %v304_v7 = vmul.f32 %v2361_v47, %v2134_v12  ;;  %v1897_v25 = vld [vmem:[%s2132_s28 + $0x78] sm:$0xff] }
  0x55   : > { %2032 = vmatprep.mubr.msk.bf16.mxu0 %vm1411_vm0, %v1389_v9  ;;  %v979_v29 = vadd.f32 %v947_v1, %v847_v15  ;;  %v1343_v37 = vmul.f32 %v2218_v5, %v2547_v8  ;;  %v403_v16 = vmul.f32 %v2363_v53, %v2136_v13  ;;  %v404_v46 = vmul.f32 %v2365_v35, %v2136_v13  ;;  %v1898_v35 = vld [vmem:[%s2132_s28 + $0x80] sm:$0xff] }
  0x56   : > { %v1111_v14 = vadd.f32 %v1079_v10, %v978_v58  ;;  %v1344_v44 = vmul.f32 %v2218_v5, %v2549_v2  ;;  %v535_v47 = vmul.f32 %v2370_v36, %v2141_v17  ;;  %v536_v38 = vmul.f32 %v2379_v45, %v2141_v17  ;;  %v1961_v61 = vld [vmem:[%s2132_s28 + $0x7a] sm:$0xff] }
  0x57   : > { %v1112_v57 = vadd.f32 %v1080_v11, %v979_v29  ;;  %v435_v24 = vadd.f32 %v403_v16, %v303_v23  ;;  %v436_v30 = vadd.f32 %v404_v46, %v304_v7  ;;  %v668_v53 = vmul.f32 %v2474_v32, %v2143_v18 }
  0x58   : > { %v1243_v51 = vadd.f32 %v1211_v21, %v1111_v14  ;;  %v669_v39 = vmul.f32 %v2477_v54, %v2143_v18  ;;  %v800_v36 = vmul.f32 %v2479_v0, %v2145_v19  ;;  %v801_v45 = vmul.f32 %v2484_v62, %v2145_v19 }
  0x59   : > { %v1244_v33 = vadd.f32 %v1212_v22, %v1112_v57  ;;  %v567_v1 = vadd.f32 %v535_v47, %v435_v24  ;;  %v568_v42 = vadd.f32 %v536_v38, %v436_v30  ;;  %v932_v26 = vmul.f32 %v2490_v28, %v2147_v20  ;;  %v1962_v22 = vld [vmem:[%s2132_s28 + $0x82] sm:$0xff] }
  0x5a   : > { %v1375_v3 = vadd.f32 %v1343_v37, %v1243_v51  ;;  %v933_v52 = vmul.f32 %v2494_v6, %v2147_v20  ;;  %v2585_v63 = vmax.f32 %v1897_v25, 0.0  ;;  %v2587_v10 = vmax.f32 %v1898_v35, 0.0 }
  0x5b   : > { %v1376_v11 = vadd.f32 %v1344_v44, %v1244_v33  ;;  %v700_v21 = vadd.f32 %v668_v53, %v567_v1  ;;  %v701_v9 = vadd.f32 %v669_v39, %v568_v42  ;;  %v2589_v15 = vmax.f32 %v1929_v50, 0.0  ;;  %v1914_v33 = vld [vmem:[%s2132_s28 + $0x140] sm:$0xff] }
  0x5c   : > { %v1065_v58 = vmul.f32 %v2152_v27, %v2585_v63  ;;  %v1066_v23 = vmul.f32 %v2152_v27, %v2587_v10  ;;  %v2596_v7 = vmax.f32 %v1930_v55, 0.0  ;;  %v2598_v29 = vmax.f32 %v1961_v61, 0.0  ;;  %v1945_v42 = vld [vmem:[%s2132_s28 + $0x139] sm:$0xff] }
  0x5d   : > { %v1397_v37 = vpack.c.bf16 %v1376_v11, %v1375_v3  ;;  %v832_v16 = vadd.f32 %v800_v36, %v700_v21  ;;  %v833_v46 = vadd.f32 %v801_v45, %v701_v9  ;;  %v1197_v14 = vmul.f32 %v2163_v34, %v2589_v15 }
  0x5e   : > { %v1198_v44 = vmul.f32 %v2163_v34, %v2596_v7  ;;  %v2604_v47 = vmax.f32 %v1962_v22, 0.0  ;;  %v1329_v38 = vmul.f32 %v2218_v5, %v2598_v29  ;;  %v319_v57 = vmul.f32 %v2419_v56, %v2134_v12 }
  0x5f   : > { %2048 = vmatprep.mubr.msk.bf16.mxu1 %vm1411_vm0, %v1397_v37  ;;  %v964_v24 = vadd.f32 %v932_v26, %v832_v16  ;;  %v965_v30 = vadd.f32 %v933_v52, %v833_v46  ;;  %v320_v53 = vmul.f32 %v2421_v31, %v2134_v12  ;;  %v419_v25 = vmul.f32 %v2424_v49, %v2136_v13  ;;  %v1913_v49 = vld [vmem:[%s2132_s28 + $0x138] sm:$0xff]  ;;  %v1946_v52 = vld [vmem:[%s2132_s28 + $0x141] sm:$0xff] }
  0x60   : > { %v1330_v35 = vmul.f32 %v2218_v5, %v2604_v47  ;;  %v420_v51 = vmul.f32 %v2431_v40, %v2136_v13  ;;  %v551_v56 = vmul.f32 %v2435_v59, %v2141_v17  ;;  %v552_v39 = vmul.f32 %v2439_v41, %v2141_v17 }
  0x61   : > { %v1097_v36 = vadd.f32 %v1065_v58, %v964_v24  ;;  %v1098_v45 = vadd.f32 %v1066_v23, %v965_v30  ;;  %v451_v31 = vadd.f32 %v419_v25, %v319_v57  ;;  %v684_v50 = vmul.f32 %v2529_v48, %v2143_v18  ;;  %v1977_v58 = vld [vmem:[%s2132_s28 + $0x13a] sm:$0xff] }
  0x62   : > { %v452_v1 = vadd.f32 %v420_v51, %v320_v53  ;;  %v685_v40 = vmul.f32 %v2531_v60, %v2143_v18  ;;  %v816_v59 = vmul.f32 %v2533_v4, %v2145_v19  ;;  %v817_v41 = vmul.f32 %v2536_v43, %v2145_v19 }
  0x63   : > { %v1229_v26 = vadd.f32 %v1197_v14, %v1097_v36  ;;  %v1230_v55 = vadd.f32 %v1198_v44, %v1098_v45  ;;  %v583_v61 = vadd.f32 %v551_v56, %v451_v31  ;;  %v948_v3 = vmul.f32 %v2547_v8, %v2147_v20  ;;  %v1978_v14 = vld [vmem:[%s2132_s28 + $0x142] sm:$0xff] }
  0x64   : > { %v584_v11 = vadd.f32 %v552_v39, %v452_v1  ;;  %v949_v21 = vmul.f32 %v2549_v2, %v2147_v20  ;;  %v2639_v9 = vmax.f32 %v1913_v49, 0.0  ;;  %v2641_v22 = vmax.f32 %v1914_v33, 0.0 }
  0x65   : > { %v1361_v23 = vadd.f32 %v1329_v38, %v1229_v26  ;;  %v1362_v37 = vadd.f32 %v1330_v35, %v1230_v55  ;;  %v716_v16 = vadd.f32 %v684_v50, %v583_v61  ;;  %v2644_v46 = vmax.f32 %v1945_v42, 0.0 }
  0x66   : > { %v717_v44 = vadd.f32 %v685_v40, %v584_v11  ;;  %v1081_v57 = vmul.f32 %v2152_v27, %v2639_v9  ;;  %v1082_v24 = vmul.f32 %v2152_v27, %v2641_v22  ;;  %v2651_v30 = vmax.f32 %v1946_v52, 0.0 }
  0x67   : > { %v1390_v53 = vpack.c.bf16 %v1362_v37, %v1361_v23  ;;  %v848_v25 = vadd.f32 %v816_v59, %v716_v16  ;;  %v1213_v51 = vmul.f32 %v2163_v34, %v2644_v46  ;;  %v2655_v38 = vmax.f32 %v1977_v58, 0.0  ;;  %v1932_v58 = vld [vmem:[%s2132_s28 + $0x99] sm:$0xff] }
  0x68   : > { %v849_v35 = vadd.f32 %v817_v41, %v717_v44  ;;  %v1214_v56 = vmul.f32 %v2163_v34, %v2651_v30  ;;  %v2659_v39 = vmax.f32 %v1978_v14, 0.0  ;;  %v305_v36 = vmul.f32 %v2474_v32, %v2134_v12  ;;  %v1963_v44 = vld [vmem:[%s2132_s28 + $0x92] sm:$0xff] }
  0x69   : > { %2033 = vmatmul.mubr.msk.bf16.gmra.mrb[4].mxu0 %vm1411_vm0, %v1390_v53  ;;  %v980_v45 = vadd.f32 %v948_v3, %v848_v25  ;;  %v1345_v31 = vmul.f32 %v2218_v5, %v2655_v38  ;;  %v306_v50 = vmul.f32 %v2477_v54, %v2134_v12  ;;  %v405_v49 = vmul.f32 %v2479_v0, %v2136_v13  ;;  %v1899_v0 = vld [vmem:[%s2132_s28 + $0x90] sm:$0xff] }
  0x6a   : > { %v981_v33 = vadd.f32 %v949_v21, %v849_v35  ;;  %v1346_v1 = vmul.f32 %v2218_v5, %v2659_v39  ;;  %v406_v32 = vmul.f32 %v2484_v62, %v2136_v13  ;;  %v537_v40 = vmul.f32 %v2490_v28, %v2141_v17  ;;  %v1900_v28 = vld [vmem:[%s2132_s28 + $0x98] sm:$0xff] }
  0x6b   : > { %v1113_v59 = vadd.f32 %v1081_v57, %v980_v45  ;;  %v437_v41 = vadd.f32 %v405_v49, %v305_v36  ;;  %v538_v54 = vmul.f32 %v2494_v6, %v2141_v17  ;;  %v670_v42 = vmul.f32 %v2585_v63, %v2143_v18  ;;  %v1931_v3 = vld [vmem:[%s2132_s28 + $0x91] sm:$0xff] }
  0x6c   : > { %v1114_v26 = vadd.f32 %v1082_v24, %v981_v33  ;;  %v438_v55 = vadd.f32 %v406_v32, %v306_v50  ;;  %v671_v61 = vmul.f32 %v2587_v10, %v2143_v18  ;;  %v802_v62 = vmul.f32 %v2589_v15, %v2145_v19 }
  0x6d   : > { %v1245_v52 = vadd.f32 %v1213_v51, %v1113_v59  ;;  %v569_v11 = vadd.f32 %v537_v40, %v437_v41  ;;  %v803_v6 = vmul.f32 %v2596_v7, %v2145_v19  ;;  %v934_v21 = vmul.f32 %v2598_v29, %v2147_v20  ;;  %v1964_v51 = vld [vmem:[%s2132_s28 + $0x9a] sm:$0xff] }
  0x6e   : > { %v1246_v23 = vadd.f32 %v1214_v56, %v1114_v26  ;;  %v570_v37 = vadd.f32 %v538_v54, %v438_v55  ;;  %v935_v16 = vmul.f32 %v2604_v47, %v2147_v20  ;;  %v2694_v14 = vmax.f32 %v1899_v0, 0.0 }
  0x6f   : > { %v1377_v57 = vadd.f32 %v1345_v31, %v1245_v52  ;;  %v702_v24 = vadd.f32 %v670_v42, %v569_v11  ;;  %v2697_v53 = vmax.f32 %v1900_v28, 0.0  ;;  %v2699_v25 = vmax.f32 %v1931_v3, 0.0 }
  0x70   : > { %v1378_v35 = vadd.f32 %v1346_v1, %v1246_v23  ;;  %v703_v36 = vadd.f32 %v671_v61, %v570_v37  ;;  %v1067_v45 = vmul.f32 %v2152_v27, %v2694_v14  ;;  %v2704_v56 = vmax.f32 %v1932_v58, 0.0  ;;  %v1947_v58 = vld [vmem:[%s2132_s28 + $0x151] sm:$0xff] }
  0x71   : > { %v834_v50 = vadd.f32 %v802_v62, %v702_v24  ;;  %v1068_v49 = vmul.f32 %v2152_v27, %v2697_v53  ;;  %v1199_v31 = vmul.f32 %v2163_v34, %v2699_v25  ;;  %v2710_v33 = vmax.f32 %v1963_v44, 0.0 }
  0x72   : > { %v1398_v32 = vpack.c.bf16 %v1378_v35, %v1377_v57  ;;  %v835_v40 = vadd.f32 %v803_v6, %v703_v36  ;;  %v1200_v1 = vmul.f32 %v2163_v34, %v2704_v56  ;;  %v2714_v59 = vmax.f32 %v1964_v51, 0.0  ;;  %v1979_v35 = vld [vmem:[%s2132_s28 + $0x152] sm:$0xff] }
  0x73   : > { %v966_v41 = vadd.f32 %v934_v21, %v834_v50  ;;  %v1331_v54 = vmul.f32 %v2218_v5, %v2710_v33  ;;  %v321_v42 = vmul.f32 %v2529_v48, %v2134_v12  ;;  %v322_v0 = vmul.f32 %v2531_v60, %v2134_v12  ;;  %v1915_v21 = vld [vmem:[%s2132_s28 + $0x150] sm:$0xff] }
  0x74   : > { %2049 = vmatmul.mubr.msk.bf16.gmra.mrb[4].mxu1 %vm1411_vm0, %v1398_v32  ;;  %v967_v26 = vadd.f32 %v935_v16, %v835_v40  ;;  %v1332_v55 = vmul.f32 %v2218_v5, %v2714_v59  ;;  %v421_v61 = vmul.f32 %v2533_v4, %v2136_v13  ;;  %v422_v62 = vmul.f32 %v2536_v43, %v2136_v13  ;;  %v1916_v43 = vld [vmem:[%s2132_s28 + $0x158] sm:$0xff] }
  0x75   : > { %v1099_v28 = vadd.f32 %v1067_v45, %v966_v41  ;;  %v553_v48 = vmul.f32 %v2547_v8, %v2141_v17  ;;  %v554_v60 = vmul.f32 %v2549_v2, %v2141_v17  ;;  %v686_v3 = vmul.f32 %v2639_v9, %v2143_v18  ;;  %v1948_v16 = vld [vmem:[%s2132_s28 + $0x159] sm:$0xff] }
  0x76   : > { %v1100_v52 = vadd.f32 %v1068_v49, %v967_v26  ;;  %v453_v11 = vadd.f32 %v421_v61, %v321_v42  ;;  %v454_v6 = vadd.f32 %v422_v62, %v322_v0  ;;  %v687_v4 = vmul.f32 %v2641_v22, %v2143_v18  ;;  %v1980_v42 = vld [vmem:[%s2132_s28 + $0x15a] sm:$0xff] }
  0x77   : > { %v1231_v23 = vadd.f32 %v1199_v31, %v1099_v28  ;;  %v818_v8 = vmul.f32 %v2644_v46, %v2145_v19  ;;  %v819_v2 = vmul.f32 %v2651_v30, %v2145_v19  ;;  %v950_v37 = vmul.f32 %v2655_v38, %v2147_v20 }
  0x78   : > { %v1232_v44 = vadd.f32 %v1200_v1, %v1100_v52  ;;  %v585_v57 = vadd.f32 %v553_v48, %v453_v11  ;;  %v586_v24 = vadd.f32 %v554_v60, %v454_v6  ;;  %v951_v51 = vmul.f32 %v2659_v39, %v2147_v20 }
  0x79   : > { %v1363_v36 = vadd.f32 %v1331_v54, %v1231_v23  ;;  %v2750_v45 = vmax.f32 %v1915_v21, 0.0  ;;  %v2752_v50 = vmax.f32 %v1916_v43, 0.0  ;;  %v2754_v49 = vmax.f32 %v1947_v58, 0.0 }
  0x7a   : > { %v1364_v31 = vadd.f32 %v1332_v55, %v1232_v44  ;;  %v718_v32 = vadd.f32 %v686_v3, %v585_v57  ;;  %v719_v40 = vadd.f32 %v687_v4, %v586_v24  ;;  %v2756_v41 = vmax.f32 %v1948_v16, 0.0  ;;  %v1933_v16 = vld [vmem:[%s2132_s28 + $0xa9] sm:$0xff] }
  0x7b   : > { %v1083_v1 = vmul.f32 %v2152_v27, %v2750_v45  ;;  %v1084_v0 = vmul.f32 %v2152_v27, %v2752_v50  ;;  %v1215_v54 = vmul.f32 %v2163_v34, %v2754_v49  ;;  %v2765_v26 = vmax.f32 %v1979_v35, 0.0 }
  0x7c   : > { %v1391_v61 = vpack.c.bf16 %v1364_v31, %v1363_v36  ;;  %v850_v62 = vadd.f32 %v818_v8, %v718_v32  ;;  %v851_v28 = vadd.f32 %v819_v2, %v719_v40  ;;  %v1216_v55 = vmul.f32 %v2163_v34, %v2756_v41  ;;  %v1934_v36 = vld [vmem:[%s2132_s28 + $0xb1] sm:$0xff] }
  0x7d   : > { %v2769_v48 = vmax.f32 %v1980_v42, 0.0  ;;  %v1347_v60 = vmul.f32 %v2218_v5, %v2765_v26  ;;  %v307_v3 = vmul.f32 %v2585_v63, %v2134_v12  ;;  %v308_v52 = vmul.f32 %v2587_v10, %v2134_v12 }
  0x7e   : > { %2036 = vmatprep.mubr.msk.bf16.mxu0 %vm1411_vm0, %v1391_v61  ;;  %v982_v11 = vadd.f32 %v950_v37, %v850_v62  ;;  %v983_v6 = vadd.f32 %v951_v51, %v851_v28  ;;  %v407_v4 = vmul.f32 %v2589_v15, %v2136_v13  ;;  %v408_v21 = vmul.f32 %v2596_v7, %v2136_v13  ;;  %v1901_v37 = vld [vmem:[%s2132_s28 + $0xa8] sm:$0xff]  ;;  %v1902_v7 = vld [vmem:[%s2132_s28 + $0xb0] sm:$0xff] }
  0x7f   : > { %v1348_v43 = vmul.f32 %v2218_v5, %v2769_v48  ;;  %v539_v63 = vmul.f32 %v2598_v29, %v2141_v17  ;;  %v540_v10 = vmul.f32 %v2604_v47, %v2141_v17  ;;  %v672_v58 = vmul.f32 %v2694_v14, %v2143_v18 }
  0x80   : > { %v1115_v23 = vadd.f32 %v1083_v1, %v982_v11  ;;  %v1116_v8 = vadd.f32 %v1084_v0, %v983_v6  ;;  %v439_v2 = vadd.f32 %v407_v4, %v307_v3  ;;  %v440_v15 = vadd.f32 %v408_v21, %v308_v52  ;;  %v1965_v1 = vld [vmem:[%s2132_s28 + $0xaa] sm:$0xff]  ;;  %v1966_v3 = vld [vmem:[%s2132_s28 + $0xb2] sm:$0xff] }
  0x81   : > { %v673_v5 = vmul.f32 %v2697_v53, %v2143_v18  ;;  %v804_v29 = vmul.f32 %v2699_v25, %v2145_v19  ;;  %v805_v47 = vmul.f32 %v2704_v56, %v2145_v19  ;;  %v936_v44 = vmul.f32 %v2710_v33, %v2147_v20 }
  0x82   : > { %v1247_v57 = vadd.f32 %v1215_v54, %v1115_v23  ;;  %v1248_v24 = vadd.f32 %v1216_v55, %v1116_v8  ;;  %v571_v51 = vadd.f32 %v539_v63, %v439_v2  ;;  %v572_v35 = vadd.f32 %v540_v10, %v440_v15  ;;  %v2834_v2 = vld [vmem:[%s3260_s1 + $0x8] ss:$0 sm:$0xff] }
  0x83   : > { %v937_v31 = vmul.f32 %v2714_v59, %v2147_v20  ;;  %v2804_v32 = vmax.f32 %v1901_v37, 0.0  ;;  %v2806_v40 = vmax.f32 %v1902_v7, 0.0  ;;  %v2808_v42 = vmax.f32 %v1933_v16, 0.0 }
  0x84   : > { %v1379_v0 = vadd.f32 %v1347_v60, %v1247_v57  ;;  %v1380_v61 = vadd.f32 %v1348_v43, %v1248_v24  ;;  %v704_v62 = vadd.f32 %v672_v58, %v571_v51  ;;  %v705_v28 = vadd.f32 %v673_v5, %v572_v35  ;;  %v1918_v57 = vld [vmem:[%s2132_s28 + $0x170] sm:$0xff] }
  0x85   : > { %v1069_v54 = vmul.f32 %v2152_v27, %v2804_v32  ;;  %v1070_v55 = vmul.f32 %v2152_v27, %v2806_v40  ;;  %v2816_v52 = vmax.f32 %v1934_v36, 0.0  ;;  %v1201_v11 = vmul.f32 %v2163_v34, %v2808_v42  ;;  %v1949_v51 = vld [vmem:[%s2132_s28 + $0x169] sm:$0xff] }
  0x86   : > { %v1399_v6 = vpack.c.bf16 %v1380_v61, %v1379_v0  ;;  %v836_v4 = vadd.f32 %v804_v29, %v704_v62  ;;  %v837_v21 = vadd.f32 %v805_v47, %v705_v28  ;;  %v2820_v63 = vmax.f32 %v1965_v1, 0.0  ;;  %v1950_v0 = vld [vmem:[%s2132_s28 + $0x171] sm:$0xff] }
  0x87   : > { %v1202_v60 = vmul.f32 %v2163_v34, %v2816_v52  ;;  %v2824_v43 = vmax.f32 %v1966_v3, 0.0  ;;  %v323_v10 = vmul.f32 %v2639_v9, %v2134_v12  ;;  %v324_v58 = vmul.f32 %v2641_v22, %v2134_v12 }
  0x88   : > { %2052 = vmatprep.mubr.msk.bf16.mxu1 %vm1411_vm0, %v1399_v6  ;;  %v968_v23 = vadd.f32 %v936_v44, %v836_v4  ;;  %v969_v8 = vadd.f32 %v937_v31, %v837_v21  ;;  %v1333_v15 = vmul.f32 %v2834_v2, %v2820_v63  ;;  %v423_v9 = vmul.f32 %v2644_v46, %v2136_v13  ;;  %v1917_v46 = vld [vmem:[%s2132_s28 + $0x168] sm:$0xff] }
  0x89   : > { %v1334_v22 = vmul.f32 %v2834_v2, %v2824_v43  ;;  %v424_v37 = vmul.f32 %v2651_v30, %v2136_v13  ;;  %v555_v7 = vmul.f32 %v2655_v38, %v2141_v17  ;;  %v556_v16 = vmul.f32 %v2659_v39, %v2141_v17 }
  0x8a   : > { %v1101_v5 = vadd.f32 %v1069_v54, %v968_v23  ;;  %v1102_v29 = vadd.f32 %v1070_v55, %v969_v8  ;;  %v455_v47 = vadd.f32 %v423_v9, %v323_v10  ;;  %v688_v44 = vmul.f32 %v2750_v45, %v2143_v18  ;;  %v1981_v54 = vld [vmem:[%s2132_s28 + $0x16a] sm:$0xff] }
  0x8b   : > { %v456_v24 = vadd.f32 %v424_v37, %v324_v58  ;;  %v689_v30 = vmul.f32 %v2752_v50, %v2143_v18  ;;  %v820_v38 = vmul.f32 %v2754_v49, %v2145_v19  ;;  %v821_v39 = vmul.f32 %v2756_v41, %v2145_v19 }
  0x8c   : > { %v1233_v35 = vadd.f32 %v1201_v11, %v1101_v5  ;;  %v1234_v36 = vadd.f32 %v1202_v60, %v1102_v29  ;;  %v587_v31 = vadd.f32 %v555_v7, %v455_v47  ;;  %v952_v1 = vmul.f32 %v2765_v26, %v2147_v20  ;;  %v1982_v11 = vld [vmem:[%s2132_s28 + $0x172] sm:$0xff] }
  0x8d   : > { %v588_v61 = vadd.f32 %v556_v16, %v456_v24  ;;  %v953_v62 = vmul.f32 %v2769_v48, %v2147_v20  ;;  %v2864_v28 = vmax.f32 %v1917_v46, 0.0  ;;  %v2866_v3 = vmax.f32 %v1918_v57, 0.0 }
  0x8e   : > { %v1365_v55 = vadd.f32 %v1333_v15, %v1233_v35  ;;  %v1366_v6 = vadd.f32 %v1334_v22, %v1234_v36  ;;  %v720_v4 = vadd.f32 %v688_v44, %v587_v31  ;;  %v2869_v21 = vmax.f32 %v1949_v51, 0.0  ;;  %v2913_v31 = vld [vmem:[%s2132_s28 + $0xc8] sm:$0xff] }
  0x8f   : > { %v721_v60 = vadd.f32 %v689_v30, %v588_v61  ;;  %v1085_v10 = vmul.f32 %v2152_v27, %v2864_v28  ;;  %v1086_v58 = vmul.f32 %v2152_v27, %v2866_v3  ;;  %v2876_v23 = vmax.f32 %v1950_v0, 0.0 }
  0x90   : > { %v1392_v8 = vpack.c.bf16 %v1366_v6, %v1365_v55  ;;  %v852_v9 = vadd.f32 %v820_v38, %v720_v4  ;;  %v1217_v37 = vmul.f32 %v2163_v34, %v2869_v21  ;;  %v2880_v15 = vmax.f32 %v1981_v54, 0.0  ;;  %v2923_v54 = vld [vmem:[%s2132_s28 + $0xc9] sm:$0xff] }
  0x91   : > { %v853_v22 = vadd.f32 %v821_v39, %v721_v60  ;;  %v1218_v7 = vmul.f32 %v2163_v34, %v2876_v23  ;;  %v2884_v16 = vmax.f32 %v1982_v11, 0.0  ;;  %v309_v5 = vmul.f32 %v2694_v14, %v2134_v12  ;;  %v2929_v60 = vld [vmem:[%s2132_s28 + $0xc2] sm:$0xff] }
  0x92   : > { %2037 = vmatmul.mubr.msk.bf16.gmra.mrb[8].mxu0 %vm1411_vm0, %v1392_v8  ;;  %v984_v29 = vadd.f32 %v952_v1, %v852_v9  ;;  %v1349_v47 = vmul.f32 %v2834_v2, %v2880_v15  ;;  %v310_v44 = vmul.f32 %v2697_v53, %v2134_v12  ;;  %v409_v46 = vmul.f32 %v2699_v25, %v2136_v13  ;;  %v2906_v25 = vld [vmem:[%s2132_s28 + $0xc0] sm:$0xff] }
  0x93   : > { %v985_v57 = vadd.f32 %v953_v62, %v853_v22  ;;  %v1350_v24 = vmul.f32 %v2834_v2, %v2884_v16  ;;  %v410_v14 = vmul.f32 %v2704_v56, %v2136_v13  ;;  %v541_v30 = vmul.f32 %v2710_v33, %v2141_v17  ;;  %v2916_v1 = vld [vmem:[%s2132_s28 + $0xc1] sm:$0xff] }
  0x94   : > { %v1117_v38 = vadd.f32 %v1085_v10, %v984_v29  ;;  %v441_v39 = vadd.f32 %v409_v46, %v309_v5  ;;  %v542_v53 = vmul.f32 %v2714_v59, %v2141_v17  ;;  %v674_v51 = vmul.f32 %v2804_v32, %v2143_v18 }
  0x95   : > { %v1118_v35 = vadd.f32 %v1086_v58, %v985_v57  ;;  %v442_v36 = vadd.f32 %v410_v14, %v310_v44  ;;  %v675_v56 = vmul.f32 %v2806_v40, %v2143_v18  ;;  %v806_v33 = vmul.f32 %v2808_v42, %v2145_v19 }
  0x96   : > { %v1249_v59 = vadd.f32 %v1217_v37, %v1117_v38  ;;  %v573_v0 = vadd.f32 %v541_v30, %v441_v39  ;;  %v807_v61 = vmul.f32 %v2816_v52, %v2145_v19  ;;  %v938_v62 = vmul.f32 %v2820_v63, %v2147_v20  ;;  %v2934_v37 = vld [vmem:[%s2132_s28 + $0xca] sm:$0xff] }
  0x97   : > { %v1250_v55 = vadd.f32 %v1218_v7, %v1118_v35  ;;  %v574_v6 = vadd.f32 %v542_v53, %v442_v36  ;;  %v939_v4 = vmul.f32 %v2824_v43, %v2147_v20  ;;  %v1035_v11 = vmax.f32 %v2906_v25, 0.0 }
  0x98   : > { %v1381_v10 = vadd.f32 %v1349_v47, %v1249_v59  ;;  %v706_v58 = vadd.f32 %v674_v51, %v573_v0  ;;  %v1036_v8 = vmax.f32 %v2913_v31, 0.0  ;;  %v1167_v9 = vmax.f32 %v2916_v1, 0.0 }
  0x99   : > { %v1382_v22 = vadd.f32 %v1350_v24, %v1250_v55  ;;  %v707_v5 = vadd.f32 %v675_v56, %v574_v6  ;;  %v1071_v7 = vmul.f32 %v2152_v27, %v1035_v11  ;;  %v1168_v29 = vmax.f32 %v2923_v54, 0.0 }
  0x9a   : > { %v838_v44 = vadd.f32 %v806_v33, %v706_v58  ;;  %v1072_v47 = vmul.f32 %v2152_v27, %v1036_v8  ;;  %v1203_v46 = vmul.f32 %v2163_v34, %v1167_v9  ;;  %v1299_v57 = vmax.f32 %v2929_v60, 0.0  ;;  %v1970_v60 = vld [vmem:[%s2132_s28 + $0xe2] sm:$0xff] }
  0x9b   : > { %v1400_v14 = vpack.c.bf16 %v1382_v22, %v1381_v10  ;;  %v839_v24 = vadd.f32 %v807_v61, %v707_v5  ;;  %v1204_v30 = vmul.f32 %v2163_v34, %v1168_v29  ;;  %v1300_v38 = vmax.f32 %v2934_v37, 0.0  ;;  %v2981_v10 = vld [vmem:[%s2132_s28 + $0x181] sm:$0xff]  ;;  %v2990_v5 = vld [vmem:[%s2132_s28 + $0x189] sm:$0xff] }
  0x9c   : > { %v970_v39 = vadd.f32 %v938_v62, %v838_v44  ;;  %v1335_v53 = vmul.f32 %v2834_v2, %v1299_v57  ;;  %v325_v51 = vmul.f32 %v2750_v45, %v2134_v12  ;;  %v326_v35 = vmul.f32 %v2752_v50, %v2134_v12 }
  0x9d   : > { %2053 = vmatmul.mubr.msk.bf16.gmra.mrb[8].mxu1 %vm1411_vm0, %v1400_v14  ;;  %v971_v36 = vadd.f32 %v939_v4, %v839_v24  ;;  %v1336_v56 = vmul.f32 %v2834_v2, %v1300_v38  ;;  %v425_v33 = vmul.f32 %v2754_v49, %v2136_v13  ;;  %v426_v59 = vmul.f32 %v2756_v41, %v2136_v13  ;;  %v2975_v4 = vld [vmem:[%s2132_s28 + $0x180] sm:$0xff]  ;;  %v2978_v41 = vld [vmem:[%s2132_s28 + $0x188] sm:$0xff] }
  0x9e   : > { %v1103_v45 = vadd.f32 %v1071_v7, %v970_v39  ;;  %v557_v0 = vmul.f32 %v2765_v26, %v2141_v17  ;;  %v558_v50 = vmul.f32 %v2769_v48, %v2141_v17  ;;  %v690_v61 = vmul.f32 %v2864_v28, %v2143_v18  ;;  %v2995_v24 = vld [vmem:[%s2132_s28 + $0x182] sm:$0xff] }
  0x9f   : > { %v1104_v62 = vadd.f32 %v1072_v47, %v971_v36  ;;  %v457_v55 = vadd.f32 %v425_v33, %v325_v51  ;;  %v458_v6 = vadd.f32 %v426_v59, %v326_v35  ;;  %v691_v49 = vmul.f32 %v2866_v3, %v2143_v18 }
  0xa0   : > { %v1235_v26 = vadd.f32 %v1203_v46, %v1103_v45  ;;  %v822_v48 = vmul.f32 %v2869_v21, %v2145_v19  ;;  %v823_v58 = vmul.f32 %v2876_v23, %v2145_v19  ;;  %v954_v22 = vmul.f32 %v2880_v15, %v2147_v20 }
  0xa1   : > { %v1236_v7 = vadd.f32 %v1204_v30, %v1104_v62  ;;  %v589_v44 = vadd.f32 %v557_v0, %v457_v55  ;;  %v590_v47 = vadd.f32 %v558_v50, %v458_v6  ;;  %v955_v14 = vmul.f32 %v2884_v16, %v2147_v20  ;;  %v3002_v30 = vld [vmem:[%s2132_s28 + $0x18a] sm:$0xff] }
  0xa2   : > { %v1367_v46 = vadd.f32 %v1335_v53, %v1235_v26  ;;  %v1051_v39 = vmax.f32 %v2975_v4, 0.0  ;;  %v1052_v51 = vmax.f32 %v2978_v41, 0.0  ;;  %v1183_v35 = vmax.f32 %v2981_v10, 0.0 }
  0xa3   : > { %v1368_v36 = vadd.f32 %v1336_v56, %v1236_v7  ;;  %v722_v33 = vadd.f32 %v690_v61, %v589_v44  ;;  %v723_v59 = vadd.f32 %v691_v49, %v590_v47  ;;  %v1184_v45 = vmax.f32 %v2990_v5, 0.0 }
  0xa4   : > { %v1087_v0 = vmul.f32 %v2152_v27, %v1051_v39  ;;  %v1088_v53 = vmul.f32 %v2152_v27, %v1052_v51  ;;  %v1219_v50 = vmul.f32 %v2163_v34, %v1183_v35  ;;  %v1315_v56 = vmax.f32 %v2995_v24, 0.0 }
  0xa5   : > { %v1393_v61 = vpack.c.bf16 %v1368_v36, %v1367_v46  ;;  %v854_v62 = vadd.f32 %v822_v48, %v722_v33  ;;  %v855_v55 = vadd.f32 %v823_v58, %v723_v59  ;;  %v1220_v6 = vmul.f32 %v2163_v34, %v1184_v45 }
  0xa6   : > { %v1316_v49 = vmax.f32 %v3002_v30, 0.0  ;;  %v1351_v26 = vmul.f32 %v2834_v2, %v1315_v56  ;;  %v311_v7 = vmul.f32 %v2804_v32, %v2134_v12  ;;  %v312_v44 = vmul.f32 %v2806_v40, %v2134_v12 }
  0xa7   : > { %2040 = vmatprep.mubr.msk.bf16.mxu0 %vm1411_vm0, %v1393_v61  ;;  %v986_v48 = vadd.f32 %v954_v22, %v854_v62  ;;  %v987_v58 = vadd.f32 %v955_v14, %v855_v55  ;;  %v411_v47 = vmul.f32 %v2808_v42, %v2136_v13  ;;  %v412_v46 = vmul.f32 %v2816_v52, %v2136_v13  ;;  %v1905_v52 = vld [vmem:[%s2132_s28 + $0xd8] sm:$0xff]  ;;  %v1906_v61 = vld [vmem:[%s2132_s28 + $0xe0] sm:$0xff] }
  0xa8   : > { %v1352_v36 = vmul.f32 %v2834_v2, %v1316_v49  ;;  %v543_v32 = vmul.f32 %v2820_v63, %v2141_v17  ;;  %v544_v40 = vmul.f32 %v2824_v43, %v2141_v17  ;;  %v676_v22 = vmul.f32 %v1035_v11, %v2143_v18  ;;  %v1937_v62 = vld [vmem:[%s2132_s28 + $0xd9] sm:$0xff] }
  0xa9   : > { %v1119_v14 = vadd.f32 %v1087_v0, %v986_v48  ;;  %v1120_v42 = vadd.f32 %v1088_v53, %v987_v58  ;;  %v443_v33 = vadd.f32 %v411_v47, %v311_v7  ;;  %v444_v59 = vadd.f32 %v412_v46, %v312_v44  ;;  %v1938_v44 = vld [vmem:[%s2132_s28 + $0xe1] sm:$0xff] }
  0xaa   : > { %v677_v63 = vmul.f32 %v1036_v8, %v2143_v18  ;;  %v808_v43 = vmul.f32 %v1167_v9, %v2145_v19  ;;  %v809_v25 = vmul.f32 %v1168_v29, %v2145_v19  ;;  %v940_v11 = vmul.f32 %v1299_v57, %v2147_v20  ;;  %v1969_v48 = vld [vmem:[%s2132_s28 + $0xda] sm:$0xff] }
  0xab   : > { %v1251_v0 = vadd.f32 %v1219_v50, %v1119_v14  ;;  %v1252_v53 = vadd.f32 %v1220_v6, %v1120_v42  ;;  %v575_v55 = vadd.f32 %v543_v32, %v443_v33  ;;  %v576_v7 = vadd.f32 %v544_v40, %v444_v59 }
  0xac   : > { %v941_v31 = vmul.f32 %v1300_v38, %v2147_v20  ;;  %v1037_v1 = vmax.f32 %v1905_v52, 0.0  ;;  %v1038_v8 = vmax.f32 %v1906_v61, 0.0  ;;  %v1169_v9 = vmax.f32 %v1937_v62, 0.0 }
  0xad   : > { %v1383_v54 = vadd.f32 %v1351_v26, %v1251_v0  ;;  %v1384_v29 = vadd.f32 %v1352_v36, %v1252_v53  ;;  %v708_v58 = vadd.f32 %v676_v22, %v575_v55  ;;  %v709_v47 = vadd.f32 %v677_v63, %v576_v7  ;;  %v1985_v7 = vld [vmem:[%s2132_s28 + $0x19a] sm:$0xff] }
  0xae   : > { %v1073_v57 = vmul.f32 %v2152_v27, %v1037_v1  ;;  %v1074_v50 = vmul.f32 %v2152_v27, %v1038_v8  ;;  %v1170_v6 = vmax.f32 %v1938_v44, 0.0  ;;  %v1205_v46 = vmul.f32 %v2163_v34, %v1169_v9  ;;  %v1986_v1 = vld [vmem:[%s2132_s28 + $0x1a2] sm:$0xff] }
  0xaf   : > { %v1401_v32 = vpack.c.bf16 %v1384_v29, %v1383_v54  ;;  %v840_v40 = vadd.f32 %v808_v43, %v708_v58  ;;  %v841_v37 = vadd.f32 %v809_v25, %v709_v47  ;;  %v1301_v38 = vmax.f32 %v1969_v48, 0.0 }
  0xb0   : > { %v1206_v14 = vmul.f32 %v2163_v34, %v1170_v6  ;;  %v1302_v42 = vmax.f32 %v1970_v60, 0.0  ;;  %v327_v26 = vmul.f32 %v2864_v28, %v2134_v12  ;;  %v328_v36 = vmul.f32 %v2866_v3, %v2134_v12 }
  0xb1   : > { %2056 = vmatprep.mubr.msk.bf16.mxu1 %vm1411_vm0, %v1401_v32  ;;  %v972_v22 = vadd.f32 %v940_v11, %v840_v40  ;;  %v973_v33 = vadd.f32 %v941_v31, %v841_v37  ;;  %v1337_v59 = vmul.f32 %v2834_v2, %v1301_v38  ;;  %v427_v52 = vmul.f32 %v2869_v21, %v2136_v13  ;;  %v1921_v21 = vld [vmem:[%s2132_s28 + $0x198] sm:$0xff]  ;;  %v1922_v11 = vld [vmem:[%s2132_s28 + $0x1a0] sm:$0xff] }
  0xb2   : > { %v1338_v61 = vmul.f32 %v2834_v2, %v1302_v42  ;;  %v428_v62 = vmul.f32 %v2876_v23, %v2136_v13  ;;  %v559_v28 = vmul.f32 %v2880_v15, %v2141_v17  ;;  %v560_v12 = vmul.f32 %v2884_v16, %v2141_v17  ;;  %v1953_v17 = vld [vmem:[%s2132_s28 + $0x199] sm:$0xff] }
  0xb3   : > { %v1105_v3 = vadd.f32 %v1073_v57, %v972_v22  ;;  %v1106_v63 = vadd.f32 %v1074_v50, %v973_v33  ;;  %v459_v43 = vadd.f32 %v427_v52, %v327_v26  ;;  %v692_v25 = vmul.f32 %v1051_v39, %v2143_v18  ;;  %v1954_v39 = vld [vmem:[%s2132_s28 + $0x1a1] sm:$0xff] }
  0xb4   : > { %v460_v0 = vadd.f32 %v428_v62, %v328_v36  ;;  %v693_v13 = vmul.f32 %v1052_v51, %v2143_v18  ;;  %v824_v23 = vmul.f32 %v1183_v35, %v2145_v19  ;;  %v825_v4 = vmul.f32 %v1184_v45, %v2145_v19 }
  0xb5   : > { %v1237_v15 = vadd.f32 %v1205_v46, %v1105_v3  ;;  %v1238_v16 = vadd.f32 %v1206_v14, %v1106_v63  ;;  %v591_v53 = vadd.f32 %v559_v28, %v459_v43  ;;  %v956_v41 = vmul.f32 %v1315_v56, %v2147_v20 }
  0xb6   : > { %v592_v55 = vadd.f32 %v560_v12, %v460_v0  ;;  %v1053_v18 = vmax.f32 %v1921_v21, 0.0  ;;  %v1054_v51 = vmax.f32 %v1922_v11, 0.0  ;;  %v1185_v31 = vmax.f32 %v1953_v17, 0.0 }
  0xb7   : > { %v1369_v10 = vadd.f32 %v1337_v59, %v1237_v15  ;;  %v1370_v35 = vadd.f32 %v1338_v61, %v1238_v16  ;;  %v724_v44 = vadd.f32 %v692_v25, %v591_v53  ;;  %v957_v5 = vmul.f32 %v1316_v49, %v2147_v20 }
  0xb8   : > { %v725_v8 = vadd.f32 %v693_v13, %v592_v55  ;;  %v1186_v19 = vmax.f32 %v1954_v39, 0.0  ;;  %v1089_v48 = vmul.f32 %v2152_v27, %v1053_v18  ;;  %v1317_v24 = vmax.f32 %v1985_v7, 0.0 }
  0xb9   : > { %v1394_v45 = vpack.c.bf16 %v1370_v35, %v1369_v10  ;;  %v856_v9 = vadd.f32 %v824_v23, %v724_v44  ;;  %v1090_v54 = vmul.f32 %v2152_v27, %v1054_v51  ;;  %v1318_v29 = vmax.f32 %v1986_v1, 0.0 }
  0xba   : > { %v857_v56 = vadd.f32 %v825_v4, %v725_v8  ;;  %v1221_v47 = vmul.f32 %v2163_v34, %v1185_v31  ;;  %v1222_v30 = vmul.f32 %v2163_v34, %v1186_v19  ;;  %v1353_v49 = vmul.f32 %v2834_v2, %v1317_v24  ;;  %v3116_v34 = vld [vmem:[%s3262_s3] ss:$0 sm:$0xff] }
  0xbb   : > { %2041 = vmatmul.mubr.msk.bf16.gmra.mrb[12].mxu0 %vm1411_vm0, %v1394_v45  ;;  %v988_v58 = vadd.f32 %v956_v41, %v856_v9  ;;  %v1354_v50 = vmul.f32 %v2834_v2, %v1318_v29  ;;  %v3121_v2 = vld [vmem:[%s3263_s4] ss:$0 sm:$0xff] }
  0xbc   : > { %v989_v60 = vadd.f32 %v957_v5, %v857_v56 }
  0xbd   : > { %v1121_v20 = vadd.f32 %v1089_v48, %v988_v58 }
  0xbe   : > { %v1122_v57 = vadd.f32 %v1090_v54, %v989_v60 }
  0xbf   : > { %v1253_v6 = vadd.f32 %v1221_v47, %v1121_v20 }
  0xc0   : > { %v1254_v46 = vadd.f32 %v1222_v30, %v1122_v57 }
  0xc1   : > { %v1385_v32 = vadd.f32 %v1353_v49, %v1253_v6 }
  0xc2   : > { %v1386_v27 = vadd.f32 %v1354_v50, %v1254_v46 }
  0xc4   : > { %v1402_v40 = vpack.c.bf16 %v1386_v27, %v1385_v32 }
  0xc6   : > { %2057 = vmatmul.mubr.msk.bf16.gmra.mrb[12].mxu1 %vm1411_vm0, %v1402_v40 }
 0x114   : > { %v2030_v37 = vpop.f32.mrb[0].mxu0 }
 0x115   : > { %v1630_v38 = vmul.f32 %v2030_v37, %v3116_v34  ;;  %v1494_v14 = vpop.f32.mrb[1].mxu0 }
 0x116   : > { %v1628_v42 = vmul.f32 %v3116_v34, %v1494_v14  ;;  %v2031_v26 = vpop.f32.mrb[2].mxu0 }
 0x117   : > { %v1669_v36 = vadd.f32 %v3121_v2, %v1630_v38  ;;  %v1631_v22 = vmul.f32 %v2031_v26, %v3116_v34  ;;  %v1497_v33 = vpop.f32.mrb[3].mxu0 }
 0x118   : > { %v1667_v59 = vadd.f32 %v3121_v2, %v1628_v42  ;;  %v1629_v52 = vmul.f32 %v3116_v34, %v1497_v33 }
 0x119   : > { %1701 = vst.msk [vmem:[%s3127_s16 + $0x10] sm:$0xff] %vm1411_vm0, %v1669_v36  ;;  %v1670_v61 = vadd.f32 %v3121_v2, %v1631_v22 }
 0x11a   : > { %1699 = vst.msk [vmem:[%s3127_s16] sm:$0xff] %vm1411_vm0, %v1667_v59  ;;  %v1668_v62 = vadd.f32 %v3121_v2, %v1629_v52 }
 0x11b   : > { %1702 = vst.msk [vmem:[%s3127_s16 + $0x18] sm:$0xff] %vm1411_vm0, %v1670_v61 }
 0x11c   : > { %1700 = vst.msk [vmem:[%s3127_s16 + $0x8] sm:$0xff] %vm1411_vm0, %v1668_v62 }
 0x11d   : > { %v2046_v28 = vpop.f32.mrb[0].mxu1 }
 0x11e   : > { %v1646_v12 = vmul.f32 %v2046_v28, %v3116_v34  ;;  %v1558_v3 = vpop.f32.mrb[1].mxu1 }
 0x11f   : > { %v1644_v63 = vmul.f32 %v3116_v34, %v1558_v3  ;;  %v2047_v43 = vpop.f32.mrb[2].mxu1 }
 0x120   : > { %v1685_v25 = vadd.f32 %v3121_v2, %v1646_v12  ;;  %v1647_v21 = vmul.f32 %v2047_v43, %v3116_v34  ;;  %v1561_v11 = vpop.f32.mrb[3].mxu1 }
 0x121   : > { %v1683_v0 = vadd.f32 %v3121_v2, %v1644_v63  ;;  %v1645_v13 = vmul.f32 %v3116_v34, %v1561_v11 }
 0x122   : > { %1717 = vst.msk [vmem:[%s3127_s16 + $0x90] sm:$0xff] %vm1411_vm0, %v1685_v25  ;;  %v1686_v23 = vadd.f32 %v3121_v2, %v1647_v21 }
 0x123   : > { %1715 = vst.msk [vmem:[%s3127_s16 + $0x80] sm:$0xff] %vm1411_vm0, %v1683_v0  ;;  %v1684_v17 = vadd.f32 %v3121_v2, %v1645_v13 }
 0x124   : > { %1718 = vst.msk [vmem:[%s3127_s16 + $0x98] sm:$0xff] %vm1411_vm0, %v1686_v23 }
 0x125   : > { %1716 = vst.msk [vmem:[%s3127_s16 + $0x88] sm:$0xff] %vm1411_vm0, %v1684_v17 }
 0x13c   : > { %v2034_v15 = vpop.f32.mrb[4].mxu0 }
 0x13d   : > { %v1634_v16 = vmul.f32 %v2034_v15, %v3116_v34  ;;  %v1510_v53 = vpop.f32.mrb[5].mxu0 }
 0x13e   : > { %v1632_v4 = vmul.f32 %v3116_v34, %v1510_v53  ;;  %v2035_v39 = vpop.f32.mrb[6].mxu0 }
 0x13f   : > { %v1673_v55 = vadd.f32 %v3121_v2, %v1634_v16  ;;  %v1635_v41 = vmul.f32 %v2035_v39, %v3116_v34  ;;  %v1513_v18 = vpop.f32.mrb[7].mxu0 }
 0x140   : > { %v1671_v51 = vadd.f32 %v3121_v2, %v1632_v4  ;;  %v1633_v7 = vmul.f32 %v3116_v34, %v1513_v18 }
 0x141   : > { %1705 = vst.msk [vmem:[%s3127_s16 + $0x30] sm:$0xff] %vm1411_vm0, %v1673_v55  ;;  %v1674_v10 = vadd.f32 %v3121_v2, %v1635_v41 }
 0x142   : > { %1703 = vst.msk [vmem:[%s3127_s16 + $0x20] sm:$0xff] %vm1411_vm0, %v1671_v51  ;;  %v1672_v35 = vadd.f32 %v3121_v2, %v1633_v7 }
 0x143   : > { %1706 = vst.msk [vmem:[%s3127_s16 + $0x38] sm:$0xff] %vm1411_vm0, %v1674_v10 }
 0x144   : > { %1704 = vst.msk [vmem:[%s3127_s16 + $0x28] sm:$0xff] %vm1411_vm0, %v1672_v35 }
 0x147   : > { %v2050_v44 = vpop.f32.mrb[4].mxu1 }
 0x148   : > { %v1650_v31 = vmul.f32 %v2050_v44, %v3116_v34  ;;  %v1574_v1 = vpop.f32.mrb[5].mxu1 }
 0x149   : > { %v1648_v8 = vmul.f32 %v3116_v34, %v1574_v1  ;;  %v2051_v5 = vpop.f32.mrb[6].mxu1 }
 0x14a   : > { %v1689_v19 = vadd.f32 %v3121_v2, %v1650_v31  ;;  %v1651_v45 = vmul.f32 %v2051_v5, %v3116_v34  ;;  %v1577_v9 = vpop.f32.mrb[7].mxu1 }
 0x14b   : > { %v1687_v48 = vadd.f32 %v3121_v2, %v1648_v8  ;;  %v1649_v24 = vmul.f32 %v3116_v34, %v1577_v9 }
 0x14c   : > { %1721 = vst.msk [vmem:[%s3127_s16 + $0xb0] sm:$0xff] %vm1411_vm0, %v1689_v19  ;;  %v1690_v56 = vadd.f32 %v3121_v2, %v1651_v45 }
 0x14d   : > { %1719 = vst.msk [vmem:[%s3127_s16 + $0xa0] sm:$0xff] %vm1411_vm0, %v1687_v48  ;;  %v1688_v54 = vadd.f32 %v3121_v2, %v1649_v24 }
 0x14e   : > { %1722 = vst.msk [vmem:[%s3127_s16 + $0xb8] sm:$0xff] %vm1411_vm0, %v1690_v56 }
 0x14f   : > { %1720 = vst.msk [vmem:[%s3127_s16 + $0xa8] sm:$0xff] %vm1411_vm0, %v1688_v54 }
 0x165   : > { %v2038_v29 = vpop.f32.mrb[8].mxu0 }
 0x166   : > { %v1638_v58 = vmul.f32 %v2038_v29, %v3116_v34  ;;  %v1526_v47 = vpop.f32.mrb[9].mxu0 }
 0x167   : > { %v1636_v60 = vmul.f32 %v3116_v34, %v1526_v47  ;;  %v2039_v30 = vpop.f32.mrb[10].mxu0 }
 0x168   : > { %v1677_v20 = vadd.f32 %v3121_v2, %v1638_v58  ;;  %v1639_v49 = vmul.f32 %v2039_v30, %v3116_v34  ;;  %v1529_v57 = vpop.f32.mrb[11].mxu0 }
 0x169   : > { %v1675_v50 = vadd.f32 %v3121_v2, %v1636_v60  ;;  %v1637_v6 = vmul.f32 %v3116_v34, %v1529_v57 }
 0x16a   : > { %1709 = vst.msk [vmem:[%s3127_s16 + $0x50] sm:$0xff] %vm1411_vm0, %v1677_v20  ;;  %v1678_v46 = vadd.f32 %v3121_v2, %v1639_v49 }
 0x16b   : > { %1707 = vst.msk [vmem:[%s3127_s16 + $0x40] sm:$0xff] %vm1411_vm0, %v1675_v50  ;;  %v1676_v32 = vadd.f32 %v3121_v2, %v1637_v6 }
 0x16c   : > { %1710 = vst.msk [vmem:[%s3127_s16 + $0x58] sm:$0xff] %vm1411_vm0, %v1678_v46 }
 0x16d   : > { %1708 = vst.msk [vmem:[%s3127_s16 + $0x48] sm:$0xff] %vm1411_vm0, %v1676_v32 }
 0x170   : > { %v2054_v27 = vpop.f32.mrb[8].mxu1 }
 0x171   : > { %v1654_v40 = vmul.f32 %v2054_v27, %v3116_v34  ;;  %v1590_v37 = vpop.f32.mrb[9].mxu1 }
 0x172   : > { %v1652_v38 = vmul.f32 %v3116_v34, %v1590_v37  ;;  %v2055_v14 = vpop.f32.mrb[10].mxu1 }
 0x173   : > { %v1693_v42 = vadd.f32 %v3121_v2, %v1654_v40  ;;  %v1655_v26 = vmul.f32 %v2055_v14, %v3116_v34  ;;  %v1593_v36 = vpop.f32.mrb[11].mxu1 }
 0x174   : > { %v1691_v22 = vadd.f32 %v3121_v2, %v1652_v38  ;;  %v1653_v33 = vmul.f32 %v3116_v34, %v1593_v36 }
 0x175   : > { %1725 = vst.msk [vmem:[%s3127_s16 + $0xd0] sm:$0xff] %vm1411_vm0, %v1693_v42  ;;  %v1694_v59 = vadd.f32 %v3121_v2, %v1655_v26 }
 0x176   : > { %1723 = vst.msk [vmem:[%s3127_s16 + $0xc0] sm:$0xff] %vm1411_vm0, %v1691_v22  ;;  %v1692_v52 = vadd.f32 %v3121_v2, %v1653_v33 }
 0x177   : > { %1726 = vst.msk [vmem:[%s3127_s16 + $0xd8] sm:$0xff] %vm1411_vm0, %v1694_v59 }
 0x178   : > { %1724 = vst.msk [vmem:[%s3127_s16 + $0xc8] sm:$0xff] %vm1411_vm0, %v1692_v52 }
 0x18e   : > { %v2042_v61 = vpop.f32.mrb[12].mxu0 }
 0x18f   : > { %v1642_v62 = vmul.f32 %v2042_v61, %v3116_v34  ;;  %v1542_v28 = vpop.f32.mrb[13].mxu0 }
 0x190   : > { %v1640_v12 = vmul.f32 %v3116_v34, %v1542_v28  ;;  %v2043_v3 = vpop.f32.mrb[14].mxu0 }
 0x191   : > { %v1681_v63 = vadd.f32 %v3121_v2, %v1642_v62  ;;  %v1643_v43 = vmul.f32 %v2043_v3, %v3116_v34  ;;  %v1545_v25 = vpop.f32.mrb[15].mxu0 }
 0x192   : > { %v1679_v21 = vadd.f32 %v3121_v2, %v1640_v12  ;;  %v1641_v11 = vmul.f32 %v3116_v34, %v1545_v25 }
 0x193   : > { %1713 = vst.msk [vmem:[%s3127_s16 + $0x70] sm:$0xff] %vm1411_vm0, %v1681_v63  ;;  %v1682_v0 = vadd.f32 %v3121_v2, %v1643_v43 }
 0x194   : > { %1711 = vst.msk [vmem:[%s3127_s16 + $0x60] sm:$0xff] %vm1411_vm0, %v1679_v21  ;;  %v1680_v13 = vadd.f32 %v3121_v2, %v1641_v11 }
 0x195   : > { %1714 = vst.msk [vmem:[%s3127_s16 + $0x78] sm:$0xff] %vm1411_vm0, %v1682_v0 }
 0x196   : > { %1712 = vst.msk [vmem:[%s3127_s16 + $0x68] sm:$0xff] %vm1411_vm0, %v1680_v13 }
 0x199   : > { %v2058_v23 = vpop.f32.mrb[12].mxu1 }
 0x19a   : > { %v1658_v17 = vmul.f32 %v2058_v23, %v3116_v34  ;;  %v1606_v15 = vpop.f32.mrb[13].mxu1 }
 0x19b   : > { %v1656_v16 = vmul.f32 %v3116_v34, %v1606_v15  ;;  %v2059_v53 = vpop.f32.mrb[14].mxu1 }
 0x19c   : > { %v1697_v4 = vadd.f32 %v3121_v2, %v1658_v17  ;;  %v1659_v39 = vmul.f32 %v2059_v53, %v3116_v34  ;;  %v1609_v55 = vpop.f32.mrb[15].mxu1 }
 0x19d   : > { %v1695_v41 = vadd.f32 %v3121_v2, %v1656_v16  ;;  %v1657_v18 = vmul.f32 %v3116_v34, %v1609_v55 }
 0x19e   : > { %1729 = vst.msk [vmem:[%s3127_s16 + $0xf0] sm:$0xff] %vm1411_vm0, %v1697_v4  ;;  %v1698_v51 = vadd.f32 %v3121_v2, %v1659_v39 }
 0x19f   : > { %1727 = vst.msk [vmem:[%s3127_s16 + $0xe0] sm:$0xff] %vm1411_vm0, %v1695_v41  ;;  %v1696_v7 = vadd.f32 %v3121_v2, %v1657_v18 }
 0x1a0   : > { %1730 = vst.msk [vmem:[%s3127_s16 + $0xf8] sm:$0xff] %vm1411_vm0, %v1698_v51 }
 0x1a1   : > { %1728 = vst.msk [vmem:[%s3127_s16 + $0xe8] sm:$0xff] %vm1411_vm0, %v1696_v7 }
 0x1a2 PF: > { %s15_s18 = sadd.s32 1, %s2079_s18  }
 0x1a3   : > { %p12_p5 = scmp.ge.s32.totalorder %s15_s18, 4  }
 0x1a5   :  { %14 = sbr.rel (!%p12_p5) target bundleno = 1 (0x1), region = 72 }

// kernel: forward.42
= control target key start
LH: loop header
LB: loop body
LE: loop exit
PB: predicated region body
PF: predicated region fallthrough
CT: control target
= control target key end

     0   :  { %s2111_s18 = smov 0   ;;  %s3475_s0 = inlined_call_operand.vmem [shape: f32[2,20,20,16], index: 0, kind: input, shape index: {}]   ;;  %s3476_s1 = inlined_call_operand.vmem [shape: f32[9,16], index: 1, kind: input, shape index: {}]   ;;  %s3477_s2 = inlined_call_operand.vmem [shape: bf16[16,16], index: 2, kind: input, shape index: {}]   ;;  %s3478_s3 = inlined_call_operand.vmem [shape: f32[1,16], index: 3, kind: input, shape index: {}]   ;;  %s3479_s4 = inlined_call_operand.vmem [shape: f32[1,16], index: 4, kind: input, shape index: {}]   ;;  %s3480_s5 = inlined_call_operand.vmem [shape: f32[512,16], index: 5, kind: output, shape index: {}]  }
   0x1 LB: > { %s2117_s19 = sadd.s32 4294967295, %s2079_s18   ;;  %p1791_p0 = scmp.ge.s32.totalorder %s2079_s18, 1  ;;  %s2079_s18 = sphi %s2111_s18, %s15_s18  }
   0x2   : > { %p187_p1 = scmp.lt.s32.totalorder %s2079_s18, 3 }
   0x4   : > { %p188_p2 = pnand %p1791_p0, %p187_p1 }
   0x6   : > { %191 = sbr.rel (%p188_p2) target bundleno = 459 (0x1cb), region = 40 }
   0xd   : > { %v2071_v0 = vld [vmem:[%s3477_s2] sm:$0xff]   ;;  %p215_p3 = scmp.lt.s32.totalorder %s2117_s19, 1  ;;  %v293_v1 = vlaneseq  ;;  %vm1411_vm0 = vcmask 130048   ;;  %s1793_s8 = sshll.u32 %s2117_s19, 5 }
   0xe   : > { %2026 = vmatprep.subr.bf16.mxu0 %v2071_v0  ;;  %2060 = vmatprep.subr.bf16.mxu1 %v2071_v0  ;;  %v227_v3 = vld [vmem:[%s3476_s1] sm:$0xff]  ;;  %p221_p4 = scmp.lt.s32.totalorder %s1793_s8, 63 }
   0xf   : > { %s216_s22 = scalar_select %p215_p3, %s2117_s19, 1  ;;  %v294_v2 = vshrl.u32 %v293_v1, 7  ;;  %2027 = vmatpush3.bf16.msra.mxu0 %v2071_v0  ;;  %2061 = vmatpush3.bf16.msra.mxu1 %v2071_v0 }
  0x10   : > { %s3688_s8 = smov (!%p221_p4, %s1793_s8), 63 }
  0x11   : > { %s2062_s25 = smul.u32 480, %s216_s22  ;;  %v295_v4 = vsub.s32 0, %v294_v2  ;;  %v395_v5 = vsub.s32 1, %v294_v2  ;;  %v527_v6 = vsub.s32 2, %v294_v2  ;;  %v660_v7 = vsub.s32 3, %v294_v2  ;;  %s1794_s11 = sshll.u32 %s3688_s8, 3 }
  0x12   : > { %v792_v8 = vsub.s32 4, %v294_v2  ;;  %v924_v9 = vsub.s32 5, %v294_v2  ;;  %v1057_v10 = vsub.s32 6, %v294_v2  ;;  %v1189_v11 = vsub.s32 7, %v294_v2  ;;  %s3343_s16 = scalar_lea.vmem %s3480_s5, %s1794_s11 }
  0x13   : > { %s2132_s28 = scalar_lea.vmem %s3475_s0, %s2062_s25  ;;  %v2134_v12 = vrot.slane %v227_v3, %v295_v4  ;;  %v2136_v13 = vrot.slane %v227_v3, %v395_v5  ;;  %v2141_v17 = vrot.slane %v227_v3, %v527_v6  ;;  %v2143_v18 = vrot.slane %v227_v3, %v660_v7  ;;  %v2228_v5 = vld [vmem:[%s3476_s1 + $0x8] ss:$0 sm:$0xff] }
  0x14   : > { %v229_v14 = vld [vmem:[%s2132_s28] sm:$0xff]  ;;  %v230_v15 = vld [vmem:[%s2132_s28 + $0x8] sm:$0xff]  ;;  %v2145_v19 = vrot.slane %v227_v3, %v792_v8  ;;  %v2147_v20 = vrot.slane %v227_v3, %v924_v9  ;;  %v2152_v27 = vrot.slane %v227_v3, %v1057_v10  ;;  %v2155_v31 = vld [vmem:[%s2132_s28 + $0x30] sm:$0xff]  ;;  %v2163_v34 = vrot.slane %v227_v3, %v1189_v11 }
  0x15   : > { %v329_v16 = vld [vmem:[%s2132_s28 + $0x2] sm:$0xff]  ;;  %v261_v21 = vmax.f32 %v229_v14, 0.0  ;;  %v262_v22 = vmax.f32 %v230_v15, 0.0  ;;  %v330_v23 = vld [vmem:[%s2132_s28 + $0xa] sm:$0xff]  ;;  %v2158_v32 = vld [vmem:[%s2132_s28 + $0x38] sm:$0xff]  ;;  %v3510_v38 = vmax.f32 %v2155_v31, 0.0 }
  0x16   : > { %v361_v24 = vmax.f32 %v329_v16, 0.0  ;;  %v461_v25 = vld [vmem:[%s2132_s28 + $0x4] sm:$0xff]  ;;  %v462_v26 = vld [vmem:[%s2132_s28 + $0xc] sm:$0xff]  ;;  %v362_v28 = vmax.f32 %v330_v23, 0.0  ;;  %v2170_v39 = vld [vmem:[%s2132_s28 + $0x3a] sm:$0xff]  ;;  %v3509_v45 = vmax.f32 %v2158_v32, 0.0 }
  0x17   : > { %v493_v29 = vmax.f32 %v461_v25, 0.0  ;;  %v494_v30 = vmax.f32 %v462_v26, 0.0  ;;  %v2161_v33 = vld [vmem:[%s2132_s28 + $0x32] sm:$0xff]  ;;  %v297_v35 = vmul.f32 %v2134_v12, %v261_v21  ;;  %v298_v36 = vmul.f32 %v2134_v12, %v262_v22  ;;  %v2176_v41 = vld [vmem:[%s2132_s28 + $0x3c] sm:$0xff]  ;;  %v2191_v51 = vld [vmem:[%s2132_s28 + $0x68] sm:$0xff] }
  0x18   : > { %v397_v37 = vmul.f32 %v2136_v13, %v361_v24  ;;  %v2173_v40 = vld [vmem:[%s2132_s28 + $0x34] sm:$0xff]  ;;  %v398_v42 = vmul.f32 %v2136_v13, %v362_v28  ;;  %v2183_v46 = vld [vmem:[%s2132_s28 + $0x60] sm:$0xff]  ;;  %v662_v48 = vmul.f32 %v2143_v18, %v3510_v38  ;;  %v3508_v49 = vmax.f32 %v2161_v33, 0.0  ;;  %v2202_v57 = vld [vmem:[%s2132_s28 + $0x6a] sm:$0xff] }
  0x19   : > { %v529_v43 = vmul.f32 %v2141_v17, %v493_v29  ;;  %v530_v44 = vmul.f32 %v2141_v17, %v494_v30  ;;  %v3505_v50 = vmax.f32 %v2170_v39, 0.0  ;;  %v663_v53 = vmul.f32 %v2143_v18, %v3509_v45  ;;  %v2199_v56 = vld [vmem:[%s2132_s28 + $0x62] sm:$0xff]  ;;  %v2215_v63 = vld [vmem:[%s2132_s28 + $0x6c] sm:$0xff] }
  0x1a   : > { %v429_v47 = vadd.f32 %v397_v37, %v297_v35  ;;  %v430_v52 = vadd.f32 %v398_v42, %v298_v36  ;;  %v3500_v54 = vmax.f32 %v2173_v40, 0.0  ;;  %v3499_v55 = vmax.f32 %v2176_v41, 0.0  ;;  %v2212_v62 = vld [vmem:[%s2132_s28 + $0x64] sm:$0xff]  ;;  %v478_v29 = vld [vmem:[%s2132_s28 + $0xcc] sm:$0xff] }
  0x1b   : > { %v794_v59 = vmul.f32 %v2145_v19, %v3508_v49  ;;  %v795_v60 = vmul.f32 %v2145_v19, %v3505_v50  ;;  %v3497_v61 = vmax.f32 %v2183_v46, 0.0  ;;  %v3494_v3 = vmax.f32 %v2191_v51, 0.0  ;;  %v245_v4 = vld [vmem:[%s2132_s28 + $0xc0] sm:$0xff]  ;;  %v246_v10 = vld [vmem:[%s2132_s28 + $0xc8] sm:$0xff]  ;;  %v2258_v42 = vld [vmem:[%s2132_s28 + $0xf0] sm:$0xff] }
  0x1c   : > { %v561_v58 = vadd.f32 %v529_v43, %v429_v47  ;;  %v562_v0 = vadd.f32 %v530_v44, %v430_v52  ;;  %v926_v1 = vmul.f32 %v2147_v20, %v3500_v54  ;;  %v927_v2 = vmul.f32 %v2147_v20, %v3499_v55  ;;  %v345_v21 = vld [vmem:[%s2132_s28 + $0xc2] sm:$0xff]  ;;  %v346_v22 = vld [vmem:[%s2132_s28 + $0xca] sm:$0xff]  ;;  %v2262_v52 = vld [vmem:[%s2132_s28 + $0xf8] sm:$0xff] }
  0x1d   : > { %v1059_v7 = vmul.f32 %v2152_v27, %v3497_v61  ;;  %v3493_v8 = vmax.f32 %v2199_v56, 0.0  ;;  %v3490_v9 = vmax.f32 %v2202_v57, 0.0  ;;  %v1060_v14 = vmul.f32 %v2152_v27, %v3494_v3  ;;  %v477_v28 = vld [vmem:[%s2132_s28 + $0xc4] sm:$0xff] }
  0x1e   : > { %v694_v6 = vadd.f32 %v662_v48, %v561_v58  ;;  %v695_v11 = vadd.f32 %v663_v53, %v562_v0  ;;  %v3489_v15 = vmax.f32 %v2212_v62, 0.0  ;;  %v3488_v16 = vmax.f32 %v2215_v63, 0.0  ;;  %v248_v50 = vld [vmem:[%s2132_s28 + $0xe0] sm:$0xff] }
  0x1f   : > { %v1191_v24 = vmul.f32 %v2163_v34, %v3493_v8  ;;  %v1192_v25 = vmul.f32 %v2163_v34, %v3490_v9  ;;  %v277_v26 = vmax.f32 %v245_v4, 0.0  ;;  %v278_v37 = vmax.f32 %v246_v10, 0.0  ;;  %v2269_v10 = vld [vmem:[%s2132_s28 + $0xf2] sm:$0xff]  ;;  %v464_v9 = vld [vmem:[%s2132_s28 + $0x24] sm:$0xff] }
  0x20   : > { %v826_v23 = vadd.f32 %v794_v59, %v694_v6  ;;  %v827_v30 = vadd.f32 %v795_v60, %v695_v11  ;;  %v1323_v35 = vmul.f32 %v2228_v5, %v3489_v15  ;;  %v1324_v36 = vmul.f32 %v2228_v5, %v3488_v16  ;;  %v2272_v11 = vld [vmem:[%s2132_s28 + $0xfa] sm:$0xff]  ;;  %v348_v45 = vld [vmem:[%s2132_s28 + $0xe2] sm:$0xff] }
  0x21   : > { %v313_v44 = vmul.f32 %v2134_v12, %v277_v26  ;;  %v377_v47 = vmax.f32 %v345_v21, 0.0  ;;  %v378_v48 = vmax.f32 %v346_v22, 0.0  ;;  %v314_v58 = vmul.f32 %v2134_v12, %v278_v37  ;;  %v2284_v37 = vld [vmem:[%s2132_s28 + $0xfc] sm:$0xff] }
  0x22   : > { %v958_v43 = vadd.f32 %v926_v1, %v826_v23  ;;  %v959_v53 = vadd.f32 %v927_v2, %v827_v30  ;;  %v509_v59 = vmax.f32 %v477_v28, 0.0  ;;  %v510_v60 = vmax.f32 %v478_v29, 0.0  ;;  %v463_v15 = vld [vmem:[%s2132_s28 + $0x1c] sm:$0xff] }
  0x23   : > { %v413_v4 = vmul.f32 %v2136_v13, %v377_v47  ;;  %v414_v6 = vmul.f32 %v2136_v13, %v378_v48  ;;  %v3487_v1 = vmax.f32 %v2258_v42, 0.0  ;;  %v3484_v23 = vmax.f32 %v2262_v52, 0.0 }
  0x24   : > { %v1091_v0 = vadd.f32 %v1059_v7, %v958_v43  ;;  %v1092_v21 = vadd.f32 %v1060_v14, %v959_v53  ;;  %v545_v2 = vmul.f32 %v2141_v17, %v509_v59  ;;  %v546_v22 = vmul.f32 %v2141_v17, %v510_v60  ;;  %v2278_v7 = vld [vmem:[%s2132_s28 + $0xf4] sm:$0xff]  ;;  %v2292_v53 = vld [vmem:[%s2132_s28 + $0x120] sm:$0xff]  ;;  %v2296_v60 = vld [vmem:[%s2132_s28 + $0x128] sm:$0xff] }
  0x25   : > { %v445_v28 = vadd.f32 %v413_v4, %v313_v44  ;;  %v446_v29 = vadd.f32 %v414_v6, %v314_v58  ;;  %v678_v30 = vmul.f32 %v2143_v18, %v3487_v1  ;;  %v679_v43 = vmul.f32 %v2143_v18, %v3484_v23  ;;  %v331_v23 = vld [vmem:[%s2132_s28 + $0x1a] sm:$0xff] }
  0x26   : > { %v1223_v26 = vadd.f32 %v1191_v24, %v1091_v0  ;;  %v1224_v14 = vadd.f32 %v1192_v25, %v1092_v21  ;;  %v3483_v47 = vmax.f32 %v2269_v10, 0.0  ;;  %v3481_v48 = vmax.f32 %v2272_v11, 0.0  ;;  %v2299_v25 = vld [vmem:[%s2132_s28 + $0x122] sm:$0xff]  ;;  %v2309_v21 = vld [vmem:[%s2132_s28 + $0x12a] sm:$0xff] }
  0x27   : > { %v577_v44 = vadd.f32 %v545_v2, %v445_v28  ;;  %v578_v58 = vadd.f32 %v546_v22, %v446_v29  ;;  %v3482_v59 = vmax.f32 %v2278_v7, 0.0  ;;  %v2316_v28 = vld [vmem:[%s2132_s28 + $0x124] sm:$0xff]  ;;  %v2319_v29 = vld [vmem:[%s2132_s28 + $0x12c] sm:$0xff]  ;;  %v363_v3 = vmax.f32 %v331_v23, 0.0 }
  0x28   : > { %v1355_v24 = vadd.f32 %v1323_v35, %v1223_v26  ;;  %v1356_v0 = vadd.f32 %v1324_v36, %v1224_v14  ;;  %v810_v4 = vmul.f32 %v2145_v19, %v3483_v47  ;;  %v811_v6 = vmul.f32 %v2145_v19, %v3481_v48 }
  0x29   : > { %v3485_v35 = vmax.f32 %v2284_v37, 0.0  ;;  %v710_v2 = vadd.f32 %v678_v30, %v577_v44  ;;  %v711_v22 = vadd.f32 %v679_v43, %v578_v58  ;;  %v942_v36 = vmul.f32 %v2147_v20, %v3482_v59  ;;  %v231_v44 = vld [vmem:[%s2132_s28 + $0x18] sm:$0xff] }
  0x2a   : > { %v3486_v26 = vmax.f32 %v2292_v53, 0.0  ;;  %v1387_v14 = vpack.c.bf16 %v1356_v0, %v1355_v24  ;;  %v3491_v30 = vmax.f32 %v2296_v60, 0.0  ;;  %v3492_v43 = vmax.f32 %v2299_v25, 0.0  ;;  %v232_v0 = vld [vmem:[%s2132_s28 + $0x20] sm:$0xff] }
  0x2b   : > { %v943_v48 = vmul.f32 %v2147_v20, %v3485_v35  ;;  %v842_v58 = vadd.f32 %v810_v4, %v710_v2  ;;  %v843_v59 = vadd.f32 %v811_v6, %v711_v22  ;;  %v3495_v24 = vmax.f32 %v2309_v21, 0.0  ;;  %v332_v22 = vld [vmem:[%s2132_s28 + $0x22] sm:$0xff] }
  0x2c   : > { %v1075_v47 = vmul.f32 %v2152_v27, %v3486_v26  ;;  %2028 = vmatprep.mubr.msk.bf16.mxu0 %vm1411_vm0, %v1387_v14  ;;  %v1076_v35 = vmul.f32 %v2152_v27, %v3491_v30  ;;  %v1207_v4 = vmul.f32 %v2163_v34, %v3492_v43  ;;  %v3496_v6 = vmax.f32 %v2316_v28, 0.0 }
  0x2d   : > { %v3498_v2 = vmax.f32 %v2319_v29, 0.0  ;;  %v974_v26 = vadd.f32 %v942_v36, %v842_v58  ;;  %v975_v1 = vadd.f32 %v943_v48, %v843_v59  ;;  %v1208_v14 = vmul.f32 %v2163_v34, %v3495_v24  ;;  %v2355_v48 = vld [vmem:[%s2132_s28 + $0x48] sm:$0xff]  ;;  %v2359_v24 = vld [vmem:[%s2132_s28 + $0x50] sm:$0xff] }
  0x2e   : > { %v263_v16 = vmax.f32 %v231_v44, 0.0  ;;  %v1339_v30 = vmul.f32 %v2228_v5, %v3496_v6  ;;  %v264_v8 = vmax.f32 %v232_v0, 0.0  ;;  %v364_v58 = vmax.f32 %v332_v22, 0.0 }
  0x2f   : > { %v1340_v43 = vmul.f32 %v2228_v5, %v3498_v2  ;;  %v1107_v59 = vadd.f32 %v1075_v47, %v974_v26  ;;  %v1108_v36 = vadd.f32 %v1076_v35, %v975_v1  ;;  %v399_v61 = vmul.f32 %v2136_v13, %v363_v3  ;;  %v2366_v47 = vld [vmem:[%s2132_s28 + $0x4a] sm:$0xff] }
  0x30   : > { %v299_v44 = vmul.f32 %v2134_v12, %v263_v16  ;;  %v300_v6 = vmul.f32 %v2134_v12, %v264_v8  ;;  %v495_v2 = vmax.f32 %v463_v15, 0.0  ;;  %v496_v0 = vmax.f32 %v464_v9, 0.0  ;;  %v2369_v16 = vld [vmem:[%s2132_s28 + $0x52] sm:$0xff] }
  0x31   : > { %v1239_v55 = vadd.f32 %v1207_v4, %v1107_v59  ;;  %v1240_v23 = vadd.f32 %v1208_v14, %v1108_v36  ;;  %v400_v54 = vmul.f32 %v2136_v13, %v364_v58  ;;  %v3504_v1 = vmax.f32 %v2355_v48, 0.0  ;;  %v2375_v9 = vld [vmem:[%s2132_s28 + $0x4c] sm:$0xff]  ;;  %v2378_v15 = vld [vmem:[%s2132_s28 + $0x54] sm:$0xff] }
  0x32   : > { %v431_v35 = vadd.f32 %v399_v61, %v299_v44  ;;  %v531_v26 = vmul.f32 %v2141_v17, %v495_v2  ;;  %v532_v8 = vmul.f32 %v2141_v17, %v496_v0  ;;  %v3503_v3 = vmax.f32 %v2359_v24, 0.0  ;;  %3576 = vst [vmem:[#allocation2_spill] sm:$0xff] %v2375_v9  ;;  %3577 = vst [vmem:[#allocation3_spill] sm:$0xff] %v2378_v15  ;;  %v2384_v61 = vld [vmem:[%s2132_s28 + $0x78] sm:$0xff] }
  0x33   : > { %v1371_v4 = vadd.f32 %v1339_v30, %v1239_v55  ;;  %v1372_v22 = vadd.f32 %v1340_v43, %v1240_v23  ;;  %v432_v14 = vadd.f32 %v400_v54, %v300_v6  ;;  %v664_v59 = vmul.f32 %v2143_v18, %v3504_v1  ;;  %3578 = vst [vmem:[#allocation4_spill] sm:$0xff] %v2384_v61  ;;  %v2392_v55 = vld [vmem:[%s2132_s28 + $0x80] sm:$0xff] }
  0x34   : > { %v563_v2 = vadd.f32 %v531_v26, %v431_v35  ;;  %v665_v36 = vmul.f32 %v2143_v18, %v3503_v3  ;;  %v3501_v44 = vmax.f32 %v2366_v47, 0.0  ;;  %v3502_v58 = vmax.f32 %v2369_v16, 0.0  ;;  %3579 = vst [vmem:[#allocation5_spill] sm:$0xff] %v2392_v55  ;;  %v2397_v0 = vld [vmem:[%s2132_s28 + $0x7a] sm:$0xff]  ;;  %v2400_v23 = vld [vmem:[%s2132_s28 + $0x82] sm:$0xff] }
  0x35   : > { %v1395_v54 = vpack.c.bf16 %v1372_v22, %v1371_v4  ;;  %v564_v30 = vadd.f32 %v532_v8, %v432_v14  ;;  %v3506_v43 = vmax.f32 %v2375_v9, 0.0  ;;  %v3507_v6 = vmax.f32 %v2378_v15, 0.0  ;;  %3580 = vst [vmem:[#allocation6_spill] sm:$0xff] %v2397_v0  ;;  %3581 = vst [vmem:[#allocation7_spill] sm:$0xff] %v2400_v23  ;;  %v2410_v22 = vld [vmem:[%s2132_s28 + $0x7c] sm:$0xff]  ;;  %v2413_v14 = vld [vmem:[%s2132_s28 + $0x84] sm:$0xff] }
  0x36   : > { %v696_v35 = vadd.f32 %v664_v59, %v563_v2  ;;  %v796_v26 = vmul.f32 %v2145_v19, %v3501_v44  ;;  %v797_v4 = vmul.f32 %v2145_v19, %v3502_v58  ;;  %v3511_v8 = vmax.f32 %v2384_v61, 0.0  ;;  %3582 = vst [vmem:[#allocation8_spill] sm:$0xff] %v2410_v22  ;;  %3583 = vst [vmem:[#allocation9_spill] sm:$0xff] %v2413_v14  ;;  %v247_v3 = vld [vmem:[%s2132_s28 + $0xd8] sm:$0xff]  ;;  %v480_v61 = vld [vmem:[%s2132_s28 + $0xe4] sm:$0xff] }
  0x37   : > { %2044 = vmatprep.mubr.msk.bf16.mxu1 %vm1411_vm0, %v1395_v54  ;;  %v697_v59 = vadd.f32 %v665_v36, %v564_v30  ;;  %v928_v2 = vmul.f32 %v2147_v20, %v3506_v43  ;;  %v929_v44 = vmul.f32 %v2147_v20, %v3507_v6  ;;  %v3514_v58 = vmax.f32 %v2392_v55, 0.0  ;;  %v479_v55 = vld [vmem:[%s2132_s28 + $0xdc] sm:$0xff] }
  0x38   : > { %v828_v1 = vadd.f32 %v796_v26, %v696_v35  ;;  %v1061_v54 = vmul.f32 %v2152_v27, %v3511_v8  ;;  %v3516_v36 = vmax.f32 %v2397_v0, 0.0  ;;  %v3518_v30 = vmax.f32 %v2400_v23, 0.0  ;;  %v347_v26 = vld [vmem:[%s2132_s28 + $0xda] sm:$0xff] }
  0x39   : > { %v829_v43 = vadd.f32 %v797_v4, %v697_v59  ;;  %v1062_v6 = vmul.f32 %v2152_v27, %v3514_v58  ;;  %v3520_v49 = vmax.f32 %v2410_v22, 0.0  ;;  %v279_v59 = vmax.f32 %v247_v3, 0.0 }
  0x3a   : > { %v960_v38 = vadd.f32 %v928_v2, %v828_v1  ;;  %v1193_v8 = vmul.f32 %v2163_v34, %v3516_v36  ;;  %v1194_v4 = vmul.f32 %v2163_v34, %v3518_v30  ;;  %v3584_v15 = vmax.f32 %v2413_v14, 0.0  ;;  %v2452_v36 = vld [vmem:[%s2132_s28 + $0x108] sm:$0xff] }
  0x3b   : > { %v961_v58 = vadd.f32 %v929_v44, %v829_v43  ;;  %v1325_v35 = vmul.f32 %v2228_v5, %v3520_v49  ;;  %v280_v2 = vmax.f32 %v248_v50, 0.0  ;;  %v315_v30 = vmul.f32 %v2134_v12, %v279_v59  ;;  %v2456_v44 = vld [vmem:[%s2132_s28 + $0x110] sm:$0xff] }
  0x3c   : > { %v1326_v1 = vmul.f32 %v2228_v5, %v3584_v15  ;;  %v1093_v23 = vadd.f32 %v1061_v54, %v960_v38  ;;  %v379_v3 = vmax.f32 %v347_v26, 0.0  ;;  %v380_v0 = vmax.f32 %v348_v45, 0.0  ;;  %v2463_v54 = vld [vmem:[%s2132_s28 + $0x10a] sm:$0xff]  ;;  %v2466_v45 = vld [vmem:[%s2132_s28 + $0x112] sm:$0xff] }
  0x3d   : > { %v1094_v43 = vadd.f32 %v1062_v6, %v961_v58  ;;  %v316_v49 = vmul.f32 %v2134_v12, %v280_v2  ;;  %v511_v14 = vmax.f32 %v479_v55, 0.0  ;;  %v512_v22 = vmax.f32 %v480_v61, 0.0  ;;  %3585 = vst [vmem:[#allocation10_spill] sm:$0xff] %v2463_v54  ;;  %3586 = vst [vmem:[#allocation11_spill] sm:$0xff] %v2466_v45  ;;  %v2472_v61 = vld [vmem:[%s2132_s28 + $0x10c] sm:$0xff]  ;;  %v2475_v6 = vld [vmem:[%s2132_s28 + $0x114] sm:$0xff] }
  0x3e   : > { %v1225_v15 = vadd.f32 %v1193_v8, %v1093_v23  ;;  %v415_v50 = vmul.f32 %v2136_v13, %v379_v3  ;;  %v416_v9 = vmul.f32 %v2136_v13, %v380_v0  ;;  %v3525_v38 = vmax.f32 %v2452_v36, 0.0  ;;  %v2481_v2 = vld [vmem:[%s2132_s28 + $0x138] sm:$0xff] }
  0x3f   : > { %v1226_v26 = vadd.f32 %v1194_v4, %v1094_v43  ;;  %v547_v59 = vmul.f32 %v2141_v17, %v511_v14  ;;  %v548_v58 = vmul.f32 %v2141_v17, %v512_v22  ;;  %v3524_v55 = vmax.f32 %v2456_v44, 0.0 }
  0x40   : > { %v1357_v0 = vadd.f32 %v1325_v35, %v1225_v15  ;;  %v447_v23 = vadd.f32 %v415_v50, %v315_v30  ;;  %v448_v8 = vadd.f32 %v416_v9, %v316_v49  ;;  %v680_v4 = vmul.f32 %v2143_v18, %v3525_v38  ;;  %v2491_v15 = vld [vmem:[%s2132_s28 + $0x140] sm:$0xff] }
  0x41   : > { %v1358_v22 = vadd.f32 %v1326_v1, %v1226_v26  ;;  %v681_v14 = vmul.f32 %v2143_v18, %v3524_v55  ;;  %v3526_v3 = vmax.f32 %v2463_v54, 0.0  ;;  %v3527_v43 = vmax.f32 %v2466_v45, 0.0  ;;  %v2494_v50 = vld [vmem:[%s2132_s28 + $0x13a] sm:$0xff]  ;;  %v2497_v1 = vld [vmem:[%s2132_s28 + $0x142] sm:$0xff] }
  0x42   : > { %v579_v35 = vadd.f32 %v547_v59, %v447_v23  ;;  %v580_v30 = vadd.f32 %v548_v58, %v448_v8  ;;  %v3530_v49 = vmax.f32 %v2472_v61, 0.0  ;;  %3587 = vst [vmem:[#allocation12_spill] sm:$0xff] %v2497_v1  ;;  %v3531_v58 = vmax.f32 %v2481_v2, 0.0  ;;  %v2507_v23 = vld [vmem:[%s2132_s28 + $0x13c] sm:$0xff]  ;;  %v2510_v8 = vld [vmem:[%s2132_s28 + $0x144] sm:$0xff] }
  0x43   : > { %v1388_v26 = vpack.c.bf16 %v1358_v22, %v1357_v0  ;;  %v812_v55 = vmul.f32 %v2145_v19, %v3526_v3  ;;  %v813_v59 = vmul.f32 %v2145_v19, %v3527_v43  ;;  %3588 = vst [vmem:[#allocation13_spill] sm:$0xff] %v2510_v8  ;;  %v3589_v22 = vmax.f32 %v2475_v6, 0.0 }
  0x44   : > { %v712_v38 = vadd.f32 %v680_v4, %v579_v35  ;;  %v713_v9 = vadd.f32 %v681_v14, %v580_v30  ;;  %v944_v0 = vmul.f32 %v2147_v20, %v3530_v49  ;;  %v3532_v43 = vmax.f32 %v2491_v15, 0.0 }
  0x45   : > { %v945_v3 = vmul.f32 %v2147_v20, %v3589_v22  ;;  %2029 = vmatmul.mubr.msk.bf16.vlgmr.msra.gmra.mrb[0].mxu0 %vm1411_vm0, %v1388_v26  ;;  %v1077_v45 = vmul.f32 %v2152_v27, %v3531_v58  ;;  %v3533_v54 = vmax.f32 %v2494_v50, 0.0  ;;  %v3535_v4 = vmax.f32 %v2497_v1, 0.0 }
  0x46   : > { %v844_v14 = vadd.f32 %v812_v55, %v712_v38  ;;  %v845_v35 = vadd.f32 %v813_v59, %v713_v9  ;;  %v3536_v30 = vmax.f32 %v2507_v23, 0.0  ;;  %v3538_v49 = vmax.f32 %v2510_v8, 0.0 }
  0x47   : > { %v1078_v26 = vmul.f32 %v2152_v27, %v3532_v43  ;;  %v1209_v22 = vmul.f32 %v2163_v34, %v3533_v54  ;;  %v1210_v58 = vmul.f32 %v2163_v34, %v3535_v4  ;;  %v3590_v38 = vmax.f32 %v2155_v31, 0.0 }
  0x48   : > { %v976_v9 = vadd.f32 %v944_v0, %v844_v14  ;;  %v977_v59 = vadd.f32 %v945_v3, %v845_v35  ;;  %v1341_v43 = vmul.f32 %v2228_v5, %v3536_v30  ;;  %v1342_v54 = vmul.f32 %v2228_v5, %v3538_v49 }
  0x49   : > { %v301_v55 = vmul.f32 %v3590_v38, %v2134_v12  ;;  %v3591_v1 = vmax.f32 %v2158_v32, 0.0  ;;  %v3592_v31 = vmax.f32 %v2161_v33, 0.0  ;;  %v3593_v3 = vmax.f32 %v2170_v39, 0.0 }
  0x4a   : > { %v3594_v14 = vmax.f32 %v2173_v40, 0.0  ;;  %v1109_v30 = vadd.f32 %v1077_v45, %v976_v9  ;;  %v1110_v8 = vadd.f32 %v1078_v26, %v977_v59  ;;  %v3595_v49 = vmax.f32 %v2176_v41, 0.0  ;;  %v2573_v9 = vld [vmem:[%s2132_s28 + $0x98] sm:$0xff] }
  0x4b   : > { %v302_v4 = vmul.f32 %v3591_v1, %v2134_v12  ;;  %v401_v38 = vmul.f32 %v3592_v31, %v2136_v13  ;;  %v402_v0 = vmul.f32 %v3593_v3, %v2136_v13  ;;  %v3596_v1 = vmax.f32 %v2183_v46, 0.0  ;;  %v2564_v31 = vld [vmem:[%s2132_s28 + $0x90] sm:$0xff] }
  0x4c   : > { %v533_v35 = vmul.f32 %v3594_v14, %v2141_v17  ;;  %v534_v32 = vmul.f32 %v3595_v49, %v2141_v17  ;;  %v3597_v40 = vmax.f32 %v2191_v51, 0.0  ;;  %v3598_v45 = vmax.f32 %v2199_v56, 0.0  ;;  %v2576_v41 = vld [vmem:[%s2132_s28 + $0x92] sm:$0xff] }
  0x4d   : > { %v666_v33 = vmul.f32 %v3596_v1, %v2143_v18  ;;  %v433_v39 = vadd.f32 %v401_v38, %v301_v55  ;;  %v434_v3 = vadd.f32 %v402_v0, %v302_v4  ;;  %v1241_v46 = vadd.f32 %v1209_v22, %v1109_v30  ;;  %v2585_v38 = vld [vmem:[%s2132_s28 + $0x9a] sm:$0xff] }
  0x4e   : > { %v667_v14 = vmul.f32 %v3597_v40, %v2143_v18  ;;  %v798_v26 = vmul.f32 %v3598_v45, %v2145_v19  ;;  %v1242_v49 = vadd.f32 %v1210_v58, %v1110_v8  ;;  %v3599_v59 = vmax.f32 %v2202_v57, 0.0  ;;  %v2592_v30 = vld [vmem:[%s2132_s28 + $0x94] sm:$0xff] }
  0x4f   : > { %v3600_v4 = vmax.f32 %v2212_v62, 0.0  ;;  %v565_v0 = vadd.f32 %v533_v35, %v433_v39  ;;  %v566_v56 = vadd.f32 %v534_v32, %v434_v3  ;;  %v3601_v1 = vmax.f32 %v2215_v63, 0.0  ;;  %v2597_v62 = vld [vmem:[%s2132_s28 + $0x9c] sm:$0xff] }
  0x50   : > { %v799_v55 = vmul.f32 %v3599_v59, %v2145_v19  ;;  %v1027_v45 = vmax.f32 %v2564_v31, 0.0  ;;  %v1373_v58 = vadd.f32 %v1341_v43, %v1241_v46  ;;  %v1374_v8 = vadd.f32 %v1342_v54, %v1242_v49 }
  0x51   : > { %v930_v51 = vmul.f32 %v3600_v4, %v2147_v20  ;;  %v931_v40 = vmul.f32 %v3601_v1, %v2147_v20  ;;  %v1028_v57 = vmax.f32 %v2573_v9, 0.0  ;;  %v1159_v22 = vmax.f32 %v2576_v41, 0.0  ;;  %v2898_v41 = vld [vmem:[%s2132_s28 + $0xc4] sm:$0xff] }
  0x52   : > { %v698_v59 = vadd.f32 %v666_v33, %v565_v0  ;;  %v699_v4 = vadd.f32 %v667_v14, %v566_v56  ;;  %v1063_v35 = vmul.f32 %v2152_v27, %v1027_v45  ;;  %v1160_v63 = vmax.f32 %v2585_v38, 0.0 }
  0x53   : > { %v1396_v32 = vpack.c.bf16 %v1374_v8, %v1373_v58  ;;  %v1064_v43 = vmul.f32 %v2152_v27, %v1028_v57  ;;  %v1195_v54 = vmul.f32 %v2163_v34, %v1159_v22  ;;  %v1291_v39 = vmax.f32 %v2592_v30, 0.0 }
  0x54   : > { %v830_v3 = vadd.f32 %v798_v26, %v698_v59  ;;  %v831_v33 = vadd.f32 %v799_v55, %v699_v4  ;;  %v1196_v14 = vmul.f32 %v2163_v34, %v1160_v63  ;;  %v3539_v46 = vmax.f32 %v2597_v62, 0.0 }
  0x55   : > { %2045 = vmatmul.mubr.msk.bf16.vlgmr.msra.gmra.mrb[0].mxu1 %vm1411_vm0, %v1396_v32  ;;  %v1327_v49 = vmul.f32 %v2228_v5, %v1291_v39  ;;  %v3602_v0 = vmax.f32 %v2258_v42, 0.0  ;;  %v3603_v26 = vmax.f32 %v2262_v52, 0.0  ;;  %v3604_v1 = vmax.f32 %v2269_v10, 0.0 }
  0x56   : > { %v962_v8 = vadd.f32 %v930_v51, %v830_v3  ;;  %v963_v59 = vadd.f32 %v931_v40, %v831_v33  ;;  %v1328_v4 = vmul.f32 %v2228_v5, %v3539_v46  ;;  %v3605_v42 = vmax.f32 %v2272_v11, 0.0 }
  0x57   : > { %v317_v56 = vmul.f32 %v3602_v0, %v2134_v12  ;;  %v318_v55 = vmul.f32 %v3603_v26, %v2134_v12  ;;  %v417_v58 = vmul.f32 %v3604_v1, %v2136_v13  ;;  %v3606_v52 = vmax.f32 %v2278_v7, 0.0  ;;  %v2649_v7 = vld [vmem:[%s2132_s28 + $0x158] sm:$0xff] }
  0x58   : > { %v418_v32 = vmul.f32 %v3605_v42, %v2136_v13  ;;  %v3607_v10 = vmax.f32 %v2284_v37, 0.0  ;;  %v3608_v51 = vmax.f32 %v2292_v53, 0.0  ;;  %v1095_v3 = vadd.f32 %v1063_v35, %v962_v8  ;;  %v2664_v8 = vld [vmem:[%s2132_s28 + $0x15a] sm:$0xff] }
  0x59   : > { %v449_v0 = vadd.f32 %v417_v58, %v317_v56  ;;  %v549_v26 = vmul.f32 %v3606_v52, %v2141_v17  ;;  %v1096_v33 = vadd.f32 %v1064_v43, %v963_v59  ;;  %v3609_v11 = vmax.f32 %v2296_v60, 0.0  ;;  %v2646_v56 = vld [vmem:[%s2132_s28 + $0x150] sm:$0xff] }
  0x5a   : > { %v550_v1 = vmul.f32 %v3607_v10, %v2141_v17  ;;  %v682_v40 = vmul.f32 %v3608_v51, %v2143_v18  ;;  %v450_v46 = vadd.f32 %v418_v32, %v318_v55  ;;  %v2652_v58 = vld [vmem:[%s2132_s28 + $0x152] sm:$0xff]  ;;  %v3610_v52 = vmax.f32 %v2299_v25, 0.0 }
  0x5b   : > { %v683_v42 = vmul.f32 %v3609_v11, %v2143_v18  ;;  %v581_v37 = vadd.f32 %v549_v26, %v449_v0  ;;  %v3611_v35 = vmax.f32 %v2309_v21, 0.0  ;;  %v3612_v60 = vmax.f32 %v2316_v28, 0.0 }
  0x5c   : > { %v814_v53 = vmul.f32 %v3610_v52, %v2145_v19  ;;  %v1227_v59 = vadd.f32 %v1195_v54, %v1095_v3  ;;  %v1228_v32 = vadd.f32 %v1196_v14, %v1096_v33  ;;  %v582_v10 = vadd.f32 %v550_v1, %v450_v46  ;;  %v2673_v52 = vld [vmem:[%s2132_s28 + $0x154] sm:$0xff]  ;;  %v2677_v14 = vld [vmem:[%s2132_s28 + $0x15c] sm:$0xff] }
  0x5d   : > { %v815_v43 = vmul.f32 %v3611_v35, %v2145_v19  ;;  %v946_v55 = vmul.f32 %v3612_v60, %v2147_v20  ;;  %v3613_v0 = vmax.f32 %v2319_v29, 0.0  ;;  %v714_v25 = vadd.f32 %v682_v40, %v581_v37 }
  0x5e   : > { %v3545_v51 = vmax.f32 %v2646_v56, 0.0  ;;  %v3544_v21 = vmax.f32 %v2649_v7, 0.0  ;;  %v3543_v11 = vmax.f32 %v2652_v58, 0.0  ;;  %v1359_v28 = vadd.f32 %v1327_v49, %v1227_v59 }
  0x5f   : > { %v947_v26 = vmul.f32 %v3613_v0, %v2147_v20  ;;  %v1360_v35 = vadd.f32 %v1328_v4, %v1228_v32  ;;  %v715_v60 = vadd.f32 %v683_v42, %v582_v10  ;;  %v3542_v54 = vmax.f32 %v2664_v8, 0.0 }
  0x60   : > { %v846_v46 = vadd.f32 %v814_v53, %v714_v25  ;;  %v1079_v29 = vmul.f32 %v2152_v27, %v3545_v51  ;;  %v1080_v1 = vmul.f32 %v2152_v27, %v3544_v21  ;;  %v1211_v40 = vmul.f32 %v2163_v34, %v3543_v11 }
  0x61   : > { %v1389_v49 = vpack.c.bf16 %v1360_v35, %v1359_v28  ;;  %v847_v4 = vadd.f32 %v815_v43, %v715_v60  ;;  %v1212_v3 = vmul.f32 %v2163_v34, %v3542_v54  ;;  %v3541_v33 = vmax.f32 %v2673_v52, 0.0 }
  0x62   : > { %v978_v42 = vadd.f32 %v946_v55, %v846_v46  ;;  %v3540_v37 = vmax.f32 %v2677_v14, 0.0  ;;  %v3614_v53 = vmax.f32 %v2355_v48, 0.0  ;;  %v3615_v32 = vmax.f32 %v2359_v24, 0.0 }
  0x63   : > { %2032 = vmatprep.mubr.msk.bf16.mxu0 %vm1411_vm0, %v1389_v49  ;;  %v979_v43 = vadd.f32 %v947_v26, %v847_v4  ;;  %v1343_v0 = vmul.f32 %v2228_v5, %v3541_v33  ;;  %v3616_v55 = vmax.f32 %v2366_v47, 0.0  ;;  %v3617_v48 = vmax.f32 %v2369_v16, 0.0  ;;  %v3618_v26 = vld [vmem:[#allocation2_spill] sm:$0xff]  ;;  %v3620_v49 = vld [vmem:[#allocation3_spill] sm:$0xff] }
  0x64   : > { %v303_v59 = vmul.f32 %v3614_v53, %v2134_v12  ;;  %v304_v10 = vmul.f32 %v3615_v32, %v2134_v12  ;;  %v1111_v35 = vadd.f32 %v1079_v29, %v978_v42  ;;  %v1344_v24 = vmul.f32 %v2228_v5, %v3540_v37  ;;  %v2725_v37 = vld [vmem:[%s2132_s28 + $0xb0] sm:$0xff] }
  0x65   : > { %v403_v25 = vmul.f32 %v3616_v55, %v2136_v13  ;;  %v404_v28 = vmul.f32 %v3617_v48, %v2136_v13  ;;  %v3619_v60 = vmax.f32 %v3618_v26, 0.0  ;;  %v3621_v4 = vmax.f32 %v3620_v49, 0.0  ;;  %v3622_v55 = vld [vmem:[#allocation4_spill] sm:$0xff]  ;;  %v2722_v48 = vld [vmem:[%s2132_s28 + $0xa8] sm:$0xff]  ;;  %v3624_v26 = vld [vmem:[#allocation5_spill] sm:$0xff] }
  0x66   : > { %v1112_v47 = vadd.f32 %v1080_v1, %v979_v43  ;;  %v3623_v29 = vmax.f32 %v3622_v55, 0.0  ;;  %v1243_v33 = vadd.f32 %v1211_v40, %v1111_v35  ;;  %v3626_v49 = vld [vmem:[#allocation6_spill] sm:$0xff]  ;;  %v3630_v40 = vld [vmem:[#allocation8_spill] sm:$0xff]  ;;  %v3552_v51 = vmax.f32 %v2725_v37, 0.0 }
  0x67   : > { %v535_v46 = vmul.f32 %v3619_v60, %v2141_v17  ;;  %v536_v53 = vmul.f32 %v3621_v4, %v2141_v17  ;;  %v435_v32 = vadd.f32 %v403_v25, %v303_v59  ;;  %v436_v16 = vadd.f32 %v404_v28, %v304_v10  ;;  %v3628_v59 = vld [vmem:[#allocation7_spill] sm:$0xff] }
  0x68   : > { %v668_v42 = vmul.f32 %v3623_v29, %v2143_v18  ;;  %v3625_v60 = vmax.f32 %v3624_v26, 0.0  ;;  %v3627_v4 = vmax.f32 %v3626_v49, 0.0  ;;  %v3629_v10 = vmax.f32 %v3628_v59, 0.0  ;;  %v2737_v25 = vld [vmem:[%s2132_s28 + $0xaa] sm:$0xff]  ;;  %v2743_v26 = vld [vmem:[%s2132_s28 + $0xb2] sm:$0xff] }
  0x69   : > { %v1244_v28 = vadd.f32 %v1212_v3, %v1112_v47  ;;  %v567_v55 = vadd.f32 %v535_v46, %v435_v32  ;;  %v568_v29 = vadd.f32 %v536_v53, %v436_v16  ;;  %v3631_v35 = vmax.f32 %v3630_v40, 0.0  ;;  %v2755_v32 = vld [vmem:[%s2132_s28 + $0xb4] sm:$0xff] }
  0x6a   : > { %v669_v54 = vmul.f32 %v3625_v60, %v2143_v18  ;;  %v800_v1 = vmul.f32 %v3627_v4, %v2145_v19  ;;  %v801_v43 = vmul.f32 %v3629_v10, %v2145_v19  ;;  %v2746_v60 = vld [vmem:[%s2132_s28 + $0xac] sm:$0xff]  ;;  %v1375_v49 = vadd.f32 %v1343_v0, %v1243_v33  ;;  %v3632_v4 = vld [vmem:[#allocation9_spill] sm:$0xff] }
  0x6b   : > { %v932_v11 = vmul.f32 %v3631_v35, %v2147_v20  ;;  %v3633_v21 = vmax.f32 %v3632_v4, 0.0  ;;  %v3554_v10 = vmax.f32 %v2722_v48, 0.0  ;;  %v1376_v3 = vadd.f32 %v1344_v24, %v1244_v28 }
  0x6c   : > { %v700_v46 = vadd.f32 %v668_v42, %v567_v55  ;;  %v701_v53 = vadd.f32 %v669_v54, %v568_v29  ;;  %v3548_v47 = vmax.f32 %v2737_v25, 0.0  ;;  %v1066_v33 = vmul.f32 %v2152_v27, %v3552_v51  ;;  %v469_v51 = vld [vmem:[%s2132_s28 + $0x64] sm:$0xff] }
  0x6d   : > { %v933_v59 = vmul.f32 %v3633_v21, %v2147_v20  ;;  %v1065_v16 = vmul.f32 %v2152_v27, %v3554_v10  ;;  %v3546_v21 = vmax.f32 %v2743_v26, 0.0  ;;  %v3547_v0 = vmax.f32 %v2746_v60, 0.0 }
  0x6e   : > { %v1397_v40 = vpack.c.bf16 %v1376_v3, %v1375_v49  ;;  %v832_v24 = vadd.f32 %v800_v1, %v700_v46  ;;  %v833_v42 = vadd.f32 %v801_v43, %v701_v53  ;;  %v1197_v54 = vmul.f32 %v2163_v34, %v3548_v47  ;;  %v3636_v46 = vld [vmem:[#allocation10_spill] sm:$0xff] }
  0x6f   : > { %v1198_v28 = vmul.f32 %v2163_v34, %v3546_v21  ;;  %v3549_v55 = vmax.f32 %v2755_v32, 0.0  ;;  %v1329_v29 = vmul.f32 %v2228_v5, %v3547_v0  ;;  %v3634_v35 = vmax.f32 %v2452_v36, 0.0  ;;  %v3638_v36 = vld [vmem:[#allocation11_spill] sm:$0xff] }
  0x70   : > { %2048 = vmatprep.mubr.msk.bf16.mxu1 %vm1411_vm0, %v1397_v40  ;;  %v964_v43 = vadd.f32 %v932_v11, %v832_v24  ;;  %v965_v49 = vadd.f32 %v933_v59, %v833_v42  ;;  %v3635_v4 = vmax.f32 %v2456_v44, 0.0  ;;  %v3637_v53 = vmax.f32 %v3636_v46, 0.0 }
  0x71   : > { %v319_v1 = vmul.f32 %v3634_v35, %v2134_v12  ;;  %v1330_v0 = vmul.f32 %v2228_v5, %v3549_v55  ;;  %v3639_v35 = vmax.f32 %v3638_v36, 0.0  ;;  %v3640_v11 = vmax.f32 %v2472_v61, 0.0  ;;  %v2801_v55 = vld [vmem:[%s2132_s28 + $0x168] sm:$0xff]  ;;  %v2804_v36 = vld [vmem:[%s2132_s28 + $0x170] sm:$0xff] }
  0x72   : > { %v320_v3 = vmul.f32 %v3635_v4, %v2134_v12  ;;  %v419_v21 = vmul.f32 %v3637_v53, %v2136_v13  ;;  %v3641_v44 = vmax.f32 %v2475_v6, 0.0  ;;  %v1097_v24 = vadd.f32 %v1065_v16, %v964_v43 }
  0x73   : > { %v420_v47 = vmul.f32 %v3639_v35, %v2136_v13  ;;  %v551_v59 = vmul.f32 %v3640_v11, %v2141_v17  ;;  %v1098_v42 = vadd.f32 %v1066_v33, %v965_v49  ;;  %v3642_v46 = vmax.f32 %v2481_v2, 0.0  ;;  %v3645_v33 = vld [vmem:[#allocation12_spill] sm:$0xff] }
  0x74   : > { %v552_v40 = vmul.f32 %v3641_v44, %v2141_v17  ;;  %v451_v4 = vadd.f32 %v419_v21, %v319_v1  ;;  %v3643_v61 = vmax.f32 %v2491_v15, 0.0  ;;  %v3644_v6 = vmax.f32 %v2494_v50, 0.0  ;;  %v2816_v2 = vld [vmem:[%s2132_s28 + $0x16a] sm:$0xff] }
  0x75   : > { %v684_v53 = vmul.f32 %v3642_v46, %v2143_v18  ;;  %v452_v35 = vadd.f32 %v420_v47, %v320_v3  ;;  %v3646_v21 = vmax.f32 %v3645_v33, 0.0  ;;  %v1229_v43 = vadd.f32 %v1197_v54, %v1097_v24  ;;  %v2822_v3 = vld [vmem:[%s2132_s28 + $0x172] sm:$0xff] }
  0x76   : > { %v685_v11 = vmul.f32 %v3643_v61, %v2143_v18  ;;  %v816_v16 = vmul.f32 %v3644_v6, %v2145_v19  ;;  %v1230_v49 = vadd.f32 %v1198_v28, %v1098_v42  ;;  %v583_v44 = vadd.f32 %v551_v59, %v451_v4  ;;  %v3648_v46 = vld [vmem:[#allocation13_spill] sm:$0xff]  ;;  %v2830_v54 = vld [vmem:[%s2132_s28 + $0x16c] sm:$0xff] }
  0x77   : > { %v817_v1 = vmul.f32 %v3646_v21, %v2145_v19  ;;  %v3647_v47 = vmax.f32 %v2507_v23, 0.0  ;;  %v584_v50 = vadd.f32 %v552_v40, %v452_v35  ;;  %v3649_v61 = vmax.f32 %v3648_v46, 0.0  ;;  %v2834_v42 = vld [vmem:[%s2132_s28 + $0x174] sm:$0xff]  ;;  %v237_v40 = vld [vmem:[%s2132_s28 + $0x60] sm:$0xff] }
  0x78   : > { %v3551_v33 = vmax.f32 %v2801_v55, 0.0  ;;  %v3550_v21 = vmax.f32 %v2804_v36, 0.0  ;;  %v1361_v28 = vadd.f32 %v1329_v29, %v1229_v43  ;;  %v1362_v59 = vadd.f32 %v1330_v0, %v1230_v49  ;;  %v238_v43 = vld [vmem:[%s2132_s28 + $0x68] sm:$0xff] }
  0x79   : > { %v948_v15 = vmul.f32 %v3647_v47, %v2147_v20  ;;  %v949_v6 = vmul.f32 %v3649_v61, %v2147_v20  ;;  %v716_v23 = vadd.f32 %v684_v53, %v583_v44  ;;  %v3553_v24 = vmax.f32 %v2816_v2, 0.0  ;;  %v337_v0 = vld [vmem:[%s2132_s28 + $0x62] sm:$0xff] }
  0x7a   : > { %v717_v4 = vadd.f32 %v685_v11, %v584_v50  ;;  %v1081_v35 = vmul.f32 %v2152_v27, %v3551_v33  ;;  %v1082_v47 = vmul.f32 %v2152_v27, %v3550_v21  ;;  %v3555_v29 = vmax.f32 %v2822_v3, 0.0  ;;  %v338_v50 = vld [vmem:[%s2132_s28 + $0x6a] sm:$0xff] }
  0x7b   : > { %v1390_v53 = vpack.c.bf16 %v1362_v59, %v1361_v28  ;;  %v848_v49 = vadd.f32 %v816_v16, %v716_v23  ;;  %v1213_v44 = vmul.f32 %v2163_v34, %v3553_v24  ;;  %v1309_v11 = vmax.f32 %v2830_v54, 0.0  ;;  %v470_v24 = vld [vmem:[%s2132_s28 + $0x6c] sm:$0xff] }
  0x7c   : > { %v849_v46 = vadd.f32 %v817_v1, %v717_v4  ;;  %v1214_v61 = vmul.f32 %v2163_v34, %v3555_v29  ;;  %v3556_v21 = vmax.f32 %v2834_v42, 0.0  ;;  %v269_v33 = vmax.f32 %v237_v40, 0.0 }
  0x7d   : > { %2033 = vmatmul.mubr.msk.bf16.gmra.mrb[4].mxu0 %vm1411_vm0, %v1390_v53  ;;  %v980_v28 = vadd.f32 %v948_v15, %v848_v49  ;;  %v1345_v16 = vmul.f32 %v2228_v5, %v1309_v11  ;;  %v270_v59 = vmax.f32 %v238_v43, 0.0  ;;  %v369_v23 = vmax.f32 %v337_v0, 0.0 }
  0x7e   : > { %v981_v10 = vadd.f32 %v949_v6, %v849_v46  ;;  %v1346_v1 = vmul.f32 %v2228_v5, %v3556_v21  ;;  %v305_v4 = vmul.f32 %v2134_v12, %v269_v33  ;;  %v370_v40 = vmax.f32 %v338_v50, 0.0 }
  0x7f   : > { %v1113_v29 = vadd.f32 %v1081_v35, %v980_v28  ;;  %v306_v53 = vmul.f32 %v2134_v12, %v270_v59  ;;  %v405_v15 = vmul.f32 %v2136_v13, %v369_v23  ;;  %v501_v49 = vmax.f32 %v469_v51, 0.0  ;;  %v2876_v28 = vld [vmem:[%s2132_s28 + $0xc0] sm:$0xff] }
  0x80   : > { %v1114_v43 = vadd.f32 %v1082_v47, %v981_v10  ;;  %v406_v6 = vmul.f32 %v2136_v13, %v370_v40  ;;  %v502_v0 = vmax.f32 %v470_v24, 0.0  ;;  %v670_v46 = vmul.f32 %v1027_v45, %v2143_v18  ;;  %v2883_v45 = vld [vmem:[%s2132_s28 + $0xc8] sm:$0xff]  ;;  %v253_v40 = vld [vmem:[%s2132_s28 + $0x120] sm:$0xff] }
  0x81   : > { %v1245_v21 = vadd.f32 %v1213_v44, %v1113_v29  ;;  %v437_v33 = vadd.f32 %v405_v15, %v305_v4  ;;  %v537_v35 = vmul.f32 %v2141_v17, %v501_v49  ;;  %v671_v50 = vmul.f32 %v1028_v57, %v2143_v18  ;;  %v2886_v24 = vld [vmem:[%s2132_s28 + $0xc2] sm:$0xff]  ;;  %v2889_v29 = vld [vmem:[%s2132_s28 + $0xca] sm:$0xff] }
  0x82   : > { %v1246_v51 = vadd.f32 %v1214_v61, %v1114_v43  ;;  %v438_v10 = vadd.f32 %v406_v6, %v306_v53  ;;  %v538_v47 = vmul.f32 %v2141_v17, %v502_v0  ;;  %v802_v31 = vmul.f32 %v1159_v22, %v2145_v19  ;;  %v254_v49 = vld [vmem:[%s2132_s28 + $0x128] sm:$0xff] }
  0x83   : > { %v1377_v9 = vadd.f32 %v1345_v16, %v1245_v21  ;;  %v569_v57 = vadd.f32 %v537_v35, %v437_v33  ;;  %v803_v44 = vmul.f32 %v1160_v63, %v2145_v19  ;;  %v934_v61 = vmul.f32 %v1291_v39, %v2147_v20  ;;  %v2908_v39 = vld [vmem:[%s2132_s28 + $0xcc] sm:$0xff]  ;;  %v353_v43 = vld [vmem:[%s2132_s28 + $0x122] sm:$0xff] }
  0x84   : > { %v1378_v22 = vadd.f32 %v1346_v1, %v1246_v51  ;;  %v570_v59 = vadd.f32 %v538_v47, %v438_v10  ;;  %v3650_v23 = vmax.f32 %v2597_v62, 0.0  ;;  %v1031_v16 = vmax.f32 %v2876_v28, 0.0  ;;  %v354_v6 = vld [vmem:[%s2132_s28 + $0x12a] sm:$0xff] }
  0x85   : > { %v702_v4 = vadd.f32 %v670_v46, %v569_v57  ;;  %v1032_v38 = vmax.f32 %v2883_v45, 0.0  ;;  %v3558_v30 = vmax.f32 %v2886_v24, 0.0  ;;  %v3557_v63 = vmax.f32 %v2889_v29, 0.0 }
  0x86   : > { %v935_v21 = vmul.f32 %v3650_v23, %v2147_v20  ;;  %v1398_v1 = vpack.c.bf16 %v1378_v22, %v1377_v9  ;;  %v703_v53 = vadd.f32 %v671_v50, %v570_v59  ;;  %v1067_v62 = vmul.f32 %v2152_v27, %v1031_v16  ;;  %v485_v50 = vld [vmem:[%s2132_s28 + $0x124] sm:$0xff]  ;;  %v486_v23 = vld [vmem:[%s2132_s28 + $0x12c] sm:$0xff] }
  0x87   : > { %v1295_v15 = vmax.f32 %v2898_v41, 0.0  ;;  %v834_v0 = vadd.f32 %v802_v31, %v702_v4  ;;  %v1068_v46 = vmul.f32 %v2152_v27, %v1032_v38  ;;  %v1199_v33 = vmul.f32 %v2163_v34, %v3558_v30 }
  0x88   : > { %v1200_v35 = vmul.f32 %v2163_v34, %v3557_v63  ;;  %2049 = vmatmul.mubr.msk.bf16.gmra.mrb[4].mxu1 %vm1411_vm0, %v1398_v1  ;;  %v835_v51 = vadd.f32 %v803_v44, %v703_v53  ;;  %v3563_v10 = vmax.f32 %v2908_v39, 0.0  ;;  %v285_v31 = vmax.f32 %v253_v40, 0.0 }
  0x89   : > { %v1331_v47 = vmul.f32 %v2228_v5, %v1295_v15  ;;  %v966_v9 = vadd.f32 %v934_v61, %v834_v0  ;;  %v286_v57 = vmax.f32 %v254_v49, 0.0  ;;  %v385_v22 = vmax.f32 %v353_v43, 0.0 }
  0x8a   : > { %v386_v59 = vmax.f32 %v354_v6, 0.0  ;;  %v967_v4 = vadd.f32 %v935_v21, %v835_v51  ;;  %v1332_v63 = vmul.f32 %v2228_v5, %v3563_v10  ;;  %v321_v44 = vmul.f32 %v2134_v12, %v285_v31 }
  0x8b   : > { %v517_v1 = vmax.f32 %v485_v50, 0.0  ;;  %v1099_v53 = vadd.f32 %v1067_v62, %v966_v9  ;;  %v322_v30 = vmul.f32 %v2134_v12, %v286_v57  ;;  %v421_v40 = vmul.f32 %v2136_v13, %v385_v22  ;;  %v2949_v9 = vld [vmem:[%s2132_s28 + $0x180] sm:$0xff]  ;;  %v2952_v57 = vld [vmem:[%s2132_s28 + $0x188] sm:$0xff] }
  0x8c   : > { %v422_v61 = vmul.f32 %v2136_v13, %v386_v59  ;;  %v1100_v49 = vadd.f32 %v1068_v46, %v967_v4  ;;  %v518_v21 = vmax.f32 %v486_v23, 0.0  ;;  %v3651_v5 = vmax.f32 %v2646_v56, 0.0  ;;  %v2962_v23 = vld [vmem:[%s2132_s28 + $0x182] sm:$0xff] }
  0x8d   : > { %v553_v43 = vmul.f32 %v2141_v17, %v517_v1  ;;  %v1231_v0 = vadd.f32 %v1199_v33, %v1099_v53  ;;  %v453_v50 = vadd.f32 %v421_v40, %v321_v44  ;;  %v3652_v51 = vmax.f32 %v2649_v7, 0.0  ;;  %v2965_v7 = vld [vmem:[%s2132_s28 + $0x18a] sm:$0xff] }
  0x8e   : > { %v686_v6 = vmul.f32 %v3651_v5, %v2143_v18  ;;  %v454_v62 = vadd.f32 %v422_v61, %v322_v30  ;;  %v1232_v46 = vadd.f32 %v1200_v35, %v1100_v49  ;;  %v554_v22 = vmul.f32 %v2141_v17, %v518_v21  ;;  %v2968_v4 = vld [vmem:[%s2132_s28 + $0x184] sm:$0xff]  ;;  %v2979_v5 = vld [vmem:[%s2132_s28 + $0x18c] sm:$0xff] }
  0x8f   : > { %v687_v31 = vmul.f32 %v3652_v51, %v2143_v18  ;;  %v3653_v59 = vmax.f32 %v2652_v58, 0.0  ;;  %v3654_v33 = vmax.f32 %v2664_v8, 0.0  ;;  %v1363_v44 = vadd.f32 %v1331_v47, %v1231_v0 }
  0x90   : > { %v585_v35 = vadd.f32 %v553_v43, %v453_v50  ;;  %v3655_v1 = vmax.f32 %v2673_v52, 0.0  ;;  %v3656_v58 = vmax.f32 %v2677_v14, 0.0  ;;  %v1364_v8 = vadd.f32 %v1332_v63, %v1232_v46  ;;  %v239_v14 = vld [vmem:[%s2132_s28 + $0x78] sm:$0xff]  ;;  %v240_v50 = vld [vmem:[%s2132_s28 + $0x80] sm:$0xff] }
  0x91   : > { %v818_v56 = vmul.f32 %v3653_v59, %v2145_v19  ;;  %v819_v30 = vmul.f32 %v3654_v33, %v2145_v19  ;;  %v586_v61 = vadd.f32 %v554_v22, %v454_v62  ;;  %v3562_v49 = vmax.f32 %v2949_v9, 0.0  ;;  %v339_v46 = vld [vmem:[%s2132_s28 + $0x7a] sm:$0xff]  ;;  %v340_v22 = vld [vmem:[%s2132_s28 + $0x82] sm:$0xff] }
  0x92   : > { %v950_v53 = vmul.f32 %v3655_v1, %v2147_v20  ;;  %v951_v40 = vmul.f32 %v3656_v58, %v2147_v20  ;;  %v3561_v21 = vmax.f32 %v2952_v57, 0.0  ;;  %v718_v47 = vadd.f32 %v686_v6, %v585_v35  ;;  %v471_v35 = vld [vmem:[%s2132_s28 + $0x7c] sm:$0xff]  ;;  %v3006_v58 = vld [vmem:[%s3476_s1 + $0x8] ss:$0 sm:$0xff] }
  0x93   : > { %v3559_v43 = vmax.f32 %v2962_v23, 0.0  ;;  %v3560_v52 = vmax.f32 %v2965_v7, 0.0  ;;  %v3564_v0 = vmax.f32 %v2968_v4, 0.0  ;;  %v1391_v51 = vpack.c.bf16 %v1364_v8, %v1363_v44 }
  0x94   : > { %v719_v63 = vadd.f32 %v687_v31, %v586_v61  ;;  %v1083_v62 = vmul.f32 %v2152_v27, %v3562_v49  ;;  %v1084_v6 = vmul.f32 %v2152_v27, %v3561_v21  ;;  %v850_v59 = vadd.f32 %v818_v56, %v718_v47  ;;  %v472_v47 = vld [vmem:[%s2132_s28 + $0x84] sm:$0xff] }
  0x95   : > { %v1215_v33 = vmul.f32 %v2163_v34, %v3559_v43  ;;  %v1216_v31 = vmul.f32 %v2163_v34, %v3560_v52  ;;  %v3568_v44 = vmax.f32 %v2979_v5, 0.0  ;;  %2036 = vmatprep.mubr.msk.bf16.mxu0 %vm1411_vm0, %v1391_v51  ;;  %v1347_v56 = vmul.f32 %v3006_v58, %v3564_v0 }
  0x96   : > { %v851_v1 = vadd.f32 %v819_v30, %v719_v63  ;;  %v271_v8 = vmax.f32 %v239_v14, 0.0  ;;  %v272_v61 = vmax.f32 %v240_v50, 0.0  ;;  %v982_v43 = vadd.f32 %v950_v53, %v850_v59 }
  0x97   : > { %v1348_v52 = vmul.f32 %v3006_v58, %v3568_v44  ;;  %v371_v21 = vmax.f32 %v339_v46, 0.0  ;;  %v372_v51 = vmax.f32 %v340_v22, 0.0  ;;  %v503_v10 = vmax.f32 %v471_v35, 0.0 }
  0x98   : > { %v983_v30 = vadd.f32 %v951_v40, %v851_v1  ;;  %v307_v63 = vmul.f32 %v2134_v12, %v271_v8  ;;  %v308_v49 = vmul.f32 %v2134_v12, %v272_v61  ;;  %v1115_v0 = vadd.f32 %v1083_v62, %v982_v43  ;;  %v3028_v61 = vld [vmem:[%s2132_s28 + $0xd8] sm:$0xff] }
  0x99   : > { %v407_v14 = vmul.f32 %v2136_v13, %v371_v21  ;;  %v408_v53 = vmul.f32 %v2136_v13, %v372_v51  ;;  %v504_v50 = vmax.f32 %v472_v47, 0.0  ;;  %v539_v46 = vmul.f32 %v2141_v17, %v503_v10  ;;  %v3031_v47 = vld [vmem:[%s2132_s28 + $0xe0] sm:$0xff] }
  0x9a   : > { %v1116_v59 = vadd.f32 %v1084_v6, %v983_v30  ;;  %v3657_v40 = vmax.f32 %v2722_v48, 0.0  ;;  %v3658_v1 = vmax.f32 %v2725_v37, 0.0  ;;  %v1247_v35 = vadd.f32 %v1215_v33, %v1115_v0  ;;  %v3034_v6 = vld [vmem:[%s2132_s28 + $0xda] sm:$0xff]  ;;  %v3046_v30 = vld [vmem:[%s2132_s28 + $0xe2] sm:$0xff] }
  0x9b   : > { %v439_v43 = vadd.f32 %v407_v14, %v307_v63  ;;  %v440_v62 = vadd.f32 %v408_v53, %v308_v49  ;;  %v540_v21 = vmul.f32 %v2141_v17, %v504_v50  ;;  %v3659_v48 = vmax.f32 %v2737_v25, 0.0  ;;  %v3049_v63 = vld [vmem:[%s2132_s28 + $0xdc] sm:$0xff] }
  0x9c   : > { %v672_v22 = vmul.f32 %v3657_v40, %v2143_v18  ;;  %v673_v8 = vmul.f32 %v3658_v1, %v2143_v18  ;;  %v1248_v10 = vadd.f32 %v1216_v31, %v1116_v59  ;;  %v3660_v37 = vmax.f32 %v2743_v26, 0.0  ;;  %v3058_v1 = vld [vmem:[%s2132_s28 + $0xe4] sm:$0xff] }
  0x9d   : > { %v804_v51 = vmul.f32 %v3659_v48, %v2145_v19  ;;  %v3661_v49 = vmax.f32 %v2746_v60, 0.0  ;;  %v1379_v31 = vadd.f32 %v1347_v56, %v1247_v35  ;;  %v571_v14 = vadd.f32 %v539_v46, %v439_v43  ;;  %v255_v35 = vld [vmem:[%s2132_s28 + $0x138] sm:$0xff] }
  0x9e   : > { %v805_v0 = vmul.f32 %v3660_v37, %v2145_v19  ;;  %v572_v53 = vadd.f32 %v540_v21, %v440_v62  ;;  %v3662_v25 = vmax.f32 %v2755_v32, 0.0  ;;  %v1380_v26 = vadd.f32 %v1348_v52, %v1248_v10  ;;  %v256_v32 = vld [vmem:[%s2132_s28 + $0x140] sm:$0xff] }
  0x9f   : > { %v936_v33 = vmul.f32 %v3661_v49, %v2147_v20  ;;  %v3566_v59 = vmax.f32 %v3028_v61, 0.0  ;;  %v3565_v60 = vmax.f32 %v3031_v47, 0.0  ;;  %v3567_v40 = vmax.f32 %v3034_v6, 0.0  ;;  %v355_v43 = vld [vmem:[%s2132_s28 + $0x13a] sm:$0xff] }
  0xa0   : > { %v937_v50 = vmul.f32 %v3662_v25, %v2147_v20  ;;  %v704_v48 = vadd.f32 %v672_v22, %v571_v14  ;;  %v705_v37 = vadd.f32 %v673_v8, %v572_v53  ;;  %v3569_v56 = vmax.f32 %v3046_v30, 0.0  ;;  %v356_v8 = vld [vmem:[%s2132_s28 + $0x142] sm:$0xff] }
  0xa1   : > { %v3575_v46 = vmax.f32 %v3049_v63, 0.0  ;;  %v1399_v52 = vpack.c.bf16 %v1380_v26, %v1379_v31  ;;  %v1069_v62 = vmul.f32 %v2152_v27, %v3566_v59  ;;  %v1070_v21 = vmul.f32 %v2152_v27, %v3565_v60  ;;  %v487_v53 = vld [vmem:[%s2132_s28 + $0x13c] sm:$0xff] }
  0xa2   : > { %v1201_v22 = vmul.f32 %v2163_v34, %v3567_v40  ;;  %v836_v10 = vadd.f32 %v804_v51, %v704_v48  ;;  %v837_v49 = vadd.f32 %v805_v0, %v705_v37  ;;  %v1202_v14 = vmul.f32 %v2163_v34, %v3569_v56  ;;  %v488_v40 = vld [vmem:[%s2132_s28 + $0x144] sm:$0xff] }
  0xa3   : > { %v3570_v31 = vmax.f32 %v3058_v1, 0.0  ;;  %2052 = vmatprep.mubr.msk.bf16.mxu1 %vm1411_vm0, %v1399_v52  ;;  %v1333_v25 = vmul.f32 %v3006_v58, %v3575_v46  ;;  %v287_v26 = vmax.f32 %v255_v35, 0.0  ;;  %v288_v60 = vmax.f32 %v256_v32, 0.0 }
  0xa4   : > { %v387_v59 = vmax.f32 %v355_v43, 0.0  ;;  %v968_v44 = vadd.f32 %v936_v33, %v836_v10  ;;  %v969_v51 = vadd.f32 %v937_v50, %v837_v49  ;;  %v388_v48 = vmax.f32 %v356_v8, 0.0 }
  0xa5   : > { %v1334_v0 = vmul.f32 %v3006_v58, %v3570_v31  ;;  %v323_v37 = vmul.f32 %v2134_v12, %v287_v26  ;;  %v324_v52 = vmul.f32 %v2134_v12, %v288_v60  ;;  %v519_v35 = vmax.f32 %v487_v53, 0.0 }
  0xa6   : > { %v423_v56 = vmul.f32 %v2136_v13, %v387_v59  ;;  %v1101_v32 = vadd.f32 %v1069_v62, %v968_v44  ;;  %v1102_v43 = vadd.f32 %v1070_v21, %v969_v51  ;;  %v424_v33 = vmul.f32 %v2136_v13, %v388_v48  ;;  %v3101_v21 = vld [vmem:[%s2132_s28 + $0x198] sm:$0xff] }
  0xa7   : > { %v520_v50 = vmax.f32 %v488_v40, 0.0  ;;  %v555_v8 = vmul.f32 %v2141_v17, %v519_v35  ;;  %v3663_v49 = vmax.f32 %v2801_v55, 0.0  ;;  %v3664_v60 = vmax.f32 %v2804_v36, 0.0  ;;  %v3104_v40 = vld [vmem:[%s2132_s28 + $0x1a0] sm:$0xff] }
  0xa8   : > { %v455_v10 = vadd.f32 %v423_v56, %v323_v37  ;;  %v1233_v31 = vadd.f32 %v1201_v22, %v1101_v32  ;;  %v1234_v53 = vadd.f32 %v1202_v14, %v1102_v43  ;;  %v456_v44 = vadd.f32 %v424_v33, %v324_v52  ;;  %v3107_v56 = vld [vmem:[%s2132_s28 + $0x19a] sm:$0xff]  ;;  %v3119_v37 = vld [vmem:[%s2132_s28 + $0x1a2] sm:$0xff] }
  0xa9   : > { %v688_v26 = vmul.f32 %v3663_v49, %v2143_v18  ;;  %v689_v59 = vmul.f32 %v3664_v60, %v2143_v18  ;;  %v556_v62 = vmul.f32 %v2141_v17, %v520_v50  ;;  %v3665_v55 = vmax.f32 %v2816_v2, 0.0  ;;  %v3122_v52 = vld [vmem:[%s2132_s28 + $0x19c] sm:$0xff]  ;;  %v341_v60 = vld [vmem:[%s2132_s28 + $0x92] sm:$0xff] }
  0xaa   : > { %v587_v51 = vadd.f32 %v555_v8, %v455_v10  ;;  %v3666_v36 = vmax.f32 %v2822_v3, 0.0  ;;  %v952_v14 = vmul.f32 %v1309_v11, %v2147_v20  ;;  %v1365_v35 = vadd.f32 %v1333_v25, %v1233_v31  ;;  %v3131_v10 = vld [vmem:[%s2132_s28 + $0x1a4] sm:$0xff] }
  0xab   : > { %v820_v48 = vmul.f32 %v3665_v55, %v2145_v19  ;;  %v1366_v32 = vadd.f32 %v1334_v0, %v1234_v53  ;;  %v588_v43 = vadd.f32 %v556_v62, %v456_v44  ;;  %v3667_v2 = vmax.f32 %v2834_v42, 0.0  ;;  %v241_v0 = vld [vmem:[%s2132_s28 + $0x90] sm:$0xff]  ;;  %v242_v42 = vld [vmem:[%s2132_s28 + $0x98] sm:$0xff] }
  0xac   : > { %v821_v22 = vmul.f32 %v3666_v36, %v2145_v19  ;;  %v720_v3 = vadd.f32 %v688_v26, %v587_v51  ;;  %v3574_v50 = vmax.f32 %v3101_v21, 0.0  ;;  %v3572_v54 = vmax.f32 %v3104_v40, 0.0  ;;  %v342_v62 = vld [vmem:[%s2132_s28 + $0x9a] sm:$0xff] }
  0xad   : > { %v953_v33 = vmul.f32 %v3667_v2, %v2147_v20  ;;  %v3571_v11 = vmax.f32 %v3107_v56, 0.0  ;;  %v1392_v8 = vpack.c.bf16 %v1366_v32, %v1365_v35  ;;  %v721_v49 = vadd.f32 %v689_v59, %v588_v43  ;;  %v473_v51 = vld [vmem:[%s2132_s28 + $0x94] sm:$0xff] }
  0xae   : > { %v3573_v31 = vmax.f32 %v3119_v37, 0.0  ;;  %v1313_v25 = vmax.f32 %v3122_v52, 0.0  ;;  %v852_v26 = vadd.f32 %v820_v48, %v720_v3  ;;  %v1085_v53 = vmul.f32 %v2152_v27, %v3574_v50 }
  0xaf   : > { %v1086_v44 = vmul.f32 %v2152_v27, %v3572_v54  ;;  %v1217_v59 = vmul.f32 %v2163_v34, %v3571_v11  ;;  %2037 = vmatmul.mubr.msk.bf16.gmra.mrb[8].mxu0 %vm1411_vm0, %v1392_v8  ;;  %v853_v55 = vadd.f32 %v821_v22, %v721_v49  ;;  %v1314_v36 = vmax.f32 %v3131_v10, 0.0  ;;  %v474_v11 = vld [vmem:[%s2132_s28 + $0x9c] sm:$0xff] }
  0xb0   : > { %v1218_v48 = vmul.f32 %v2163_v34, %v3573_v31  ;;  %v1349_v35 = vmul.f32 %v3006_v58, %v1313_v25  ;;  %v984_v32 = vadd.f32 %v952_v14, %v852_v26  ;;  %v273_v43 = vmax.f32 %v241_v0, 0.0 }
  0xb1   : > { %v274_v2 = vmax.f32 %v242_v42, 0.0  ;;  %v373_v3 = vmax.f32 %v341_v60, 0.0  ;;  %v985_v54 = vadd.f32 %v953_v33, %v853_v55  ;;  %v1350_v22 = vmul.f32 %v3006_v58, %v1314_v36  ;;  %v1903_v55 = vld [vmem:[%s2132_s28 + $0xf0] sm:$0xff] }
  0xb2   : > { %v374_v8 = vmax.f32 %v342_v62, 0.0  ;;  %v505_v49 = vmax.f32 %v473_v51, 0.0  ;;  %v1117_v31 = vadd.f32 %v1085_v53, %v984_v32  ;;  %v309_v50 = vmul.f32 %v2134_v12, %v273_v43 }
  0xb3   : > { %v310_v46 = vmul.f32 %v2134_v12, %v274_v2  ;;  %v409_v14 = vmul.f32 %v2136_v13, %v373_v3  ;;  %v1118_v0 = vadd.f32 %v1086_v44, %v985_v54  ;;  %v506_v42 = vmax.f32 %v474_v11, 0.0 }
  0xb4   : > { %v410_v33 = vmul.f32 %v2136_v13, %v374_v8  ;;  %v541_v60 = vmul.f32 %v2141_v17, %v505_v49  ;;  %v1249_v26 = vadd.f32 %v1217_v59, %v1117_v31  ;;  %v674_v53 = vmul.f32 %v1031_v16, %v2143_v18  ;;  %v1904_v31 = vld [vmem:[%s2132_s28 + $0xf8] sm:$0xff] }
  0xb5   : > { %v441_v62 = vadd.f32 %v409_v14, %v309_v50  ;;  %v675_v51 = vmul.f32 %v1032_v38, %v2143_v18  ;;  %v1250_v32 = vadd.f32 %v1218_v48, %v1118_v0  ;;  %v542_v54 = vmul.f32 %v2141_v17, %v506_v42  ;;  %v1935_v50 = vld [vmem:[%s2132_s28 + $0xf2] sm:$0xff]  ;;  %v1936_v59 = vld [vmem:[%s2132_s28 + $0xfa] sm:$0xff] }
  0xb6   : > { %v442_v43 = vadd.f32 %v410_v33, %v310_v46  ;;  %v3668_v11 = vmax.f32 %v2886_v24, 0.0  ;;  %v1381_v28 = vadd.f32 %v1349_v35, %v1249_v26  ;;  %v3669_v45 = vmax.f32 %v2889_v29, 0.0  ;;  %v1967_v48 = vld [vmem:[%s2132_s28 + $0xf4] sm:$0xff]  ;;  %v1968_v33 = vld [vmem:[%s2132_s28 + $0xfc] sm:$0xff] }
  0xb7   : > { %v573_v16 = vadd.f32 %v541_v60, %v441_v62  ;;  %v938_v46 = vmul.f32 %v1295_v15, %v2147_v20  ;;  %v1382_v24 = vadd.f32 %v1350_v22, %v1250_v32  ;;  %v3670_v3 = vmax.f32 %v2908_v39, 0.0  ;;  %v257_v42 = vld [vmem:[%s2132_s28 + $0x150] sm:$0xff]  ;;  %v258_v22 = vld [vmem:[%s2132_s28 + $0x158] sm:$0xff] }
  0xb8   : > { %v806_v44 = vmul.f32 %v3668_v11, %v2145_v19  ;;  %v807_v38 = vmul.f32 %v3669_v45, %v2145_v19  ;;  %v574_v2 = vadd.f32 %v542_v54, %v442_v43  ;;  %v1035_v35 = vmax.f32 %v1903_v55, 0.0  ;;  %v357_v62 = vld [vmem:[%s2132_s28 + $0x152] sm:$0xff]  ;;  %v358_v32 = vld [vmem:[%s2132_s28 + $0x15a] sm:$0xff] }
  0xb9   : > { %v939_v8 = vmul.f32 %v3670_v3, %v2147_v20  ;;  %v706_v49 = vadd.f32 %v674_v53, %v573_v16  ;;  %v1036_v14 = vmax.f32 %v1904_v31, 0.0  ;;  %v1167_v29 = vmax.f32 %v1935_v50, 0.0  ;;  %v489_v54 = vld [vmem:[%s2132_s28 + $0x154] sm:$0xff] }
  0xba   : > { %v1168_v0 = vmax.f32 %v1936_v59, 0.0  ;;  %v1400_v41 = vpack.c.bf16 %v1382_v24, %v1381_v28  ;;  %v707_v15 = vadd.f32 %v675_v51, %v574_v2  ;;  %v1071_v60 = vmul.f32 %v2152_v27, %v1035_v35 }
  0xbb   : > { %v1299_v26 = vmax.f32 %v1967_v48, 0.0  ;;  %v838_v43 = vadd.f32 %v806_v44, %v706_v49  ;;  %v1072_v39 = vmul.f32 %v2152_v27, %v1036_v14  ;;  %v1203_v53 = vmul.f32 %v2163_v34, %v1167_v29  ;;  %v490_v48 = vld [vmem:[%s2132_s28 + $0x15c] sm:$0xff] }
  0xbc   : > { %v1204_v55 = vmul.f32 %v2163_v34, %v1168_v0  ;;  %2053 = vmatmul.mubr.msk.bf16.gmra.mrb[8].mxu1 %vm1411_vm0, %v1400_v41  ;;  %v839_v11 = vadd.f32 %v807_v38, %v707_v15  ;;  %v1300_v31 = vmax.f32 %v1968_v33, 0.0  ;;  %v289_v50 = vmax.f32 %v257_v42, 0.0 }
  0xbd   : > { %v1335_v51 = vmul.f32 %v3006_v58, %v1299_v26  ;;  %v970_v59 = vadd.f32 %v938_v46, %v838_v43  ;;  %v290_v28 = vmax.f32 %v258_v22, 0.0  ;;  %v389_v16 = vmax.f32 %v357_v62, 0.0  ;;  %v1919_v22 = vld [vmem:[%s2132_s28 + $0x1b0] sm:$0xff]  ;;  %v1920_v62 = vld [vmem:[%s2132_s28 + $0x1b8] sm:$0xff] }
  0xbe   : > { %v390_v45 = vmax.f32 %v358_v32, 0.0  ;;  %v971_v44 = vadd.f32 %v939_v8, %v839_v11  ;;  %v1336_v24 = vmul.f32 %v3006_v58, %v1300_v31  ;;  %v325_v2 = vmul.f32 %v2134_v12, %v289_v50  ;;  %v1951_v11 = vld [vmem:[%s2132_s28 + $0x1b2] sm:$0xff]  ;;  %v1952_v31 = vld [vmem:[%s2132_s28 + $0x1ba] sm:$0xff] }
  0xbf   : > { %v521_v3 = vmax.f32 %v489_v54, 0.0  ;;  %v1103_v35 = vadd.f32 %v1071_v60, %v970_v59  ;;  %v326_v38 = vmul.f32 %v2134_v12, %v290_v28  ;;  %v425_v49 = vmul.f32 %v2136_v13, %v389_v16 }
  0xc0   : > { %v426_v46 = vmul.f32 %v2136_v13, %v390_v45  ;;  %v1104_v14 = vadd.f32 %v1072_v39, %v971_v44  ;;  %v522_v29 = vmax.f32 %v490_v48, 0.0  ;;  %v3671_v0 = vmax.f32 %v2949_v9, 0.0 }
  0xc1   : > { %v557_v8 = vmul.f32 %v2141_v17, %v521_v3  ;;  %v1235_v42 = vadd.f32 %v1203_v53, %v1103_v35  ;;  %v457_v41 = vadd.f32 %v425_v49, %v325_v2  ;;  %v3672_v60 = vmax.f32 %v2952_v57, 0.0  ;;  %v1983_v57 = vld [vmem:[%s2132_s28 + $0x1b4] sm:$0xff]  ;;  %v1984_v2 = vld [vmem:[%s2132_s28 + $0x1bc] sm:$0xff]  ;;  %v243_v49 = vld [vmem:[%s2132_s28 + $0xa8] sm:$0xff] }
  0xc2   : > { %v690_v33 = vmul.f32 %v3671_v0, %v2143_v18  ;;  %v458_v15 = vadd.f32 %v426_v46, %v326_v38  ;;  %v1236_v32 = vadd.f32 %v1204_v55, %v1104_v14  ;;  %v558_v43 = vmul.f32 %v2141_v17, %v522_v29  ;;  %v244_v46 = vld [vmem:[%s2132_s28 + $0xb0] sm:$0xff] }
  0xc3   : > { %v691_v26 = vmul.f32 %v3672_v60, %v2143_v18  ;;  %v3673_v39 = vmax.f32 %v2962_v23, 0.0  ;;  %v3674_v9 = vmax.f32 %v2965_v7, 0.0  ;;  %v1367_v50 = vadd.f32 %v1335_v51, %v1235_v42 }
  0xc4   : > { %v589_v59 = vadd.f32 %v557_v8, %v457_v41  ;;  %v3675_v55 = vmax.f32 %v2968_v4, 0.0  ;;  %v3676_v16 = vmax.f32 %v2979_v5, 0.0  ;;  %v1368_v45 = vadd.f32 %v1336_v24, %v1236_v32  ;;  %v343_v24 = vld [vmem:[%s2132_s28 + $0xaa] sm:$0xff]  ;;  %v344_v8 = vld [vmem:[%s2132_s28 + $0xb2] sm:$0xff] }
  0xc5   : > { %v822_v54 = vmul.f32 %v3673_v39, %v2145_v19  ;;  %v823_v53 = vmul.f32 %v3674_v9, %v2145_v19  ;;  %v590_v7 = vadd.f32 %v558_v43, %v458_v15  ;;  %v1051_v48 = vmax.f32 %v1919_v22, 0.0  ;;  %v475_v15 = vld [vmem:[%s2132_s28 + $0xac] sm:$0xff]  ;;  %v476_v32 = vld [vmem:[%s2132_s28 + $0xb4] sm:$0xff] }
  0xc6   : > { %v954_v28 = vmul.f32 %v3675_v55, %v2147_v20  ;;  %v955_v23 = vmul.f32 %v3676_v16, %v2147_v20  ;;  %v1052_v44 = vmax.f32 %v1920_v62, 0.0  ;;  %v722_v3 = vadd.f32 %v690_v33, %v589_v59 }
  0xc7   : > { %v1183_v35 = vmax.f32 %v1951_v11, 0.0  ;;  %v1184_v51 = vmax.f32 %v1952_v31, 0.0  ;;  %v1315_v38 = vmax.f32 %v1983_v57, 0.0  ;;  %v1393_v4 = vpack.c.bf16 %v1368_v45, %v1367_v50 }
  0xc8   : > { %v723_v14 = vadd.f32 %v691_v26, %v590_v7  ;;  %v1087_v5 = vmul.f32 %v2152_v27, %v1051_v48  ;;  %v1088_v29 = vmul.f32 %v2152_v27, %v1052_v44  ;;  %v854_v0 = vadd.f32 %v822_v54, %v722_v3 }
  0xc9   : > { %v1219_v42 = vmul.f32 %v2163_v34, %v1183_v35  ;;  %v1220_v33 = vmul.f32 %v2163_v34, %v1184_v51  ;;  %v1316_v41 = vmax.f32 %v1984_v2, 0.0  ;;  %2040 = vmatprep.mubr.msk.bf16.mxu0 %vm1411_vm0, %v1393_v4  ;;  %v1351_v22 = vmul.f32 %v3006_v58, %v1315_v38  ;;  %v1905_v38 = vld [vmem:[%s2132_s28 + $0x108] sm:$0xff] }
  0xca   : > { %v855_v60 = vadd.f32 %v823_v53, %v723_v14  ;;  %v275_v62 = vmax.f32 %v243_v49, 0.0  ;;  %v276_v26 = vmax.f32 %v244_v46, 0.0  ;;  %v986_v43 = vadd.f32 %v954_v28, %v854_v0  ;;  %v1906_v49 = vld [vmem:[%s2132_s28 + $0x110] sm:$0xff] }
  0xcb   : > { %v1352_v39 = vmul.f32 %v3006_v58, %v1316_v41  ;;  %v375_v9 = vmax.f32 %v343_v24, 0.0  ;;  %v376_v11 = vmax.f32 %v344_v8, 0.0  ;;  %v507_v50 = vmax.f32 %v475_v15, 0.0  ;;  %v1937_v46 = vld [vmem:[%s2132_s28 + $0x10a] sm:$0xff]  ;;  %v1938_v8 = vld [vmem:[%s2132_s28 + $0x112] sm:$0xff] }
  0xcc   : > { %v987_v54 = vadd.f32 %v955_v23, %v855_v60  ;;  %v311_v31 = vmul.f32 %v2134_v12, %v275_v62  ;;  %v312_v57 = vmul.f32 %v2134_v12, %v276_v26  ;;  %v1119_v53 = vadd.f32 %v1087_v5, %v986_v43  ;;  %v1969_v0 = vld [vmem:[%s2132_s28 + $0x10c] sm:$0xff] }
  0xcd   : > { %v411_v59 = vmul.f32 %v2136_v13, %v375_v9  ;;  %v412_v55 = vmul.f32 %v2136_v13, %v376_v11  ;;  %v508_v16 = vmax.f32 %v476_v32, 0.0  ;;  %v543_v45 = vmul.f32 %v2141_v17, %v507_v50  ;;  %v1970_v32 = vld [vmem:[%s2132_s28 + $0x114] sm:$0xff] }
  0xce   : > { %v1120_v28 = vadd.f32 %v1088_v29, %v987_v54  ;;  %v3677_v23 = vmax.f32 %v3028_v61, 0.0  ;;  %v3678_v48 = vmax.f32 %v3031_v47, 0.0  ;;  %v1251_v2 = vadd.f32 %v1219_v42, %v1119_v53  ;;  %v259_v54 = vld [vmem:[%s2132_s28 + $0x168] sm:$0xff]  ;;  %v360_v53 = vld [vmem:[%s2132_s28 + $0x172] sm:$0xff] }
  0xcf   : > { %v443_v3 = vadd.f32 %v411_v59, %v311_v31  ;;  %v444_v35 = vadd.f32 %v412_v55, %v312_v57  ;;  %v544_v51 = vmul.f32 %v2141_v17, %v508_v16  ;;  %v3679_v14 = vmax.f32 %v3034_v6, 0.0  ;;  %v260_v31 = vld [vmem:[%s2132_s28 + $0x170] sm:$0xff] }
  0xd0   : > { %v676_v7 = vmul.f32 %v3677_v23, %v2143_v18  ;;  %v677_v44 = vmul.f32 %v3678_v48, %v2143_v18  ;;  %v1252_v4 = vadd.f32 %v1220_v33, %v1120_v28  ;;  %v3680_v61 = vmax.f32 %v3046_v30, 0.0 }
  0xd1   : > { %v808_v5 = vmul.f32 %v3679_v14, %v2145_v19  ;;  %v3681_v47 = vmax.f32 %v3049_v63, 0.0  ;;  %v1383_v42 = vadd.f32 %v1351_v22, %v1251_v2  ;;  %v575_v41 = vadd.f32 %v543_v45, %v443_v3  ;;  %v359_v22 = vld [vmem:[%s2132_s28 + $0x16a] sm:$0xff]  ;;  %v492_v2 = vld [vmem:[%s2132_s28 + $0x174] sm:$0xff] }
  0xd2   : > { %v809_v29 = vmul.f32 %v3680_v61, %v2145_v19  ;;  %v576_v33 = vadd.f32 %v544_v51, %v444_v35  ;;  %v3682_v6 = vmax.f32 %v3058_v1, 0.0  ;;  %v1384_v60 = vadd.f32 %v1352_v39, %v1252_v4  ;;  %v491_v45 = vld [vmem:[%s2132_s28 + $0x16c] sm:$0xff] }
  0xd3   : > { %v940_v24 = vmul.f32 %v3681_v47, %v2147_v20  ;;  %v1037_v30 = vmax.f32 %v1905_v38, 0.0  ;;  %v1038_v62 = vmax.f32 %v1906_v49, 0.0  ;;  %v1169_v26 = vmax.f32 %v1937_v46, 0.0 }
  0xd4   : > { %v941_v15 = vmul.f32 %v3682_v6, %v2147_v20  ;;  %v708_v63 = vadd.f32 %v676_v7, %v575_v41  ;;  %v709_v43 = vadd.f32 %v677_v44, %v576_v33  ;;  %v1170_v9 = vmax.f32 %v1938_v8, 0.0 }
  0xd5   : > { %v1301_v11 = vmax.f32 %v1969_v0, 0.0  ;;  %v1401_v57 = vpack.c.bf16 %v1384_v60, %v1383_v42  ;;  %v1073_v50 = vmul.f32 %v2152_v27, %v1037_v30  ;;  %v1074_v1 = vmul.f32 %v2152_v27, %v1038_v62  ;;  %v1922_v30 = vld [vmem:[%s2132_s28 + $0x1d0] sm:$0xff] }
  0xd6   : > { %v1205_v39 = vmul.f32 %v2163_v34, %v1169_v26  ;;  %v840_v59 = vadd.f32 %v808_v5, %v708_v63  ;;  %v841_v55 = vadd.f32 %v809_v29, %v709_v43  ;;  %v1206_v16 = vmul.f32 %v2163_v34, %v1170_v9  ;;  %v1953_v62 = vld [vmem:[%s2132_s28 + $0x1ca] sm:$0xff] }
  0xd7   : > { %v1302_v28 = vmax.f32 %v1970_v32, 0.0  ;;  %2056 = vmatprep.mubr.msk.bf16.mxu1 %vm1411_vm0, %v1401_v57  ;;  %v1337_v23 = vmul.f32 %v3006_v58, %v1301_v11  ;;  %v291_v7 = vmax.f32 %v259_v54, 0.0  ;;  %v292_v48 = vmax.f32 %v260_v31, 0.0  ;;  %v1985_v54 = vld [vmem:[%s2132_s28 + $0x1cc] sm:$0xff] }
  0xd8   : > { %v391_v44 = vmax.f32 %v359_v22, 0.0  ;;  %v972_v3 = vadd.f32 %v940_v24, %v840_v59  ;;  %v973_v35 = vadd.f32 %v941_v15, %v841_v55  ;;  %v392_v38 = vmax.f32 %v360_v53, 0.0 }
  0xd9   : > { %v1338_v51 = vmul.f32 %v3006_v58, %v1302_v28  ;;  %v327_v49 = vmul.f32 %v2134_v12, %v291_v7  ;;  %v328_v46 = vmul.f32 %v2134_v12, %v292_v48  ;;  %v523_v14 = vmax.f32 %v491_v45, 0.0 }
  0xda   : > { %v427_v4 = vmul.f32 %v2136_v13, %v391_v44  ;;  %v1105_v5 = vadd.f32 %v1073_v50, %v972_v3  ;;  %v1106_v61 = vadd.f32 %v1074_v1, %v973_v35  ;;  %v428_v29 = vmul.f32 %v2136_v13, %v392_v38  ;;  %v1921_v13 = vld [vmem:[%s2132_s28 + $0x1c8] sm:$0xff]  ;;  %v1986_v1 = vld [vmem:[%s2132_s28 + $0x1d4] sm:$0xff] }
  0xdb   : > { %v524_v47 = vmax.f32 %v492_v2, 0.0  ;;  %v559_v8 = vmul.f32 %v2141_v17, %v523_v14  ;;  %v3683_v0 = vmax.f32 %v3101_v21, 0.0  ;;  %v3684_v12 = vmax.f32 %v3104_v40, 0.0 }
  0xdc   : > { %v459_v24 = vadd.f32 %v427_v4, %v327_v49  ;;  %v1237_v33 = vadd.f32 %v1205_v39, %v1105_v5  ;;  %v1238_v6 = vadd.f32 %v1206_v16, %v1106_v61  ;;  %v460_v15 = vadd.f32 %v428_v29, %v328_v46 }
  0xdd   : > { %v692_v42 = vmul.f32 %v3683_v0, %v2143_v18  ;;  %v693_v41 = vmul.f32 %v3684_v12, %v2143_v18  ;;  %v560_v60 = vmul.f32 %v2141_v17, %v524_v47  ;;  %v3685_v32 = vmax.f32 %v3107_v56, 0.0  ;;  %v1954_v18 = vld [vmem:[%s2132_s28 + $0x1d2] sm:$0xff] }
  0xde   : > { %v591_v26 = vadd.f32 %v559_v8, %v459_v24  ;;  %v3686_v63 = vmax.f32 %v3119_v37, 0.0  ;;  %v1369_v43 = vadd.f32 %v1337_v23, %v1237_v33  ;;  %v1370_v9 = vadd.f32 %v1338_v51, %v1238_v6 }
  0xdf   : > { %v824_v21 = vmul.f32 %v3685_v32, %v2145_v19  ;;  %v592_v11 = vadd.f32 %v560_v60, %v460_v15  ;;  %v956_v17 = vmul.f32 %v1313_v25, %v2147_v20  ;;  %v1053_v22 = vmax.f32 %v1921_v13, 0.0 }
  0xe0   : > { %v825_v40 = vmul.f32 %v3686_v63, %v2145_v19  ;;  %v724_v31 = vadd.f32 %v692_v42, %v591_v26  ;;  %v1054_v57 = vmax.f32 %v1922_v30, 0.0  ;;  %v1185_v50 = vmax.f32 %v1953_v62, 0.0 }
  0xe1   : > { %v1394_v56 = vpack.c.bf16 %v1370_v9, %v1369_v43  ;;  %v725_v39 = vadd.f32 %v693_v41, %v592_v11  ;;  %v957_v19 = vmul.f32 %v1314_v36, %v2147_v20  ;;  %v1186_v37 = vmax.f32 %v1954_v18, 0.0 }
  0xe2   : > { %v856_v53 = vadd.f32 %v824_v21, %v724_v31  ;;  %v1089_v59 = vmul.f32 %v2152_v27, %v1053_v22  ;;  %v1317_v55 = vmax.f32 %v1985_v54, 0.0  ;;  %v1090_v25 = vmul.f32 %v2152_v27, %v1054_v57  ;;  %v3332_v27 = vld [vmem:[%s3478_s3] ss:$0 sm:$0xff] }
  0xe3   : > { %2041 = vmatmul.mubr.msk.bf16.gmra.mrb[12].mxu0 %vm1411_vm0, %v1394_v56  ;;  %v857_v52 = vadd.f32 %v825_v40, %v725_v39  ;;  %v1318_v16 = vmax.f32 %v1986_v1, 0.0  ;;  %v1221_v45 = vmul.f32 %v2163_v34, %v1185_v50  ;;  %v1222_v7 = vmul.f32 %v2163_v34, %v1186_v37 }
  0xe4   : > { %v988_v28 = vadd.f32 %v956_v17, %v856_v53  ;;  %v1353_v20 = vmul.f32 %v3006_v58, %v1317_v55 }
  0xe5   : > { %v989_v23 = vadd.f32 %v957_v19, %v857_v52  ;;  %v1354_v48 = vmul.f32 %v3006_v58, %v1318_v16  ;;  %v3337_v58 = vld [vmem:[%s3479_s4] ss:$0 sm:$0xff] }
  0xe6   : > { %v1121_v10 = vadd.f32 %v1089_v59, %v988_v28 }
  0xe7   : > { %v1122_v36 = vadd.f32 %v1090_v25, %v989_v23 }
  0xe8   : > { %v1253_v44 = vadd.f32 %v1221_v45, %v1121_v10 }
  0xe9   : > { %v1254_v2 = vadd.f32 %v1222_v7, %v1122_v36 }
  0xea   : > { %v1385_v3 = vadd.f32 %v1353_v20, %v1253_v44 }
  0xeb   : > { %v1386_v35 = vadd.f32 %v1354_v48, %v1254_v2 }
  0xed   : > { %v1402_v51 = vpack.c.bf16 %v1386_v35, %v1385_v3 }
  0xef   : > { %2057 = vmatmul.mubr.msk.bf16.gmra.mrb[12].mxu1 %vm1411_vm0, %v1402_v51 }
 0x118   : > { %v2030_v34 = vpop.f32.mrb[0].mxu0 }
 0x119   : > { %v1630_v38 = vmul.f32 %v2030_v34, %v3332_v27  ;;  %v1494_v49 = vpop.f32.mrb[1].mxu0 }
 0x11a   : > { %v1628_v46 = vmul.f32 %v3332_v27, %v1494_v49  ;;  %v2031_v4 = vpop.f32.mrb[2].mxu0 }
 0x11b   : > { %v1669_v14 = vadd.f32 %v3337_v58, %v1630_v38  ;;  %v1631_v5 = vmul.f32 %v2031_v4, %v3332_v27  ;;  %v1497_v61 = vpop.f32.mrb[3].mxu0 }
 0x11c   : > { %v1667_v29 = vadd.f32 %v3337_v58, %v1628_v46  ;;  %v1629_v47 = vmul.f32 %v3332_v27, %v1497_v61 }
 0x11d   : > { %1701 = vst.msk [vmem:[%s3343_s16 + $0x10] sm:$0xff] %vm1411_vm0, %v1669_v14  ;;  %v1670_v24 = vadd.f32 %v3337_v58, %v1631_v5 }
 0x11e   : > { %1699 = vst.msk [vmem:[%s3343_s16] sm:$0xff] %vm1411_vm0, %v1667_v29  ;;  %v1668_v8 = vadd.f32 %v3337_v58, %v1629_v47 }
 0x11f   : > { %1702 = vst.msk [vmem:[%s3343_s16 + $0x18] sm:$0xff] %vm1411_vm0, %v1670_v24 }
 0x120   : > { %1700 = vst.msk [vmem:[%s3343_s16 + $0x8] sm:$0xff] %vm1411_vm0, %v1668_v8 }
 0x128   : > { %v2046_v0 = vpop.f32.mrb[0].mxu1 }
 0x129   : > { %v1646_v42 = vmul.f32 %v2046_v0, %v3332_v27  ;;  %v1558_v12 = vpop.f32.mrb[1].mxu1 }
 0x12a   : > { %v1644_v41 = vmul.f32 %v3332_v27, %v1558_v12  ;;  %v2047_v33 = vpop.f32.mrb[2].mxu1 }
 0x12b   : > { %v1685_v6 = vadd.f32 %v3337_v58, %v1646_v42  ;;  %v1647_v15 = vmul.f32 %v2047_v33, %v3332_v27  ;;  %v1561_v60 = vpop.f32.mrb[3].mxu1 }
 0x12c   : > { %v1683_v13 = vadd.f32 %v3337_v58, %v1644_v41  ;;  %v1645_v30 = vmul.f32 %v3332_v27, %v1561_v60 }
 0x12d   : > { %1717 = vst.msk [vmem:[%s3343_s16 + $0x90] sm:$0xff] %vm1411_vm0, %v1685_v6  ;;  %v1686_v62 = vadd.f32 %v3337_v58, %v1647_v15 }
 0x12e   : > { %1715 = vst.msk [vmem:[%s3343_s16 + $0x80] sm:$0xff] %vm1411_vm0, %v1683_v13  ;;  %v1684_v26 = vadd.f32 %v3337_v58, %v1645_v30 }
 0x12f   : > { %1718 = vst.msk [vmem:[%s3343_s16 + $0x98] sm:$0xff] %vm1411_vm0, %v1686_v62 }
 0x130   : > { %1716 = vst.msk [vmem:[%s3343_s16 + $0x88] sm:$0xff] %vm1411_vm0, %v1684_v26 }
 0x150   : > { %v2034_v32 = vpop.f32.mrb[4].mxu0 }
 0x151   : > { %v1634_v21 = vmul.f32 %v2034_v32, %v3332_v27  ;;  %v1510_v63 = vpop.f32.mrb[5].mxu0 }
 0x152   : > { %v1632_v40 = vmul.f32 %v3332_v27, %v1510_v63  ;;  %v2035_v18 = vpop.f32.mrb[6].mxu0 }
 0x153   : > { %v1673_v43 = vadd.f32 %v3337_v58, %v1634_v21  ;;  %v1635_v9 = vmul.f32 %v2035_v18, %v3332_v27  ;;  %v1513_v11 = vpop.f32.mrb[7].mxu0 }
 0x154   : > { %v1671_v17 = vadd.f32 %v3337_v58, %v1632_v40  ;;  %v1633_v54 = vmul.f32 %v3332_v27, %v1513_v11 }
 0x155   : > { %1705 = vst.msk [vmem:[%s3343_s16 + $0x30] sm:$0xff] %vm1411_vm0, %v1673_v43  ;;  %v1674_v31 = vadd.f32 %v3337_v58, %v1635_v9 }
 0x156   : > { %1703 = vst.msk [vmem:[%s3343_s16 + $0x20] sm:$0xff] %vm1411_vm0, %v1671_v17  ;;  %v1672_v22 = vadd.f32 %v3337_v58, %v1633_v54 }
 0x157   : > { %1706 = vst.msk [vmem:[%s3343_s16 + $0x38] sm:$0xff] %vm1411_vm0, %v1674_v31 }
 0x158   : > { %1704 = vst.msk [vmem:[%s3343_s16 + $0x28] sm:$0xff] %vm1411_vm0, %v1672_v22 }
 0x15b   : > { %v2050_v57 = vpop.f32.mrb[4].mxu1 }
 0x15c   : > { %v1650_v50 = vmul.f32 %v2050_v57, %v3332_v27  ;;  %v1574_v1 = vpop.f32.mrb[5].mxu1 }
 0x15d   : > { %v1648_v56 = vmul.f32 %v3332_v27, %v1574_v1  ;;  %v2051_v39 = vpop.f32.mrb[6].mxu1 }
 0x15e   : > { %v1689_v19 = vadd.f32 %v3337_v58, %v1650_v50  ;;  %v1651_v37 = vmul.f32 %v2051_v39, %v3332_v27  ;;  %v1577_v53 = vpop.f32.mrb[7].mxu1 }
 0x15f   : > { %v1687_v59 = vadd.f32 %v3337_v58, %v1648_v56  ;;  %v1649_v55 = vmul.f32 %v3332_v27, %v1577_v53 }
 0x160   : > { %1721 = vst.msk [vmem:[%s3343_s16 + $0xb0] sm:$0xff] %vm1411_vm0, %v1689_v19  ;;  %v1690_v52 = vadd.f32 %v3337_v58, %v1651_v37 }
 0x161   : > { %1719 = vst.msk [vmem:[%s3343_s16 + $0xa0] sm:$0xff] %vm1411_vm0, %v1687_v59  ;;  %v1688_v25 = vadd.f32 %v3337_v58, %v1649_v55 }
 0x162   : > { %1722 = vst.msk [vmem:[%s3343_s16 + $0xb8] sm:$0xff] %vm1411_vm0, %v1690_v52 }
 0x163   : > { %1720 = vst.msk [vmem:[%s3343_s16 + $0xa8] sm:$0xff] %vm1411_vm0, %v1688_v25 }
 0x182   : > { %v2038_v16 = vpop.f32.mrb[8].mxu0 }
 0x183   : > { %v1638_v28 = vmul.f32 %v2038_v16, %v3332_v27  ;;  %v1526_v45 = vpop.f32.mrb[9].mxu0 }
 0x184   : > { %v1636_v23 = vmul.f32 %v3332_v27, %v1526_v45  ;;  %v2039_v7 = vpop.f32.mrb[10].mxu0 }
 0x185   : > { %v1677_v10 = vadd.f32 %v3337_v58, %v1638_v28  ;;  %v1639_v20 = vmul.f32 %v2039_v7, %v3332_v27  ;;  %v1529_v36 = vpop.f32.mrb[11].mxu0 }
 0x186   : > { %v1675_v48 = vadd.f32 %v3337_v58, %v1636_v23  ;;  %v1637_v44 = vmul.f32 %v3332_v27, %v1529_v36 }
 0x187   : > { %1709 = vst.msk [vmem:[%s3343_s16 + $0x50] sm:$0xff] %vm1411_vm0, %v1677_v10  ;;  %v1678_v2 = vadd.f32 %v3337_v58, %v1639_v20 }
 0x188   : > { %1707 = vst.msk [vmem:[%s3343_s16 + $0x40] sm:$0xff] %vm1411_vm0, %v1675_v48  ;;  %v1676_v3 = vadd.f32 %v3337_v58, %v1637_v44 }
 0x189   : > { %1710 = vst.msk [vmem:[%s3343_s16 + $0x58] sm:$0xff] %vm1411_vm0, %v1678_v2 }
 0x18a   : > { %1708 = vst.msk [vmem:[%s3343_s16 + $0x48] sm:$0xff] %vm1411_vm0, %v1676_v3 }
 0x18f   : > { %v2054_v35 = vpop.f32.mrb[8].mxu1 }
 0x190   : > { %v1654_v51 = vmul.f32 %v2054_v35, %v3332_v27  ;;  %v1590_v34 = vpop.f32.mrb[9].mxu1 }
 0x191   : > { %v1652_v38 = vmul.f32 %v3332_v27, %v1590_v34  ;;  %v2055_v49 = vpop.f32.mrb[10].mxu1 }
 0x192   : > { %v1693_v46 = vadd.f32 %v3337_v58, %v1654_v51  ;;  %v1655_v4 = vmul.f32 %v2055_v49, %v3332_v27  ;;  %v1593_v14 = vpop.f32.mrb[11].mxu1 }
 0x193   : > { %v1691_v5 = vadd.f32 %v3337_v58, %v1652_v38  ;;  %v1653_v61 = vmul.f32 %v3332_v27, %v1593_v14 }
 0x194   : > { %1725 = vst.msk [vmem:[%s3343_s16 + $0xd0] sm:$0xff] %vm1411_vm0, %v1693_v46  ;;  %v1694_v29 = vadd.f32 %v3337_v58, %v1655_v4 }
 0x195   : > { %1723 = vst.msk [vmem:[%s3343_s16 + $0xc0] sm:$0xff] %vm1411_vm0, %v1691_v5  ;;  %v1692_v47 = vadd.f32 %v3337_v58, %v1653_v61 }
 0x196   : > { %1726 = vst.msk [vmem:[%s3343_s16 + $0xd8] sm:$0xff] %vm1411_vm0, %v1694_v29 }
 0x197   : > { %1724 = vst.msk [vmem:[%s3343_s16 + $0xc8] sm:$0xff] %vm1411_vm0, %v1692_v47 }
 0x1b6   : > { %v2042_v24 = vpop.f32.mrb[12].mxu0 }
 0x1b7   : > { %v1642_v8 = vmul.f32 %v2042_v24, %v3332_v27  ;;  %v1542_v0 = vpop.f32.mrb[13].mxu0 }
 0x1b8   : > { %v1640_v42 = vmul.f32 %v3332_v27, %v1542_v0  ;;  %v2043_v12 = vpop.f32.mrb[14].mxu0 }
 0x1b9   : > { %v1681_v41 = vadd.f32 %v3337_v58, %v1642_v8  ;;  %v1643_v33 = vmul.f32 %v2043_v12, %v3332_v27  ;;  %v1545_v6 = vpop.f32.mrb[15].mxu0 }
 0x1ba   : > { %v1679_v15 = vadd.f32 %v3337_v58, %v1640_v42  ;;  %v1641_v60 = vmul.f32 %v3332_v27, %v1545_v6 }
 0x1bb   : > { %1713 = vst.msk [vmem:[%s3343_s16 + $0x70] sm:$0xff] %vm1411_vm0, %v1681_v41  ;;  %v1682_v13 = vadd.f32 %v3337_v58, %v1643_v33 }
 0x1bc   : > { %1711 = vst.msk [vmem:[%s3343_s16 + $0x60] sm:$0xff] %vm1411_vm0, %v1679_v15  ;;  %v1680_v30 = vadd.f32 %v3337_v58, %v1641_v60 }
 0x1bd   : > { %1714 = vst.msk [vmem:[%s3343_s16 + $0x78] sm:$0xff] %vm1411_vm0, %v1682_v13 }
 0x1be   : > { %1712 = vst.msk [vmem:[%s3343_s16 + $0x68] sm:$0xff] %vm1411_vm0, %v1680_v30 }
 0x1c2   : > { %v2058_v62 = vpop.f32.mrb[12].mxu1 }
 0x1c3   : > { %v1658_v26 = vmul.f32 %v2058_v62, %v3332_v27  ;;  %v1606_v32 = vpop.f32.mrb[13].mxu1 }
 0x1c4   : > { %v1656_v21 = vmul.f32 %v3332_v27, %v1606_v32  ;;  %v2059_v63 = vpop.f32.mrb[14].mxu1 }
 0x1c5   : > { %v1697_v40 = vadd.f32 %v3337_v58, %v1658_v26  ;;  %v1659_v18 = vmul.f32 %v2059_v63, %v3332_v27  ;;  %v1609_v43 = vpop.f32.mrb[15].mxu1 }
 0x1c6   : > { %v1695_v9 = vadd.f32 %v3337_v58, %v1656_v21  ;;  %v1657_v11 = vmul.f32 %v3332_v27, %v1609_v43 }
 0x1c7   : > { %1729 = vst.msk [vmem:[%s3343_s16 + $0xf0] sm:$0xff] %vm1411_vm0, %v1697_v40  ;;  %v1698_v17 = vadd.f32 %v3337_v58, %v1659_v18 }
 0x1c8   : > { %1727 = vst.msk [vmem:[%s3343_s16 + $0xe0] sm:$0xff] %vm1411_vm0, %v1695_v9  ;;  %v1696_v54 = vadd.f32 %v3337_v58, %v1657_v11 }
 0x1c9   : > { %1730 = vst.msk [vmem:[%s3343_s16 + $0xf8] sm:$0xff] %vm1411_vm0, %v1698_v17 }
 0x1ca   : > { %1728 = vst.msk [vmem:[%s3343_s16 + $0xe8] sm:$0xff] %vm1411_vm0, %v1696_v54 }
 0x1cb PF: > { %s15_s18 = sadd.s32 1, %s2079_s18  }
 0x1cc   : > { %p12_p5 = scmp.ge.s32.totalorder %s15_s18, 4  }
 0x1ce   :  { %14 = sbr.rel (!%p12_p5) target bundleno = 1 (0x1), region = 72 }

// kernel: forward.47
= control target key start
LH: loop header
LB: loop body
LE: loop exit
PB: predicated region body
PF: predicated region fallthrough
CT: control target
= control target key end

     0   :  { %s568_s15 = smov 0   ;;  %s640_s0 = inlined_call_operand.vmem [shape: f32[128,128], index: 0, kind: input, shape index: {}]   ;;  %s641_s1 = inlined_call_operand.vmem [shape: bf16[128,16], index: 1, kind: input, shape index: {}]   ;;  %s642_s2 = inlined_call_operand.vmem [shape: f32[1,16], index: 2, kind: input, shape index: {}]   ;;  %s643_s3 = inlined_call_operand.vmem [shape: f32[1,16], index: 3, kind: input, shape index: {}]   ;;  %s644_s4 = inlined_call_operand.vmem [shape: f32[128,16], index: 4, kind: output, shape index: {}]  }
   0x1 LB: > { %s446_s16 = sadd.s32 4294967295, %s541_s15   ;;  %p450_p0 = scmp.ge.s32.totalorder %s541_s15, 1  ;;  %s541_s15 = sphi %s568_s15, %s14_s15  }
   0x2   : > { %p163_p1 = scmp.lt.s32.totalorder %s541_s15, 3 }
   0x4   : > { %p164_p2 = pnand %p450_p0, %p163_p1 }
   0x5   : > { %v527_v0 = vld [vmem:[%s641_s1] sm:$0xff] (!%p164_p2)   ;;  %s451_s19 = sshll.u32 (!%p164_p2), %s446_s16, 3  ;;  %v528_v1 = vld [vmem:[%s641_s1 + $0x8] sm:$0xff] (!%p164_p2)   ;;  %v529_v2 = vld [vmem:[%s641_s1 + $0x10] sm:$0xff] (!%p164_p2)   ;;  %vm381_vm0 = vcmask (!%p164_p2), 130048  }
   0x6   : > { %167 = sbr.rel (%p164_p2) target bundleno = 258 (0x102), region = 36  ;;  %p190_p3 = scmp.lt.s32.totalorder (!%p164_p2), %s451_s19, 15  ;;  %479 = vmatprep.subr.bf16.mxu0 (!%p164_p2), %v527_v0  ;;  %503 = vmatprep.subr.bf16.mxu1 (!%p164_p2), %v527_v0  ;;  %v530_v3 = vld [vmem:[%s641_s1 + $0x18] sm:$0xff] (!%p164_p2)   ;;  %v531_v13 = vld [vmem:[%s641_s1 + $0x20] sm:$0xff] (!%p164_p2)   ;;  %v532_v15 = vld [vmem:[%s641_s1 + $0x28] sm:$0xff] (!%p164_p2)  }
   0x7   : > { %480 = vmatpush3.bf16.msra.mxu0 (!%p164_p2), %v527_v0  ;;  %511 = vmatpush3.bf16.msra.mxu1 (!%p164_p2), %v527_v0  ;;  %v533_v16 = vld [vmem:[%s641_s1 + $0x30] sm:$0xff] (!%p164_p2)   ;;  %v534_v21 = vld [vmem:[%s641_s1 + $0x38] sm:$0xff] (!%p164_p2)   ;;  %v463_v28 = vld [vmem:[%s642_s2] ss:$0 sm:$0xff] (!%p164_p2) }
   0x8   : > { %481 = vmatprep.subr.bf16.mxu0 (!%p164_p2), %v528_v1  ;;  %504 = vmatprep.subr.bf16.mxu1 (!%p164_p2), %v528_v1  ;;  %v464_v30 = vld [vmem:[%s643_s3] ss:$0 sm:$0xff] (!%p164_p2) }
   0xb   : > { %482 = vmatpush3.bf16.msra.mxu0 (!%p164_p2), %v528_v1  ;;  %512 = vmatpush3.bf16.msra.mxu1 (!%p164_p2), %v528_v1 }
   0xc   : > { %483 = vmatprep.subr.bf16.mxu0 (!%p164_p2), %v529_v2  ;;  %505 = vmatprep.subr.bf16.mxu1 (!%p164_p2), %v529_v2 }
   0xd   : > { %s646_s19 = smov (!%p190_p3, %s451_s19), 15 }
   0xe   : > { %s452_s24 = sshll.u32 %s646_s19, 3 }
   0xf   : > { %s593_s27 = scalar_lea.vmem %s640_s0, %s452_s24  ;;  %484 = vmatpush3.bf16.msra.mxu0 %v529_v2  ;;  %513 = vmatpush3.bf16.msra.mxu1 %v529_v2  ;;  %s199_s20 = scalar_lea.vmem %s644_s4, %s452_s24 }
  0x10   : > { %v202_v4 = vld [vmem:[%s593_s27] sm:$0xff]  ;;  %v203_v5 = vld [vmem:[%s593_s27 + $0x8] sm:$0xff]  ;;  %485 = vmatprep.subr.bf16.mxu0 %v530_v3  ;;  %506 = vmatprep.subr.bf16.mxu1 %v530_v3  ;;  %v204_v17 = vld [vmem:[%s593_s27 + $0x10] sm:$0xff] }
  0x11   : > { %v206_v6 = vld [vmem:[%s593_s27 + $0x20] sm:$0xff]  ;;  %v210_v7 = vmax.f32 %v202_v4, 0.0  ;;  %v211_v8 = vmax.f32 %v203_v5, 0.0  ;;  %v207_v9 = vld [vmem:[%s593_s27 + $0x28] sm:$0xff]  ;;  %v205_v18 = vld [vmem:[%s593_s27 + $0x18] sm:$0xff]  ;;  %v212_v22 = vmax.f32 %v204_v17, 0.0 }
  0x12   : > { %v214_v10 = vmax.f32 %v206_v6, 0.0  ;;  %v215_v11 = vmax.f32 %v207_v9, 0.0  ;;  %v208_v19 = vld [vmem:[%s593_s27 + $0x30] sm:$0xff]  ;;  %v209_v20 = vld [vmem:[%s593_s27 + $0x38] sm:$0xff]  ;;  %v213_v23 = vmax.f32 %v205_v18, 0.0 }
  0x13   : > { %v218_v12 = vpack.c.bf16 %v211_v8, %v210_v7  ;;  %486 = vmatpush3.bf16.msra.mxu0 %v530_v3  ;;  %514 = vmatpush3.bf16.msra.mxu1 %v530_v3  ;;  %v216_v24 = vmax.f32 %v208_v19, 0.0  ;;  %v217_v25 = vmax.f32 %v209_v20, 0.0 }
  0x14   : > { %v220_v14 = vpack.c.bf16 %v215_v11, %v214_v10  ;;  %487 = vmatprep.subr.bf16.mxu0 %v531_v13  ;;  %507 = vmatprep.subr.bf16.mxu1 %v531_v13  ;;  %v219_v26 = vpack.c.bf16 %v213_v23, %v212_v22 }
  0x15   : > { %495 = vmatprep.mubr.bf16.mxu0 %v218_v12  ;;  %v221_v27 = vpack.c.bf16 %v217_v25, %v216_v24 }
  0x16   : > { %499 = vmatprep.mubr.bf16.mxu1 %v220_v14 }
  0x17   : > { %488 = vmatpush3.bf16.msra.mxu0 %v531_v13  ;;  %515 = vmatpush3.bf16.msra.mxu1 %v531_v13 }
  0x18   : > { %489 = vmatprep.subr.bf16.mxu0 %v532_v15  ;;  %508 = vmatprep.subr.bf16.mxu1 %v532_v15 }
  0x1b   : > { %490 = vmatpush3.bf16.msra.mxu0 %v532_v15  ;;  %516 = vmatpush3.bf16.msra.mxu1 %v532_v15 }
  0x1c   : > { %491 = vmatprep.subr.bf16.mxu0 %v533_v16  ;;  %509 = vmatprep.subr.bf16.mxu1 %v533_v16 }
  0x1f   : > { %492 = vmatpush3.bf16.msra.mxu0 %v533_v16  ;;  %517 = vmatpush3.bf16.msra.mxu1 %v533_v16 }
  0x20   : > { %493 = vmatprep.subr.bf16.mxu0 %v534_v21  ;;  %510 = vmatprep.subr.bf16.mxu1 %v534_v21 }
  0x23   : > { %494 = vmatpush3.bf16.msra.mxu0 %v534_v21  ;;  %518 = vmatpush3.bf16.msra.mxu1 %v534_v21 }
  0x26   : > { %496 = vmatmul.mubr.bf16.vlgmr.msra.gmra.mrb[0].mxu0 %v219_v26  ;;  %500 = vmatmul.mubr.bf16.vlgmr.msra.gmra.mrb[0].mxu1 %v221_v27 }
  0xf9   : > { %v497_v29 = vpop.f32.mrb[0].mxu0  ;;  %v501_v31 = vpop.f32.mrb[0].mxu1 }
  0xfa   : > { %v360_v32 = vmul.f32 %v497_v29, %v463_v28  ;;  %v364_v33 = vmul.f32 %v501_v31, %v463_v28  ;;  %v320_v34 = vpop.f32.mrb[1].mxu0  ;;  %v336_v35 = vpop.f32.mrb[1].mxu1 }
  0xfb   : > { %v358_v36 = vmul.f32 %v463_v28, %v320_v34  ;;  %v362_v37 = vmul.f32 %v463_v28, %v336_v35  ;;  %v498_v38 = vpop.f32.mrb[2].mxu0  ;;  %v502_v39 = vpop.f32.mrb[2].mxu1 }
  0xfc   : > { %v375_v40 = vadd.f32 %v464_v30, %v360_v32  ;;  %v379_v41 = vadd.f32 %v464_v30, %v364_v33  ;;  %v361_v42 = vmul.f32 %v498_v38, %v463_v28  ;;  %v365_v43 = vmul.f32 %v502_v39, %v463_v28  ;;  %v323_v44 = vpop.f32.mrb[3].mxu0  ;;  %v339_v45 = vpop.f32.mrb[3].mxu1 }
  0xfd   : > { %v373_v46 = vadd.f32 %v464_v30, %v358_v36  ;;  %v377_v47 = vadd.f32 %v464_v30, %v362_v37  ;;  %v359_v48 = vmul.f32 %v463_v28, %v323_v44  ;;  %v363_v49 = vmul.f32 %v463_v28, %v339_v45 }
  0xfe   : > { %384 = vst.msk [vmem:[%s199_s20 + $0x10] sm:$0xff] %vm381_vm0, %v375_v40  ;;  %388 = vst.msk [vmem:[%s199_s20 + $0x30] sm:$0xff] %vm381_vm0, %v379_v41  ;;  %v376_v50 = vadd.f32 %v464_v30, %v361_v42  ;;  %v380_v51 = vadd.f32 %v464_v30, %v365_v43 }
  0xff   : > { %382 = vst.msk [vmem:[%s199_s20] sm:$0xff] %vm381_vm0, %v373_v46  ;;  %386 = vst.msk [vmem:[%s199_s20 + $0x20] sm:$0xff] %vm381_vm0, %v377_v47  ;;  %v374_v52 = vadd.f32 %v464_v30, %v359_v48  ;;  %v378_v53 = vadd.f32 %v464_v30, %v363_v49 }
 0x100   : > { %385 = vst.msk [vmem:[%s199_s20 + $0x18] sm:$0xff] %vm381_vm0, %v376_v50  ;;  %389 = vst.msk [vmem:[%s199_s20 + $0x38] sm:$0xff] %vm381_vm0, %v380_v51 }
 0x101   : > { %383 = vst.msk [vmem:[%s199_s20 + $0x8] sm:$0xff] %vm381_vm0, %v374_v52  ;;  %387 = vst.msk [vmem:[%s199_s20 + $0x28] sm:$0xff] %vm381_vm0, %v378_v53 }
 0x102 PF: > { %s14_s15 = sadd.s32 1, %s541_s15  }
 0x103   : > { %p11_p4 = scmp.ge.s32.totalorder %s14_s15, 4  }
 0x105   :  { %13 = sbr.rel (!%p11_p4) target bundleno = 1 (0x1), region = 66 }

// kernel: forward.49
= control target key start
LH: loop header
LB: loop body
LE: loop exit
PB: predicated region body
PF: predicated region fallthrough
CT: control target
= control target key end

     0   :  { %s405_s6 = smov 0   ;;  %s521_s0 = inlined_call_operand.vmem [shape: f32[2,10,10,16], index: 0, kind: input, shape index: {}]   ;;  %s522_s1 = inlined_call_operand.vmem [shape: f32[2,8,8,16], index: 1, kind: output, shape index: {}]  }
   0x1 LB: > { %s319_s7 = sadd.s32 4294967295, %s393_s6   ;;  %p323_p0 = scmp.ge.s32.totalorder %s393_s6, 1  ;;  %s393_s6 = sphi %s405_s6, %s11_s6  }
   0x2   : > { %p87_p1 = scmp.lt.s32.totalorder %s393_s6, 3 }
   0x4   : > { %p88_p2 = pnand %p323_p0, %p87_p1 }
   0x5   : > { %p107_p3 = scmp.lt.s32.totalorder (!%p88_p2), %s319_s7, 1  ;;  %vm255_vm0 = vcmask (!%p88_p2), 130048  }
   0x6   : > { %91 = sbr.rel (%p88_p2) target bundleno = 45 (0x2d), region = 24 }
   0xd   : > { %s524_s7 = smov (!%p107_p3, %s319_s7), 1 }
   0xe   : > { %s378_s8 = smul.u32 160, %s524_s7  ;;  %s377_s12 = sshll.u32 %s524_s7, 6 }
   0xf   : > { %s489_s15 = scalar_lea.vmem %s522_s1, %s377_s12 }
  0x10   : > { %s419_s11 = scalar_lea.vmem %s521_s0, %s378_s8 }
  0x11   : > { %v117_v0 = vld [vmem:[%s419_s11] sm:$0xff]  ;;  %v327_v4 = vld [vmem:[%s419_s11 + $0x10] sm:$0xff] }
  0x12   : > { %v125_v1 = vld [vmem:[%s419_s11 + $0x1] sm:$0xff]  ;;  %v335_v5 = vld [vmem:[%s419_s11 + $0x11] sm:$0xff] }
  0x13   : > { %v141_v2 = vld [vmem:[%s419_s11 + $0x2] sm:$0xff]  ;;  %v133_v3 = vmax.f32 %v117_v0, %v125_v1  ;;  %v343_v6 = vld [vmem:[%s419_s11 + $0x12] sm:$0xff]  ;;  %v134_v10 = vmax.f32 %v327_v4, %v335_v5 }
  0x14   : > { %v351_v7 = vld [vmem:[%s419_s11 + $0x20] sm:$0xff]  ;;  %v352_v12 = vld [vmem:[%s419_s11 + $0x30] sm:$0xff] }
  0x15   : > { %v429_v8 = vld [vmem:[%s419_s11 + $0x21] sm:$0xff]  ;;  %v149_v11 = vmax.f32 %v133_v3, %v141_v2  ;;  %v436_v13 = vld [vmem:[%s419_s11 + $0x31] sm:$0xff]  ;;  %v150_v16 = vmax.f32 %v134_v10, %v343_v6 }
  0x16   : > { %v432_v9 = vld [vmem:[%s419_s11 + $0x22] sm:$0xff]  ;;  %v439_v14 = vld [vmem:[%s419_s11 + $0x32] sm:$0xff]  ;;  %v135_v15 = vmax.f32 %v351_v7, %v429_v8  ;;  %v136_v20 = vmax.f32 %v352_v12, %v436_v13 }
  0x17   : > { %v353_v17 = vld [vmem:[%s419_s11 + $0x40] sm:$0xff]  ;;  %v166_v21 = vmax.f32 %v149_v11, %v327_v4  ;;  %v354_v23 = vld [vmem:[%s419_s11 + $0x50] sm:$0xff]  ;;  %v167_v27 = vmax.f32 %v150_v16, %v351_v7 }
  0x18   : > { %v444_v18 = vld [vmem:[%s419_s11 + $0x41] sm:$0xff]  ;;  %v151_v22 = vmax.f32 %v135_v15, %v432_v9  ;;  %v453_v24 = vld [vmem:[%s419_s11 + $0x51] sm:$0xff]  ;;  %v152_v28 = vmax.f32 %v136_v20, %v439_v14 }
  0x19   : > { %v447_v19 = vld [vmem:[%s419_s11 + $0x42] sm:$0xff]  ;;  %v456_v25 = vld [vmem:[%s419_s11 + $0x52] sm:$0xff]  ;;  %v137_v26 = vmax.f32 %v353_v17, %v444_v18  ;;  %v138_v32 = vmax.f32 %v354_v23, %v453_v24  ;;  %v182_v33 = vmax.f32 %v166_v21, %v335_v5  ;;  %v183_v40 = vmax.f32 %v167_v27, %v429_v8 }
  0x1a   : > { %v355_v29 = vld [vmem:[%s419_s11 + $0x60] sm:$0xff]  ;;  %v168_v34 = vmax.f32 %v151_v22, %v352_v12  ;;  %v356_v36 = vld [vmem:[%s419_s11 + $0x70] sm:$0xff]  ;;  %v169_v41 = vmax.f32 %v152_v28, %v353_v17 }
  0x1b   : > { %v462_v30 = vld [vmem:[%s419_s11 + $0x61] sm:$0xff]  ;;  %v153_v35 = vmax.f32 %v137_v26, %v447_v19  ;;  %v364_v37 = vld [vmem:[%s419_s11 + $0x71] sm:$0xff]  ;;  %v154_v42 = vmax.f32 %v138_v32, %v456_v25  ;;  %v198_v44 = vmax.f32 %v182_v33, %v343_v6  ;;  %v199_v49 = vmax.f32 %v183_v40, %v432_v9 }
  0x1c   : > { %v371_v31 = vld [vmem:[%s419_s11 + $0x62] sm:$0xff]  ;;  %v372_v38 = vld [vmem:[%s419_s11 + $0x72] sm:$0xff]  ;;  %v139_v39 = vmax.f32 %v355_v29, %v462_v30  ;;  %v140_v43 = vmax.f32 %v356_v36, %v364_v37  ;;  %v184_v45 = vmax.f32 %v168_v34, %v436_v13  ;;  %v185_v50 = vmax.f32 %v169_v41, %v444_v18 }
  0x1d   : > { %v170_v46 = vmax.f32 %v153_v35, %v354_v23  ;;  %v357_v48 = vld [vmem:[%s419_s11 + $0x80] sm:$0xff]  ;;  %v171_v51 = vmax.f32 %v154_v42, %v355_v29  ;;  %v215_v53 = vmax.f32 %v198_v44, %v351_v7  ;;  %v216_v58 = vmax.f32 %v199_v49, %v352_v12  ;;  %v358_v12 = vld [vmem:[%s419_s11 + $0x90] sm:$0xff] }
  0x1e   : > { %v155_v47 = vmax.f32 %v139_v39, %v371_v31  ;;  %v156_v52 = vmax.f32 %v140_v43, %v372_v38  ;;  %v200_v54 = vmax.f32 %v184_v45, %v439_v14  ;;  %v365_v57 = vld [vmem:[%s419_s11 + $0x81] sm:$0xff]  ;;  %v201_v59 = vmax.f32 %v185_v50, %v447_v19  ;;  %v366_v21 = vld [vmem:[%s419_s11 + $0x91] sm:$0xff] }
  0x1f   : > { %v186_v55 = vmax.f32 %v170_v46, %v453_v24  ;;  %v187_v60 = vmax.f32 %v171_v51, %v462_v30  ;;  %v231_v62 = vmax.f32 %v215_v53, %v429_v8  ;;  %v373_v2 = vld [vmem:[%s419_s11 + $0x82] sm:$0xff]  ;;  %v232_v3 = vmax.f32 %v216_v58, %v436_v13  ;;  %v374_v27 = vld [vmem:[%s419_s11 + $0x92] sm:$0xff] }
  0x20   : > { %v172_v56 = vmax.f32 %v155_v47, %v356_v36  ;;  %v173_v61 = vmax.f32 %v156_v52, %v357_v48  ;;  %v217_v63 = vmax.f32 %v200_v54, %v353_v17  ;;  %v218_v4 = vmax.f32 %v201_v59, %v354_v23 }
  0x21   : > { %v202_v0 = vmax.f32 %v186_v55, %v456_v25  ;;  %v203_v5 = vmax.f32 %v187_v60, %v371_v31  ;;  %v247_v7 = vmax.f32 %v231_v62, %v432_v9  ;;  %v248_v15 = vmax.f32 %v232_v3, %v439_v14 }
  0x22   : > { %v188_v1 = vmax.f32 %v172_v56, %v364_v37  ;;  %v189_v6 = vmax.f32 %v173_v61, %v365_v57  ;;  %v233_v8 = vmax.f32 %v217_v63, %v444_v18  ;;  %v234_v16 = vmax.f32 %v218_v4, %v453_v24 }
  0x23   : > { %v219_v10 = vmax.f32 %v202_v0, %v355_v29  ;;  %v220_v13 = vmax.f32 %v203_v5, %v356_v36  ;;  %256 = vst.msk [vmem:[%s489_s15] sm:$0xff] %vm255_vm0, %v247_v7  ;;  %257 = vst.msk [vmem:[%s489_s15 + $0x8] sm:$0xff] %vm255_vm0, %v248_v15 }
  0x24   : > { %v204_v11 = vmax.f32 %v188_v1, %v372_v38  ;;  %v205_v17 = vmax.f32 %v189_v6, %v373_v2  ;;  %v249_v20 = vmax.f32 %v233_v8, %v447_v19  ;;  %v250_v14 = vmax.f32 %v234_v16, %v456_v25 }
  0x25   : > { %v235_v9 = vmax.f32 %v219_v10, %v462_v30  ;;  %v236_v22 = vmax.f32 %v220_v13, %v364_v37 }
  0x26   : > { %v221_v18 = vmax.f32 %v204_v11, %v357_v48  ;;  %v222_v23 = vmax.f32 %v205_v17, %v358_v12  ;;  %258 = vst.msk [vmem:[%s489_s15 + $0x10] sm:$0xff] %vm255_vm0, %v249_v20  ;;  %259 = vst.msk [vmem:[%s489_s15 + $0x18] sm:$0xff] %vm255_vm0, %v250_v14 }
  0x27   : > { %v251_v24 = vmax.f32 %v235_v9, %v371_v31  ;;  %v252_v19 = vmax.f32 %v236_v22, %v372_v38 }
  0x28   : > { %v237_v26 = vmax.f32 %v221_v18, %v365_v57  ;;  %v238_v28 = vmax.f32 %v222_v23, %v366_v21 }
  0x29   : > { %260 = vst.msk [vmem:[%s489_s15 + $0x20] sm:$0xff] %vm255_vm0, %v251_v24  ;;  %261 = vst.msk [vmem:[%s489_s15 + $0x28] sm:$0xff] %vm255_vm0, %v252_v19 }
  0x2a   : > { %v253_v29 = vmax.f32 %v237_v26, %v373_v2  ;;  %v254_v30 = vmax.f32 %v238_v28, %v374_v27 }
  0x2c   : > { %262 = vst.msk [vmem:[%s489_s15 + $0x30] sm:$0xff] %vm255_vm0, %v253_v29  ;;  %263 = vst.msk [vmem:[%s489_s15 + $0x38] sm:$0xff] %vm255_vm0, %v254_v30 }
  0x2d PF: > { %s11_s6 = sadd.s32 1, %s393_s6  }
  0x2e   : > { %p8_p4 = scmp.ge.s32.totalorder %s11_s6, 4  }
  0x30   :  { %10 = sbr.rel (!%p8_p4) target bundleno = 1 (0x1), region = 56 }

// kernel: forward.44
= control target key start
LH: loop header
LB: loop body
LE: loop exit
PB: predicated region body
PF: predicated region fallthrough
CT: control target
= control target key end

     0   :  { %s837_s15 = smov 0   ;;  %s1063_s0 = inlined_call_operand.vmem [shape: f32[512,64], index: 0, kind: input, shape index: {}]   ;;  %s1064_s1 = inlined_call_operand.vmem [shape: bf16[64,16], index: 1, kind: input, shape index: {}]   ;;  %s1065_s2 = inlined_call_operand.vmem [shape: f32[1,16], index: 2, kind: input, shape index: {}]   ;;  %s1066_s3 = inlined_call_operand.vmem [shape: f32[1,16], index: 3, kind: input, shape index: {}]   ;;  %s1067_s4 = inlined_call_operand.vmem [shape: f32[512,16], index: 4, kind: output, shape index: {}]  }
   0x1 LB: > { %s691_s16 = sadd.s32 4294967295, %s810_s15   ;;  %p695_p0 = scmp.ge.s32.totalorder %s810_s15, 1  ;;  %s810_s15 = sphi %s837_s15, %s14_s15  }
   0x2   : > { %p163_p1 = scmp.lt.s32.totalorder %s810_s15, 3 }
   0x4   : > { %p164_p2 = pnand %p695_p0, %p163_p1 }
   0x5   : > { %v800_v0 = vld [vmem:[%s1064_s1] sm:$0xff] (!%p164_p2)   ;;  %s696_s19 = sshll.u32 (!%p164_p2), %s691_s16, 5  ;;  %v801_v1 = vld [vmem:[%s1064_s1 + $0x8] sm:$0xff] (!%p164_p2)   ;;  %v802_v2 = vld [vmem:[%s1064_s1 + $0x10] sm:$0xff] (!%p164_p2)   ;;  %vm314_vm0 = vcmask (!%p164_p2), 523264   ;;  %vm602_vm1 = vcmask (!%p164_p2), 130048  }
   0x6   : > { %167 = sbr.rel (%p164_p2) target bundleno = 267 (0x10b), region = 36  ;;  %p190_p3 = scmp.lt.s32.totalorder (!%p164_p2), %s696_s19, 63  ;;  %744 = vmatprep.subr.bf16.mxu0 (!%p164_p2), %v800_v0  ;;  %784 = vmatprep.subr.bf16.mxu1 (!%p164_p2), %v800_v0  ;;  %v803_v3 = vld [vmem:[%s1064_s1 + $0x18] sm:$0xff] (!%p164_p2)  }
   0x7   : > { %745 = vmatpush3.bf16.msra.mxu0 (!%p164_p2), %v800_v0  ;;  %788 = vmatpush3.bf16.msra.mxu1 (!%p164_p2), %v800_v0 }
   0x8   : > { %746 = vmatprep.subr.bf16.mxu0 (!%p164_p2), %v801_v1  ;;  %785 = vmatprep.subr.bf16.mxu1 (!%p164_p2), %v801_v1 }
   0xb   : > { %747 = vmatpush3.bf16.msra.mxu0 (!%p164_p2), %v801_v1  ;;  %789 = vmatpush3.bf16.msra.mxu1 (!%p164_p2), %v801_v1 }
   0xc   : > { %748 = vmatprep.subr.bf16.mxu0 (!%p164_p2), %v802_v2  ;;  %786 = vmatprep.subr.bf16.mxu1 (!%p164_p2), %v802_v2 }
   0xd   : > { %s1069_s19 = smov (!%p190_p3, %s696_s19), 63 }
   0xe   : > { %s697_s24 = sshll.u32 %s1069_s19, 3 }
   0xf   : > { %s865_s29 = scalar_lea.vmem %s1063_s0, %s697_s24  ;;  %749 = vmatpush3.bf16.msra.mxu0 %v802_v2  ;;  %790 = vmatpush3.bf16.msra.mxu1 %v802_v2  ;;  %s932_s10 = scalar_lea.vmem %s1067_s4, %s697_s24 }
  0x10   : > { %v202_v4 = vld [vmem:[%s865_s29] sm:$0xff]  ;;  %v203_v5 = vld [vmem:[%s865_s29 + $0x8] sm:$0xff]  ;;  %v204_v11 = vld [vmem:[%s865_s29 + $0x10] sm:$0xff]  ;;  %750 = vmatprep.subr.bf16.mxu0 %v803_v3  ;;  %787 = vmatprep.subr.bf16.mxu1 %v803_v3 }
  0x11   : > { %v218_v6 = vld [vmem:[%s865_s29 + $0x80] sm:$0xff]  ;;  %v234_v7 = vmax.f32 %v202_v4, 0.0  ;;  %v235_v8 = vmax.f32 %v203_v5, 0.0  ;;  %v219_v9 = vld [vmem:[%s865_s29 + $0x88] sm:$0xff]  ;;  %v205_v12 = vld [vmem:[%s865_s29 + $0x18] sm:$0xff]  ;;  %v236_v14 = vmax.f32 %v204_v11, 0.0 }
  0x12   : > { %v250_v10 = vmax.f32 %v218_v6, 0.0  ;;  %v251_v13 = vmax.f32 %v219_v9, 0.0  ;;  %v220_v15 = vld [vmem:[%s865_s29 + $0x90] sm:$0xff]  ;;  %v221_v16 = vld [vmem:[%s865_s29 + $0x98] sm:$0xff]  ;;  %v206_v17 = vld [vmem:[%s865_s29 + $0x20] sm:$0xff]  ;;  %v237_v19 = vmax.f32 %v205_v12, 0.0 }
  0x13   : > { %v266_v18 = vpack.c.bf16 %v235_v8, %v234_v7  ;;  %v252_v20 = vmax.f32 %v220_v15, 0.0  ;;  %v253_v21 = vmax.f32 %v221_v16, 0.0  ;;  %v207_v22 = vld [vmem:[%s865_s29 + $0x28] sm:$0xff]  ;;  %v222_v23 = vld [vmem:[%s865_s29 + $0xa0] sm:$0xff]  ;;  %v238_v26 = vmax.f32 %v206_v17, 0.0  ;;  %v208_v32 = vld [vmem:[%s865_s29 + $0x30] sm:$0xff]  ;;  %751 = vmatpush3.bf16.msra.mxu0 %v803_v3  ;;  %791 = vmatpush3.bf16.msra.mxu1 %v803_v3 }
  0x14   : > { %v223_v24 = vld [vmem:[%s865_s29 + $0xa8] sm:$0xff]  ;;  %v274_v25 = vpack.c.bf16 %v251_v13, %v250_v10  ;;  %v239_v27 = vmax.f32 %v207_v22, 0.0  ;;  %v254_v28 = vmax.f32 %v222_v23, 0.0  ;;  %v267_v30 = vpack.c.bf16 %v237_v19, %v236_v14  ;;  %v209_v33 = vld [vmem:[%s865_s29 + $0x38] sm:$0xff]  ;;  %v224_v36 = vld [vmem:[%s865_s29 + $0xb0] sm:$0xff] }
  0x15   : > { %v255_v29 = vmax.f32 %v223_v24, 0.0  ;;  %752 = vmatprep.mubr.msk.bf16.mxu0 %vm314_vm0, %v266_v18  ;;  %v275_v31 = vpack.c.bf16 %v253_v21, %v252_v20  ;;  %v225_v37 = vld [vmem:[%s865_s29 + $0xb8] sm:$0xff]  ;;  %v210_v38 = vld [vmem:[%s865_s29 + $0x40] sm:$0xff]  ;;  %v211_v39 = vld [vmem:[%s865_s29 + $0x48] sm:$0xff]  ;;  %v240_v42 = vmax.f32 %v208_v32, 0.0  ;;  %v241_v43 = vmax.f32 %v209_v33, 0.0 }
  0x16   : > { %768 = vmatprep.mubr.msk.bf16.mxu1 %vm314_vm0, %v274_v25  ;;  %v268_v34 = vpack.c.bf16 %v239_v27, %v238_v26  ;;  %v226_v40 = vld [vmem:[%s865_s29 + $0xc0] sm:$0xff]  ;;  %v227_v41 = vld [vmem:[%s865_s29 + $0xc8] sm:$0xff]  ;;  %753 = vmatmul.mubr.msk.bf16.vlgmr.msra.gmra.mrb[0].mxu0 %vm314_vm0, %v267_v30  ;;  %v256_v44 = vmax.f32 %v224_v36, 0.0  ;;  %v257_v45 = vmax.f32 %v225_v37, 0.0  ;;  %v242_v46 = vmax.f32 %v210_v38, 0.0  ;;  %v212_v52 = vld [vmem:[%s865_s29 + $0x50] sm:$0xff] }
  0x17   : > { %v276_v35 = vpack.c.bf16 %v255_v29, %v254_v28  ;;  %769 = vmatmul.mubr.msk.bf16.vlgmr.msra.gmra.mrb[0].mxu1 %vm314_vm0, %v275_v31  ;;  %v243_v47 = vmax.f32 %v211_v39, 0.0  ;;  %v258_v48 = vmax.f32 %v226_v40, 0.0  ;;  %v259_v49 = vmax.f32 %v227_v41, 0.0  ;;  %v213_v53 = vld [vmem:[%s865_s29 + $0x58] sm:$0xff]  ;;  %v228_v56 = vld [vmem:[%s865_s29 + $0xd0] sm:$0xff]  ;;  %v214_v58 = vld [vmem:[%s865_s29 + $0x60] sm:$0xff] }
  0x18   : > { %756 = vmatprep.mubr.msk.bf16.mxu0 %vm314_vm0, %v268_v34  ;;  %v269_v50 = vpack.c.bf16 %v241_v43, %v240_v42  ;;  %v277_v51 = vpack.c.bf16 %v257_v45, %v256_v44  ;;  %v229_v57 = vld [vmem:[%s865_s29 + $0xd8] sm:$0xff]  ;;  %v215_v59 = vld [vmem:[%s865_s29 + $0x68] sm:$0xff]  ;;  %v230_v60 = vld [vmem:[%s865_s29 + $0xe0] sm:$0xff]  ;;  %v244_v62 = vmax.f32 %v212_v52, 0.0  ;;  %v245_v63 = vmax.f32 %v213_v53, 0.0 }
  0x19   : > { %772 = vmatprep.mubr.msk.bf16.mxu1 %vm314_vm0, %v276_v35  ;;  %v270_v54 = vpack.c.bf16 %v243_v47, %v242_v46  ;;  %v278_v55 = vpack.c.bf16 %v259_v49, %v258_v48  ;;  %v231_v61 = vld [vmem:[%s865_s29 + $0xe8] sm:$0xff]  ;;  %v260_v0 = vmax.f32 %v228_v56, 0.0  ;;  %v261_v1 = vmax.f32 %v229_v57, 0.0  ;;  %v216_v8 = vld [vmem:[%s865_s29 + $0x70] sm:$0xff]  ;;  %v217_v11 = vld [vmem:[%s865_s29 + $0x78] sm:$0xff] }
  0x1a   : > { %v246_v2 = vmax.f32 %v214_v58, 0.0  ;;  %v247_v3 = vmax.f32 %v215_v59, 0.0  ;;  %v262_v4 = vmax.f32 %v230_v60, 0.0  ;;  %v263_v5 = vmax.f32 %v231_v61, 0.0  ;;  %v232_v12 = vld [vmem:[%s865_s29 + $0xf0] sm:$0xff]  ;;  %v233_v13 = vld [vmem:[%s865_s29 + $0xf8] sm:$0xff] }
  0x1b   : > { %v271_v6 = vpack.c.bf16 %v245_v63, %v244_v62  ;;  %v279_v7 = vpack.c.bf16 %v261_v1, %v260_v0  ;;  %v248_v14 = vmax.f32 %v216_v8, 0.0  ;;  %v249_v15 = vmax.f32 %v217_v11, 0.0  ;;  %v918_v20 = vld [vmem:[%s1065_s2] ss:$0 sm:$0xff] }
  0x1c   : > { %v272_v9 = vpack.c.bf16 %v247_v3, %v246_v2  ;;  %v280_v10 = vpack.c.bf16 %v263_v5, %v262_v4  ;;  %v264_v16 = vmax.f32 %v232_v12, 0.0  ;;  %v265_v17 = vmax.f32 %v233_v13, 0.0  ;;  %v923_v22 = vld [vmem:[%s1066_s3] ss:$0 sm:$0xff] }
  0x1d   : > { %v273_v18 = vpack.c.bf16 %v249_v15, %v248_v14 }
  0x1e   : > { %757 = vmatmul.mubr.msk.bf16.gmra.mrb[4].mxu0 %vm314_vm0, %v269_v50  ;;  %v281_v19 = vpack.c.bf16 %v265_v17, %v264_v16 }
  0x1f   : > { %773 = vmatmul.mubr.msk.bf16.gmra.mrb[4].mxu1 %vm314_vm0, %v277_v51  ;;  %760 = vmatprep.mubr.msk.bf16.mxu0 %vm314_vm0, %v270_v54 }
  0x20   : > { %776 = vmatprep.mubr.msk.bf16.mxu1 %vm314_vm0, %v278_v55 }
  0x26   : > { %761 = vmatmul.mubr.msk.bf16.gmra.mrb[8].mxu0 %vm314_vm0, %v271_v6 }
  0x27   : > { %777 = vmatmul.mubr.msk.bf16.gmra.mrb[8].mxu1 %vm314_vm0, %v279_v7  ;;  %764 = vmatprep.mubr.msk.bf16.mxu0 %vm314_vm0, %v272_v9 }
  0x28   : > { %780 = vmatprep.mubr.msk.bf16.mxu1 %vm314_vm0, %v280_v10 }
  0x2e   : > { %765 = vmatmul.mubr.msk.bf16.gmra.mrb[12].mxu0 %vm314_vm0, %v273_v18 }
  0x2f   : > { %781 = vmatmul.mubr.msk.bf16.gmra.mrb[12].mxu1 %vm314_vm0, %v281_v19 }
  0xe9   : > { %v754_v21 = vpop.f32.mrb[0].mxu0 }
  0xea   : > { %v770_v23 = vpop.f32.mrb[0].mxu1  ;;  %v533_v24 = vmul.f32 %v754_v21, %v918_v20  ;;  %v397_v26 = vpop.f32.mrb[1].mxu0 }
  0xeb   : > { %v549_v25 = vmul.f32 %v770_v23, %v918_v20  ;;  %v461_v27 = vpop.f32.mrb[1].mxu1  ;;  %v531_v28 = vmul.f32 %v918_v20, %v397_v26  ;;  %v755_v30 = vpop.f32.mrb[2].mxu0 }
  0xec   : > { %v547_v29 = vmul.f32 %v918_v20, %v461_v27  ;;  %v771_v31 = vpop.f32.mrb[2].mxu1  ;;  %v572_v32 = vadd.f32 %v923_v22, %v533_v24  ;;  %v534_v34 = vmul.f32 %v755_v30, %v918_v20  ;;  %v400_v36 = vpop.f32.mrb[3].mxu0 }
  0xed   : > { %v588_v33 = vadd.f32 %v923_v22, %v549_v25  ;;  %v550_v35 = vmul.f32 %v771_v31, %v918_v20  ;;  %v464_v37 = vpop.f32.mrb[3].mxu1  ;;  %v570_v38 = vadd.f32 %v923_v22, %v531_v28  ;;  %v532_v40 = vmul.f32 %v918_v20, %v400_v36 }
  0xee   : > { %v586_v39 = vadd.f32 %v923_v22, %v547_v29  ;;  %v548_v41 = vmul.f32 %v918_v20, %v464_v37  ;;  %605 = vst.msk [vmem:[%s932_s10 + $0x10] sm:$0xff] %vm602_vm1, %v572_v32  ;;  %v573_v42 = vadd.f32 %v923_v22, %v534_v34 }
  0xef   : > { %621 = vst.msk [vmem:[%s932_s10 + $0x90] sm:$0xff] %vm602_vm1, %v588_v33  ;;  %v589_v43 = vadd.f32 %v923_v22, %v550_v35  ;;  %603 = vst.msk [vmem:[%s932_s10] sm:$0xff] %vm602_vm1, %v570_v38  ;;  %v571_v44 = vadd.f32 %v923_v22, %v532_v40 }
  0xf0   : > { %619 = vst.msk [vmem:[%s932_s10 + $0x80] sm:$0xff] %vm602_vm1, %v586_v39  ;;  %v587_v45 = vadd.f32 %v923_v22, %v548_v41  ;;  %606 = vst.msk [vmem:[%s932_s10 + $0x18] sm:$0xff] %vm602_vm1, %v573_v42 }
  0xf1   : > { %622 = vst.msk [vmem:[%s932_s10 + $0x98] sm:$0xff] %vm602_vm1, %v589_v43  ;;  %604 = vst.msk [vmem:[%s932_s10 + $0x8] sm:$0xff] %vm602_vm1, %v571_v44  ;;  %v758_v46 = vpop.f32.mrb[4].mxu0 }
  0xf2   : > { %620 = vst.msk [vmem:[%s932_s10 + $0x88] sm:$0xff] %vm602_vm1, %v587_v45  ;;  %v774_v47 = vpop.f32.mrb[4].mxu1  ;;  %v537_v48 = vmul.f32 %v758_v46, %v918_v20  ;;  %v413_v50 = vpop.f32.mrb[5].mxu0 }
  0xf3   : > { %v553_v49 = vmul.f32 %v774_v47, %v918_v20  ;;  %v477_v51 = vpop.f32.mrb[5].mxu1  ;;  %v535_v52 = vmul.f32 %v918_v20, %v413_v50  ;;  %v759_v54 = vpop.f32.mrb[6].mxu0 }
  0xf4   : > { %v551_v53 = vmul.f32 %v918_v20, %v477_v51  ;;  %v775_v55 = vpop.f32.mrb[6].mxu1  ;;  %v576_v56 = vadd.f32 %v923_v22, %v537_v48  ;;  %v538_v58 = vmul.f32 %v759_v54, %v918_v20  ;;  %v416_v60 = vpop.f32.mrb[7].mxu0 }
  0xf5   : > { %v592_v57 = vadd.f32 %v923_v22, %v553_v49  ;;  %v554_v59 = vmul.f32 %v775_v55, %v918_v20  ;;  %v480_v61 = vpop.f32.mrb[7].mxu1  ;;  %v574_v62 = vadd.f32 %v923_v22, %v535_v52  ;;  %v536_v0 = vmul.f32 %v918_v20, %v416_v60 }
  0xf6   : > { %v590_v63 = vadd.f32 %v923_v22, %v551_v53  ;;  %v552_v1 = vmul.f32 %v918_v20, %v480_v61  ;;  %609 = vst.msk [vmem:[%s932_s10 + $0x30] sm:$0xff] %vm602_vm1, %v576_v56  ;;  %v577_v2 = vadd.f32 %v923_v22, %v538_v58 }
  0xf7   : > { %625 = vst.msk [vmem:[%s932_s10 + $0xb0] sm:$0xff] %vm602_vm1, %v592_v57  ;;  %v593_v3 = vadd.f32 %v923_v22, %v554_v59  ;;  %607 = vst.msk [vmem:[%s932_s10 + $0x20] sm:$0xff] %vm602_vm1, %v574_v62  ;;  %v575_v4 = vadd.f32 %v923_v22, %v536_v0 }
  0xf8   : > { %623 = vst.msk [vmem:[%s932_s10 + $0xa0] sm:$0xff] %vm602_vm1, %v590_v63  ;;  %v591_v5 = vadd.f32 %v923_v22, %v552_v1  ;;  %610 = vst.msk [vmem:[%s932_s10 + $0x38] sm:$0xff] %vm602_vm1, %v577_v2 }
  0xf9   : > { %626 = vst.msk [vmem:[%s932_s10 + $0xb8] sm:$0xff] %vm602_vm1, %v593_v3  ;;  %608 = vst.msk [vmem:[%s932_s10 + $0x28] sm:$0xff] %vm602_vm1, %v575_v4  ;;  %v762_v6 = vpop.f32.mrb[8].mxu0 }
  0xfa   : > { %624 = vst.msk [vmem:[%s932_s10 + $0xa8] sm:$0xff] %vm602_vm1, %v591_v5  ;;  %v778_v7 = vpop.f32.mrb[8].mxu1  ;;  %v541_v8 = vmul.f32 %v762_v6, %v918_v20  ;;  %v429_v10 = vpop.f32.mrb[9].mxu0 }
  0xfb   : > { %v557_v9 = vmul.f32 %v778_v7, %v918_v20  ;;  %v493_v11 = vpop.f32.mrb[9].mxu1  ;;  %v539_v12 = vmul.f32 %v918_v20, %v429_v10  ;;  %v763_v14 = vpop.f32.mrb[10].mxu0 }
  0xfc   : > { %v555_v13 = vmul.f32 %v918_v20, %v493_v11  ;;  %v779_v15 = vpop.f32.mrb[10].mxu1  ;;  %v580_v16 = vadd.f32 %v923_v22, %v541_v8  ;;  %v542_v18 = vmul.f32 %v763_v14, %v918_v20  ;;  %v432_v21 = vpop.f32.mrb[11].mxu0 }
  0xfd   : > { %v596_v17 = vadd.f32 %v923_v22, %v557_v9  ;;  %v558_v19 = vmul.f32 %v779_v15, %v918_v20  ;;  %v496_v23 = vpop.f32.mrb[11].mxu1  ;;  %v578_v24 = vadd.f32 %v923_v22, %v539_v12  ;;  %v540_v26 = vmul.f32 %v918_v20, %v432_v21 }
  0xfe   : > { %v594_v25 = vadd.f32 %v923_v22, %v555_v13  ;;  %v556_v27 = vmul.f32 %v918_v20, %v496_v23  ;;  %613 = vst.msk [vmem:[%s932_s10 + $0x50] sm:$0xff] %vm602_vm1, %v580_v16  ;;  %v581_v28 = vadd.f32 %v923_v22, %v542_v18 }
  0xff   : > { %629 = vst.msk [vmem:[%s932_s10 + $0xd0] sm:$0xff] %vm602_vm1, %v596_v17  ;;  %v597_v29 = vadd.f32 %v923_v22, %v558_v19  ;;  %611 = vst.msk [vmem:[%s932_s10 + $0x40] sm:$0xff] %vm602_vm1, %v578_v24  ;;  %v579_v30 = vadd.f32 %v923_v22, %v540_v26 }
 0x100   : > { %627 = vst.msk [vmem:[%s932_s10 + $0xc0] sm:$0xff] %vm602_vm1, %v594_v25  ;;  %v595_v31 = vadd.f32 %v923_v22, %v556_v27  ;;  %614 = vst.msk [vmem:[%s932_s10 + $0x58] sm:$0xff] %vm602_vm1, %v581_v28 }
 0x101   : > { %630 = vst.msk [vmem:[%s932_s10 + $0xd8] sm:$0xff] %vm602_vm1, %v597_v29  ;;  %612 = vst.msk [vmem:[%s932_s10 + $0x48] sm:$0xff] %vm602_vm1, %v579_v30  ;;  %v766_v32 = vpop.f32.mrb[12].mxu0 }
 0x102   : > { %628 = vst.msk [vmem:[%s932_s10 + $0xc8] sm:$0xff] %vm602_vm1, %v595_v31  ;;  %v782_v33 = vpop.f32.mrb[12].mxu1  ;;  %v545_v34 = vmul.f32 %v766_v32, %v918_v20  ;;  %v445_v36 = vpop.f32.mrb[13].mxu0 }
 0x103   : > { %v561_v35 = vmul.f32 %v782_v33, %v918_v20  ;;  %v509_v37 = vpop.f32.mrb[13].mxu1  ;;  %v543_v38 = vmul.f32 %v918_v20, %v445_v36  ;;  %v767_v40 = vpop.f32.mrb[14].mxu0 }
 0x104   : > { %v559_v39 = vmul.f32 %v918_v20, %v509_v37  ;;  %v783_v41 = vpop.f32.mrb[14].mxu1  ;;  %v584_v42 = vadd.f32 %v923_v22, %v545_v34  ;;  %v546_v44 = vmul.f32 %v767_v40, %v918_v20  ;;  %v448_v46 = vpop.f32.mrb[15].mxu0 }
 0x105   : > { %v600_v43 = vadd.f32 %v923_v22, %v561_v35  ;;  %v562_v45 = vmul.f32 %v783_v41, %v918_v20  ;;  %v512_v47 = vpop.f32.mrb[15].mxu1  ;;  %v582_v48 = vadd.f32 %v923_v22, %v543_v38  ;;  %v544_v50 = vmul.f32 %v918_v20, %v448_v46 }
 0x106   : > { %v598_v49 = vadd.f32 %v923_v22, %v559_v39  ;;  %v560_v51 = vmul.f32 %v918_v20, %v512_v47  ;;  %617 = vst.msk [vmem:[%s932_s10 + $0x70] sm:$0xff] %vm602_vm1, %v584_v42  ;;  %v585_v52 = vadd.f32 %v923_v22, %v546_v44 }
 0x107   : > { %633 = vst.msk [vmem:[%s932_s10 + $0xf0] sm:$0xff] %vm602_vm1, %v600_v43  ;;  %v601_v53 = vadd.f32 %v923_v22, %v562_v45  ;;  %615 = vst.msk [vmem:[%s932_s10 + $0x60] sm:$0xff] %vm602_vm1, %v582_v48  ;;  %v583_v54 = vadd.f32 %v923_v22, %v544_v50 }
 0x108   : > { %631 = vst.msk [vmem:[%s932_s10 + $0xe0] sm:$0xff] %vm602_vm1, %v598_v49  ;;  %v599_v55 = vadd.f32 %v923_v22, %v560_v51  ;;  %618 = vst.msk [vmem:[%s932_s10 + $0x78] sm:$0xff] %vm602_vm1, %v585_v52 }
 0x109   : > { %634 = vst.msk [vmem:[%s932_s10 + $0xf8] sm:$0xff] %vm602_vm1, %v601_v53  ;;  %616 = vst.msk [vmem:[%s932_s10 + $0x68] sm:$0xff] %vm602_vm1, %v583_v54 }
 0x10a   : > { %632 = vst.msk [vmem:[%s932_s10 + $0xe8] sm:$0xff] %vm602_vm1, %v599_v55 }
 0x10b PF: > { %s14_s15 = sadd.s32 1, %s810_s15  }
 0x10c   : > { %p11_p4 = scmp.ge.s32.totalorder %s14_s15, 4  }
 0x10e   :  { %13 = sbr.rel (!%p11_p4) target bundleno = 1 (0x1), region = 66 }

// kernel: forward.48
= control target key start
LH: loop header
LB: loop body
LE: loop exit
PB: predicated region body
PF: predicated region fallthrough
CT: control target
= control target key end

     0   :  { %s525_s15 = smov 0   ;;  %s579_s0 = inlined_call_operand.vmem [shape: f32[128,64], index: 0, kind: input, shape index: {}]   ;;  %s580_s1 = inlined_call_operand.vmem [shape: bf16[64,16], index: 1, kind: input, shape index: {}]   ;;  %s581_s2 = inlined_call_operand.vmem [shape: f32[1,16], index: 2, kind: input, shape index: {}]   ;;  %s582_s3 = inlined_call_operand.vmem [shape: f32[1,16], index: 3, kind: input, shape index: {}]   ;;  %s583_s4 = inlined_call_operand.vmem [shape: f32[128,16], index: 4, kind: output, shape index: {}]  }
   0x1 LB: > { %s427_s16 = sadd.s32 4294967295, %s498_s15   ;;  %p431_p0 = scmp.ge.s32.totalorder %s498_s15, 1  ;;  %s498_s15 = sphi %s525_s15, %s14_s15  }
   0x2   : > { %p163_p1 = scmp.lt.s32.totalorder %s498_s15, 3 }
   0x4   : > { %p164_p2 = pnand %p431_p0, %p163_p1 }
   0x5   : > { %v488_v0 = vld [vmem:[%s580_s1] sm:$0xff] (!%p164_p2)   ;;  %s432_s19 = sshll.u32 (!%p164_p2), %s427_s16, 3  ;;  %v489_v1 = vld [vmem:[%s580_s1 + $0x8] sm:$0xff] (!%p164_p2)   ;;  %v490_v2 = vld [vmem:[%s580_s1 + $0x10] sm:$0xff] (!%p164_p2)   ;;  %vm254_vm0 = vcmask (!%p164_p2), 523264   ;;  %vm362_vm1 = vcmask (!%p164_p2), 130048  }
   0x6   : > { %167 = sbr.rel (%p164_p2) target bundleno = 243 (0xf3), region = 36  ;;  %p190_p3 = scmp.lt.s32.totalorder (!%p164_p2), %s432_s19, 15  ;;  %456 = vmatprep.subr.bf16.mxu0 (!%p164_p2), %v488_v0  ;;  %472 = vmatprep.subr.bf16.mxu1 (!%p164_p2), %v488_v0  ;;  %v491_v3 = vld [vmem:[%s580_s1 + $0x18] sm:$0xff] (!%p164_p2)   ;;  %v444_v24 = vld [vmem:[%s581_s2] ss:$0 sm:$0xff] (!%p164_p2) }
   0x7   : > { %457 = vmatpush3.bf16.msra.mxu0 (!%p164_p2), %v488_v0  ;;  %476 = vmatpush3.bf16.msra.mxu1 (!%p164_p2), %v488_v0  ;;  %v445_v26 = vld [vmem:[%s582_s3] ss:$0 sm:$0xff] (!%p164_p2) }
   0x8   : > { %458 = vmatprep.subr.bf16.mxu0 (!%p164_p2), %v489_v1  ;;  %473 = vmatprep.subr.bf16.mxu1 (!%p164_p2), %v489_v1 }
   0xb   : > { %459 = vmatpush3.bf16.msra.mxu0 (!%p164_p2), %v489_v1  ;;  %477 = vmatpush3.bf16.msra.mxu1 (!%p164_p2), %v489_v1 }
   0xc   : > { %460 = vmatprep.subr.bf16.mxu0 (!%p164_p2), %v490_v2  ;;  %474 = vmatprep.subr.bf16.mxu1 (!%p164_p2), %v490_v2 }
   0xd   : > { %s585_s19 = smov (!%p190_p3, %s432_s19), 15 }
   0xe   : > { %s433_s24 = sshll.u32 %s585_s19, 3 }
   0xf   : > { %s193_s29 = scalar_lea.vmem %s579_s0, %s433_s24  ;;  %461 = vmatpush3.bf16.msra.mxu0 %v490_v2  ;;  %478 = vmatpush3.bf16.msra.mxu1 %v490_v2  ;;  %s199_s10 = scalar_lea.vmem %s583_s4, %s433_s24 }
  0x10   : > { %v202_v4 = vld [vmem:[%s193_s29] sm:$0xff]  ;;  %v203_v5 = vld [vmem:[%s193_s29 + $0x8] sm:$0xff]  ;;  %v204_v11 = vld [vmem:[%s193_s29 + $0x10] sm:$0xff]  ;;  %462 = vmatprep.subr.bf16.mxu0 %v491_v3  ;;  %475 = vmatprep.subr.bf16.mxu1 %v491_v3 }
  0x11   : > { %v206_v6 = vld [vmem:[%s193_s29 + $0x20] sm:$0xff]  ;;  %v210_v7 = vmax.f32 %v202_v4, 0.0  ;;  %v211_v8 = vmax.f32 %v203_v5, 0.0  ;;  %v207_v9 = vld [vmem:[%s193_s29 + $0x28] sm:$0xff]  ;;  %v205_v12 = vld [vmem:[%s193_s29 + $0x18] sm:$0xff]  ;;  %v212_v14 = vmax.f32 %v204_v11, 0.0 }
  0x12   : > { %v214_v10 = vmax.f32 %v206_v6, 0.0  ;;  %v215_v13 = vmax.f32 %v207_v9, 0.0  ;;  %v208_v15 = vld [vmem:[%s193_s29 + $0x30] sm:$0xff]  ;;  %v209_v16 = vld [vmem:[%s193_s29 + $0x38] sm:$0xff]  ;;  %v213_v18 = vmax.f32 %v205_v12, 0.0 }
  0x13   : > { %v218_v17 = vpack.c.bf16 %v211_v8, %v210_v7  ;;  %v216_v19 = vmax.f32 %v208_v15, 0.0  ;;  %v217_v20 = vmax.f32 %v209_v16, 0.0  ;;  %463 = vmatpush3.bf16.msra.mxu0 %v491_v3  ;;  %479 = vmatpush3.bf16.msra.mxu1 %v491_v3 }
  0x14   : > { %v220_v21 = vpack.c.bf16 %v215_v13, %v214_v10  ;;  %v219_v22 = vpack.c.bf16 %v213_v18, %v212_v14 }
  0x15   : > { %464 = vmatprep.mubr.msk.bf16.mxu0 %vm254_vm0, %v218_v17  ;;  %v221_v23 = vpack.c.bf16 %v217_v20, %v216_v19 }
  0x16   : > { %468 = vmatprep.mubr.msk.bf16.mxu1 %vm254_vm0, %v220_v21  ;;  %465 = vmatmul.mubr.msk.bf16.vlgmr.msra.gmra.mrb[0].mxu0 %vm254_vm0, %v219_v22 }
  0x17   : > { %469 = vmatmul.mubr.msk.bf16.vlgmr.msra.gmra.mrb[0].mxu1 %vm254_vm0, %v221_v23 }
  0xe9   : > { %v466_v25 = vpop.f32.mrb[0].mxu0 }
  0xea   : > { %v470_v27 = vpop.f32.mrb[0].mxu1  ;;  %v341_v28 = vmul.f32 %v466_v25, %v444_v24  ;;  %v301_v30 = vpop.f32.mrb[1].mxu0 }
  0xeb   : > { %v345_v29 = vmul.f32 %v470_v27, %v444_v24  ;;  %v317_v31 = vpop.f32.mrb[1].mxu1  ;;  %v339_v32 = vmul.f32 %v444_v24, %v301_v30  ;;  %v467_v34 = vpop.f32.mrb[2].mxu0 }
  0xec   : > { %v343_v33 = vmul.f32 %v444_v24, %v317_v31  ;;  %v471_v35 = vpop.f32.mrb[2].mxu1  ;;  %v356_v36 = vadd.f32 %v445_v26, %v341_v28  ;;  %v342_v38 = vmul.f32 %v467_v34, %v444_v24  ;;  %v304_v40 = vpop.f32.mrb[3].mxu0 }
  0xed   : > { %v360_v37 = vadd.f32 %v445_v26, %v345_v29  ;;  %v346_v39 = vmul.f32 %v471_v35, %v444_v24  ;;  %v320_v41 = vpop.f32.mrb[3].mxu1  ;;  %v354_v42 = vadd.f32 %v445_v26, %v339_v32  ;;  %v340_v44 = vmul.f32 %v444_v24, %v304_v40 }
  0xee   : > { %v358_v43 = vadd.f32 %v445_v26, %v343_v33  ;;  %v344_v45 = vmul.f32 %v444_v24, %v320_v41  ;;  %365 = vst.msk [vmem:[%s199_s10 + $0x10] sm:$0xff] %vm362_vm1, %v356_v36  ;;  %v357_v46 = vadd.f32 %v445_v26, %v342_v38 }
  0xef   : > { %369 = vst.msk [vmem:[%s199_s10 + $0x30] sm:$0xff] %vm362_vm1, %v360_v37  ;;  %v361_v47 = vadd.f32 %v445_v26, %v346_v39  ;;  %363 = vst.msk [vmem:[%s199_s10] sm:$0xff] %vm362_vm1, %v354_v42  ;;  %v355_v48 = vadd.f32 %v445_v26, %v340_v44 }
  0xf0   : > { %367 = vst.msk [vmem:[%s199_s10 + $0x20] sm:$0xff] %vm362_vm1, %v358_v43  ;;  %v359_v49 = vadd.f32 %v445_v26, %v344_v45  ;;  %366 = vst.msk [vmem:[%s199_s10 + $0x18] sm:$0xff] %vm362_vm1, %v357_v46 }
  0xf1   : > { %370 = vst.msk [vmem:[%s199_s10 + $0x38] sm:$0xff] %vm362_vm1, %v361_v47  ;;  %364 = vst.msk [vmem:[%s199_s10 + $0x8] sm:$0xff] %vm362_vm1, %v355_v48 }
  0xf2   : > { %368 = vst.msk [vmem:[%s199_s10 + $0x28] sm:$0xff] %vm362_vm1, %v359_v49 }
  0xf3 PF: > { %s14_s15 = sadd.s32 1, %s498_s15  }
  0xf4   : > { %p11_p4 = scmp.ge.s32.totalorder %s14_s15, 4  }
  0xf6   :  { %13 = sbr.rel (!%p11_p4) target bundleno = 1 (0x1), region = 66 }

// kernel: forward.51
= control target key start
LH: loop header
LB: loop body
LE: loop exit
PB: predicated region body
PF: predicated region fallthrough
CT: control target
= control target key end

     0   :  { %v217_v3 = vmov 0.0|0.0   ;;  %vm218_vm0 = vmmov 0   ;;  %v219_v6 = vmov 0.0   ;;  %vm19_vm1 = vcmask 523264   ;;  %s297_s0 = inlined_call_operand.vmem [shape: f32[2,16,64], index: 0, kind: input, shape index: {}]   ;;  %s298_s1 = inlined_call_operand.vmem [shape: f32[64,10], index: 1, kind: input, shape index: {}]   ;;  %s299_s2 = inlined_call_operand.vmem [shape: f32[1,10], index: 2, kind: input, shape index: {}]   ;;  %s300_s3 = inlined_call_operand.hbm [shape: f32[2,10], index: 3, kind: output, shape index: {}]  }
   0x1   :  { %v40_v0 = vld [vmem:[%s298_s1] sm:$0xff]  ;;  %v41_v1 = vld [vmem:[%s298_s1 + $0x8] sm:$0xff]  ;;  %v42_v2 = vld [vmem:[%s298_s1 + $0x10] sm:$0xff]  ;;  %177 = vmatprep.subr.bf16.mxu0 %v217_v3  ;;  %174 = vmatprep.mubr.msk.f32.mxu0 %vm218_vm0, %v219_v6 }
   0x2   :  { %v178_v4 = vpack.c.bf16 %v41_v1, %v40_v0  ;;  %v43_v5 = vld [vmem:[%s298_s1 + $0x18] sm:$0xff]  ;;  %v15_v7 = vld [vmem:[%s297_s0] sm:$0xff]  ;;  %v16_v9 = vld [vmem:[%s297_s0 + $0x8] sm:$0xff] }
   0x3   :  { %v181_v8 = vpack.c.bf16 %v43_v5, %v42_v2  ;;  %v17_v10 = vld [vmem:[%s297_s0 + $0x10] sm:$0xff]  ;;  %v18_v11 = vld [vmem:[%s297_s0 + $0x18] sm:$0xff]  ;;  %v20_v12 = vsel %vm19_vm1, %v15_v7, 0.0  ;;  %v44_v13 = vld [vmem:[%s298_s1 + $0x20] sm:$0xff]  ;;  %v21_v15 = vsel %vm19_vm1, %v16_v9, 0.0 }
   0x4   :  { %179 = vmatpush3.bf16.msra.mxu0 %v178_v4  ;;  %v45_v14 = vld [vmem:[%s298_s1 + $0x28] sm:$0xff]  ;;  %v29_v16 = vsel %vm19_vm1, %v17_v10, 0.0  ;;  %v30_v17 = vsel %vm19_vm1, %v18_v11, 0.0  ;;  %v22_v18 = vadd.f32 %v21_v15, %v20_v12 }
   0x5   :  { %180 = vmatprep.subr.bf16.mxu0 %v217_v3  ;;  %v31_v19 = vadd.f32 %v30_v17, %v29_v16 }
   0x6   :  { %8 = vsyncpa [#allocation3], 0  ;;  %v184_v20 = vpack.c.bf16 %v45_v14, %v44_v13  ;;  %v23_v21 = vrot.slane %v22_v18, 4  ;;  %v46_v23 = vld [vmem:[%s298_s1 + $0x30] sm:$0xff]  ;;  %v47_v24 = vld [vmem:[%s298_s1 + $0x38] sm:$0xff]  ;;  %vm57_vm2 = vcmask 1041409  }
   0x7   :  { %v32_v22 = vrot.slane %v31_v19, 4  ;;  %v187_v27 = vpack.c.bf16 %v47_v24, %v46_v23  ;;  %v147_v39 = vld [vmem:[%s299_s2] ss:$0 sm:$0xff]  ;;  %s220_s9 = smov [#allocation2]   ;;  %vm131_vm3 = vcmask 74752  }
   0x8   :  { %182 = vmatpush3.bf16.msra.mxu0 %v181_v8  ;;  %v24_v25 = vadd.f32 %v23_v21, %v22_v18  ;;  %s139_s10 = sshll.u32 %s220_s9, 4  ;;  %s140_s10 = int_to_ptr.vmem [resolvable:$true] %s139_s10 }
   0x9   :  { %183 = vmatprep.subr.bf16.mxu0 %v217_v3  ;;  %v33_v26 = vadd.f32 %v32_v22, %v31_v19  ;;  %s193_s11 = scalar_lea.vmem %s140_s10, 32  ;;  %p198_p1 = scmp.lt.s32.totalorder %s140_s10, %s140_s10 }
   0xa   :  { %v25_v28 = vrot.slane %v24_v25, 2  ;;  %p194_p0 = scmp.ne.s32.totalorder %s140_s10, %s193_s11  ;;  %p199_p2 = scmp.lt.s32.totalorder %s193_s11, %s193_s11 }
   0xb   :  { %v34_v29 = vrot.slane %v33_v26, 2 }
   0xc   :  { %185 = vmatpush3.bf16.msra.mxu0 %v184_v20  ;;  %v26_v30 = vadd.f32 %v25_v28, %v24_v25  ;;  %p200_p3 = por %p199_p2, %p198_p1 }
   0xd   :  { %186 = vmatprep.subr.bf16.mxu0 %v217_v3  ;;  %v35_v31 = vadd.f32 %v34_v29, %v33_v26 }
   0xe   :  { %v27_v32 = vrot.slane %v26_v30, 1  ;;  %p201_p4 = pnand %p200_p3, %p194_p0 }
   0xf   :  { %v36_v33 = vrot.slane %v35_v31, 1 }
  0x10   :  { %188 = vmatpush3.bf16.msra.mxu0 %v187_v27  ;;  %v28_v34 = vadd.f32 %v27_v32, %v26_v30 }
  0x11   :  { %v37_v35 = vadd.f32 %v36_v33, %v35_v31 }
  0x12   :  { %v38_v36 = vmul.f32 0.0625, %v28_v34 }
  0x13   :  { %v39_v37 = vmul.f32 0.0625, %v37_v35 }
  0x15   :  { %v58_v38 = vsel %vm57_vm2, %v39_v37, %v38_v36 }
  0x16   :  { %175 = vmatmul.mubr.msk.f32.vlgmr.msra.gmra.mrb[0].mxu0 %vm19_vm1, %v58_v38 }
  0xe9   :  { %v127_v40 = vpop.f32.mrb[0].mxu0 }
  0xea   :  { %v128_v41 = vadd.f32 %v147_v39, %v127_v40  ;;  %v176_v42 = vpop.f32.mrb[1].mxu0 }
  0xec   :  { %132 = vst.msk [vmem:[#allocation2] sm:$0x3] %vm131_vm3, %v128_v41 }
  0xed   :  { %204 = shalt.err (!%p201_p4)
}
  0xee   :  { %s205_s14 = scalar_lea.hbm %s300_s3, 32 }
  0xef   :  { %p206_p5 = scmp.ne.s32.totalorder %s300_s3, %s205_s14  ;;  %p209_p6 = scmp.lt.u32.totalorder %s205_s14, %s300_s3 }
  0xf1   :  { %p211_p7 = pnand %p209_p6, %p206_p5 }
  0xf3   :  { %214 = shalt.err (!%p211_p7)
}
  0xf4   :  { %142 = dma.vmem_to_hbm [thread:$0]  %s140_s10, 32, %s300_s3, [#allocation3]  }
  0xf5   :  { %215 = dma.done.wait [#allocation3], 32  }
  0xf6   :  { %216 = vsyncadd [#allocation3], 4294967264 }
  0xf7   :  { %146 = vsyncpa [#allocation3], 1 }

</bundles_post_ra>
